<compile_context>
chip_gen: v5e
topology: v5e:2x2
jax: 0.10.0
libtpu: 0.0.40
codegen_flags: <defaults>
</compile_context>

<pallas_src>
import jax
import jax.numpy as jnp
from jax import lax
from jax.experimental import pallas as pl
from jax.experimental.pallas import tpu as pltpu


TIME_CHUNK = 128  # upper bound on the LSTM time-streaming chunk


def _round_up(x, m):
    return ((x + m - 1) // m) * m


def _pick_t_chunk(Bp, D, Hp, max_chunk=TIME_CHUNK, budget_bytes=20 * 1024 * 1024):
    """Largest time chunk (multiple of 8) whose bilstm-pipeline VMEM footprint fits."""
    # per (time*batch) row: 2 dirs * [x bf16 dbl-buf + mask f32 dbl-buf
    #                                 + out bf16 dbl-buf + gate scratch f32]
    per_row = 2 * (2 * 2 * D + 2 * 4 + 2 * 2 * Hp + 4 * 4 * Hp)
    t = budget_bytes // max(per_row * Bp, 1)
    t = min(max_chunk, t)
    t = max(8, (t // 8) * 8)
    return int(t)


def _pick_row_tile(M, cap=1024):
    """Largest divisor of M that is a multiple of 8 and <= cap (no pad/slice needed)."""
    best = 8
    d = 8
    while d <= min(M, cap):
        if M % d == 0:
            best = d
        d += 8
    return best


# ---------------------------------------------------------------------------
# Pallas kernels
# ---------------------------------------------------------------------------
def head_kernel(x1_ref, x2_ref, w1_ref, w2_ref, b_ref, o_ref):
    # logits = h_fwd @ w_fwd + h_bwd @ w_bwd + b   (concat-free bidirectional head)
    o_ref[...] = (
        jnp.dot(x1_ref[...], w1_ref[...], preferred_element_type=jnp.float32)
        + jnp.dot(x2_ref[...], w2_ref[...], preferred_element_type=jnp.float32)
        + b_ref[...]
    )


def linear2_tiled(x1, x2, w1_t, w2_t, b):
    """y = x1 @ w1 + x2 @ w2 + b, tiled over rows with a 'parallel' grid.

    The row tile is a divisor of M, so no pad/slice HBM copies ever happen.
    """
    M, K = x1.shape
    N = w1_t.shape[1]
    tm = _pick_row_tile(M)
    return pl.pallas_call(
        head_kernel,
        out_shape=jax.ShapeDtypeStruct((M, N), jnp.float32),
        grid=(M // tm,),
        in_specs=[
            pl.BlockSpec((tm, K), lambda i: (i, 0)),
            pl.BlockSpec((tm, K), lambda i: (i, 0)),
            pl.BlockSpec((K, N), lambda i: (0, 0)),
            pl.BlockSpec((K, N), lambda i: (0, 0)),
            pl.BlockSpec((1, N), lambda i: (0, 0)),
        ],
        out_specs=pl.BlockSpec((tm, N), lambda i: (i, 0)),
        compiler_params=pltpu.CompilerParams(dimension_semantics=("parallel",)),
    )(x1, x2, w1_t, w2_t, b)


def bilstm_kernel(xf_ref, xb_ref, mf_ref, mb_ref,
                  wif_ref, wib_ref, bif_ref, bib_ref,
                  whhf_ref, whhb_ref,
                  of_ref, ob_ref,
                  gf_sc, gb_sc, st_sc):
    # xf/xb   : (TC*Bp, D)   bf16  time-major x chunk (fwd chunk c / bwd chunk C-1-c)
    # mf/mb   : (TC*Bp, 1)   f32   step validity mask (same chunk selection)
    # wif/wib : (D, 4Hp)     bf16  input-projection weights (resident)
    # bif/bib : (1, 4Hp)     f32   fused biases b_ih + b_hh
    # whhf/b  : (Hp, 4Hp)    bf16  recurrent weights (transposed, resident)
    # of/ob   : (TC*Bp, Hp)  bf16  per-step hidden states (0 at padded steps)
    # gf/gb   : (TC*Bp, 4Hp) f32   gate pre-activations (VMEM only, never hits HBM)
    # st_sc   : (4, Bp, Hp)  f32   [h_f, c_f, h_b, c_b], persists across chunks
    TCB, G = gf_sc.shape
    Hp = G // 4
    Bp = st_sc.shape[1]
    TC = TCB // Bp

    @pl.when(pl.program_id(0) == 0)
    def _():
        st_sc[...] = jnp.zeros_like(st_sc)

    # Fused input projection for the whole chunk (both directions) -- two big MXU
    # dots; the f32 gate tensor stays in VMEM scratch (no HBM round trip).
    gf_sc[...] = jnp.dot(xf_ref[...], wif_ref[...],
                         preferred_element_type=jnp.float32) + bif_ref[...]
    gb_sc[...] = jnp.dot(xb_ref[...], wib_ref[...],
                         preferred_element_type=jnp.float32) + bib_ref[...]

    whh_f = whhf_ref[...]
    whh_b = whhb_ref[...]

    def sigm(x):
        # one EUP push per gate: sigmoid(x) = 0.5*tanh(0.5x) + 0.5
        return 0.5 * jnp.tanh(0.5 * x) + 0.5

    def cell(gates, c_prev):
        # PyTorch gate order: i, f, g, o ; Hp is a multiple of 128 so slices are
        # lane-block aligned.
        i_g = sigm(gates[:, 0:Hp])
        f_g = sigm(gates[:, Hp:2 * Hp])
        g_g = jnp.tanh(gates[:, 2 * Hp:3 * Hp])
        o_g = sigm(gates[:, 3 * Hp:4 * Hp])
        c_new = f_g * c_prev + i_g * g_g
        h_new = o_g * jnp.tanh(c_new)
        return h_new, c_new

    def step(s, carry):
        h_f, c_f, h_b, c_b = carry          # loop-carried state (vregs)
        sb = TC - 1 - s
        rf = pl.multiple_of(s * Bp, Bp)     # sublane-aligned row offsets
        rb = pl.multiple_of(sb * Bp, Bp)
        # Two independent MXU dots per step (fwd + bwd) hide MXU push latency.
        gates_f = gf_sc[pl.ds(rf, Bp), :] + jnp.dot(
            h_f.astype(jnp.bfloat16), whh_f, preferred_element_type=jnp.float32)
        gates_b = gb_sc[pl.ds(rb, Bp), :] + jnp.dot(
            h_b.astype(jnp.bfloat16), whh_b, preferred_element_type=jnp.float32)
        hf_new, cf_new = cell(gates_f, c_f)
        hb_new, cb_new = cell(gates_b, c_b)
        vf = mf_ref[pl.ds(rf, Bp), :] > 0.5   # (Bp, 1) bool
        vb = mb_ref[pl.ds(rb, Bp), :] > 0.5
        # state frozen on padded steps (pack_padded_sequence semantics)
        h_f = jnp.where(vf, hf_new, h_f)
        c_f = jnp.where(vf, cf_new, c_f)
        h_b = jnp.where(vb, hb_new, h_b)
        c_b = jnp.where(vb, cb_new, c_b)
        # padded steps emit 0
        # TODO(synk): keys_vocab_cls.stoi['<pad>'] is unknown; 0.0 used as padding value.
        of_ref[pl.ds(rf, Bp), :] = jnp.where(vf, h_f, 0.0).astype(of_ref.dtype)
        ob_ref[pl.ds(rb, Bp), :] = jnp.where(vb, h_b, 0.0).astype(ob_ref.dtype)
        return (h_f, c_f, h_b, c_b)

    carry = (st_sc[0], st_sc[1], st_sc[2], st_sc[3])
    carry = lax.fori_loop(0, TC, step, carry, unroll=(True if TC <= 32 else 8))
    st_sc[0] = carry[0]
    st_sc[1] = carry[1]
    st_sc[2] = carry[2]
    st_sc[3] = carry[3]


def bilstm(x_t, m_t, pp, Bp, t_chunk):
    """Fused (projection + recurrence) bidirectional masked LSTM, streamed over time chunks.

    x_t : (Tm*Bp, D) bf16  time-major input
    m_t : (Tm*Bp, 1) f32   validity mask
    returns (out_f, out_b), each (Tm*Bp, Hp) bf16
    """
    TmBp, D = x_t.shape
    Hp = pp["Hp"]
    TCB = t_chunk * Bp
    C = TmBp // TCB

    row_f = lambda c: (c, 0)           # forward chunk stream
    row_b = lambda c: (C - 1 - c, 0)   # backward direction: reversed chunk order
    const = lambda c: (0, 0)           # resident weights

    return pl.pallas_call(
        bilstm_kernel,
        out_shape=(jax.ShapeDtypeStruct((TmBp, Hp), jnp.bfloat16),
                   jax.ShapeDtypeStruct((TmBp, Hp), jnp.bfloat16)),
        grid=(C,),
        in_specs=[
            pl.BlockSpec((TCB, D), row_f),        # x (fwd chunks)
            pl.BlockSpec((TCB, D), row_b),        # x (bwd chunks)
            pl.BlockSpec((TCB, 1), row_f),        # mask (fwd)
            pl.BlockSpec((TCB, 1), row_b),        # mask (bwd)
            pl.BlockSpec((D, 4 * Hp), const),     # W_ih fwd (bf16)
            pl.BlockSpec((D, 4 * Hp), const),     # W_ih bwd (bf16)
            pl.BlockSpec((1, 4 * Hp), const),     # b fwd
            pl.BlockSpec((1, 4 * Hp), const),     # b bwd
            pl.BlockSpec((Hp, 4 * Hp), const),    # W_hh fwd (bf16)
            pl.BlockSpec((Hp, 4 * Hp), const),    # W_hh bwd (bf16)
        ],
        out_specs=(pl.BlockSpec((TCB, Hp), row_f),
                   pl.BlockSpec((TCB, Hp), row_b)),
        scratch_shapes=[
            pltpu.VMEM((TCB, 4 * Hp), jnp.float32),  # fwd gate pre-activations
            pltpu.VMEM((TCB, 4 * Hp), jnp.float32),  # bwd gate pre-activations
            pltpu.VMEM((4, Bp, Hp), jnp.float32),    # [h_f, c_f, h_b, c_b]
        ],
        compiler_params=pltpu.CompilerParams(
            dimension_semantics=("arbitrary",),      # serial recurrence over chunks
            vmem_limit_bytes=32 * 1024 * 1024,       # sized for v7x's small VMEM
        ),
    )(x_t, x_t, m_t, m_t,
      pp["w_in_f"], pp["w_in_b"], pp["b_in_f"], pp["b_in_b"],
      pp["whh_f_t"], pp["whh_b_t"])


# ---------------------------------------------------------------------------
# Parameter init (deterministic, synthetic; PyTorch-shaped) and one-time prep
# ---------------------------------------------------------------------------
def init_params(key, d_in, hidden, n_tags):
    ks = jax.random.split(key, 10)
    s = 0.1
    nrm = lambda k, shp: jax.random.normal(k, shp, jnp.float32) * s
    return {
        "w_ih_f": nrm(ks[0], (4 * hidden, d_in)),
        "w_hh_f": nrm(ks[1], (4 * hidden, hidden)),
        "b_ih_f": nrm(ks[2], (4 * hidden,)),
        "b_hh_f": nrm(ks[3], (4 * hidden,)),
        "w_ih_b": nrm(ks[4], (4 * hidden, d_in)),
        "w_hh_b": nrm(ks[5], (4 * hidden, hidden)),
        "b_ih_b": nrm(ks[6], (4 * hidden,)),
        "b_hh_b": nrm(ks[7], (4 * hidden,)),
        "w_mlp": nrm(ks[8], (n_tags, 2 * hidden)),
        "b_mlp": nrm(ks[9], (n_tags,)),
    }


def prep_params(p, hidden, n_tags):
    """One-time: pad H / n_tags to 128 lanes (mathematically exact: padded hidden
    units provably stay 0), transpose to matmul layouts, cast weights to bf16."""
    H = hidden
    Hp = _round_up(H, 128)
    Np = _round_up(n_tags, 128)

    def pad_gate_rows(w):   # (4H, X) -> (4Hp, X), each of the 4 gate blocks zero-padded
        return jnp.concatenate(
            [jnp.pad(w[g * H:(g + 1) * H], ((0, Hp - H), (0, 0))) for g in range(4)],
            axis=0)

    def pad_gate_vec(v):    # (4H,) -> (4Hp,)
        return jnp.concatenate(
            [jnp.pad(v[g * H:(g + 1) * H], (0, Hp - H)) for g in range(4)], axis=0)

    w_in_f = pad_gate_rows(p["w_ih_f"]).T.astype(jnp.bfloat16)        # (D, 4Hp)
    w_in_b = pad_gate_rows(p["w_ih_b"]).T.astype(jnp.bfloat16)        # (D, 4Hp)
    b_in_f = pad_gate_vec(p["b_ih_f"] + p["b_hh_f"]).reshape(1, 4 * Hp).astype(jnp.float32)
    b_in_b = pad_gate_vec(p["b_ih_b"] + p["b_hh_b"]).reshape(1, 4 * Hp).astype(jnp.float32)

    def prep_whh(w):        # (4H, H) -> (Hp, 4Hp) transposed, bf16
        w = pad_gate_rows(w)                     # (4Hp, H)
        w = jnp.pad(w, ((0, 0), (0, Hp - H)))    # (4Hp, Hp)
        return w.T.astype(jnp.bfloat16)

    w_mlp = p["w_mlp"]      # (n_tags, 2H), input layout [fwd H | bwd H]
    wf = jnp.pad(w_mlp[:, :H], ((0, Np - n_tags), (0, Hp - H))).T.astype(jnp.bfloat16)
    wb = jnp.pad(w_mlp[:, H:], ((0, Np - n_tags), (0, Hp - H))).T.astype(jnp.bfloat16)
    b_mlp = jnp.pad(p["b_mlp"], (0, Np - n_tags)).reshape(1, Np).astype(jnp.float32)

    return dict(H=H, Hp=Hp, n_tags=n_tags, Np=Np,
                w_in_f=w_in_f, w_in_b=w_in_b, b_in_f=b_in_f, b_in_b=b_in_b,
                whh_f_t=prep_whh(p["w_hh_f"]), whh_b_t=prep_whh(p["w_hh_b"]),
                w_mlp_f=wf, w_mlp_b=wb, b_mlp=b_mlp)


# ---------------------------------------------------------------------------
# Decoder forward (eval mode)
# ---------------------------------------------------------------------------
def decoder_forward(pp, x, x_gcn, mask, length, tags=None):
    B, N, T, D = x.shape
    Hp, Np = pp["Hp"], pp["Np"]

    # ---------------- UnionLayer ----------------
    x2 = x.reshape(B, N * T, D)
    mask2 = mask.reshape(B, N * T)
    doc_seq_len = jnp.sum(length, axis=-1).astype(jnp.int32)

    # TODO(synk): int() forces a host sync; production should pass a static bucketed
    # max length (multiple of the time chunk) to avoid a recompile per unique length.
    max_len = int(jnp.max(doc_seq_len))

    Bp = _round_up(B, 8)                         # sublane-aligned batch
    t_chunk = _pick_t_chunk(Bp, D, Hp)
    if max_len <= t_chunk:
        Tm = _round_up(max_len, 8)
        t_chunk = Tm
    else:
        Tm = _round_up(max_len, t_chunk)

    # per-document compaction of valid tokens (data-dependent gather: JAX glue)
    order = jnp.argsort(1 - mask2, axis=1)       # stable: valid tokens first, in order
    new_x = jnp.take_along_axis(x2, order[:, :, None], axis=1)
    keep = jnp.take_along_axis(mask2, order, axis=1).astype(x.dtype)[:, :, None]
    new_x = new_x * keep
    # positional gcn add -- matches PyTorch UnionLayer: x_gcn is indexed by compacted
    # position (i -> node i//T), NOT permuted by `order`.
    x_gcn_exp = jnp.broadcast_to(x_gcn[:, :, None, :], (B, N, T, D)).reshape(B, N * T, D)
    if Tm > N * T:
        pad = Tm - N * T
        new_x = jnp.pad(new_x, ((0, 0), (0, pad), (0, 0)))
        x_gcn_exp = jnp.pad(x_gcn_exp, ((0, 0), (0, pad), (0, 0)))
    new_x = x_gcn_exp[:, :Tm] + new_x[:, :Tm]    # (B, Tm, D)

    # ---------------- BiLSTMLayer (fused projection + recurrence) ----------------
    if Bp > B:
        new_x = jnp.pad(new_x, ((0, Bp - B), (0, 0), (0, 0)))
        doc_pad = jnp.pad(doc_seq_len, (0, Bp - B))   # padded docs: length 0 -> all masked
    else:
        doc_pad = doc_seq_len
    # single transpose of the narrow D-wide tensor; everything downstream stays 2-D
    # time-major, so no gate-tensor HBM round trip, no [::-1], no concats.
    x_t = jnp.transpose(new_x, (1, 0, 2)).reshape(Tm * Bp, D).astype(jnp.bfloat16)
    m_t = (jnp.arange(Tm)[:, None] < doc_pad[None, :]).astype(jnp.float32).reshape(Tm * Bp, 1)

    out_f, out_b = bilstm(x_t, m_t, pp, Bp, t_chunk)

    # ---------------- MLP head (single Linear, concat-free) ----------------
    logits = linear2_tiled(out_f, out_b, pp["w_mlp_f"], pp["w_mlp_b"], pp["b_mlp"])
    logits = jnp.transpose(logits.reshape(Tm, Bp, Np), (1, 0, 2))[:B, :max_len, :pp["n_tags"]]

    new_mask = (jnp.arange(max_len)[None, :] < doc_seq_len[:, None]).astype(mask.dtype)

    # CRF log-likelihood is training-only; eval returns None.
    return logits, new_mask, None


# ---------------------------------------------------------------------------
if __name__ == "__main__":
    B, N, T, D, H, NTAGS = 2, 4, 4, 32, 32, 8

    key = jax.random.PRNGKey(0)
    k_x, k_g, k_p, k_t = jax.random.split(key, 4)

    x = jax.random.normal(k_x, (B, N, T, D), jnp.float32)
    x_gcn = jax.random.normal(k_g, (B, N, D), jnp.float32)
    length = jnp.array([[4, 2, 3, 1], [2, 4, 1, 3]], dtype=jnp.int32)   # per-node lengths
    mask = (jnp.arange(T)[None, None, :] < length[:, :, None]).astype(jnp.int32)
    tags = jax.random.randint(k_t, (B, N, T), 0, NTAGS, dtype=jnp.int32)  # unused (eval)

    params = init_params(k_p, D, H, NTAGS)
    prepped = prep_params(params, H, NTAGS)

    logits, new_mask, log_likelihood = decoder_forward(prepped, x, x_gcn, mask, length, tags)
    jax.block_until_ready((logits, new_mask))

    max_len = int(jnp.max(jnp.sum(length, axis=-1)))
    assert logits.shape == (B, max_len, NTAGS)
    assert new_mask.shape == (B, max_len)
    assert log_likelihood is None
    print("KERNEL_OK")
</pallas_src>

<mosaic_0001>
module attributes {stable_mosaic.version = 11 : i64} {
  func.func @bilstm_kernel(%arg0: i32, %arg1: memref<128x32xbf16, #tpu.memory_space<vmem>>, %arg2: memref<128x32xbf16, #tpu.memory_space<vmem>>, %arg3: memref<128x1xf32, #tpu.memory_space<vmem>>, %arg4: memref<128x1xf32, #tpu.memory_space<vmem>>, %arg5: memref<32x512xbf16, #tpu.memory_space<vmem>>, %arg6: memref<32x512xbf16, #tpu.memory_space<vmem>>, %arg7: memref<1x512xf32, #tpu.memory_space<vmem>>, %arg8: memref<1x512xf32, #tpu.memory_space<vmem>>, %arg9: memref<128x512xbf16, #tpu.memory_space<vmem>>, %arg10: memref<128x512xbf16, #tpu.memory_space<vmem>>, %arg11: memref<128x128xbf16, #tpu.memory_space<vmem>>, %arg12: memref<128x128xbf16, #tpu.memory_space<vmem>>, %arg13: memref<128x512xf32, #tpu.memory_space<vmem>>, %arg14: memref<128x512xf32, #tpu.memory_space<vmem>>, %arg15: memref<4x8x128xf32, #tpu.memory_space<vmem>>) attributes {dimension_semantics = [#tpu.dimension_semantics<arbitrary>], iteration_bounds = array<i64: 1>, scalar_prefetch = 0 : i64, scratch_operands = 3 : i64, tpu.core_type = #tpu.core_type<tc>, window_params = [{transform_indices = @transform_0, window_bounds = array<i64: 128, 32>}, {transform_indices = @transform_1, window_bounds = array<i64: 128, 32>}, {transform_indices = @transform_2, window_bounds = array<i64: 128, 1>}, {transform_indices = @transform_3, window_bounds = array<i64: 128, 1>}, {pipeline_mode = #tpu.pipeline_mode<synchronous>, transform_indices = @transform_4, window_bounds = array<i64: 32, 512>}, {pipeline_mode = #tpu.pipeline_mode<synchronous>, transform_indices = @transform_5, window_bounds = array<i64: 32, 512>}, {pipeline_mode = #tpu.pipeline_mode<synchronous>, transform_indices = @transform_6, window_bounds = array<i64: 1, 512>}, {pipeline_mode = #tpu.pipeline_mode<synchronous>, transform_indices = @transform_7, window_bounds = array<i64: 1, 512>}, {pipeline_mode = #tpu.pipeline_mode<synchronous>, transform_indices = @transform_8, window_bounds = array<i64: 128, 512>}, {pipeline_mode = #tpu.pipeline_mode<synchronous>, transform_indices = @transform_9, window_bounds = array<i64: 128, 512>}, {transform_indices = @transform_10, window_bounds = array<i64: 128, 128>}, {transform_indices = @transform_11, window_bounds = array<i64: 128, 128>}]} {
    %c0_i32 = arith.constant 0 : i32
    %0 = arith.cmpi eq, %arg0, %c0_i32 : i32
    %1 = arith.extui %0 : i1 to i32
    %c0_i32_0 = arith.constant 0 : i32
    %2 = arith.cmpi ne, %1, %c0_i32_0 : i32
    scf.if %2 {
      %cst_571 = arith.constant 0.000000e+00 : f32
      %1815 = vector.broadcast %cst_571 : f32 to vector<4x8x128xf32>
      %c0_572 = arith.constant 0 : index
      %c0_573 = arith.constant 0 : index
      %c0_574 = arith.constant 0 : index
      %1816 = vector.load %arg15[%c0_572, %c0_573, %c0_574] : memref<4x8x128xf32, #tpu.memory_space<vmem>>, vector<4x8x128xf32>
      tpu.vector_store %arg15[%c0_572, %c0_573, %c0_574], %1815 {strides = array<i32>} : memref<4x8x128xf32, #tpu.memory_space<vmem>>, vector<4x8x128xf32>,
    } else {
    }
    %c0 = arith.constant 0 : index
    %c0_1 = arith.constant 0 : index
    %3 = vector.load %arg1[%c0, %c0_1] : memref<128x32xbf16, #tpu.memory_space<vmem>>, vector<128x32xbf16>
    %c0_2 = arith.constant 0 : index
    %c0_3 = arith.constant 0 : index
    %4 = vector.load %arg5[%c0_2, %c0_3] : memref<32x512xbf16, #tpu.memory_space<vmem>>, vector<32x512xbf16>
    %cst = arith.constant dense<0.000000e+00> : vector<128x512xf32>
    %5 = tpu.matmul %3, %4, %cst {dimension_numbers = #tpu.dot_dimension_numbers<[1], [0], [0], [1], [0, 0, 1, 1], [], []>} : vector<128x32xbf16>, vector<32x512xbf16>, vector<128x512xf32> -> vector<128x512xf32>
    %c0_4 = arith.constant 0 : index
    %c0_5 = arith.constant 0 : index
    %6 = vector.load %arg7[%c0_4, %c0_5] : memref<1x512xf32, #tpu.memory_space<vmem>>, vector<1x512xf32>
    %7 = vector.broadcast %6 : vector<1x512xf32> to vector<128x512xf32>
    %8 = arith.addf %5, %7 : vector<128x512xf32>
    %c0_6 = arith.constant 0 : index
    %c0_7 = arith.constant 0 : index
    %9 = vector.load %arg13[%c0_6, %c0_7] : memref<128x512xf32, #tpu.memory_space<vmem>>, vector<128x512xf32>
    tpu.vector_store %arg13[%c0_6, %c0_7], %8 {strides = array<i32>} : memref<128x512xf32, #tpu.memory_space<vmem>>, vector<128x512xf32>,
    %c0_8 = arith.constant 0 : index
    %c0_9 = arith.constant 0 : index
    %10 = vector.load %arg2[%c0_8, %c0_9] : memref<128x32xbf16, #tpu.memory_space<vmem>>, vector<128x32xbf16>
    %c0_10 = arith.constant 0 : index
    %c0_11 = arith.constant 0 : index
    %11 = vector.load %arg6[%c0_10, %c0_11] : memref<32x512xbf16, #tpu.memory_space<vmem>>, vector<32x512xbf16>
    %cst_12 = arith.constant dense<0.000000e+00> : vector<128x512xf32>
    %12 = tpu.matmul %10, %11, %cst_12 {dimension_numbers = #tpu.dot_dimension_numbers<[1], [0], [0], [1], [0, 0, 1, 1], [], []>} : vector<128x32xbf16>, vector<32x512xbf16>, vector<128x512xf32> -> vector<128x512xf32>
    %c0_13 = arith.constant 0 : index
    %c0_14 = arith.constant 0 : index
    %13 = vector.load %arg8[%c0_13, %c0_14] : memref<1x512xf32, #tpu.memory_space<vmem>>, vector<1x512xf32>
    %14 = vector.broadcast %13 : vector<1x512xf32> to vector<128x512xf32>
    %15 = arith.addf %12, %14 : vector<128x512xf32>
    %c0_15 = arith.constant 0 : index
    %c0_16 = arith.constant 0 : index
    %16 = vector.load %arg14[%c0_15, %c0_16] : memref<128x512xf32, #tpu.memory_space<vmem>>, vector<128x512xf32>
    tpu.vector_store %arg14[%c0_15, %c0_16], %15 {strides = array<i32>} : memref<128x512xf32, #tpu.memory_space<vmem>>, vector<128x512xf32>,
    %c0_17 = arith.constant 0 : index
    %c0_18 = arith.constant 0 : index
    %17 = vector.load %arg9[%c0_17, %c0_18] : memref<128x512xbf16, #tpu.memory_space<vmem>>, vector<128x512xbf16>
    %c0_19 = arith.constant 0 : index
    %c0_20 = arith.constant 0 : index
    %18 = vector.load %arg10[%c0_19, %c0_20] : memref<128x512xbf16, #tpu.memory_space<vmem>>, vector<128x512xbf16>
    %c0_21 = arith.constant 0 : index
    %c0_22 = arith.constant 0 : index
    %c0_23 = arith.constant 0 : index
    %19 = vector.load %arg15[%c0_21, %c0_22, %c0_23] : memref<4x8x128xf32, #tpu.memory_space<vmem>>, vector<1x8x128xf32>
    %20 = vector.shape_cast %19 : vector<1x8x128xf32> to vector<8x128xf32>
    %c1 = arith.constant 1 : index
    %c0_24 = arith.constant 0 : index
    %c0_25 = arith.constant 0 : index
    %21 = vector.load %arg15[%c1, %c0_24, %c0_25] : memref<4x8x128xf32, #tpu.memory_space<vmem>>, vector<1x8x128xf32>
    %22 = vector.shape_cast %21 : vector<1x8x128xf32> to vector<8x128xf32>
    %c2 = arith.constant 2 : index
    %c0_26 = arith.constant 0 : index
    %c0_27 = arith.constant 0 : index
    %23 = vector.load %arg15[%c2, %c0_26, %c0_27] : memref<4x8x128xf32, #tpu.memory_space<vmem>>, vector<1x8x128xf32>
    %24 = vector.shape_cast %23 : vector<1x8x128xf32> to vector<8x128xf32>
    %c3 = arith.constant 3 : index
    %c0_28 = arith.constant 0 : index
    %c0_29 = arith.constant 0 : index
    %25 = vector.load %arg15[%c3, %c0_28, %c0_29] : memref<4x8x128xf32, #tpu.memory_space<vmem>>, vector<1x8x128xf32>
    %26 = vector.shape_cast %25 : vector<1x8x128xf32> to vector<8x128xf32>
    %c0_i32_30 = arith.constant 0 : i32
    %c15_i32 = arith.constant 15 : i32
    %27 = arith.subi %c15_i32, %c0_i32_30 : i32
    %c8_i32 = arith.constant 8 : i32
    %28 = arith.muli %c0_i32_30, %c8_i32 : i32
    %29 = tpu.assume_multiple %28, 8 : i32
    %c8_i32_31 = arith.constant 8 : i32
    %30 = arith.muli %27, %c8_i32_31 : i32
    %31 = tpu.assume_multiple %30, 8 : i32
    %32 = arith.index_cast %29 : i32 to index
    %c0_32 = arith.constant 0 : index
    %33 = vector.load %arg13[%32, %c0_32] : memref<128x512xf32, #tpu.memory_space<vmem>>, vector<8x512xf32>
    %34 = arith.truncf %20 : vector<8x128xf32> to vector<8x128xbf16>
    %cst_33 = arith.constant dense<0.000000e+00> : vector<8x512xf32>
    %35 = tpu.matmul %34, %17, %cst_33 {dimension_numbers = #tpu.dot_dimension_numbers<[1], [0], [0], [1], [0, 0, 1, 1], [], []>} : vector<8x128xbf16>, vector<128x512xbf16>, vector<8x512xf32> -> vector<8x512xf32>
    %36 = arith.addf %33, %35 : vector<8x512xf32>
    %37 = arith.index_cast %31 : i32 to index
    %c0_34 = arith.constant 0 : index
    %38 = vector.load %arg14[%37, %c0_34] : memref<128x512xf32, #tpu.memory_space<vmem>>, vector<8x512xf32>
    %39 = arith.truncf %24 : vector<8x128xf32> to vector<8x128xbf16>
    %cst_35 = arith.constant dense<0.000000e+00> : vector<8x512xf32>
    %40 = tpu.matmul %39, %18, %cst_35 {dimension_numbers = #tpu.dot_dimension_numbers<[1], [0], [0], [1], [0, 0, 1, 1], [], []>} : vector<8x128xbf16>, vector<128x512xbf16>, vector<8x512xf32> -> vector<8x512xf32>
    %41 = arith.addf %38, %40 : vector<8x512xf32>
    %42 = vector.extract_strided_slice %36 {offsets = [0, 0], sizes = [8, 128], strides = [1, 1]} : vector<8x512xf32> to vector<8x128xf32>
    %cst_36 = arith.constant 5.000000e-01 : f32
    %43 = vector.broadcast %cst_36 : f32 to vector<8x128xf32>
    %44 = arith.mulf %43, %42 : vector<8x128xf32>
    %45 = math.tanh %44 : vector<8x128xf32>
    %cst_37 = arith.constant 5.000000e-01 : f32
    %46 = vector.broadcast %cst_37 : f32 to vector<8x128xf32>
    %47 = arith.mulf %46, %45 : vector<8x128xf32>
    %cst_38 = arith.constant 5.000000e-01 : f32
    %48 = vector.broadcast %cst_38 : f32 to vector<8x128xf32>
    %49 = arith.addf %47, %48 : vector<8x128xf32>
    %50 = vector.extract_strided_slice %36 {offsets = [0, 128], sizes = [8, 128], strides = [1, 1]} : vector<8x512xf32> to vector<8x128xf32>
    %cst_39 = arith.constant 5.000000e-01 : f32
    %51 = vector.broadcast %cst_39 : f32 to vector<8x128xf32>
    %52 = arith.mulf %51, %50 : vector<8x128xf32>
    %53 = math.tanh %52 : vector<8x128xf32>
    %cst_40 = arith.constant 5.000000e-01 : f32
    %54 = vector.broadcast %cst_40 : f32 to vector<8x128xf32>
    %55 = arith.mulf %54, %53 : vector<8x128xf32>
    %cst_41 = arith.constant 5.000000e-01 : f32
    %56 = vector.broadcast %cst_41 : f32 to vector<8x128xf32>
    %57 = arith.addf %55, %56 : vector<8x128xf32>
    %58 = vector.extract_strided_slice %36 {offsets = [0, 256], sizes = [8, 128], strides = [1, 1]} : vector<8x512xf32> to vector<8x128xf32>
    %59 = math.tanh %58 : vector<8x128xf32>
    %60 = vector.extract_strided_slice %36 {offsets = [0, 384], sizes = [8, 128], strides = [1, 1]} : vector<8x512xf32> to vector<8x128xf32>
    %cst_42 = arith.constant 5.000000e-01 : f32
    %61 = vector.broadcast %cst_42 : f32 to vector<8x128xf32>
    %62 = arith.mulf %61, %60 : vector<8x128xf32>
    %63 = math.tanh %62 : vector<8x128xf32>
    %cst_43 = arith.constant 5.000000e-01 : f32
    %64 = vector.broadcast %cst_43 : f32 to vector<8x128xf32>
    %65 = arith.mulf %64, %63 : vector<8x128xf32>
    %cst_44 = arith.constant 5.000000e-01 : f32
    %66 = vector.broadcast %cst_44 : f32 to vector<8x128xf32>
    %67 = arith.addf %65, %66 : vector<8x128xf32>
    %68 = arith.mulf %57, %22 : vector<8x128xf32>
    %69 = arith.mulf %49, %59 : vector<8x128xf32>
    %70 = arith.addf %68, %69 : vector<8x128xf32>
    %71 = math.tanh %70 : vector<8x128xf32>
    %72 = arith.mulf %67, %71 : vector<8x128xf32>
    %73 = vector.extract_strided_slice %41 {offsets = [0, 0], sizes = [8, 128], strides = [1, 1]} : vector<8x512xf32> to vector<8x128xf32>
    %cst_45 = arith.constant 5.000000e-01 : f32
    %74 = vector.broadcast %cst_45 : f32 to vector<8x128xf32>
    %75 = arith.mulf %74, %73 : vector<8x128xf32>
    %76 = math.tanh %75 : vector<8x128xf32>
    %cst_46 = arith.constant 5.000000e-01 : f32
    %77 = vector.broadcast %cst_46 : f32 to vector<8x128xf32>
    %78 = arith.mulf %77, %76 : vector<8x128xf32>
    %cst_47 = arith.constant 5.000000e-01 : f32
    %79 = vector.broadcast %cst_47 : f32 to vector<8x128xf32>
    %80 = arith.addf %78, %79 : vector<8x128xf32>
    %81 = vector.extract_strided_slice %41 {offsets = [0, 128], sizes = [8, 128], strides = [1, 1]} : vector<8x512xf32> to vector<8x128xf32>
    %cst_48 = arith.constant 5.000000e-01 : f32
    %82 = vector.broadcast %cst_48 : f32 to vector<8x128xf32>
    %83 = arith.mulf %82, %81 : vector<8x128xf32>
    %84 = math.tanh %83 : vector<8x128xf32>
    %cst_49 = arith.constant 5.000000e-01 : f32
    %85 = vector.broadcast %cst_49 : f32 to vector<8x128xf32>
    %86 = arith.mulf %85, %84 : vector<8x128xf32>
    %cst_50 = arith.constant 5.000000e-01 : f32
    %87 = vector.broadcast %cst_50 : f32 to vector<8x128xf32>
    %88 = arith.addf %86, %87 : vector<8x128xf32>
    %89 = vector.extract_strided_slice %41 {offsets = [0, 256], sizes = [8, 128], strides = [1, 1]} : vector<8x512xf32> to vector<8x128xf32>
    %90 = math.tanh %89 : vector<8x128xf32>
    %91 = vector.extract_strided_slice %41 {offsets = [0, 384], sizes = [8, 128], strides = [1, 1]} : vector<8x512xf32> to vector<8x128xf32>
    %cst_51 = arith.constant 5.000000e-01 : f32
    %92 = vector.broadcast %cst_51 : f32 to vector<8x128xf32>
    %93 = arith.mulf %92, %91 : vector<8x128xf32>
    %94 = math.tanh %93 : vector<8x128xf32>
    %cst_52 = arith.constant 5.000000e-01 : f32
    %95 = vector.broadcast %cst_52 : f32 to vector<8x128xf32>
    %96 = arith.mulf %95, %94 : vector<8x128xf32>
    %cst_53 = arith.constant 5.000000e-01 : f32
    %97 = vector.broadcast %cst_53 : f32 to vector<8x128xf32>
    %98 = arith.addf %96, %97 : vector<8x128xf32>
    %99 = arith.mulf %88, %26 : vector<8x128xf32>
    %100 = arith.mulf %80, %90 : vector<8x128xf32>
    %101 = arith.addf %99, %100 : vector<8x128xf32>
    %102 = math.tanh %101 : vector<8x128xf32>
    %103 = arith.mulf %98, %102 : vector<8x128xf32>
    %104 = arith.index_cast %29 : i32 to index
    %c0_54 = arith.constant 0 : index
    %105 = vector.load %arg3[%104, %c0_54] : memref<128x1xf32, #tpu.memory_space<vmem>>, vector<8x1xf32>
    %cst_55 = arith.constant 5.000000e-01 : f32
    %106 = vector.broadcast %cst_55 : f32 to vector<8x1xf32>
    %107 = arith.cmpf ogt, %105, %106 : vector<8x1xf32>
    %108 = arith.index_cast %31 : i32 to index
    %c0_56 = arith.constant 0 : index
    %109 = vector.load %arg4[%108, %c0_56] : memref<128x1xf32, #tpu.memory_space<vmem>>, vector<8x1xf32>
    %cst_57 = arith.constant 5.000000e-01 : f32
    %110 = vector.broadcast %cst_57 : f32 to vector<8x1xf32>
    %111 = arith.cmpf ogt, %109, %110 : vector<8x1xf32>
    %112 = vector.shape_cast %107 : vector<8x1xi1> to vector<8x1xi1>
    %113 = vector.broadcast %112 : vector<8x1xi1> to vector<8x128xi1>
    %114 = arith.select %113, %72, %20 : vector<8x128xi1>, vector<8x128xf32>
    %115 = vector.shape_cast %107 : vector<8x1xi1> to vector<8x1xi1>
    %116 = vector.broadcast %115 : vector<8x1xi1> to vector<8x128xi1>
    %117 = arith.select %116, %70, %22 : vector<8x128xi1>, vector<8x128xf32>
    %118 = vector.shape_cast %111 : vector<8x1xi1> to vector<8x1xi1>
    %119 = vector.broadcast %118 : vector<8x1xi1> to vector<8x128xi1>
    %120 = arith.select %119, %103, %24 : vector<8x128xi1>, vector<8x128xf32>
    %121 = vector.shape_cast %111 : vector<8x1xi1> to vector<8x1xi1>
    %122 = vector.broadcast %121 : vector<8x1xi1> to vector<8x128xi1>
    %123 = arith.select %122, %101, %26 : vector<8x128xi1>, vector<8x128xf32>
    %cst_58 = arith.constant 0.000000e+00 : f32
    %124 = vector.shape_cast %107 : vector<8x1xi1> to vector<8x1xi1>
    %125 = vector.broadcast %124 : vector<8x1xi1> to vector<8x128xi1>
    %126 = vector.broadcast %cst_58 : f32 to vector<8x128xf32>
    %127 = arith.select %125, %114, %126 : vector<8x128xi1>, vector<8x128xf32>
    %128 = arith.truncf %127 : vector<8x128xf32> to vector<8x128xbf16>
    %129 = arith.index_cast %29 : i32 to index
    %c0_59 = arith.constant 0 : index
    %130 = vector.load %arg11[%129, %c0_59] : memref<128x128xbf16, #tpu.memory_space<vmem>>, vector<8x128xbf16>
    tpu.vector_store %arg11[%129, %c0_59], %128 {strides = array<i32>} : memref<128x128xbf16, #tpu.memory_space<vmem>>, vector<8x128xbf16>,
    %cst_60 = arith.constant 0.000000e+00 : f32
    %131 = vector.shape_cast %111 : vector<8x1xi1> to vector<8x1xi1>
    %132 = vector.broadcast %131 : vector<8x1xi1> to vector<8x128xi1>
    %133 = vector.broadcast %cst_60 : f32 to vector<8x128xf32>
    %134 = arith.select %132, %120, %133 : vector<8x128xi1>, vector<8x128xf32>
    %135 = arith.truncf %134 : vector<8x128xf32> to vector<8x128xbf16>
    %136 = arith.index_cast %31 : i32 to index
    %c0_61 = arith.constant 0 : index
    %137 = vector.load %arg12[%136, %c0_61] : memref<128x128xbf16, #tpu.memory_space<vmem>>, vector<8x128xbf16>
    tpu.vector_store %arg12[%136, %c0_61], %135 {strides = array<i32>} : memref<128x128xbf16, #tpu.memory_space<vmem>>, vector<8x128xbf16>,
    %c1_i32 = arith.constant 1 : i32
    %c15_i32_62 = arith.constant 15 : i32
    %138 = arith.subi %c15_i32_62, %c1_i32 : i32
    %c8_i32_63 = arith.constant 8 : i32
    %139 = arith.muli %c1_i32, %c8_i32_63 : i32
    %140 = tpu.assume_multiple %139, 8 : i32
    %c8_i32_64 = arith.constant 8 : i32
    %141 = arith.muli %138, %c8_i32_64 : i32
    %142 = tpu.assume_multiple %141, 8 : i32
    %143 = arith.index_cast %140 : i32 to index
    %c0_65 = arith.constant 0 : index
    %144 = vector.load %arg13[%143, %c0_65] : memref<128x512xf32, #tpu.memory_space<vmem>>, vector<8x512xf32>
    %145 = arith.truncf %114 : vector<8x128xf32> to vector<8x128xbf16>
    %cst_66 = arith.constant dense<0.000000e+00> : vector<8x512xf32>
    %146 = tpu.matmul %145, %17, %cst_66 {dimension_numbers = #tpu.dot_dimension_numbers<[1], [0], [0], [1], [0, 0, 1, 1], [], []>} : vector<8x128xbf16>, vector<128x512xbf16>, vector<8x512xf32> -> vector<8x512xf32>
    %147 = arith.addf %144, %146 : vector<8x512xf32>
    %148 = arith.index_cast %142 : i32 to index
    %c0_67 = arith.constant 0 : index
    %149 = vector.load %arg14[%148, %c0_67] : memref<128x512xf32, #tpu.memory_space<vmem>>, vector<8x512xf32>
    %150 = arith.truncf %120 : vector<8x128xf32> to vector<8x128xbf16>
    %cst_68 = arith.constant dense<0.000000e+00> : vector<8x512xf32>
    %151 = tpu.matmul %150, %18, %cst_68 {dimension_numbers = #tpu.dot_dimension_numbers<[1], [0], [0], [1], [0, 0, 1, 1], [], []>} : vector<8x128xbf16>, vector<128x512xbf16>, vector<8x512xf32> -> vector<8x512xf32>
    %152 = arith.addf %149, %151 : vector<8x512xf32>
    %153 = vector.extract_strided_slice %147 {offsets = [0, 0], sizes = [8, 128], strides = [1, 1]} : vector<8x512xf32> to vector<8x128xf32>
    %cst_69 = arith.constant 5.000000e-01 : f32
    %154 = vector.broadcast %cst_69 : f32 to vector<8x128xf32>
    %155 = arith.mulf %154, %153 : vector<8x128xf32>
    %156 = math.tanh %155 : vector<8x128xf32>
    %cst_70 = arith.constant 5.000000e-01 : f32
    %157 = vector.broadcast %cst_70 : f32 to vector<8x128xf32>
    %158 = arith.mulf %157, %156 : vector<8x128xf32>
    %cst_71 = arith.constant 5.000000e-01 : f32
    %159 = vector.broadcast %cst_71 : f32 to vector<8x128xf32>
    %160 = arith.addf %158, %159 : vector<8x128xf32>
    %161 = vector.extract_strided_slice %147 {offsets = [0, 128], sizes = [8, 128], strides = [1, 1]} : vector<8x512xf32> to vector<8x128xf32>
    %cst_72 = arith.constant 5.000000e-01 : f32
    %162 = vector.broadcast %cst_72 : f32 to vector<8x128xf32>
    %163 = arith.mulf %162, %161 : vector<8x128xf32>
    %164 = math.tanh %163 : vector<8x128xf32>
    %cst_73 = arith.constant 5.000000e-01 : f32
    %165 = vector.broadcast %cst_73 : f32 to vector<8x128xf32>
    %166 = arith.mulf %165, %164 : vector<8x128xf32>
    %cst_74 = arith.constant 5.000000e-01 : f32
    %167 = vector.broadcast %cst_74 : f32 to vector<8x128xf32>
    %168 = arith.addf %166, %167 : vector<8x128xf32>
    %169 = vector.extract_strided_slice %147 {offsets = [0, 256], sizes = [8, 128], strides = [1, 1]} : vector<8x512xf32> to vector<8x128xf32>
    %170 = math.tanh %169 : vector<8x128xf32>
    %171 = vector.extract_strided_slice %147 {offsets = [0, 384], sizes = [8, 128], strides = [1, 1]} : vector<8x512xf32> to vector<8x128xf32>
    %cst_75 = arith.constant 5.000000e-01 : f32
    %172 = vector.broadcast %cst_75 : f32 to vector<8x128xf32>
    %173 = arith.mulf %172, %171 : vector<8x128xf32>
    %174 = math.tanh %173 : vector<8x128xf32>
    %cst_76 = arith.constant 5.000000e-01 : f32
    %175 = vector.broadcast %cst_76 : f32 to vector<8x128xf32>
    %176 = arith.mulf %175, %174 : vector<8x128xf32>
    %cst_77 = arith.constant 5.000000e-01 : f32
    %177 = vector.broadcast %cst_77 : f32 to vector<8x128xf32>
    %178 = arith.addf %176, %177 : vector<8x128xf32>
    %179 = arith.mulf %168, %117 : vector<8x128xf32>
    %180 = arith.mulf %160, %170 : vector<8x128xf32>
    %181 = arith.addf %179, %180 : vector<8x128xf32>
    %182 = math.tanh %181 : vector<8x128xf32>
    %183 = arith.mulf %178, %182 : vector<8x128xf32>
    %184 = vector.extract_strided_slice %152 {offsets = [0, 0], sizes = [8, 128], strides = [1, 1]} : vector<8x512xf32> to vector<8x128xf32>
    %cst_78 = arith.constant 5.000000e-01 : f32
    %185 = vector.broadcast %cst_78 : f32 to vector<8x128xf32>
    %186 = arith.mulf %185, %184 : vector<8x128xf32>
    %187 = math.tanh %186 : vector<8x128xf32>
    %cst_79 = arith.constant 5.000000e-01 : f32
    %188 = vector.broadcast %cst_79 : f32 to vector<8x128xf32>
    %189 = arith.mulf %188, %187 : vector<8x128xf32>
    %cst_80 = arith.constant 5.000000e-01 : f32
    %190 = vector.broadcast %cst_80 : f32 to vector<8x128xf32>
    %191 = arith.addf %189, %190 : vector<8x128xf32>
    %192 = vector.extract_strided_slice %152 {offsets = [0, 128], sizes = [8, 128], strides = [1, 1]} : vector<8x512xf32> to vector<8x128xf32>
    %cst_81 = arith.constant 5.000000e-01 : f32
    %193 = vector.broadcast %cst_81 : f32 to vector<8x128xf32>
    %194 = arith.mulf %193, %192 : vector<8x128xf32>
    %195 = math.tanh %194 : vector<8x128xf32>
    %cst_82 = arith.constant 5.000000e-01 : f32
    %196 = vector.broadcast %cst_82 : f32 to vector<8x128xf32>
    %197 = arith.mulf %196, %195 : vector<8x128xf32>
    %cst_83 = arith.constant 5.000000e-01 : f32
    %198 = vector.broadcast %cst_83 : f32 to vector<8x128xf32>
    %199 = arith.addf %197, %198 : vector<8x128xf32>
    %200 = vector.extract_strided_slice %152 {offsets = [0, 256], sizes = [8, 128], strides = [1, 1]} : vector<8x512xf32> to vector<8x128xf32>
    %201 = math.tanh %200 : vector<8x128xf32>
    %202 = vector.extract_strided_slice %152 {offsets = [0, 384], sizes = [8, 128], strides = [1, 1]} : vector<8x512xf32> to vector<8x128xf32>
    %cst_84 = arith.constant 5.000000e-01 : f32
    %203 = vector.broadcast %cst_84 : f32 to vector<8x128xf32>
    %204 = arith.mulf %203, %202 : vector<8x128xf32>
    %205 = math.tanh %204 : vector<8x128xf32>
    %cst_85 = arith.constant 5.000000e-01 : f32
    %206 = vector.broadcast %cst_85 : f32 to vector<8x128xf32>
    %207 = arith.mulf %206, %205 : vector<8x128xf32>
    %cst_86 = arith.constant 5.000000e-01 : f32
    %208 = vector.broadcast %cst_86 : f32 to vector<8x128xf32>
    %209 = arith.addf %207, %208 : vector<8x128xf32>
    %210 = arith.mulf %199, %123 : vector<8x128xf32>
    %211 = arith.mulf %191, %201 : vector<8x128xf32>
    %212 = arith.addf %210, %211 : vector<8x128xf32>
    %213 = math.tanh %212 : vector<8x128xf32>
    %214 = arith.mulf %209, %213 : vector<8x128xf32>
    %215 = arith.index_cast %140 : i32 to index
    %c0_87 = arith.constant 0 : index
    %216 = vector.load %arg3[%215, %c0_87] : memref<128x1xf32, #tpu.memory_space<vmem>>, vector<8x1xf32>
    %cst_88 = arith.constant 5.000000e-01 : f32
    %217 = vector.broadcast %cst_88 : f32 to vector<8x1xf32>
    %218 = arith.cmpf ogt, %216, %217 : vector<8x1xf32>
    %219 = arith.index_cast %142 : i32 to index
    %c0_89 = arith.constant 0 : index
    %220 = vector.load %arg4[%219, %c0_89] : memref<128x1xf32, #tpu.memory_space<vmem>>, vector<8x1xf32>
    %cst_90 = arith.constant 5.000000e-01 : f32
    %221 = vector.broadcast %cst_90 : f32 to vector<8x1xf32>
    %222 = arith.cmpf ogt, %220, %221 : vector<8x1xf32>
    %223 = vector.shape_cast %218 : vector<8x1xi1> to vector<8x1xi1>
    %224 = vector.broadcast %223 : vector<8x1xi1> to vector<8x128xi1>
    %225 = arith.select %224, %183, %114 : vector<8x128xi1>, vector<8x128xf32>
    %226 = vector.shape_cast %218 : vector<8x1xi1> to vector<8x1xi1>
    %227 = vector.broadcast %226 : vector<8x1xi1> to vector<8x128xi1>
    %228 = arith.select %227, %181, %117 : vector<8x128xi1>, vector<8x128xf32>
    %229 = vector.shape_cast %222 : vector<8x1xi1> to vector<8x1xi1>
    %230 = vector.broadcast %229 : vector<8x1xi1> to vector<8x128xi1>
    %231 = arith.select %230, %214, %120 : vector<8x128xi1>, vector<8x128xf32>
    %232 = vector.shape_cast %222 : vector<8x1xi1> to vector<8x1xi1>
    %233 = vector.broadcast %232 : vector<8x1xi1> to vector<8x128xi1>
    %234 = arith.select %233, %212, %123 : vector<8x128xi1>, vector<8x128xf32>
    %cst_91 = arith.constant 0.000000e+00 : f32
    %235 = vector.shape_cast %218 : vector<8x1xi1> to vector<8x1xi1>
    %236 = vector.broadcast %235 : vector<8x1xi1> to vector<8x128xi1>
    %237 = vector.broadcast %cst_91 : f32 to vector<8x128xf32>
    %238 = arith.select %236, %225, %237 : vector<8x128xi1>, vector<8x128xf32>
    %239 = arith.truncf %238 : vector<8x128xf32> to vector<8x128xbf16>
    %240 = arith.index_cast %140 : i32 to index
    %c0_92 = arith.constant 0 : index
    %241 = vector.load %arg11[%240, %c0_92] : memref<128x128xbf16, #tpu.memory_space<vmem>>, vector<8x128xbf16>
    tpu.vector_store %arg11[%240, %c0_92], %239 {strides = array<i32>} : memref<128x128xbf16, #tpu.memory_space<vmem>>, vector<8x128xbf16>,
    %cst_93 = arith.constant 0.000000e+00 : f32
    %242 = vector.shape_cast %222 : vector<8x1xi1> to vector<8x1xi1>
    %243 = vector.broadcast %242 : vector<8x1xi1> to vector<8x128xi1>
    %244 = vector.broadcast %cst_93 : f32 to vector<8x128xf32>
    %245 = arith.select %243, %231, %244 : vector<8x128xi1>, vector<8x128xf32>
    %246 = arith.truncf %245 : vector<8x128xf32> to vector<8x128xbf16>
    %247 = arith.index_cast %142 : i32 to index
    %c0_94 = arith.constant 0 : index
    %248 = vector.load %arg12[%247, %c0_94] : memref<128x128xbf16, #tpu.memory_space<vmem>>, vector<8x128xbf16>
    tpu.vector_store %arg12[%247, %c0_94], %246 {strides = array<i32>} : memref<128x128xbf16, #tpu.memory_space<vmem>>, vector<8x128xbf16>,
    %c2_i32 = arith.constant 2 : i32
    %c15_i32_95 = arith.constant 15 : i32
    %249 = arith.subi %c15_i32_95, %c2_i32 : i32
    %c8_i32_96 = arith.constant 8 : i32
    %250 = arith.muli %c2_i32, %c8_i32_96 : i32
    %251 = tpu.assume_multiple %250, 8 : i32
    %c8_i32_97 = arith.constant 8 : i32
    %252 = arith.muli %249, %c8_i32_97 : i32
    %253 = tpu.assume_multiple %252, 8 : i32
    %254 = arith.index_cast %251 : i32 to index
    %c0_98 = arith.constant 0 : index
    %255 = vector.load %arg13[%254, %c0_98] : memref<128x512xf32, #tpu.memory_space<vmem>>, vector<8x512xf32>
    %256 = arith.truncf %225 : vector<8x128xf32> to vector<8x128xbf16>
    %cst_99 = arith.constant dense<0.000000e+00> : vector<8x512xf32>
    %257 = tpu.matmul %256, %17, %cst_99 {dimension_numbers = #tpu.dot_dimension_numbers<[1], [0], [0], [1], [0, 0, 1, 1], [], []>} : vector<8x128xbf16>, vector<128x512xbf16>, vector<8x512xf32> -> vector<8x512xf32>
    %258 = arith.addf %255, %257 : vector<8x512xf32>
    %259 = arith.index_cast %253 : i32 to index
    %c0_100 = arith.constant 0 : index
    %260 = vector.load %arg14[%259, %c0_100] : memref<128x512xf32, #tpu.memory_space<vmem>>, vector<8x512xf32>
    %261 = arith.truncf %231 : vector<8x128xf32> to vector<8x128xbf16>
    %cst_101 = arith.constant dense<0.000000e+00> : vector<8x512xf32>
    %262 = tpu.matmul %261, %18, %cst_101 {dimension_numbers = #tpu.dot_dimension_numbers<[1], [0], [0], [1], [0, 0, 1, 1], [], []>} : vector<8x128xbf16>, vector<128x512xbf16>, vector<8x512xf32> -> vector<8x512xf32>
    %263 = arith.addf %260, %262 : vector<8x512xf32>
    %264 = vector.extract_strided_slice %258 {offsets = [0, 0], sizes = [8, 128], strides = [1, 1]} : vector<8x512xf32> to vector<8x128xf32>
    %cst_102 = arith.constant 5.000000e-01 : f32
    %265 = vector.broadcast %cst_102 : f32 to vector<8x128xf32>
    %266 = arith.mulf %265, %264 : vector<8x128xf32>
    %267 = math.tanh %266 : vector<8x128xf32>
    %cst_103 = arith.constant 5.000000e-01 : f32
    %268 = vector.broadcast %cst_103 : f32 to vector<8x128xf32>
    %269 = arith.mulf %268, %267 : vector<8x128xf32>
    %cst_104 = arith.constant 5.000000e-01 : f32
    %270 = vector.broadcast %cst_104 : f32 to vector<8x128xf32>
    %271 = arith.addf %269, %270 : vector<8x128xf32>
    %272 = vector.extract_strided_slice %258 {offsets = [0, 128], sizes = [8, 128], strides = [1, 1]} : vector<8x512xf32> to vector<8x128xf32>
    %cst_105 = arith.constant 5.000000e-01 : f32
    %273 = vector.broadcast %cst_105 : f32 to vector<8x128xf32>
    %274 = arith.mulf %273, %272 : vector<8x128xf32>
    %275 = math.tanh %274 : vector<8x128xf32>
    %cst_106 = arith.constant 5.000000e-01 : f32
    %276 = vector.broadcast %cst_106 : f32 to vector<8x128xf32>
    %277 = arith.mulf %276, %275 : vector<8x128xf32>
    %cst_107 = arith.constant 5.000000e-01 : f32
    %278 = vector.broadcast %cst_107 : f32 to vector<8x128xf32>
    %279 = arith.addf %277, %278 : vector<8x128xf32>
    %280 = vector.extract_strided_slice %258 {offsets = [0, 256], sizes = [8, 128], strides = [1, 1]} : vector<8x512xf32> to vector<8x128xf32>
    %281 = math.tanh %280 : vector<8x128xf32>
    %282 = vector.extract_strided_slice %258 {offsets = [0, 384], sizes = [8, 128], strides = [1, 1]} : vector<8x512xf32> to vector<8x128xf32>
    %cst_108 = arith.constant 5.000000e-01 : f32
    %283 = vector.broadcast %cst_108 : f32 to vector<8x128xf32>
    %284 = arith.mulf %283, %282 : vector<8x128xf32>
    %285 = math.tanh %284 : vector<8x128xf32>
    %cst_109 = arith.constant 5.000000e-01 : f32
    %286 = vector.broadcast %cst_109 : f32 to vector<8x128xf32>
    %287 = arith.mulf %286, %285 : vector<8x128xf32>
    %cst_110 = arith.constant 5.000000e-01 : f32
    %288 = vector.broadcast %cst_110 : f32 to vector<8x128xf32>
    %289 = arith.addf %287, %288 : vector<8x128xf32>
    %290 = arith.mulf %279, %228 : vector<8x128xf32>
    %291 = arith.mulf %271, %281 : vector<8x128xf32>
    %292 = arith.addf %290, %291 : vector<8x128xf32>
    %293 = math.tanh %292 : vector<8x128xf32>
    %294 = arith.mulf %289, %293 : vector<8x128xf32>
    %295 = vector.extract_strided_slice %263 {offsets = [0, 0], sizes = [8, 128], strides = [1, 1]} : vector<8x512xf32> to vector<8x128xf32>
    %cst_111 = arith.constant 5.000000e-01 : f32
    %296 = vector.broadcast %cst_111 : f32 to vector<8x128xf32>
    %297 = arith.mulf %296, %295 : vector<8x128xf32>
    %298 = math.tanh %297 : vector<8x128xf32>
    %cst_112 = arith.constant 5.000000e-01 : f32
    %299 = vector.broadcast %cst_112 : f32 to vector<8x128xf32>
    %300 = arith.mulf %299, %298 : vector<8x128xf32>
    %cst_113 = arith.constant 5.000000e-01 : f32
    %301 = vector.broadcast %cst_113 : f32 to vector<8x128xf32>
    %302 = arith.addf %300, %301 : vector<8x128xf32>
    %303 = vector.extract_strided_slice %263 {offsets = [0, 128], sizes = [8, 128], strides = [1, 1]} : vector<8x512xf32> to vector<8x128xf32>
    %cst_114 = arith.constant 5.000000e-01 : f32
    %304 = vector.broadcast %cst_114 : f32 to vector<8x128xf32>
    %305 = arith.mulf %304, %303 : vector<8x128xf32>
    %306 = math.tanh %305 : vector<8x128xf32>
    %cst_115 = arith.constant 5.000000e-01 : f32
    %307 = vector.broadcast %cst_115 : f32 to vector<8x128xf32>
    %308 = arith.mulf %307, %306 : vector<8x128xf32>
    %cst_116 = arith.constant 5.000000e-01 : f32
    %309 = vector.broadcast %cst_116 : f32 to vector<8x128xf32>
    %310 = arith.addf %308, %309 : vector<8x128xf32>
    %311 = vector.extract_strided_slice %263 {offsets = [0, 256], sizes = [8, 128], strides = [1, 1]} : vector<8x512xf32> to vector<8x128xf32>
    %312 = math.tanh %311 : vector<8x128xf32>
    %313 = vector.extract_strided_slice %263 {offsets = [0, 384], sizes = [8, 128], strides = [1, 1]} : vector<8x512xf32> to vector<8x128xf32>
    %cst_117 = arith.constant 5.000000e-01 : f32
    %314 = vector.broadcast %cst_117 : f32 to vector<8x128xf32>
    %315 = arith.mulf %314, %313 : vector<8x128xf32>
    %316 = math.tanh %315 : vector<8x128xf32>
    %cst_118 = arith.constant 5.000000e-01 : f32
    %317 = vector.broadcast %cst_118 : f32 to vector<8x128xf32>
    %318 = arith.mulf %317, %316 : vector<8x128xf32>
    %cst_119 = arith.constant 5.000000e-01 : f32
    %319 = vector.broadcast %cst_119 : f32 to vector<8x128xf32>
    %320 = arith.addf %318, %319 : vector<8x128xf32>
    %321 = arith.mulf %310, %234 : vector<8x128xf32>
    %322 = arith.mulf %302, %312 : vector<8x128xf32>
    %323 = arith.addf %321, %322 : vector<8x128xf32>
    %324 = math.tanh %323 : vector<8x128xf32>
    %325 = arith.mulf %320, %324 : vector<8x128xf32>
    %326 = arith.index_cast %251 : i32 to index
    %c0_120 = arith.constant 0 : index
    %327 = vector.load %arg3[%326, %c0_120] : memref<128x1xf32, #tpu.memory_space<vmem>>, vector<8x1xf32>
    %cst_121 = arith.constant 5.000000e-01 : f32
    %328 = vector.broadcast %cst_121 : f32 to vector<8x1xf32>
    %329 = arith.cmpf ogt, %327, %328 : vector<8x1xf32>
    %330 = arith.index_cast %253 : i32 to index
    %c0_122 = arith.constant 0 : index
    %331 = vector.load %arg4[%330, %c0_122] : memref<128x1xf32, #tpu.memory_space<vmem>>, vector<8x1xf32>
    %cst_123 = arith.constant 5.000000e-01 : f32
    %332 = vector.broadcast %cst_123 : f32 to vector<8x1xf32>
    %333 = arith.cmpf ogt, %331, %332 : vector<8x1xf32>
    %334 = vector.shape_cast %329 : vector<8x1xi1> to vector<8x1xi1>
    %335 = vector.broadcast %334 : vector<8x1xi1> to vector<8x128xi1>
    %336 = arith.select %335, %294, %225 : vector<8x128xi1>, vector<8x128xf32>
    %337 = vector.shape_cast %329 : vector<8x1xi1> to vector<8x1xi1>
    %338 = vector.broadcast %337 : vector<8x1xi1> to vector<8x128xi1>
    %339 = arith.select %338, %292, %228 : vector<8x128xi1>, vector<8x128xf32>
    %340 = vector.shape_cast %333 : vector<8x1xi1> to vector<8x1xi1>
    %341 = vector.broadcast %340 : vector<8x1xi1> to vector<8x128xi1>
    %342 = arith.select %341, %325, %231 : vector<8x128xi1>, vector<8x128xf32>
    %343 = vector.shape_cast %333 : vector<8x1xi1> to vector<8x1xi1>
    %344 = vector.broadcast %343 : vector<8x1xi1> to vector<8x128xi1>
    %345 = arith.select %344, %323, %234 : vector<8x128xi1>, vector<8x128xf32>
    %cst_124 = arith.constant 0.000000e+00 : f32
    %346 = vector.shape_cast %329 : vector<8x1xi1> to vector<8x1xi1>
    %347 = vector.broadcast %346 : vector<8x1xi1> to vector<8x128xi1>
    %348 = vector.broadcast %cst_124 : f32 to vector<8x128xf32>
    %349 = arith.select %347, %336, %348 : vector<8x128xi1>, vector<8x128xf32>
    %350 = arith.truncf %349 : vector<8x128xf32> to vector<8x128xbf16>
    %351 = arith.index_cast %251 : i32 to index
    %c0_125 = arith.constant 0 : index
    %352 = vector.load %arg11[%351, %c0_125] : memref<128x128xbf16, #tpu.memory_space<vmem>>, vector<8x128xbf16>
    tpu.vector_store %arg11[%351, %c0_125], %350 {strides = array<i32>} : memref<128x128xbf16, #tpu.memory_space<vmem>>, vector<8x128xbf16>,
    %cst_126 = arith.constant 0.000000e+00 : f32
    %353 = vector.shape_cast %333 : vector<8x1xi1> to vector<8x1xi1>
    %354 = vector.broadcast %353 : vector<8x1xi1> to vector<8x128xi1>
    %355 = vector.broadcast %cst_126 : f32 to vector<8x128xf32>
    %356 = arith.select %354, %342, %355 : vector<8x128xi1>, vector<8x128xf32>
    %357 = arith.truncf %356 : vector<8x128xf32> to vector<8x128xbf16>
    %358 = arith.index_cast %253 : i32 to index
    %c0_127 = arith.constant 0 : index
    %359 = vector.load %arg12[%358, %c0_127] : memref<128x128xbf16, #tpu.memory_space<vmem>>, vector<8x128xbf16>
    tpu.vector_store %arg12[%358, %c0_127], %357 {strides = array<i32>} : memref<128x128xbf16, #tpu.memory_space<vmem>>, vector<8x128xbf16>,
    %c3_i32 = arith.constant 3 : i32
    %c15_i32_128 = arith.constant 15 : i32
    %360 = arith.subi %c15_i32_128, %c3_i32 : i32
    %c8_i32_129 = arith.constant 8 : i32
    %361 = arith.muli %c3_i32, %c8_i32_129 : i32
    %362 = tpu.assume_multiple %361, 8 : i32
    %c8_i32_130 = arith.constant 8 : i32
    %363 = arith.muli %360, %c8_i32_130 : i32
    %364 = tpu.assume_multiple %363, 8 : i32
    %365 = arith.index_cast %362 : i32 to index
    %c0_131 = arith.constant 0 : index
    %366 = vector.load %arg13[%365, %c0_131] : memref<128x512xf32, #tpu.memory_space<vmem>>, vector<8x512xf32>
    %367 = arith.truncf %336 : vector<8x128xf32> to vector<8x128xbf16>
    %cst_132 = arith.constant dense<0.000000e+00> : vector<8x512xf32>
    %368 = tpu.matmul %367, %17, %cst_132 {dimension_numbers = #tpu.dot_dimension_numbers<[1], [0], [0], [1], [0, 0, 1, 1], [], []>} : vector<8x128xbf16>, vector<128x512xbf16>, vector<8x512xf32> -> vector<8x512xf32>
    %369 = arith.addf %366, %368 : vector<8x512xf32>
    %370 = arith.index_cast %364 : i32 to index
    %c0_133 = arith.constant 0 : index
    %371 = vector.load %arg14[%370, %c0_133] : memref<128x512xf32, #tpu.memory_space<vmem>>, vector<8x512xf32>
    %372 = arith.truncf %342 : vector<8x128xf32> to vector<8x128xbf16>
    %cst_134 = arith.constant dense<0.000000e+00> : vector<8x512xf32>
    %373 = tpu.matmul %372, %18, %cst_134 {dimension_numbers = #tpu.dot_dimension_numbers<[1], [0], [0], [1], [0, 0, 1, 1], [], []>} : vector<8x128xbf16>, vector<128x512xbf16>, vector<8x512xf32> -> vector<8x512xf32>
    %374 = arith.addf %371, %373 : vector<8x512xf32>
    %375 = vector.extract_strided_slice %369 {offsets = [0, 0], sizes = [8, 128], strides = [1, 1]} : vector<8x512xf32> to vector<8x128xf32>
    %cst_135 = arith.constant 5.000000e-01 : f32
    %376 = vector.broadcast %cst_135 : f32 to vector<8x128xf32>
    %377 = arith.mulf %376, %375 : vector<8x128xf32>
    %378 = math.tanh %377 : vector<8x128xf32>
    %cst_136 = arith.constant 5.000000e-01 : f32
    %379 = vector.broadcast %cst_136 : f32 to vector<8x128xf32>
    %380 = arith.mulf %379, %378 : vector<8x128xf32>
    %cst_137 = arith.constant 5.000000e-01 : f32
    %381 = vector.broadcast %cst_137 : f32 to vector<8x128xf32>
    %382 = arith.addf %380, %381 : vector<8x128xf32>
    %383 = vector.extract_strided_slice %369 {offsets = [0, 128], sizes = [8, 128], strides = [1, 1]} : vector<8x512xf32> to vector<8x128xf32>
    %cst_138 = arith.constant 5.000000e-01 : f32
    %384 = vector.broadcast %cst_138 : f32 to vector<8x128xf32>
    %385 = arith.mulf %384, %383 : vector<8x128xf32>
    %386 = math.tanh %385 : vector<8x128xf32>
    %cst_139 = arith.constant 5.000000e-01 : f32
    %387 = vector.broadcast %cst_139 : f32 to vector<8x128xf32>
    %388 = arith.mulf %387, %386 : vector<8x128xf32>
    %cst_140 = arith.constant 5.000000e-01 : f32
    %389 = vector.broadcast %cst_140 : f32 to vector<8x128xf32>
    %390 = arith.addf %388, %389 : vector<8x128xf32>
    %391 = vector.extract_strided_slice %369 {offsets = [0, 256], sizes = [8, 128], strides = [1, 1]} : vector<8x512xf32> to vector<8x128xf32>
    %392 = math.tanh %391 : vector<8x128xf32>
    %393 = vector.extract_strided_slice %369 {offsets = [0, 384], sizes = [8, 128], strides = [1, 1]} : vector<8x512xf32> to vector<8x128xf32>
    %cst_141 = arith.constant 5.000000e-01 : f32
    %394 = vector.broadcast %cst_141 : f32 to vector<8x128xf32>
    %395 = arith.mulf %394, %393 : vector<8x128xf32>
    %396 = math.tanh %395 : vector<8x128xf32>
    %cst_142 = arith.constant 5.000000e-01 : f32
    %397 = vector.broadcast %cst_142 : f32 to vector<8x128xf32>
    %398 = arith.mulf %397, %396 : vector<8x128xf32>
    %cst_143 = arith.constant 5.000000e-01 : f32
    %399 = vector.broadcast %cst_143 : f32 to vector<8x128xf32>
    %400 = arith.addf %398, %399 : vector<8x128xf32>
    %401 = arith.mulf %390, %339 : vector<8x128xf32>
    %402 = arith.mulf %382, %392 : vector<8x128xf32>
    %403 = arith.addf %401, %402 : vector<8x128xf32>
    %404 = math.tanh %403 : vector<8x128xf32>
    %405 = arith.mulf %400, %404 : vector<8x128xf32>
    %406 = vector.extract_strided_slice %374 {offsets = [0, 0], sizes = [8, 128], strides = [1, 1]} : vector<8x512xf32> to vector<8x128xf32>
    %cst_144 = arith.constant 5.000000e-01 : f32
    %407 = vector.broadcast %cst_144 : f32 to vector<8x128xf32>
    %408 = arith.mulf %407, %406 : vector<8x128xf32>
    %409 = math.tanh %408 : vector<8x128xf32>
    %cst_145 = arith.constant 5.000000e-01 : f32
    %410 = vector.broadcast %cst_145 : f32 to vector<8x128xf32>
    %411 = arith.mulf %410, %409 : vector<8x128xf32>
    %cst_146 = arith.constant 5.000000e-01 : f32
    %412 = vector.broadcast %cst_146 : f32 to vector<8x128xf32>
    %413 = arith.addf %411, %412 : vector<8x128xf32>
    %414 = vector.extract_strided_slice %374 {offsets = [0, 128], sizes = [8, 128], strides = [1, 1]} : vector<8x512xf32> to vector<8x128xf32>
    %cst_147 = arith.constant 5.000000e-01 : f32
    %415 = vector.broadcast %cst_147 : f32 to vector<8x128xf32>
    %416 = arith.mulf %415, %414 : vector<8x128xf32>
    %417 = math.tanh %416 : vector<8x128xf32>
    %cst_148 = arith.constant 5.000000e-01 : f32
    %418 = vector.broadcast %cst_148 : f32 to vector<8x128xf32>
    %419 = arith.mulf %418, %417 : vector<8x128xf32>
    %cst_149 = arith.constant 5.000000e-01 : f32
    %420 = vector.broadcast %cst_149 : f32 to vector<8x128xf32>
    %421 = arith.addf %419, %420 : vector<8x128xf32>
    %422 = vector.extract_strided_slice %374 {offsets = [0, 256], sizes = [8, 128], strides = [1, 1]} : vector<8x512xf32> to vector<8x128xf32>
    %423 = math.tanh %422 : vector<8x128xf32>
    %424 = vector.extract_strided_slice %374 {offsets = [0, 384], sizes = [8, 128], strides = [1, 1]} : vector<8x512xf32> to vector<8x128xf32>
    %cst_150 = arith.constant 5.000000e-01 : f32
    %425 = vector.broadcast %cst_150 : f32 to vector<8x128xf32>
    %426 = arith.mulf %425, %424 : vector<8x128xf32>
    %427 = math.tanh %426 : vector<8x128xf32>
    %cst_151 = arith.constant 5.000000e-01 : f32
    %428 = vector.broadcast %cst_151 : f32 to vector<8x128xf32>
    %429 = arith.mulf %428, %427 : vector<8x128xf32>
    %cst_152 = arith.constant 5.000000e-01 : f32
    %430 = vector.broadcast %cst_152 : f32 to vector<8x128xf32>
    %431 = arith.addf %429, %430 : vector<8x128xf32>
    %432 = arith.mulf %421, %345 : vector<8x128xf32>
    %433 = arith.mulf %413, %423 : vector<8x128xf32>
    %434 = arith.addf %432, %433 : vector<8x128xf32>
    %435 = math.tanh %434 : vector<8x128xf32>
    %436 = arith.mulf %431, %435 : vector<8x128xf32>
    %437 = arith.index_cast %362 : i32 to index
    %c0_153 = arith.constant 0 : index
    %438 = vector.load %arg3[%437, %c0_153] : memref<128x1xf32, #tpu.memory_space<vmem>>, vector<8x1xf32>
    %cst_154 = arith.constant 5.000000e-01 : f32
    %439 = vector.broadcast %cst_154 : f32 to vector<8x1xf32>
    %440 = arith.cmpf ogt, %438, %439 : vector<8x1xf32>
    %441 = arith.index_cast %364 : i32 to index
    %c0_155 = arith.constant 0 : index
    %442 = vector.load %arg4[%441, %c0_155] : memref<128x1xf32, #tpu.memory_space<vmem>>, vector<8x1xf32>
    %cst_156 = arith.constant 5.000000e-01 : f32
    %443 = vector.broadcast %cst_156 : f32 to vector<8x1xf32>
    %444 = arith.cmpf ogt, %442, %443 : vector<8x1xf32>
    %445 = vector.shape_cast %440 : vector<8x1xi1> to vector<8x1xi1>
    %446 = vector.broadcast %445 : vector<8x1xi1> to vector<8x128xi1>
    %447 = arith.select %446, %405, %336 : vector<8x128xi1>, vector<8x128xf32>
    %448 = vector.shape_cast %440 : vector<8x1xi1> to vector<8x1xi1>
    %449 = vector.broadcast %448 : vector<8x1xi1> to vector<8x128xi1>
    %450 = arith.select %449, %403, %339 : vector<8x128xi1>, vector<8x128xf32>
    %451 = vector.shape_cast %444 : vector<8x1xi1> to vector<8x1xi1>
    %452 = vector.broadcast %451 : vector<8x1xi1> to vector<8x128xi1>
    %453 = arith.select %452, %436, %342 : vector<8x128xi1>, vector<8x128xf32>
    %454 = vector.shape_cast %444 : vector<8x1xi1> to vector<8x1xi1>
    %455 = vector.broadcast %454 : vector<8x1xi1> to vector<8x128xi1>
    %456 = arith.select %455, %434, %345 : vector<8x128xi1>, vector<8x128xf32>
    %cst_157 = arith.constant 0.000000e+00 : f32
    %457 = vector.shape_cast %440 : vector<8x1xi1> to vector<8x1xi1>
    %458 = vector.broadcast %457 : vector<8x1xi1> to vector<8x128xi1>
    %459 = vector.broadcast %cst_157 : f32 to vector<8x128xf32>
    %460 = arith.select %458, %447, %459 : vector<8x128xi1>, vector<8x128xf32>
    %461 = arith.truncf %460 : vector<8x128xf32> to vector<8x128xbf16>
    %462 = arith.index_cast %362 : i32 to index
    %c0_158 = arith.constant 0 : index
    %463 = vector.load %arg11[%462, %c0_158] : memref<128x128xbf16, #tpu.memory_space<vmem>>, vector<8x128xbf16>
    tpu.vector_store %arg11[%462, %c0_158], %461 {strides = array<i32>} : memref<128x128xbf16, #tpu.memory_space<vmem>>, vector<8x128xbf16>,
    %cst_159 = arith.constant 0.000000e+00 : f32
    %464 = vector.shape_cast %444 : vector<8x1xi1> to vector<8x1xi1>
    %465 = vector.broadcast %464 : vector<8x1xi1> to vector<8x128xi1>
    %466 = vector.broadcast %cst_159 : f32 to vector<8x128xf32>
    %467 = arith.select %465, %453, %466 : vector<8x128xi1>, vector<8x128xf32>
    %468 = arith.truncf %467 : vector<8x128xf32> to vector<8x128xbf16>
    %469 = arith.index_cast %364 : i32 to index
    %c0_160 = arith.constant 0 : index
    %470 = vector.load %arg12[%469, %c0_160] : memref<128x128xbf16, #tpu.memory_space<vmem>>, vector<8x128xbf16>
    tpu.vector_store %arg12[%469, %c0_160], %468 {strides = array<i32>} : memref<128x128xbf16, #tpu.memory_space<vmem>>, vector<8x128xbf16>,
    %c4_i32 = arith.constant 4 : i32
    %c15_i32_161 = arith.constant 15 : i32
    %471 = arith.subi %c15_i32_161, %c4_i32 : i32
    %c8_i32_162 = arith.constant 8 : i32
    %472 = arith.muli %c4_i32, %c8_i32_162 : i32
    %473 = tpu.assume_multiple %472, 8 : i32
    %c8_i32_163 = arith.constant 8 : i32
    %474 = arith.muli %471, %c8_i32_163 : i32
    %475 = tpu.assume_multiple %474, 8 : i32
    %476 = arith.index_cast %473 : i32 to index
    %c0_164 = arith.constant 0 : index
    %477 = vector.load %arg13[%476, %c0_164] : memref<128x512xf32, #tpu.memory_space<vmem>>, vector<8x512xf32>
    %478 = arith.truncf %447 : vector<8x128xf32> to vector<8x128xbf16>
    %cst_165 = arith.constant dense<0.000000e+00> : vector<8x512xf32>
    %479 = tpu.matmul %478, %17, %cst_165 {dimension_numbers = #tpu.dot_dimension_numbers<[1], [0], [0], [1], [0, 0, 1, 1], [], []>} : vector<8x128xbf16>, vector<128x512xbf16>, vector<8x512xf32> -> vector<8x512xf32>
    %480 = arith.addf %477, %479 : vector<8x512xf32>
    %481 = arith.index_cast %475 : i32 to index
    %c0_166 = arith.constant 0 : index
    %482 = vector.load %arg14[%481, %c0_166] : memref<128x512xf32, #tpu.memory_space<vmem>>, vector<8x512xf32>
    %483 = arith.truncf %453 : vector<8x128xf32> to vector<8x128xbf16>
    %cst_167 = arith.constant dense<0.000000e+00> : vector<8x512xf32>
    %484 = tpu.matmul %483, %18, %cst_167 {dimension_numbers = #tpu.dot_dimension_numbers<[1], [0], [0], [1], [0, 0, 1, 1], [], []>} : vector<8x128xbf16>, vector<128x512xbf16>, vector<8x512xf32> -> vector<8x512xf32>
    %485 = arith.addf %482, %484 : vector<8x512xf32>
    %486 = vector.extract_strided_slice %480 {offsets = [0, 0], sizes = [8, 128], strides = [1, 1]} : vector<8x512xf32> to vector<8x128xf32>
    %cst_168 = arith.constant 5.000000e-01 : f32
    %487 = vector.broadcast %cst_168 : f32 to vector<8x128xf32>
    %488 = arith.mulf %487, %486 : vector<8x128xf32>
    %489 = math.tanh %488 : vector<8x128xf32>
    %cst_169 = arith.constant 5.000000e-01 : f32
    %490 = vector.broadcast %cst_169 : f32 to vector<8x128xf32>
    %491 = arith.mulf %490, %489 : vector<8x128xf32>
    %cst_170 = arith.constant 5.000000e-01 : f32
    %492 = vector.broadcast %cst_170 : f32 to vector<8x128xf32>
    %493 = arith.addf %491, %492 : vector<8x128xf32>
    %494 = vector.extract_strided_slice %480 {offsets = [0, 128], sizes = [8, 128], strides = [1, 1]} : vector<8x512xf32> to vector<8x128xf32>
    %cst_171 = arith.constant 5.000000e-01 : f32
    %495 = vector.broadcast %cst_171 : f32 to vector<8x128xf32>
    %496 = arith.mulf %495, %494 : vector<8x128xf32>
    %497 = math.tanh %496 : vector<8x128xf32>
    %cst_172 = arith.constant 5.000000e-01 : f32
    %498 = vector.broadcast %cst_172 : f32 to vector<8x128xf32>
    %499 = arith.mulf %498, %497 : vector<8x128xf32>
    %cst_173 = arith.constant 5.000000e-01 : f32
    %500 = vector.broadcast %cst_173 : f32 to vector<8x128xf32>
    %501 = arith.addf %499, %500 : vector<8x128xf32>
    %502 = vector.extract_strided_slice %480 {offsets = [0, 256], sizes = [8, 128], strides = [1, 1]} : vector<8x512xf32> to vector<8x128xf32>
    %503 = math.tanh %502 : vector<8x128xf32>
    %504 = vector.extract_strided_slice %480 {offsets = [0, 384], sizes = [8, 128], strides = [1, 1]} : vector<8x512xf32> to vector<8x128xf32>
    %cst_174 = arith.constant 5.000000e-01 : f32
    %505 = vector.broadcast %cst_174 : f32 to vector<8x128xf32>
    %506 = arith.mulf %505, %504 : vector<8x128xf32>
    %507 = math.tanh %506 : vector<8x128xf32>
    %cst_175 = arith.constant 5.000000e-01 : f32
    %508 = vector.broadcast %cst_175 : f32 to vector<8x128xf32>
    %509 = arith.mulf %508, %507 : vector<8x128xf32>
    %cst_176 = arith.constant 5.000000e-01 : f32
    %510 = vector.broadcast %cst_176 : f32 to vector<8x128xf32>
    %511 = arith.addf %509, %510 : vector<8x128xf32>
    %512 = arith.mulf %501, %450 : vector<8x128xf32>
    %513 = arith.mulf %493, %503 : vector<8x128xf32>
    %514 = arith.addf %512, %513 : vector<8x128xf32>
    %515 = math.tanh %514 : vector<8x128xf32>
    %516 = arith.mulf %511, %515 : vector<8x128xf32>
    %517 = vector.extract_strided_slice %485 {offsets = [0, 0], sizes = [8, 128], strides = [1, 1]} : vector<8x512xf32> to vector<8x128xf32>
    %cst_177 = arith.constant 5.000000e-01 : f32
    %518 = vector.broadcast %cst_177 : f32 to vector<8x128xf32>
    %519 = arith.mulf %518, %517 : vector<8x128xf32>
    %520 = math.tanh %519 : vector<8x128xf32>
    %cst_178 = arith.constant 5.000000e-01 : f32
    %521 = vector.broadcast %cst_178 : f32 to vector<8x128xf32>
    %522 = arith.mulf %521, %520 : vector<8x128xf32>
    %cst_179 = arith.constant 5.000000e-01 : f32
    %523 = vector.broadcast %cst_179 : f32 to vector<8x128xf32>
    %524 = arith.addf %522, %523 : vector<8x128xf32>
    %525 = vector.extract_strided_slice %485 {offsets = [0, 128], sizes = [8, 128], strides = [1, 1]} : vector<8x512xf32> to vector<8x128xf32>
    %cst_180 = arith.constant 5.000000e-01 : f32
    %526 = vector.broadcast %cst_180 : f32 to vector<8x128xf32>
    %527 = arith.mulf %526, %525 : vector<8x128xf32>
    %528 = math.tanh %527 : vector<8x128xf32>
    %cst_181 = arith.constant 5.000000e-01 : f32
    %529 = vector.broadcast %cst_181 : f32 to vector<8x128xf32>
    %530 = arith.mulf %529, %528 : vector<8x128xf32>
    %cst_182 = arith.constant 5.000000e-01 : f32
    %531 = vector.broadcast %cst_182 : f32 to vector<8x128xf32>
    %532 = arith.addf %530, %531 : vector<8x128xf32>
    %533 = vector.extract_strided_slice %485 {offsets = [0, 256], sizes = [8, 128], strides = [1, 1]} : vector<8x512xf32> to vector<8x128xf32>
    %534 = math.tanh %533 : vector<8x128xf32>
    %535 = vector.extract_strided_slice %485 {offsets = [0, 384], sizes = [8, 128], strides = [1, 1]} : vector<8x512xf32> to vector<8x128xf32>
    %cst_183 = arith.constant 5.000000e-01 : f32
    %536 = vector.broadcast %cst_183 : f32 to vector<8x128xf32>
    %537 = arith.mulf %536, %535 : vector<8x128xf32>
    %538 = math.tanh %537 : vector<8x128xf32>
    %cst_184 = arith.constant 5.000000e-01 : f32
    %539 = vector.broadcast %cst_184 : f32 to vector<8x128xf32>
    %540 = arith.mulf %539, %538 : vector<8x128xf32>
    %cst_185 = arith.constant 5.000000e-01 : f32
    %541 = vector.broadcast %cst_185 : f32 to vector<8x128xf32>
    %542 = arith.addf %540, %541 : vector<8x128xf32>
    %543 = arith.mulf %532, %456 : vector<8x128xf32>
    %544 = arith.mulf %524, %534 : vector<8x128xf32>
    %545 = arith.addf %543, %544 : vector<8x128xf32>
    %546 = math.tanh %545 : vector<8x128xf32>
    %547 = arith.mulf %542, %546 : vector<8x128xf32>
    %548 = arith.index_cast %473 : i32 to index
    %c0_186 = arith.constant 0 : index
    %549 = vector.load %arg3[%548, %c0_186] : memref<128x1xf32, #tpu.memory_space<vmem>>, vector<8x1xf32>
    %cst_187 = arith.constant 5.000000e-01 : f32
    %550 = vector.broadcast %cst_187 : f32 to vector<8x1xf32>
    %551 = arith.cmpf ogt, %549, %550 : vector<8x1xf32>
    %552 = arith.index_cast %475 : i32 to index
    %c0_188 = arith.constant 0 : index
    %553 = vector.load %arg4[%552, %c0_188] : memref<128x1xf32, #tpu.memory_space<vmem>>, vector<8x1xf32>
    %cst_189 = arith.constant 5.000000e-01 : f32
    %554 = vector.broadcast %cst_189 : f32 to vector<8x1xf32>
    %555 = arith.cmpf ogt, %553, %554 : vector<8x1xf32>
    %556 = vector.shape_cast %551 : vector<8x1xi1> to vector<8x1xi1>
    %557 = vector.broadcast %556 : vector<8x1xi1> to vector<8x128xi1>
    %558 = arith.select %557, %516, %447 : vector<8x128xi1>, vector<8x128xf32>
    %559 = vector.shape_cast %551 : vector<8x1xi1> to vector<8x1xi1>
    %560 = vector.broadcast %559 : vector<8x1xi1> to vector<8x128xi1>
    %561 = arith.select %560, %514, %450 : vector<8x128xi1>, vector<8x128xf32>
    %562 = vector.shape_cast %555 : vector<8x1xi1> to vector<8x1xi1>
    %563 = vector.broadcast %562 : vector<8x1xi1> to vector<8x128xi1>
    %564 = arith.select %563, %547, %453 : vector<8x128xi1>, vector<8x128xf32>
    %565 = vector.shape_cast %555 : vector<8x1xi1> to vector<8x1xi1>
    %566 = vector.broadcast %565 : vector<8x1xi1> to vector<8x128xi1>
    %567 = arith.select %566, %545, %456 : vector<8x128xi1>, vector<8x128xf32>
    %cst_190 = arith.constant 0.000000e+00 : f32
    %568 = vector.shape_cast %551 : vector<8x1xi1> to vector<8x1xi1>
    %569 = vector.broadcast %568 : vector<8x1xi1> to vector<8x128xi1>
    %570 = vector.broadcast %cst_190 : f32 to vector<8x128xf32>
    %571 = arith.select %569, %558, %570 : vector<8x128xi1>, vector<8x128xf32>
    %572 = arith.truncf %571 : vector<8x128xf32> to vector<8x128xbf16>
    %573 = arith.index_cast %473 : i32 to index
    %c0_191 = arith.constant 0 : index
    %574 = vector.load %arg11[%573, %c0_191] : memref<128x128xbf16, #tpu.memory_space<vmem>>, vector<8x128xbf16>
    tpu.vector_store %arg11[%573, %c0_191], %572 {strides = array<i32>} : memref<128x128xbf16, #tpu.memory_space<vmem>>, vector<8x128xbf16>,
    %cst_192 = arith.constant 0.000000e+00 : f32
    %575 = vector.shape_cast %555 : vector<8x1xi1> to vector<8x1xi1>
    %576 = vector.broadcast %575 : vector<8x1xi1> to vector<8x128xi1>
    %577 = vector.broadcast %cst_192 : f32 to vector<8x128xf32>
    %578 = arith.select %576, %564, %577 : vector<8x128xi1>, vector<8x128xf32>
    %579 = arith.truncf %578 : vector<8x128xf32> to vector<8x128xbf16>
    %580 = arith.index_cast %475 : i32 to index
    %c0_193 = arith.constant 0 : index
    %581 = vector.load %arg12[%580, %c0_193] : memref<128x128xbf16, #tpu.memory_space<vmem>>, vector<8x128xbf16>
    tpu.vector_store %arg12[%580, %c0_193], %579 {strides = array<i32>} : memref<128x128xbf16, #tpu.memory_space<vmem>>, vector<8x128xbf16>,
    %c5_i32 = arith.constant 5 : i32
    %c15_i32_194 = arith.constant 15 : i32
    %582 = arith.subi %c15_i32_194, %c5_i32 : i32
    %c8_i32_195 = arith.constant 8 : i32
    %583 = arith.muli %c5_i32, %c8_i32_195 : i32
    %584 = tpu.assume_multiple %583, 8 : i32
    %c8_i32_196 = arith.constant 8 : i32
    %585 = arith.muli %582, %c8_i32_196 : i32
    %586 = tpu.assume_multiple %585, 8 : i32
    %587 = arith.index_cast %584 : i32 to index
    %c0_197 = arith.constant 0 : index
    %588 = vector.load %arg13[%587, %c0_197] : memref<128x512xf32, #tpu.memory_space<vmem>>, vector<8x512xf32>
    %589 = arith.truncf %558 : vector<8x128xf32> to vector<8x128xbf16>
    %cst_198 = arith.constant dense<0.000000e+00> : vector<8x512xf32>
    %590 = tpu.matmul %589, %17, %cst_198 {dimension_numbers = #tpu.dot_dimension_numbers<[1], [0], [0], [1], [0, 0, 1, 1], [], []>} : vector<8x128xbf16>, vector<128x512xbf16>, vector<8x512xf32> -> vector<8x512xf32>
    %591 = arith.addf %588, %590 : vector<8x512xf32>
    %592 = arith.index_cast %586 : i32 to index
    %c0_199 = arith.constant 0 : index
    %593 = vector.load %arg14[%592, %c0_199] : memref<128x512xf32, #tpu.memory_space<vmem>>, vector<8x512xf32>
    %594 = arith.truncf %564 : vector<8x128xf32> to vector<8x128xbf16>
    %cst_200 = arith.constant dense<0.000000e+00> : vector<8x512xf32>
    %595 = tpu.matmul %594, %18, %cst_200 {dimension_numbers = #tpu.dot_dimension_numbers<[1], [0], [0], [1], [0, 0, 1, 1], [], []>} : vector<8x128xbf16>, vector<128x512xbf16>, vector<8x512xf32> -> vector<8x512xf32>
    %596 = arith.addf %593, %595 : vector<8x512xf32>
    %597 = vector.extract_strided_slice %591 {offsets = [0, 0], sizes = [8, 128], strides = [1, 1]} : vector<8x512xf32> to vector<8x128xf32>
    %cst_201 = arith.constant 5.000000e-01 : f32
    %598 = vector.broadcast %cst_201 : f32 to vector<8x128xf32>
    %599 = arith.mulf %598, %597 : vector<8x128xf32>
    %600 = math.tanh %599 : vector<8x128xf32>
    %cst_202 = arith.constant 5.000000e-01 : f32
    %601 = vector.broadcast %cst_202 : f32 to vector<8x128xf32>
    %602 = arith.mulf %601, %600 : vector<8x128xf32>
    %cst_203 = arith.constant 5.000000e-01 : f32
    %603 = vector.broadcast %cst_203 : f32 to vector<8x128xf32>
    %604 = arith.addf %602, %603 : vector<8x128xf32>
    %605 = vector.extract_strided_slice %591 {offsets = [0, 128], sizes = [8, 128], strides = [1, 1]} : vector<8x512xf32> to vector<8x128xf32>
    %cst_204 = arith.constant 5.000000e-01 : f32
    %606 = vector.broadcast %cst_204 : f32 to vector<8x128xf32>
    %607 = arith.mulf %606, %605 : vector<8x128xf32>
    %608 = math.tanh %607 : vector<8x128xf32>
    %cst_205 = arith.constant 5.000000e-01 : f32
    %609 = vector.broadcast %cst_205 : f32 to vector<8x128xf32>
    %610 = arith.mulf %609, %608 : vector<8x128xf32>
    %cst_206 = arith.constant 5.000000e-01 : f32
    %611 = vector.broadcast %cst_206 : f32 to vector<8x128xf32>
    %612 = arith.addf %610, %611 : vector<8x128xf32>
    %613 = vector.extract_strided_slice %591 {offsets = [0, 256], sizes = [8, 128], strides = [1, 1]} : vector<8x512xf32> to vector<8x128xf32>
    %614 = math.tanh %613 : vector<8x128xf32>
    %615 = vector.extract_strided_slice %591 {offsets = [0, 384], sizes = [8, 128], strides = [1, 1]} : vector<8x512xf32> to vector<8x128xf32>
    %cst_207 = arith.constant 5.000000e-01 : f32
    %616 = vector.broadcast %cst_207 : f32 to vector<8x128xf32>
    %617 = arith.mulf %616, %615 : vector<8x128xf32>
    %618 = math.tanh %617 : vector<8x128xf32>
    %cst_208 = arith.constant 5.000000e-01 : f32
    %619 = vector.broadcast %cst_208 : f32 to vector<8x128xf32>
    %620 = arith.mulf %619, %618 : vector<8x128xf32>
    %cst_209 = arith.constant 5.000000e-01 : f32
    %621 = vector.broadcast %cst_209 : f32 to vector<8x128xf32>
    %622 = arith.addf %620, %621 : vector<8x128xf32>
    %623 = arith.mulf %612, %561 : vector<8x128xf32>
    %624 = arith.mulf %604, %614 : vector<8x128xf32>
    %625 = arith.addf %623, %624 : vector<8x128xf32>
    %626 = math.tanh %625 : vector<8x128xf32>
    %627 = arith.mulf %622, %626 : vector<8x128xf32>
    %628 = vector.extract_strided_slice %596 {offsets = [0, 0], sizes = [8, 128], strides = [1, 1]} : vector<8x512xf32> to vector<8x128xf32>
    %cst_210 = arith.constant 5.000000e-01 : f32
    %629 = vector.broadcast %cst_210 : f32 to vector<8x128xf32>
    %630 = arith.mulf %629, %628 : vector<8x128xf32>
    %631 = math.tanh %630 : vector<8x128xf32>
    %cst_211 = arith.constant 5.000000e-01 : f32
    %632 = vector.broadcast %cst_211 : f32 to vector<8x128xf32>
    %633 = arith.mulf %632, %631 : vector<8x128xf32>
    %cst_212 = arith.constant 5.000000e-01 : f32
    %634 = vector.broadcast %cst_212 : f32 to vector<8x128xf32>
    %635 = arith.addf %633, %634 : vector<8x128xf32>
    %636 = vector.extract_strided_slice %596 {offsets = [0, 128], sizes = [8, 128], strides = [1, 1]} : vector<8x512xf32> to vector<8x128xf32>
    %cst_213 = arith.constant 5.000000e-01 : f32
    %637 = vector.broadcast %cst_213 : f32 to vector<8x128xf32>
    %638 = arith.mulf %637, %636 : vector<8x128xf32>
    %639 = math.tanh %638 : vector<8x128xf32>
    %cst_214 = arith.constant 5.000000e-01 : f32
    %640 = vector.broadcast %cst_214 : f32 to vector<8x128xf32>
    %641 = arith.mulf %640, %639 : vector<8x128xf32>
    %cst_215 = arith.constant 5.000000e-01 : f32
    %642 = vector.broadcast %cst_215 : f32 to vector<8x128xf32>
    %643 = arith.addf %641, %642 : vector<8x128xf32>
    %644 = vector.extract_strided_slice %596 {offsets = [0, 256], sizes = [8, 128], strides = [1, 1]} : vector<8x512xf32> to vector<8x128xf32>
    %645 = math.tanh %644 : vector<8x128xf32>
    %646 = vector.extract_strided_slice %596 {offsets = [0, 384], sizes = [8, 128], strides = [1, 1]} : vector<8x512xf32> to vector<8x128xf32>
    %cst_216 = arith.constant 5.000000e-01 : f32
    %647 = vector.broadcast %cst_216 : f32 to vector<8x128xf32>
    %648 = arith.mulf %647, %646 : vector<8x128xf32>
    %649 = math.tanh %648 : vector<8x128xf32>
    %cst_217 = arith.constant 5.000000e-01 : f32
    %650 = vector.broadcast %cst_217 : f32 to vector<8x128xf32>
    %651 = arith.mulf %650, %649 : vector<8x128xf32>
    %cst_218 = arith.constant 5.000000e-01 : f32
    %652 = vector.broadcast %cst_218 : f32 to vector<8x128xf32>
    %653 = arith.addf %651, %652 : vector<8x128xf32>
    %654 = arith.mulf %643, %567 : vector<8x128xf32>
    %655 = arith.mulf %635, %645 : vector<8x128xf32>
    %656 = arith.addf %654, %655 : vector<8x128xf32>
    %657 = math.tanh %656 : vector<8x128xf32>
    %658 = arith.mulf %653, %657 : vector<8x128xf32>
    %659 = arith.index_cast %584 : i32 to index
    %c0_219 = arith.constant 0 : index
    %660 = vector.load %arg3[%659, %c0_219] : memref<128x1xf32, #tpu.memory_space<vmem>>, vector<8x1xf32>
    %cst_220 = arith.constant 5.000000e-01 : f32
    %661 = vector.broadcast %cst_220 : f32 to vector<8x1xf32>
    %662 = arith.cmpf ogt, %660, %661 : vector<8x1xf32>
    %663 = arith.index_cast %586 : i32 to index
    %c0_221 = arith.constant 0 : index
    %664 = vector.load %arg4[%663, %c0_221] : memref<128x1xf32, #tpu.memory_space<vmem>>, vector<8x1xf32>
    %cst_222 = arith.constant 5.000000e-01 : f32
    %665 = vector.broadcast %cst_222 : f32 to vector<8x1xf32>
    %666 = arith.cmpf ogt, %664, %665 : vector<8x1xf32>
    %667 = vector.shape_cast %662 : vector<8x1xi1> to vector<8x1xi1>
    %668 = vector.broadcast %667 : vector<8x1xi1> to vector<8x128xi1>
    %669 = arith.select %668, %627, %558 : vector<8x128xi1>, vector<8x128xf32>
    %670 = vector.shape_cast %662 : vector<8x1xi1> to vector<8x1xi1>
    %671 = vector.broadcast %670 : vector<8x1xi1> to vector<8x128xi1>
    %672 = arith.select %671, %625, %561 : vector<8x128xi1>, vector<8x128xf32>
    %673 = vector.shape_cast %666 : vector<8x1xi1> to vector<8x1xi1>
    %674 = vector.broadcast %673 : vector<8x1xi1> to vector<8x128xi1>
    %675 = arith.select %674, %658, %564 : vector<8x128xi1>, vector<8x128xf32>
    %676 = vector.shape_cast %666 : vector<8x1xi1> to vector<8x1xi1>
    %677 = vector.broadcast %676 : vector<8x1xi1> to vector<8x128xi1>
    %678 = arith.select %677, %656, %567 : vector<8x128xi1>, vector<8x128xf32>
    %cst_223 = arith.constant 0.000000e+00 : f32
    %679 = vector.shape_cast %662 : vector<8x1xi1> to vector<8x1xi1>
    %680 = vector.broadcast %679 : vector<8x1xi1> to vector<8x128xi1>
    %681 = vector.broadcast %cst_223 : f32 to vector<8x128xf32>
    %682 = arith.select %680, %669, %681 : vector<8x128xi1>, vector<8x128xf32>
    %683 = arith.truncf %682 : vector<8x128xf32> to vector<8x128xbf16>
    %684 = arith.index_cast %584 : i32 to index
    %c0_224 = arith.constant 0 : index
    %685 = vector.load %arg11[%684, %c0_224] : memref<128x128xbf16, #tpu.memory_space<vmem>>, vector<8x128xbf16>
    tpu.vector_store %arg11[%684, %c0_224], %683 {strides = array<i32>} : memref<128x128xbf16, #tpu.memory_space<vmem>>, vector<8x128xbf16>,
    %cst_225 = arith.constant 0.000000e+00 : f32
    %686 = vector.shape_cast %666 : vector<8x1xi1> to vector<8x1xi1>
    %687 = vector.broadcast %686 : vector<8x1xi1> to vector<8x128xi1>
    %688 = vector.broadcast %cst_225 : f32 to vector<8x128xf32>
    %689 = arith.select %687, %675, %688 : vector<8x128xi1>, vector<8x128xf32>
    %690 = arith.truncf %689 : vector<8x128xf32> to vector<8x128xbf16>
    %691 = arith.index_cast %586 : i32 to index
    %c0_226 = arith.constant 0 : index
    %692 = vector.load %arg12[%691, %c0_226] : memref<128x128xbf16, #tpu.memory_space<vmem>>, vector<8x128xbf16>
    tpu.vector_store %arg12[%691, %c0_226], %690 {strides = array<i32>} : memref<128x128xbf16, #tpu.memory_space<vmem>>, vector<8x128xbf16>,
    %c6_i32 = arith.constant 6 : i32
    %c15_i32_227 = arith.constant 15 : i32
    %693 = arith.subi %c15_i32_227, %c6_i32 : i32
    %c8_i32_228 = arith.constant 8 : i32
    %694 = arith.muli %c6_i32, %c8_i32_228 : i32
    %695 = tpu.assume_multiple %694, 8 : i32
    %c8_i32_229 = arith.constant 8 : i32
    %696 = arith.muli %693, %c8_i32_229 : i32
    %697 = tpu.assume_multiple %696, 8 : i32
    %698 = arith.index_cast %695 : i32 to index
    %c0_230 = arith.constant 0 : index
    %699 = vector.load %arg13[%698, %c0_230] : memref<128x512xf32, #tpu.memory_space<vmem>>, vector<8x512xf32>
    %700 = arith.truncf %669 : vector<8x128xf32> to vector<8x128xbf16>
    %cst_231 = arith.constant dense<0.000000e+00> : vector<8x512xf32>
    %701 = tpu.matmul %700, %17, %cst_231 {dimension_numbers = #tpu.dot_dimension_numbers<[1], [0], [0], [1], [0, 0, 1, 1], [], []>} : vector<8x128xbf16>, vector<128x512xbf16>, vector<8x512xf32> -> vector<8x512xf32>
    %702 = arith.addf %699, %701 : vector<8x512xf32>
    %703 = arith.index_cast %697 : i32 to index
    %c0_232 = arith.constant 0 : index
    %704 = vector.load %arg14[%703, %c0_232] : memref<128x512xf32, #tpu.memory_space<vmem>>, vector<8x512xf32>
    %705 = arith.truncf %675 : vector<8x128xf32> to vector<8x128xbf16>
    %cst_233 = arith.constant dense<0.000000e+00> : vector<8x512xf32>
    %706 = tpu.matmul %705, %18, %cst_233 {dimension_numbers = #tpu.dot_dimension_numbers<[1], [0], [0], [1], [0, 0, 1, 1], [], []>} : vector<8x128xbf16>, vector<128x512xbf16>, vector<8x512xf32> -> vector<8x512xf32>
    %707 = arith.addf %704, %706 : vector<8x512xf32>
    %708 = vector.extract_strided_slice %702 {offsets = [0, 0], sizes = [8, 128], strides = [1, 1]} : vector<8x512xf32> to vector<8x128xf32>
    %cst_234 = arith.constant 5.000000e-01 : f32
    %709 = vector.broadcast %cst_234 : f32 to vector<8x128xf32>
    %710 = arith.mulf %709, %708 : vector<8x128xf32>
    %711 = math.tanh %710 : vector<8x128xf32>
    %cst_235 = arith.constant 5.000000e-01 : f32
    %712 = vector.broadcast %cst_235 : f32 to vector<8x128xf32>
    %713 = arith.mulf %712, %711 : vector<8x128xf32>
    %cst_236 = arith.constant 5.000000e-01 : f32
    %714 = vector.broadcast %cst_236 : f32 to vector<8x128xf32>
    %715 = arith.addf %713, %714 : vector<8x128xf32>
    %716 = vector.extract_strided_slice %702 {offsets = [0, 128], sizes = [8, 128], strides = [1, 1]} : vector<8x512xf32> to vector<8x128xf32>
    %cst_237 = arith.constant 5.000000e-01 : f32
    %717 = vector.broadcast %cst_237 : f32 to vector<8x128xf32>
    %718 = arith.mulf %717, %716 : vector<8x128xf32>
    %719 = math.tanh %718 : vector<8x128xf32>
    %cst_238 = arith.constant 5.000000e-01 : f32
    %720 = vector.broadcast %cst_238 : f32 to vector<8x128xf32>
    %721 = arith.mulf %720, %719 : vector<8x128xf32>
    %cst_239 = arith.constant 5.000000e-01 : f32
    %722 = vector.broadcast %cst_239 : f32 to vector<8x128xf32>
    %723 = arith.addf %721, %722 : vector<8x128xf32>
    %724 = vector.extract_strided_slice %702 {offsets = [0, 256], sizes = [8, 128], strides = [1, 1]} : vector<8x512xf32> to vector<8x128xf32>
    %725 = math.tanh %724 : vector<8x128xf32>
    %726 = vector.extract_strided_slice %702 {offsets = [0, 384], sizes = [8, 128], strides = [1, 1]} : vector<8x512xf32> to vector<8x128xf32>
    %cst_240 = arith.constant 5.000000e-01 : f32
    %727 = vector.broadcast %cst_240 : f32 to vector<8x128xf32>
    %728 = arith.mulf %727, %726 : vector<8x128xf32>
    %729 = math.tanh %728 : vector<8x128xf32>
    %cst_241 = arith.constant 5.000000e-01 : f32
    %730 = vector.broadcast %cst_241 : f32 to vector<8x128xf32>
    %731 = arith.mulf %730, %729 : vector<8x128xf32>
    %cst_242 = arith.constant 5.000000e-01 : f32
    %732 = vector.broadcast %cst_242 : f32 to vector<8x128xf32>
    %733 = arith.addf %731, %732 : vector<8x128xf32>
    %734 = arith.mulf %723, %672 : vector<8x128xf32>
    %735 = arith.mulf %715, %725 : vector<8x128xf32>
    %736 = arith.addf %734, %735 : vector<8x128xf32>
    %737 = math.tanh %736 : vector<8x128xf32>
    %738 = arith.mulf %733, %737 : vector<8x128xf32>
    %739 = vector.extract_strided_slice %707 {offsets = [0, 0], sizes = [8, 128], strides = [1, 1]} : vector<8x512xf32> to vector<8x128xf32>
    %cst_243 = arith.constant 5.000000e-01 : f32
    %740 = vector.broadcast %cst_243 : f32 to vector<8x128xf32>
    %741 = arith.mulf %740, %739 : vector<8x128xf32>
    %742 = math.tanh %741 : vector<8x128xf32>
    %cst_244 = arith.constant 5.000000e-01 : f32
    %743 = vector.broadcast %cst_244 : f32 to vector<8x128xf32>
    %744 = arith.mulf %743, %742 : vector<8x128xf32>
    %cst_245 = arith.constant 5.000000e-01 : f32
    %745 = vector.broadcast %cst_245 : f32 to vector<8x128xf32>
    %746 = arith.addf %744, %745 : vector<8x128xf32>
    %747 = vector.extract_strided_slice %707 {offsets = [0, 128], sizes = [8, 128], strides = [1, 1]} : vector<8x512xf32> to vector<8x128xf32>
    %cst_246 = arith.constant 5.000000e-01 : f32
    %748 = vector.broadcast %cst_246 : f32 to vector<8x128xf32>
    %749 = arith.mulf %748, %747 : vector<8x128xf32>
    %750 = math.tanh %749 : vector<8x128xf32>
    %cst_247 = arith.constant 5.000000e-01 : f32
    %751 = vector.broadcast %cst_247 : f32 to vector<8x128xf32>
    %752 = arith.mulf %751, %750 : vector<8x128xf32>
    %cst_248 = arith.constant 5.000000e-01 : f32
    %753 = vector.broadcast %cst_248 : f32 to vector<8x128xf32>
    %754 = arith.addf %752, %753 : vector<8x128xf32>
    %755 = vector.extract_strided_slice %707 {offsets = [0, 256], sizes = [8, 128], strides = [1, 1]} : vector<8x512xf32> to vector<8x128xf32>
    %756 = math.tanh %755 : vector<8x128xf32>
    %757 = vector.extract_strided_slice %707 {offsets = [0, 384], sizes = [8, 128], strides = [1, 1]} : vector<8x512xf32> to vector<8x128xf32>
    %cst_249 = arith.constant 5.000000e-01 : f32
    %758 = vector.broadcast %cst_249 : f32 to vector<8x128xf32>
    %759 = arith.mulf %758, %757 : vector<8x128xf32>
    %760 = math.tanh %759 : vector<8x128xf32>
    %cst_250 = arith.constant 5.000000e-01 : f32
    %761 = vector.broadcast %cst_250 : f32 to vector<8x128xf32>
    %762 = arith.mulf %761, %760 : vector<8x128xf32>
    %cst_251 = arith.constant 5.000000e-01 : f32
    %763 = vector.broadcast %cst_251 : f32 to vector<8x128xf32>
    %764 = arith.addf %762, %763 : vector<8x128xf32>
    %765 = arith.mulf %754, %678 : vector<8x128xf32>
    %766 = arith.mulf %746, %756 : vector<8x128xf32>
    %767 = arith.addf %765, %766 : vector<8x128xf32>
    %768 = math.tanh %767 : vector<8x128xf32>
    %769 = arith.mulf %764, %768 : vector<8x128xf32>
    %770 = arith.index_cast %695 : i32 to index
    %c0_252 = arith.constant 0 : index
    %771 = vector.load %arg3[%770, %c0_252] : memref<128x1xf32, #tpu.memory_space<vmem>>, vector<8x1xf32>
    %cst_253 = arith.constant 5.000000e-01 : f32
    %772 = vector.broadcast %cst_253 : f32 to vector<8x1xf32>
    %773 = arith.cmpf ogt, %771, %772 : vector<8x1xf32>
    %774 = arith.index_cast %697 : i32 to index
    %c0_254 = arith.constant 0 : index
    %775 = vector.load %arg4[%774, %c0_254] : memref<128x1xf32, #tpu.memory_space<vmem>>, vector<8x1xf32>
    %cst_255 = arith.constant 5.000000e-01 : f32
    %776 = vector.broadcast %cst_255 : f32 to vector<8x1xf32>
    %777 = arith.cmpf ogt, %775, %776 : vector<8x1xf32>
    %778 = vector.shape_cast %773 : vector<8x1xi1> to vector<8x1xi1>
    %779 = vector.broadcast %778 : vector<8x1xi1> to vector<8x128xi1>
    %780 = arith.select %779, %738, %669 : vector<8x128xi1>, vector<8x128xf32>
    %781 = vector.shape_cast %773 : vector<8x1xi1> to vector<8x1xi1>
    %782 = vector.broadcast %781 : vector<8x1xi1> to vector<8x128xi1>
    %783 = arith.select %782, %736, %672 : vector<8x128xi1>, vector<8x128xf32>
    %784 = vector.shape_cast %777 : vector<8x1xi1> to vector<8x1xi1>
    %785 = vector.broadcast %784 : vector<8x1xi1> to vector<8x128xi1>
    %786 = arith.select %785, %769, %675 : vector<8x128xi1>, vector<8x128xf32>
    %787 = vector.shape_cast %777 : vector<8x1xi1> to vector<8x1xi1>
    %788 = vector.broadcast %787 : vector<8x1xi1> to vector<8x128xi1>
    %789 = arith.select %788, %767, %678 : vector<8x128xi1>, vector<8x128xf32>
    %cst_256 = arith.constant 0.000000e+00 : f32
    %790 = vector.shape_cast %773 : vector<8x1xi1> to vector<8x1xi1>
    %791 = vector.broadcast %790 : vector<8x1xi1> to vector<8x128xi1>
    %792 = vector.broadcast %cst_256 : f32 to vector<8x128xf32>
    %793 = arith.select %791, %780, %792 : vector<8x128xi1>, vector<8x128xf32>
    %794 = arith.truncf %793 : vector<8x128xf32> to vector<8x128xbf16>
    %795 = arith.index_cast %695 : i32 to index
    %c0_257 = arith.constant 0 : index
    %796 = vector.load %arg11[%795, %c0_257] : memref<128x128xbf16, #tpu.memory_space<vmem>>, vector<8x128xbf16>
    tpu.vector_store %arg11[%795, %c0_257], %794 {strides = array<i32>} : memref<128x128xbf16, #tpu.memory_space<vmem>>, vector<8x128xbf16>,
    %cst_258 = arith.constant 0.000000e+00 : f32
    %797 = vector.shape_cast %777 : vector<8x1xi1> to vector<8x1xi1>
    %798 = vector.broadcast %797 : vector<8x1xi1> to vector<8x128xi1>
    %799 = vector.broadcast %cst_258 : f32 to vector<8x128xf32>
    %800 = arith.select %798, %786, %799 : vector<8x128xi1>, vector<8x128xf32>
    %801 = arith.truncf %800 : vector<8x128xf32> to vector<8x128xbf16>
    %802 = arith.index_cast %697 : i32 to index
    %c0_259 = arith.constant 0 : index
    %803 = vector.load %arg12[%802, %c0_259] : memref<128x128xbf16, #tpu.memory_space<vmem>>, vector<8x128xbf16>
    tpu.vector_store %arg12[%802, %c0_259], %801 {strides = array<i32>} : memref<128x128xbf16, #tpu.memory_space<vmem>>, vector<8x128xbf16>,
    %c7_i32 = arith.constant 7 : i32
    %c15_i32_260 = arith.constant 15 : i32
    %804 = arith.subi %c15_i32_260, %c7_i32 : i32
    %c8_i32_261 = arith.constant 8 : i32
    %805 = arith.muli %c7_i32, %c8_i32_261 : i32
    %806 = tpu.assume_multiple %805, 8 : i32
    %c8_i32_262 = arith.constant 8 : i32
    %807 = arith.muli %804, %c8_i32_262 : i32
    %808 = tpu.assume_multiple %807, 8 : i32
    %809 = arith.index_cast %806 : i32 to index
    %c0_263 = arith.constant 0 : index
    %810 = vector.load %arg13[%809, %c0_263] : memref<128x512xf32, #tpu.memory_space<vmem>>, vector<8x512xf32>
    %811 = arith.truncf %780 : vector<8x128xf32> to vector<8x128xbf16>
    %cst_264 = arith.constant dense<0.000000e+00> : vector<8x512xf32>
    %812 = tpu.matmul %811, %17, %cst_264 {dimension_numbers = #tpu.dot_dimension_numbers<[1], [0], [0], [1], [0, 0, 1, 1], [], []>} : vector<8x128xbf16>, vector<128x512xbf16>, vector<8x512xf32> -> vector<8x512xf32>
    %813 = arith.addf %810, %812 : vector<8x512xf32>
    %814 = arith.index_cast %808 : i32 to index
    %c0_265 = arith.constant 0 : index
    %815 = vector.load %arg14[%814, %c0_265] : memref<128x512xf32, #tpu.memory_space<vmem>>, vector<8x512xf32>
    %816 = arith.truncf %786 : vector<8x128xf32> to vector<8x128xbf16>
    %cst_266 = arith.constant dense<0.000000e+00> : vector<8x512xf32>
    %817 = tpu.matmul %816, %18, %cst_266 {dimension_numbers = #tpu.dot_dimension_numbers<[1], [0], [0], [1], [0, 0, 1, 1], [], []>} : vector<8x128xbf16>, vector<128x512xbf16>, vector<8x512xf32> -> vector<8x512xf32>
    %818 = arith.addf %815, %817 : vector<8x512xf32>
    %819 = vector.extract_strided_slice %813 {offsets = [0, 0], sizes = [8, 128], strides = [1, 1]} : vector<8x512xf32> to vector<8x128xf32>
    %cst_267 = arith.constant 5.000000e-01 : f32
    %820 = vector.broadcast %cst_267 : f32 to vector<8x128xf32>
    %821 = arith.mulf %820, %819 : vector<8x128xf32>
    %822 = math.tanh %821 : vector<8x128xf32>
    %cst_268 = arith.constant 5.000000e-01 : f32
    %823 = vector.broadcast %cst_268 : f32 to vector<8x128xf32>
    %824 = arith.mulf %823, %822 : vector<8x128xf32>
    %cst_269 = arith.constant 5.000000e-01 : f32
    %825 = vector.broadcast %cst_269 : f32 to vector<8x128xf32>
    %826 = arith.addf %824, %825 : vector<8x128xf32>
    %827 = vector.extract_strided_slice %813 {offsets = [0, 128], sizes = [8, 128], strides = [1, 1]} : vector<8x512xf32> to vector<8x128xf32>
    %cst_270 = arith.constant 5.000000e-01 : f32
    %828 = vector.broadcast %cst_270 : f32 to vector<8x128xf32>
    %829 = arith.mulf %828, %827 : vector<8x128xf32>
    %830 = math.tanh %829 : vector<8x128xf32>
    %cst_271 = arith.constant 5.000000e-01 : f32
    %831 = vector.broadcast %cst_271 : f32 to vector<8x128xf32>
    %832 = arith.mulf %831, %830 : vector<8x128xf32>
    %cst_272 = arith.constant 5.000000e-01 : f32
    %833 = vector.broadcast %cst_272 : f32 to vector<8x128xf32>
    %834 = arith.addf %832, %833 : vector<8x128xf32>
    %835 = vector.extract_strided_slice %813 {offsets = [0, 256], sizes = [8, 128], strides = [1, 1]} : vector<8x512xf32> to vector<8x128xf32>
    %836 = math.tanh %835 : vector<8x128xf32>
    %837 = vector.extract_strided_slice %813 {offsets = [0, 384], sizes = [8, 128], strides = [1, 1]} : vector<8x512xf32> to vector<8x128xf32>
    %cst_273 = arith.constant 5.000000e-01 : f32
    %838 = vector.broadcast %cst_273 : f32 to vector<8x128xf32>
    %839 = arith.mulf %838, %837 : vector<8x128xf32>
    %840 = math.tanh %839 : vector<8x128xf32>
    %cst_274 = arith.constant 5.000000e-01 : f32
    %841 = vector.broadcast %cst_274 : f32 to vector<8x128xf32>
    %842 = arith.mulf %841, %840 : vector<8x128xf32>
    %cst_275 = arith.constant 5.000000e-01 : f32
    %843 = vector.broadcast %cst_275 : f32 to vector<8x128xf32>
    %844 = arith.addf %842, %843 : vector<8x128xf32>
    %845 = arith.mulf %834, %783 : vector<8x128xf32>
    %846 = arith.mulf %826, %836 : vector<8x128xf32>
    %847 = arith.addf %845, %846 : vector<8x128xf32>
    %848 = math.tanh %847 : vector<8x128xf32>
    %849 = arith.mulf %844, %848 : vector<8x128xf32>
    %850 = vector.extract_strided_slice %818 {offsets = [0, 0], sizes = [8, 128], strides = [1, 1]} : vector<8x512xf32> to vector<8x128xf32>
    %cst_276 = arith.constant 5.000000e-01 : f32
    %851 = vector.broadcast %cst_276 : f32 to vector<8x128xf32>
    %852 = arith.mulf %851, %850 : vector<8x128xf32>
    %853 = math.tanh %852 : vector<8x128xf32>
    %cst_277 = arith.constant 5.000000e-01 : f32
    %854 = vector.broadcast %cst_277 : f32 to vector<8x128xf32>
    %855 = arith.mulf %854, %853 : vector<8x128xf32>
    %cst_278 = arith.constant 5.000000e-01 : f32
    %856 = vector.broadcast %cst_278 : f32 to vector<8x128xf32>
    %857 = arith.addf %855, %856 : vector<8x128xf32>
    %858 = vector.extract_strided_slice %818 {offsets = [0, 128], sizes = [8, 128], strides = [1, 1]} : vector<8x512xf32> to vector<8x128xf32>
    %cst_279 = arith.constant 5.000000e-01 : f32
    %859 = vector.broadcast %cst_279 : f32 to vector<8x128xf32>
    %860 = arith.mulf %859, %858 : vector<8x128xf32>
    %861 = math.tanh %860 : vector<8x128xf32>
    %cst_280 = arith.constant 5.000000e-01 : f32
    %862 = vector.broadcast %cst_280 : f32 to vector<8x128xf32>
    %863 = arith.mulf %862, %861 : vector<8x128xf32>
    %cst_281 = arith.constant 5.000000e-01 : f32
    %864 = vector.broadcast %cst_281 : f32 to vector<8x128xf32>
    %865 = arith.addf %863, %864 : vector<8x128xf32>
    %866 = vector.extract_strided_slice %818 {offsets = [0, 256], sizes = [8, 128], strides = [1, 1]} : vector<8x512xf32> to vector<8x128xf32>
    %867 = math.tanh %866 : vector<8x128xf32>
    %868 = vector.extract_strided_slice %818 {offsets = [0, 384], sizes = [8, 128], strides = [1, 1]} : vector<8x512xf32> to vector<8x128xf32>
    %cst_282 = arith.constant 5.000000e-01 : f32
    %869 = vector.broadcast %cst_282 : f32 to vector<8x128xf32>
    %870 = arith.mulf %869, %868 : vector<8x128xf32>
    %871 = math.tanh %870 : vector<8x128xf32>
    %cst_283 = arith.constant 5.000000e-01 : f32
    %872 = vector.broadcast %cst_283 : f32 to vector<8x128xf32>
    %873 = arith.mulf %872, %871 : vector<8x128xf32>
    %cst_284 = arith.constant 5.000000e-01 : f32
    %874 = vector.broadcast %cst_284 : f32 to vector<8x128xf32>
    %875 = arith.addf %873, %874 : vector<8x128xf32>
    %876 = arith.mulf %865, %789 : vector<8x128xf32>
    %877 = arith.mulf %857, %867 : vector<8x128xf32>
    %878 = arith.addf %876, %877 : vector<8x128xf32>
    %879 = math.tanh %878 : vector<8x128xf32>
    %880 = arith.mulf %875, %879 : vector<8x128xf32>
    %881 = arith.index_cast %806 : i32 to index
    %c0_285 = arith.constant 0 : index
    %882 = vector.load %arg3[%881, %c0_285] : memref<128x1xf32, #tpu.memory_space<vmem>>, vector<8x1xf32>
    %cst_286 = arith.constant 5.000000e-01 : f32
    %883 = vector.broadcast %cst_286 : f32 to vector<8x1xf32>
    %884 = arith.cmpf ogt, %882, %883 : vector<8x1xf32>
    %885 = arith.index_cast %808 : i32 to index
    %c0_287 = arith.constant 0 : index
    %886 = vector.load %arg4[%885, %c0_287] : memref<128x1xf32, #tpu.memory_space<vmem>>, vector<8x1xf32>
    %cst_288 = arith.constant 5.000000e-01 : f32
    %887 = vector.broadcast %cst_288 : f32 to vector<8x1xf32>
    %888 = arith.cmpf ogt, %886, %887 : vector<8x1xf32>
    %889 = vector.shape_cast %884 : vector<8x1xi1> to vector<8x1xi1>
    %890 = vector.broadcast %889 : vector<8x1xi1> to vector<8x128xi1>
    %891 = arith.select %890, %849, %780 : vector<8x128xi1>, vector<8x128xf32>
    %892 = vector.shape_cast %884 : vector<8x1xi1> to vector<8x1xi1>
    %893 = vector.broadcast %892 : vector<8x1xi1> to vector<8x128xi1>
    %894 = arith.select %893, %847, %783 : vector<8x128xi1>, vector<8x128xf32>
    %895 = vector.shape_cast %888 : vector<8x1xi1> to vector<8x1xi1>
    %896 = vector.broadcast %895 : vector<8x1xi1> to vector<8x128xi1>
    %897 = arith.select %896, %880, %786 : vector<8x128xi1>, vector<8x128xf32>
    %898 = vector.shape_cast %888 : vector<8x1xi1> to vector<8x1xi1>
    %899 = vector.broadcast %898 : vector<8x1xi1> to vector<8x128xi1>
    %900 = arith.select %899, %878, %789 : vector<8x128xi1>, vector<8x128xf32>
    %cst_289 = arith.constant 0.000000e+00 : f32
    %901 = vector.shape_cast %884 : vector<8x1xi1> to vector<8x1xi1>
    %902 = vector.broadcast %901 : vector<8x1xi1> to vector<8x128xi1>
    %903 = vector.broadcast %cst_289 : f32 to vector<8x128xf32>
    %904 = arith.select %902, %891, %903 : vector<8x128xi1>, vector<8x128xf32>
    %905 = arith.truncf %904 : vector<8x128xf32> to vector<8x128xbf16>
    %906 = arith.index_cast %806 : i32 to index
    %c0_290 = arith.constant 0 : index
    %907 = vector.load %arg11[%906, %c0_290] : memref<128x128xbf16, #tpu.memory_space<vmem>>, vector<8x128xbf16>
    tpu.vector_store %arg11[%906, %c0_290], %905 {strides = array<i32>} : memref<128x128xbf16, #tpu.memory_space<vmem>>, vector<8x128xbf16>,
    %cst_291 = arith.constant 0.000000e+00 : f32
    %908 = vector.shape_cast %888 : vector<8x1xi1> to vector<8x1xi1>
    %909 = vector.broadcast %908 : vector<8x1xi1> to vector<8x128xi1>
    %910 = vector.broadcast %cst_291 : f32 to vector<8x128xf32>
    %911 = arith.select %909, %897, %910 : vector<8x128xi1>, vector<8x128xf32>
    %912 = arith.truncf %911 : vector<8x128xf32> to vector<8x128xbf16>
    %913 = arith.index_cast %808 : i32 to index
    %c0_292 = arith.constant 0 : index
    %914 = vector.load %arg12[%913, %c0_292] : memref<128x128xbf16, #tpu.memory_space<vmem>>, vector<8x128xbf16>
    tpu.vector_store %arg12[%913, %c0_292], %912 {strides = array<i32>} : memref<128x128xbf16, #tpu.memory_space<vmem>>, vector<8x128xbf16>,
    %c8_i32_293 = arith.constant 8 : i32
    %c15_i32_294 = arith.constant 15 : i32
    %915 = arith.subi %c15_i32_294, %c8_i32_293 : i32
    %c8_i32_295 = arith.constant 8 : i32
    %916 = arith.muli %c8_i32_293, %c8_i32_295 : i32
    %917 = tpu.assume_multiple %916, 8 : i32
    %c8_i32_296 = arith.constant 8 : i32
    %918 = arith.muli %915, %c8_i32_296 : i32
    %919 = tpu.assume_multiple %918, 8 : i32
    %920 = arith.index_cast %917 : i32 to index
    %c0_297 = arith.constant 0 : index
    %921 = vector.load %arg13[%920, %c0_297] : memref<128x512xf32, #tpu.memory_space<vmem>>, vector<8x512xf32>
    %922 = arith.truncf %891 : vector<8x128xf32> to vector<8x128xbf16>
    %cst_298 = arith.constant dense<0.000000e+00> : vector<8x512xf32>
    %923 = tpu.matmul %922, %17, %cst_298 {dimension_numbers = #tpu.dot_dimension_numbers<[1], [0], [0], [1], [0, 0, 1, 1], [], []>} : vector<8x128xbf16>, vector<128x512xbf16>, vector<8x512xf32> -> vector<8x512xf32>
    %924 = arith.addf %921, %923 : vector<8x512xf32>
    %925 = arith.index_cast %919 : i32 to index
    %c0_299 = arith.constant 0 : index
    %926 = vector.load %arg14[%925, %c0_299] : memref<128x512xf32, #tpu.memory_space<vmem>>, vector<8x512xf32>
    %927 = arith.truncf %897 : vector<8x128xf32> to vector<8x128xbf16>
    %cst_300 = arith.constant dense<0.000000e+00> : vector<8x512xf32>
    %928 = tpu.matmul %927, %18, %cst_300 {dimension_numbers = #tpu.dot_dimension_numbers<[1], [0], [0], [1], [0, 0, 1, 1], [], []>} : vector<8x128xbf16>, vector<128x512xbf16>, vector<8x512xf32> -> vector<8x512xf32>
    %929 = arith.addf %926, %928 : vector<8x512xf32>
    %930 = vector.extract_strided_slice %924 {offsets = [0, 0], sizes = [8, 128], strides = [1, 1]} : vector<8x512xf32> to vector<8x128xf32>
    %cst_301 = arith.constant 5.000000e-01 : f32
    %931 = vector.broadcast %cst_301 : f32 to vector<8x128xf32>
    %932 = arith.mulf %931, %930 : vector<8x128xf32>
    %933 = math.tanh %932 : vector<8x128xf32>
    %cst_302 = arith.constant 5.000000e-01 : f32
    %934 = vector.broadcast %cst_302 : f32 to vector<8x128xf32>
    %935 = arith.mulf %934, %933 : vector<8x128xf32>
    %cst_303 = arith.constant 5.000000e-01 : f32
    %936 = vector.broadcast %cst_303 : f32 to vector<8x128xf32>
    %937 = arith.addf %935, %936 : vector<8x128xf32>
    %938 = vector.extract_strided_slice %924 {offsets = [0, 128], sizes = [8, 128], strides = [1, 1]} : vector<8x512xf32> to vector<8x128xf32>
    %cst_304 = arith.constant 5.000000e-01 : f32
    %939 = vector.broadcast %cst_304 : f32 to vector<8x128xf32>
    %940 = arith.mulf %939, %938 : vector<8x128xf32>
    %941 = math.tanh %940 : vector<8x128xf32>
    %cst_305 = arith.constant 5.000000e-01 : f32
    %942 = vector.broadcast %cst_305 : f32 to vector<8x128xf32>
    %943 = arith.mulf %942, %941 : vector<8x128xf32>
    %cst_306 = arith.constant 5.000000e-01 : f32
    %944 = vector.broadcast %cst_306 : f32 to vector<8x128xf32>
    %945 = arith.addf %943, %944 : vector<8x128xf32>
    %946 = vector.extract_strided_slice %924 {offsets = [0, 256], sizes = [8, 128], strides = [1, 1]} : vector<8x512xf32> to vector<8x128xf32>
    %947 = math.tanh %946 : vector<8x128xf32>
    %948 = vector.extract_strided_slice %924 {offsets = [0, 384], sizes = [8, 128], strides = [1, 1]} : vector<8x512xf32> to vector<8x128xf32>
    %cst_307 = arith.constant 5.000000e-01 : f32
    %949 = vector.broadcast %cst_307 : f32 to vector<8x128xf32>
    %950 = arith.mulf %949, %948 : vector<8x128xf32>
    %951 = math.tanh %950 : vector<8x128xf32>
    %cst_308 = arith.constant 5.000000e-01 : f32
    %952 = vector.broadcast %cst_308 : f32 to vector<8x128xf32>
    %953 = arith.mulf %952, %951 : vector<8x128xf32>
    %cst_309 = arith.constant 5.000000e-01 : f32
    %954 = vector.broadcast %cst_309 : f32 to vector<8x128xf32>
    %955 = arith.addf %953, %954 : vector<8x128xf32>
    %956 = arith.mulf %945, %894 : vector<8x128xf32>
    %957 = arith.mulf %937, %947 : vector<8x128xf32>
    %958 = arith.addf %956, %957 : vector<8x128xf32>
    %959 = math.tanh %958 : vector<8x128xf32>
    %960 = arith.mulf %955, %959 : vector<8x128xf32>
    %961 = vector.extract_strided_slice %929 {offsets = [0, 0], sizes = [8, 128], strides = [1, 1]} : vector<8x512xf32> to vector<8x128xf32>
    %cst_310 = arith.constant 5.000000e-01 : f32
    %962 = vector.broadcast %cst_310 : f32 to vector<8x128xf32>
    %963 = arith.mulf %962, %961 : vector<8x128xf32>
    %964 = math.tanh %963 : vector<8x128xf32>
    %cst_311 = arith.constant 5.000000e-01 : f32
    %965 = vector.broadcast %cst_311 : f32 to vector<8x128xf32>
    %966 = arith.mulf %965, %964 : vector<8x128xf32>
    %cst_312 = arith.constant 5.000000e-01 : f32
    %967 = vector.broadcast %cst_312 : f32 to vector<8x128xf32>
    %968 = arith.addf %966, %967 : vector<8x128xf32>
    %969 = vector.extract_strided_slice %929 {offsets = [0, 128], sizes = [8, 128], strides = [1, 1]} : vector<8x512xf32> to vector<8x128xf32>
    %cst_313 = arith.constant 5.000000e-01 : f32
    %970 = vector.broadcast %cst_313 : f32 to vector<8x128xf32>
    %971 = arith.mulf %970, %969 : vector<8x128xf32>
    %972 = math.tanh %971 : vector<8x128xf32>
    %cst_314 = arith.constant 5.000000e-01 : f32
    %973 = vector.broadcast %cst_314 : f32 to vector<8x128xf32>
    %974 = arith.mulf %973, %972 : vector<8x128xf32>
    %cst_315 = arith.constant 5.000000e-01 : f32
    %975 = vector.broadcast %cst_315 : f32 to vector<8x128xf32>
    %976 = arith.addf %974, %975 : vector<8x128xf32>
    %977 = vector.extract_strided_slice %929 {offsets = [0, 256], sizes = [8, 128], strides = [1, 1]} : vector<8x512xf32> to vector<8x128xf32>
    %978 = math.tanh %977 : vector<8x128xf32>
    %979 = vector.extract_strided_slice %929 {offsets = [0, 384], sizes = [8, 128], strides = [1, 1]} : vector<8x512xf32> to vector<8x128xf32>
    %cst_316 = arith.constant 5.000000e-01 : f32
    %980 = vector.broadcast %cst_316 : f32 to vector<8x128xf32>
    %981 = arith.mulf %980, %979 : vector<8x128xf32>
    %982 = math.tanh %981 : vector<8x128xf32>
    %cst_317 = arith.constant 5.000000e-01 : f32
    %983 = vector.broadcast %cst_317 : f32 to vector<8x128xf32>
    %984 = arith.mulf %983, %982 : vector<8x128xf32>
    %cst_318 = arith.constant 5.000000e-01 : f32
    %985 = vector.broadcast %cst_318 : f32 to vector<8x128xf32>
    %986 = arith.addf %984, %985 : vector<8x128xf32>
    %987 = arith.mulf %976, %900 : vector<8x128xf32>
    %988 = arith.mulf %968, %978 : vector<8x128xf32>
    %989 = arith.addf %987, %988 : vector<8x128xf32>
    %990 = math.tanh %989 : vector<8x128xf32>
    %991 = arith.mulf %986, %990 : vector<8x128xf32>
    %992 = arith.index_cast %917 : i32 to index
    %c0_319 = arith.constant 0 : index
    %993 = vector.load %arg3[%992, %c0_319] : memref<128x1xf32, #tpu.memory_space<vmem>>, vector<8x1xf32>
    %cst_320 = arith.constant 5.000000e-01 : f32
    %994 = vector.broadcast %cst_320 : f32 to vector<8x1xf32>
    %995 = arith.cmpf ogt, %993, %994 : vector<8x1xf32>
    %996 = arith.index_cast %919 : i32 to index
    %c0_321 = arith.constant 0 : index
    %997 = vector.load %arg4[%996, %c0_321] : memref<128x1xf32, #tpu.memory_space<vmem>>, vector<8x1xf32>
    %cst_322 = arith.constant 5.000000e-01 : f32
    %998 = vector.broadcast %cst_322 : f32 to vector<8x1xf32>
    %999 = arith.cmpf ogt, %997, %998 : vector<8x1xf32>
    %1000 = vector.shape_cast %995 : vector<8x1xi1> to vector<8x1xi1>
    %1001 = vector.broadcast %1000 : vector<8x1xi1> to vector<8x128xi1>
    %1002 = arith.select %1001, %960, %891 : vector<8x128xi1>, vector<8x128xf32>
    %1003 = vector.shape_cast %995 : vector<8x1xi1> to vector<8x1xi1>
    %1004 = vector.broadcast %1003 : vector<8x1xi1> to vector<8x128xi1>
    %1005 = arith.select %1004, %958, %894 : vector<8x128xi1>, vector<8x128xf32>
    %1006 = vector.shape_cast %999 : vector<8x1xi1> to vector<8x1xi1>
    %1007 = vector.broadcast %1006 : vector<8x1xi1> to vector<8x128xi1>
    %1008 = arith.select %1007, %991, %897 : vector<8x128xi1>, vector<8x128xf32>
    %1009 = vector.shape_cast %999 : vector<8x1xi1> to vector<8x1xi1>
    %1010 = vector.broadcast %1009 : vector<8x1xi1> to vector<8x128xi1>
    %1011 = arith.select %1010, %989, %900 : vector<8x128xi1>, vector<8x128xf32>
    %cst_323 = arith.constant 0.000000e+00 : f32
    %1012 = vector.shape_cast %995 : vector<8x1xi1> to vector<8x1xi1>
    %1013 = vector.broadcast %1012 : vector<8x1xi1> to vector<8x128xi1>
    %1014 = vector.broadcast %cst_323 : f32 to vector<8x128xf32>
    %1015 = arith.select %1013, %1002, %1014 : vector<8x128xi1>, vector<8x128xf32>
    %1016 = arith.truncf %1015 : vector<8x128xf32> to vector<8x128xbf16>
    %1017 = arith.index_cast %917 : i32 to index
    %c0_324 = arith.constant 0 : index
    %1018 = vector.load %arg11[%1017, %c0_324] : memref<128x128xbf16, #tpu.memory_space<vmem>>, vector<8x128xbf16>
    tpu.vector_store %arg11[%1017, %c0_324], %1016 {strides = array<i32>} : memref<128x128xbf16, #tpu.memory_space<vmem>>, vector<8x128xbf16>,
    %cst_325 = arith.constant 0.000000e+00 : f32
    %1019 = vector.shape_cast %999 : vector<8x1xi1> to vector<8x1xi1>
    %1020 = vector.broadcast %1019 : vector<8x1xi1> to vector<8x128xi1>
    %1021 = vector.broadcast %cst_325 : f32 to vector<8x128xf32>
    %1022 = arith.select %1020, %1008, %1021 : vector<8x128xi1>, vector<8x128xf32>
    %1023 = arith.truncf %1022 : vector<8x128xf32> to vector<8x128xbf16>
    %1024 = arith.index_cast %919 : i32 to index
    %c0_326 = arith.constant 0 : index
    %1025 = vector.load %arg12[%1024, %c0_326] : memref<128x128xbf16, #tpu.memory_space<vmem>>, vector<8x128xbf16>
    tpu.vector_store %arg12[%1024, %c0_326], %1023 {strides = array<i32>} : memref<128x128xbf16, #tpu.memory_space<vmem>>, vector<8x128xbf16>,
    %c9_i32 = arith.constant 9 : i32
    %c15_i32_327 = arith.constant 15 : i32
    %1026 = arith.subi %c15_i32_327, %c9_i32 : i32
    %c8_i32_328 = arith.constant 8 : i32
    %1027 = arith.muli %c9_i32, %c8_i32_328 : i32
    %1028 = tpu.assume_multiple %1027, 8 : i32
    %c8_i32_329 = arith.constant 8 : i32
    %1029 = arith.muli %1026, %c8_i32_329 : i32
    %1030 = tpu.assume_multiple %1029, 8 : i32
    %1031 = arith.index_cast %1028 : i32 to index
    %c0_330 = arith.constant 0 : index
    %1032 = vector.load %arg13[%1031, %c0_330] : memref<128x512xf32, #tpu.memory_space<vmem>>, vector<8x512xf32>
    %1033 = arith.truncf %1002 : vector<8x128xf32> to vector<8x128xbf16>
    %cst_331 = arith.constant dense<0.000000e+00> : vector<8x512xf32>
    %1034 = tpu.matmul %1033, %17, %cst_331 {dimension_numbers = #tpu.dot_dimension_numbers<[1], [0], [0], [1], [0, 0, 1, 1], [], []>} : vector<8x128xbf16>, vector<128x512xbf16>, vector<8x512xf32> -> vector<8x512xf32>
    %1035 = arith.addf %1032, %1034 : vector<8x512xf32>
    %1036 = arith.index_cast %1030 : i32 to index
    %c0_332 = arith.constant 0 : index
    %1037 = vector.load %arg14[%1036, %c0_332] : memref<128x512xf32, #tpu.memory_space<vmem>>, vector<8x512xf32>
    %1038 = arith.truncf %1008 : vector<8x128xf32> to vector<8x128xbf16>
    %cst_333 = arith.constant dense<0.000000e+00> : vector<8x512xf32>
    %1039 = tpu.matmul %1038, %18, %cst_333 {dimension_numbers = #tpu.dot_dimension_numbers<[1], [0], [0], [1], [0, 0, 1, 1], [], []>} : vector<8x128xbf16>, vector<128x512xbf16>, vector<8x512xf32> -> vector<8x512xf32>
    %1040 = arith.addf %1037, %1039 : vector<8x512xf32>
    %1041 = vector.extract_strided_slice %1035 {offsets = [0, 0], sizes = [8, 128], strides = [1, 1]} : vector<8x512xf32> to vector<8x128xf32>
    %cst_334 = arith.constant 5.000000e-01 : f32
    %1042 = vector.broadcast %cst_334 : f32 to vector<8x128xf32>
    %1043 = arith.mulf %1042, %1041 : vector<8x128xf32>
    %1044 = math.tanh %1043 : vector<8x128xf32>
    %cst_335 = arith.constant 5.000000e-01 : f32
    %1045 = vector.broadcast %cst_335 : f32 to vector<8x128xf32>
    %1046 = arith.mulf %1045, %1044 : vector<8x128xf32>
    %cst_336 = arith.constant 5.000000e-01 : f32
    %1047 = vector.broadcast %cst_336 : f32 to vector<8x128xf32>
    %1048 = arith.addf %1046, %1047 : vector<8x128xf32>
    %1049 = vector.extract_strided_slice %1035 {offsets = [0, 128], sizes = [8, 128], strides = [1, 1]} : vector<8x512xf32> to vector<8x128xf32>
    %cst_337 = arith.constant 5.000000e-01 : f32
    %1050 = vector.broadcast %cst_337 : f32 to vector<8x128xf32>
    %1051 = arith.mulf %1050, %1049 : vector<8x128xf32>
    %1052 = math.tanh %1051 : vector<8x128xf32>
    %cst_338 = arith.constant 5.000000e-01 : f32
    %1053 = vector.broadcast %cst_338 : f32 to vector<8x128xf32>
    %1054 = arith.mulf %1053, %1052 : vector<8x128xf32>
    %cst_339 = arith.constant 5.000000e-01 : f32
    %1055 = vector.broadcast %cst_339 : f32 to vector<8x128xf32>
    %1056 = arith.addf %1054, %1055 : vector<8x128xf32>
    %1057 = vector.extract_strided_slice %1035 {offsets = [0, 256], sizes = [8, 128], strides = [1, 1]} : vector<8x512xf32> to vector<8x128xf32>
    %1058 = math.tanh %1057 : vector<8x128xf32>
    %1059 = vector.extract_strided_slice %1035 {offsets = [0, 384], sizes = [8, 128], strides = [1, 1]} : vector<8x512xf32> to vector<8x128xf32>
    %cst_340 = arith.constant 5.000000e-01 : f32
    %1060 = vector.broadcast %cst_340 : f32 to vector<8x128xf32>
    %1061 = arith.mulf %1060, %1059 : vector<8x128xf32>
    %1062 = math.tanh %1061 : vector<8x128xf32>
    %cst_341 = arith.constant 5.000000e-01 : f32
    %1063 = vector.broadcast %cst_341 : f32 to vector<8x128xf32>
    %1064 = arith.mulf %1063, %1062 : vector<8x128xf32>
    %cst_342 = arith.constant 5.000000e-01 : f32
    %1065 = vector.broadcast %cst_342 : f32 to vector<8x128xf32>
    %1066 = arith.addf %1064, %1065 : vector<8x128xf32>
    %1067 = arith.mulf %1056, %1005 : vector<8x128xf32>
    %1068 = arith.mulf %1048, %1058 : vector<8x128xf32>
    %1069 = arith.addf %1067, %1068 : vector<8x128xf32>
    %1070 = math.tanh %1069 : vector<8x128xf32>
    %1071 = arith.mulf %1066, %1070 : vector<8x128xf32>
    %1072 = vector.extract_strided_slice %1040 {offsets = [0, 0], sizes = [8, 128], strides = [1, 1]} : vector<8x512xf32> to vector<8x128xf32>
    %cst_343 = arith.constant 5.000000e-01 : f32
    %1073 = vector.broadcast %cst_343 : f32 to vector<8x128xf32>
    %1074 = arith.mulf %1073, %1072 : vector<8x128xf32>
    %1075 = math.tanh %1074 : vector<8x128xf32>
    %cst_344 = arith.constant 5.000000e-01 : f32
    %1076 = vector.broadcast %cst_344 : f32 to vector<8x128xf32>
    %1077 = arith.mulf %1076, %1075 : vector<8x128xf32>
    %cst_345 = arith.constant 5.000000e-01 : f32
    %1078 = vector.broadcast %cst_345 : f32 to vector<8x128xf32>
    %1079 = arith.addf %1077, %1078 : vector<8x128xf32>
    %1080 = vector.extract_strided_slice %1040 {offsets = [0, 128], sizes = [8, 128], strides = [1, 1]} : vector<8x512xf32> to vector<8x128xf32>
    %cst_346 = arith.constant 5.000000e-01 : f32
    %1081 = vector.broadcast %cst_346 : f32 to vector<8x128xf32>
    %1082 = arith.mulf %1081, %1080 : vector<8x128xf32>
    %1083 = math.tanh %1082 : vector<8x128xf32>
    %cst_347 = arith.constant 5.000000e-01 : f32
    %1084 = vector.broadcast %cst_347 : f32 to vector<8x128xf32>
    %1085 = arith.mulf %1084, %1083 : vector<8x128xf32>
    %cst_348 = arith.constant 5.000000e-01 : f32
    %1086 = vector.broadcast %cst_348 : f32 to vector<8x128xf32>
    %1087 = arith.addf %1085, %1086 : vector<8x128xf32>
    %1088 = vector.extract_strided_slice %1040 {offsets = [0, 256], sizes = [8, 128], strides = [1, 1]} : vector<8x512xf32> to vector<8x128xf32>
    %1089 = math.tanh %1088 : vector<8x128xf32>
    %1090 = vector.extract_strided_slice %1040 {offsets = [0, 384], sizes = [8, 128], strides = [1, 1]} : vector<8x512xf32> to vector<8x128xf32>
    %cst_349 = arith.constant 5.000000e-01 : f32
    %1091 = vector.broadcast %cst_349 : f32 to vector<8x128xf32>
    %1092 = arith.mulf %1091, %1090 : vector<8x128xf32>
    %1093 = math.tanh %1092 : vector<8x128xf32>
    %cst_350 = arith.constant 5.000000e-01 : f32
    %1094 = vector.broadcast %cst_350 : f32 to vector<8x128xf32>
    %1095 = arith.mulf %1094, %1093 : vector<8x128xf32>
    %cst_351 = arith.constant 5.000000e-01 : f32
    %1096 = vector.broadcast %cst_351 : f32 to vector<8x128xf32>
    %1097 = arith.addf %1095, %1096 : vector<8x128xf32>
    %1098 = arith.mulf %1087, %1011 : vector<8x128xf32>
    %1099 = arith.mulf %1079, %1089 : vector<8x128xf32>
    %1100 = arith.addf %1098, %1099 : vector<8x128xf32>
    %1101 = math.tanh %1100 : vector<8x128xf32>
    %1102 = arith.mulf %1097, %1101 : vector<8x128xf32>
    %1103 = arith.index_cast %1028 : i32 to index
    %c0_352 = arith.constant 0 : index
    %1104 = vector.load %arg3[%1103, %c0_352] : memref<128x1xf32, #tpu.memory_space<vmem>>, vector<8x1xf32>
    %cst_353 = arith.constant 5.000000e-01 : f32
    %1105 = vector.broadcast %cst_353 : f32 to vector<8x1xf32>
    %1106 = arith.cmpf ogt, %1104, %1105 : vector<8x1xf32>
    %1107 = arith.index_cast %1030 : i32 to index
    %c0_354 = arith.constant 0 : index
    %1108 = vector.load %arg4[%1107, %c0_354] : memref<128x1xf32, #tpu.memory_space<vmem>>, vector<8x1xf32>
    %cst_355 = arith.constant 5.000000e-01 : f32
    %1109 = vector.broadcast %cst_355 : f32 to vector<8x1xf32>
    %1110 = arith.cmpf ogt, %1108, %1109 : vector<8x1xf32>
    %1111 = vector.shape_cast %1106 : vector<8x1xi1> to vector<8x1xi1>
    %1112 = vector.broadcast %1111 : vector<8x1xi1> to vector<8x128xi1>
    %1113 = arith.select %1112, %1071, %1002 : vector<8x128xi1>, vector<8x128xf32>
    %1114 = vector.shape_cast %1106 : vector<8x1xi1> to vector<8x1xi1>
    %1115 = vector.broadcast %1114 : vector<8x1xi1> to vector<8x128xi1>
    %1116 = arith.select %1115, %1069, %1005 : vector<8x128xi1>, vector<8x128xf32>
    %1117 = vector.shape_cast %1110 : vector<8x1xi1> to vector<8x1xi1>
    %1118 = vector.broadcast %1117 : vector<8x1xi1> to vector<8x128xi1>
    %1119 = arith.select %1118, %1102, %1008 : vector<8x128xi1>, vector<8x128xf32>
    %1120 = vector.shape_cast %1110 : vector<8x1xi1> to vector<8x1xi1>
    %1121 = vector.broadcast %1120 : vector<8x1xi1> to vector<8x128xi1>
    %1122 = arith.select %1121, %1100, %1011 : vector<8x128xi1>, vector<8x128xf32>
    %cst_356 = arith.constant 0.000000e+00 : f32
    %1123 = vector.shape_cast %1106 : vector<8x1xi1> to vector<8x1xi1>
    %1124 = vector.broadcast %1123 : vector<8x1xi1> to vector<8x128xi1>
    %1125 = vector.broadcast %cst_356 : f32 to vector<8x128xf32>
    %1126 = arith.select %1124, %1113, %1125 : vector<8x128xi1>, vector<8x128xf32>
    %1127 = arith.truncf %1126 : vector<8x128xf32> to vector<8x128xbf16>
    %1128 = arith.index_cast %1028 : i32 to index
    %c0_357 = arith.constant 0 : index
    %1129 = vector.load %arg11[%1128, %c0_357] : memref<128x128xbf16, #tpu.memory_space<vmem>>, vector<8x128xbf16>
    tpu.vector_store %arg11[%1128, %c0_357], %1127 {strides = array<i32>} : memref<128x128xbf16, #tpu.memory_space<vmem>>, vector<8x128xbf16>,
    %cst_358 = arith.constant 0.000000e+00 : f32
    %1130 = vector.shape_cast %1110 : vector<8x1xi1> to vector<8x1xi1>
    %1131 = vector.broadcast %1130 : vector<8x1xi1> to vector<8x128xi1>
    %1132 = vector.broadcast %cst_358 : f32 to vector<8x128xf32>
    %1133 = arith.select %1131, %1119, %1132 : vector<8x128xi1>, vector<8x128xf32>
    %1134 = arith.truncf %1133 : vector<8x128xf32> to vector<8x128xbf16>
    %1135 = arith.index_cast %1030 : i32 to index
    %c0_359 = arith.constant 0 : index
    %1136 = vector.load %arg12[%1135, %c0_359] : memref<128x128xbf16, #tpu.memory_space<vmem>>, vector<8x128xbf16>
    tpu.vector_store %arg12[%1135, %c0_359], %1134 {strides = array<i32>} : memref<128x128xbf16, #tpu.memory_space<vmem>>, vector<8x128xbf16>,
    %c10_i32 = arith.constant 10 : i32
    %c15_i32_360 = arith.constant 15 : i32
    %1137 = arith.subi %c15_i32_360, %c10_i32 : i32
    %c8_i32_361 = arith.constant 8 : i32
    %1138 = arith.muli %c10_i32, %c8_i32_361 : i32
    %1139 = tpu.assume_multiple %1138, 8 : i32
    %c8_i32_362 = arith.constant 8 : i32
    %1140 = arith.muli %1137, %c8_i32_362 : i32
    %1141 = tpu.assume_multiple %1140, 8 : i32
    %1142 = arith.index_cast %1139 : i32 to index
    %c0_363 = arith.constant 0 : index
    %1143 = vector.load %arg13[%1142, %c0_363] : memref<128x512xf32, #tpu.memory_space<vmem>>, vector<8x512xf32>
    %1144 = arith.truncf %1113 : vector<8x128xf32> to vector<8x128xbf16>
    %cst_364 = arith.constant dense<0.000000e+00> : vector<8x512xf32>
    %1145 = tpu.matmul %1144, %17, %cst_364 {dimension_numbers = #tpu.dot_dimension_numbers<[1], [0], [0], [1], [0, 0, 1, 1], [], []>} : vector<8x128xbf16>, vector<128x512xbf16>, vector<8x512xf32> -> vector<8x512xf32>
    %1146 = arith.addf %1143, %1145 : vector<8x512xf32>
    %1147 = arith.index_cast %1141 : i32 to index
    %c0_365 = arith.constant 0 : index
    %1148 = vector.load %arg14[%1147, %c0_365] : memref<128x512xf32, #tpu.memory_space<vmem>>, vector<8x512xf32>
    %1149 = arith.truncf %1119 : vector<8x128xf32> to vector<8x128xbf16>
    %cst_366 = arith.constant dense<0.000000e+00> : vector<8x512xf32>
    %1150 = tpu.matmul %1149, %18, %cst_366 {dimension_numbers = #tpu.dot_dimension_numbers<[1], [0], [0], [1], [0, 0, 1, 1], [], []>} : vector<8x128xbf16>, vector<128x512xbf16>, vector<8x512xf32> -> vector<8x512xf32>
    %1151 = arith.addf %1148, %1150 : vector<8x512xf32>
    %1152 = vector.extract_strided_slice %1146 {offsets = [0, 0], sizes = [8, 128], strides = [1, 1]} : vector<8x512xf32> to vector<8x128xf32>
    %cst_367 = arith.constant 5.000000e-01 : f32
    %1153 = vector.broadcast %cst_367 : f32 to vector<8x128xf32>
    %1154 = arith.mulf %1153, %1152 : vector<8x128xf32>
    %1155 = math.tanh %1154 : vector<8x128xf32>
    %cst_368 = arith.constant 5.000000e-01 : f32
    %1156 = vector.broadcast %cst_368 : f32 to vector<8x128xf32>
    %1157 = arith.mulf %1156, %1155 : vector<8x128xf32>
    %cst_369 = arith.constant 5.000000e-01 : f32
    %1158 = vector.broadcast %cst_369 : f32 to vector<8x128xf32>
    %1159 = arith.addf %1157, %1158 : vector<8x128xf32>
    %1160 = vector.extract_strided_slice %1146 {offsets = [0, 128], sizes = [8, 128], strides = [1, 1]} : vector<8x512xf32> to vector<8x128xf32>
    %cst_370 = arith.constant 5.000000e-01 : f32
    %1161 = vector.broadcast %cst_370 : f32 to vector<8x128xf32>
    %1162 = arith.mulf %1161, %1160 : vector<8x128xf32>
    %1163 = math.tanh %1162 : vector<8x128xf32>
    %cst_371 = arith.constant 5.000000e-01 : f32
    %1164 = vector.broadcast %cst_371 : f32 to vector<8x128xf32>
    %1165 = arith.mulf %1164, %1163 : vector<8x128xf32>
    %cst_372 = arith.constant 5.000000e-01 : f32
    %1166 = vector.broadcast %cst_372 : f32 to vector<8x128xf32>
    %1167 = arith.addf %1165, %1166 : vector<8x128xf32>
    %1168 = vector.extract_strided_slice %1146 {offsets = [0, 256], sizes = [8, 128], strides = [1, 1]} : vector<8x512xf32> to vector<8x128xf32>
    %1169 = math.tanh %1168 : vector<8x128xf32>
    %1170 = vector.extract_strided_slice %1146 {offsets = [0, 384], sizes = [8, 128], strides = [1, 1]} : vector<8x512xf32> to vector<8x128xf32>
    %cst_373 = arith.constant 5.000000e-01 : f32
    %1171 = vector.broadcast %cst_373 : f32 to vector<8x128xf32>
    %1172 = arith.mulf %1171, %1170 : vector<8x128xf32>
    %1173 = math.tanh %1172 : vector<8x128xf32>
    %cst_374 = arith.constant 5.000000e-01 : f32
    %1174 = vector.broadcast %cst_374 : f32 to vector<8x128xf32>
    %1175 = arith.mulf %1174, %1173 : vector<8x128xf32>
    %cst_375 = arith.constant 5.000000e-01 : f32
    %1176 = vector.broadcast %cst_375 : f32 to vector<8x128xf32>
    %1177 = arith.addf %1175, %1176 : vector<8x128xf32>
    %1178 = arith.mulf %1167, %1116 : vector<8x128xf32>
    %1179 = arith.mulf %1159, %1169 : vector<8x128xf32>
    %1180 = arith.addf %1178, %1179 : vector<8x128xf32>
    %1181 = math.tanh %1180 : vector<8x128xf32>
    %1182 = arith.mulf %1177, %1181 : vector<8x128xf32>
    %1183 = vector.extract_strided_slice %1151 {offsets = [0, 0], sizes = [8, 128], strides = [1, 1]} : vector<8x512xf32> to vector<8x128xf32>
    %cst_376 = arith.constant 5.000000e-01 : f32
    %1184 = vector.broadcast %cst_376 : f32 to vector<8x128xf32>
    %1185 = arith.mulf %1184, %1183 : vector<8x128xf32>
    %1186 = math.tanh %1185 : vector<8x128xf32>
    %cst_377 = arith.constant 5.000000e-01 : f32
    %1187 = vector.broadcast %cst_377 : f32 to vector<8x128xf32>
    %1188 = arith.mulf %1187, %1186 : vector<8x128xf32>
    %cst_378 = arith.constant 5.000000e-01 : f32
    %1189 = vector.broadcast %cst_378 : f32 to vector<8x128xf32>
    %1190 = arith.addf %1188, %1189 : vector<8x128xf32>
    %1191 = vector.extract_strided_slice %1151 {offsets = [0, 128], sizes = [8, 128], strides = [1, 1]} : vector<8x512xf32> to vector<8x128xf32>
    %cst_379 = arith.constant 5.000000e-01 : f32
    %1192 = vector.broadcast %cst_379 : f32 to vector<8x128xf32>
    %1193 = arith.mulf %1192, %1191 : vector<8x128xf32>
    %1194 = math.tanh %1193 : vector<8x128xf32>
    %cst_380 = arith.constant 5.000000e-01 : f32
    %1195 = vector.broadcast %cst_380 : f32 to vector<8x128xf32>
    %1196 = arith.mulf %1195, %1194 : vector<8x128xf32>
    %cst_381 = arith.constant 5.000000e-01 : f32
    %1197 = vector.broadcast %cst_381 : f32 to vector<8x128xf32>
    %1198 = arith.addf %1196, %1197 : vector<8x128xf32>
    %1199 = vector.extract_strided_slice %1151 {offsets = [0, 256], sizes = [8, 128], strides = [1, 1]} : vector<8x512xf32> to vector<8x128xf32>
    %1200 = math.tanh %1199 : vector<8x128xf32>
    %1201 = vector.extract_strided_slice %1151 {offsets = [0, 384], sizes = [8, 128], strides = [1, 1]} : vector<8x512xf32> to vector<8x128xf32>
    %cst_382 = arith.constant 5.000000e-01 : f32
    %1202 = vector.broadcast %cst_382 : f32 to vector<8x128xf32>
    %1203 = arith.mulf %1202, %1201 : vector<8x128xf32>
    %1204 = math.tanh %1203 : vector<8x128xf32>
    %cst_383 = arith.constant 5.000000e-01 : f32
    %1205 = vector.broadcast %cst_383 : f32 to vector<8x128xf32>
    %1206 = arith.mulf %1205, %1204 : vector<8x128xf32>
    %cst_384 = arith.constant 5.000000e-01 : f32
    %1207 = vector.broadcast %cst_384 : f32 to vector<8x128xf32>
    %1208 = arith.addf %1206, %1207 : vector<8x128xf32>
    %1209 = arith.mulf %1198, %1122 : vector<8x128xf32>
    %1210 = arith.mulf %1190, %1200 : vector<8x128xf32>
    %1211 = arith.addf %1209, %1210 : vector<8x128xf32>
    %1212 = math.tanh %1211 : vector<8x128xf32>
    %1213 = arith.mulf %1208, %1212 : vector<8x128xf32>
    %1214 = arith.index_cast %1139 : i32 to index
    %c0_385 = arith.constant 0 : index
    %1215 = vector.load %arg3[%1214, %c0_385] : memref<128x1xf32, #tpu.memory_space<vmem>>, vector<8x1xf32>
    %cst_386 = arith.constant 5.000000e-01 : f32
    %1216 = vector.broadcast %cst_386 : f32 to vector<8x1xf32>
    %1217 = arith.cmpf ogt, %1215, %1216 : vector<8x1xf32>
    %1218 = arith.index_cast %1141 : i32 to index
    %c0_387 = arith.constant 0 : index
    %1219 = vector.load %arg4[%1218, %c0_387] : memref<128x1xf32, #tpu.memory_space<vmem>>, vector<8x1xf32>
    %cst_388 = arith.constant 5.000000e-01 : f32
    %1220 = vector.broadcast %cst_388 : f32 to vector<8x1xf32>
    %1221 = arith.cmpf ogt, %1219, %1220 : vector<8x1xf32>
    %1222 = vector.shape_cast %1217 : vector<8x1xi1> to vector<8x1xi1>
    %1223 = vector.broadcast %1222 : vector<8x1xi1> to vector<8x128xi1>
    %1224 = arith.select %1223, %1182, %1113 : vector<8x128xi1>, vector<8x128xf32>
    %1225 = vector.shape_cast %1217 : vector<8x1xi1> to vector<8x1xi1>
    %1226 = vector.broadcast %1225 : vector<8x1xi1> to vector<8x128xi1>
    %1227 = arith.select %1226, %1180, %1116 : vector<8x128xi1>, vector<8x128xf32>
    %1228 = vector.shape_cast %1221 : vector<8x1xi1> to vector<8x1xi1>
    %1229 = vector.broadcast %1228 : vector<8x1xi1> to vector<8x128xi1>
    %1230 = arith.select %1229, %1213, %1119 : vector<8x128xi1>, vector<8x128xf32>
    %1231 = vector.shape_cast %1221 : vector<8x1xi1> to vector<8x1xi1>
    %1232 = vector.broadcast %1231 : vector<8x1xi1> to vector<8x128xi1>
    %1233 = arith.select %1232, %1211, %1122 : vector<8x128xi1>, vector<8x128xf32>
    %cst_389 = arith.constant 0.000000e+00 : f32
    %1234 = vector.shape_cast %1217 : vector<8x1xi1> to vector<8x1xi1>
    %1235 = vector.broadcast %1234 : vector<8x1xi1> to vector<8x128xi1>
    %1236 = vector.broadcast %cst_389 : f32 to vector<8x128xf32>
    %1237 = arith.select %1235, %1224, %1236 : vector<8x128xi1>, vector<8x128xf32>
    %1238 = arith.truncf %1237 : vector<8x128xf32> to vector<8x128xbf16>
    %1239 = arith.index_cast %1139 : i32 to index
    %c0_390 = arith.constant 0 : index
    %1240 = vector.load %arg11[%1239, %c0_390] : memref<128x128xbf16, #tpu.memory_space<vmem>>, vector<8x128xbf16>
    tpu.vector_store %arg11[%1239, %c0_390], %1238 {strides = array<i32>} : memref<128x128xbf16, #tpu.memory_space<vmem>>, vector<8x128xbf16>,
    %cst_391 = arith.constant 0.000000e+00 : f32
    %1241 = vector.shape_cast %1221 : vector<8x1xi1> to vector<8x1xi1>
    %1242 = vector.broadcast %1241 : vector<8x1xi1> to vector<8x128xi1>
    %1243 = vector.broadcast %cst_391 : f32 to vector<8x128xf32>
    %1244 = arith.select %1242, %1230, %1243 : vector<8x128xi1>, vector<8x128xf32>
    %1245 = arith.truncf %1244 : vector<8x128xf32> to vector<8x128xbf16>
    %1246 = arith.index_cast %1141 : i32 to index
    %c0_392 = arith.constant 0 : index
    %1247 = vector.load %arg12[%1246, %c0_392] : memref<128x128xbf16, #tpu.memory_space<vmem>>, vector<8x128xbf16>
    tpu.vector_store %arg12[%1246, %c0_392], %1245 {strides = array<i32>} : memref<128x128xbf16, #tpu.memory_space<vmem>>, vector<8x128xbf16>,
    %c11_i32 = arith.constant 11 : i32
    %c15_i32_393 = arith.constant 15 : i32
    %1248 = arith.subi %c15_i32_393, %c11_i32 : i32
    %c8_i32_394 = arith.constant 8 : i32
    %1249 = arith.muli %c11_i32, %c8_i32_394 : i32
    %1250 = tpu.assume_multiple %1249, 8 : i32
    %c8_i32_395 = arith.constant 8 : i32
    %1251 = arith.muli %1248, %c8_i32_395 : i32
    %1252 = tpu.assume_multiple %1251, 8 : i32
    %1253 = arith.index_cast %1250 : i32 to index
    %c0_396 = arith.constant 0 : index
    %1254 = vector.load %arg13[%1253, %c0_396] : memref<128x512xf32, #tpu.memory_space<vmem>>, vector<8x512xf32>
    %1255 = arith.truncf %1224 : vector<8x128xf32> to vector<8x128xbf16>
    %cst_397 = arith.constant dense<0.000000e+00> : vector<8x512xf32>
    %1256 = tpu.matmul %1255, %17, %cst_397 {dimension_numbers = #tpu.dot_dimension_numbers<[1], [0], [0], [1], [0, 0, 1, 1], [], []>} : vector<8x128xbf16>, vector<128x512xbf16>, vector<8x512xf32> -> vector<8x512xf32>
    %1257 = arith.addf %1254, %1256 : vector<8x512xf32>
    %1258 = arith.index_cast %1252 : i32 to index
    %c0_398 = arith.constant 0 : index
    %1259 = vector.load %arg14[%1258, %c0_398] : memref<128x512xf32, #tpu.memory_space<vmem>>, vector<8x512xf32>
    %1260 = arith.truncf %1230 : vector<8x128xf32> to vector<8x128xbf16>
    %cst_399 = arith.constant dense<0.000000e+00> : vector<8x512xf32>
    %1261 = tpu.matmul %1260, %18, %cst_399 {dimension_numbers = #tpu.dot_dimension_numbers<[1], [0], [0], [1], [0, 0, 1, 1], [], []>} : vector<8x128xbf16>, vector<128x512xbf16>, vector<8x512xf32> -> vector<8x512xf32>
    %1262 = arith.addf %1259, %1261 : vector<8x512xf32>
    %1263 = vector.extract_strided_slice %1257 {offsets = [0, 0], sizes = [8, 128], strides = [1, 1]} : vector<8x512xf32> to vector<8x128xf32>
    %cst_400 = arith.constant 5.000000e-01 : f32
    %1264 = vector.broadcast %cst_400 : f32 to vector<8x128xf32>
    %1265 = arith.mulf %1264, %1263 : vector<8x128xf32>
    %1266 = math.tanh %1265 : vector<8x128xf32>
    %cst_401 = arith.constant 5.000000e-01 : f32
    %1267 = vector.broadcast %cst_401 : f32 to vector<8x128xf32>
    %1268 = arith.mulf %1267, %1266 : vector<8x128xf32>
    %cst_402 = arith.constant 5.000000e-01 : f32
    %1269 = vector.broadcast %cst_402 : f32 to vector<8x128xf32>
    %1270 = arith.addf %1268, %1269 : vector<8x128xf32>
    %1271 = vector.extract_strided_slice %1257 {offsets = [0, 128], sizes = [8, 128], strides = [1, 1]} : vector<8x512xf32> to vector<8x128xf32>
    %cst_403 = arith.constant 5.000000e-01 : f32
    %1272 = vector.broadcast %cst_403 : f32 to vector<8x128xf32>
    %1273 = arith.mulf %1272, %1271 : vector<8x128xf32>
    %1274 = math.tanh %1273 : vector<8x128xf32>
    %cst_404 = arith.constant 5.000000e-01 : f32
    %1275 = vector.broadcast %cst_404 : f32 to vector<8x128xf32>
    %1276 = arith.mulf %1275, %1274 : vector<8x128xf32>
    %cst_405 = arith.constant 5.000000e-01 : f32
    %1277 = vector.broadcast %cst_405 : f32 to vector<8x128xf32>
    %1278 = arith.addf %1276, %1277 : vector<8x128xf32>
    %1279 = vector.extract_strided_slice %1257 {offsets = [0, 256], sizes = [8, 128], strides = [1, 1]} : vector<8x512xf32> to vector<8x128xf32>
    %1280 = math.tanh %1279 : vector<8x128xf32>
    %1281 = vector.extract_strided_slice %1257 {offsets = [0, 384], sizes = [8, 128], strides = [1, 1]} : vector<8x512xf32> to vector<8x128xf32>
    %cst_406 = arith.constant 5.000000e-01 : f32
    %1282 = vector.broadcast %cst_406 : f32 to vector<8x128xf32>
    %1283 = arith.mulf %1282, %1281 : vector<8x128xf32>
    %1284 = math.tanh %1283 : vector<8x128xf32>
    %cst_407 = arith.constant 5.000000e-01 : f32
    %1285 = vector.broadcast %cst_407 : f32 to vector<8x128xf32>
    %1286 = arith.mulf %1285, %1284 : vector<8x128xf32>
    %cst_408 = arith.constant 5.000000e-01 : f32
    %1287 = vector.broadcast %cst_408 : f32 to vector<8x128xf32>
    %1288 = arith.addf %1286, %1287 : vector<8x128xf32>
    %1289 = arith.mulf %1278, %1227 : vector<8x128xf32>
    %1290 = arith.mulf %1270, %1280 : vector<8x128xf32>
    %1291 = arith.addf %1289, %1290 : vector<8x128xf32>
    %1292 = math.tanh %1291 : vector<8x128xf32>
    %1293 = arith.mulf %1288, %1292 : vector<8x128xf32>
    %1294 = vector.extract_strided_slice %1262 {offsets = [0, 0], sizes = [8, 128], strides = [1, 1]} : vector<8x512xf32> to vector<8x128xf32>
    %cst_409 = arith.constant 5.000000e-01 : f32
    %1295 = vector.broadcast %cst_409 : f32 to vector<8x128xf32>
    %1296 = arith.mulf %1295, %1294 : vector<8x128xf32>
    %1297 = math.tanh %1296 : vector<8x128xf32>
    %cst_410 = arith.constant 5.000000e-01 : f32
    %1298 = vector.broadcast %cst_410 : f32 to vector<8x128xf32>
    %1299 = arith.mulf %1298, %1297 : vector<8x128xf32>
    %cst_411 = arith.constant 5.000000e-01 : f32
    %1300 = vector.broadcast %cst_411 : f32 to vector<8x128xf32>
    %1301 = arith.addf %1299, %1300 : vector<8x128xf32>
    %1302 = vector.extract_strided_slice %1262 {offsets = [0, 128], sizes = [8, 128], strides = [1, 1]} : vector<8x512xf32> to vector<8x128xf32>
    %cst_412 = arith.constant 5.000000e-01 : f32
    %1303 = vector.broadcast %cst_412 : f32 to vector<8x128xf32>
    %1304 = arith.mulf %1303, %1302 : vector<8x128xf32>
    %1305 = math.tanh %1304 : vector<8x128xf32>
    %cst_413 = arith.constant 5.000000e-01 : f32
    %1306 = vector.broadcast %cst_413 : f32 to vector<8x128xf32>
    %1307 = arith.mulf %1306, %1305 : vector<8x128xf32>
    %cst_414 = arith.constant 5.000000e-01 : f32
    %1308 = vector.broadcast %cst_414 : f32 to vector<8x128xf32>
    %1309 = arith.addf %1307, %1308 : vector<8x128xf32>
    %1310 = vector.extract_strided_slice %1262 {offsets = [0, 256], sizes = [8, 128], strides = [1, 1]} : vector<8x512xf32> to vector<8x128xf32>
    %1311 = math.tanh %1310 : vector<8x128xf32>
    %1312 = vector.extract_strided_slice %1262 {offsets = [0, 384], sizes = [8, 128], strides = [1, 1]} : vector<8x512xf32> to vector<8x128xf32>
    %cst_415 = arith.constant 5.000000e-01 : f32
    %1313 = vector.broadcast %cst_415 : f32 to vector<8x128xf32>
    %1314 = arith.mulf %1313, %1312 : vector<8x128xf32>
    %1315 = math.tanh %1314 : vector<8x128xf32>
    %cst_416 = arith.constant 5.000000e-01 : f32
    %1316 = vector.broadcast %cst_416 : f32 to vector<8x128xf32>
    %1317 = arith.mulf %1316, %1315 : vector<8x128xf32>
    %cst_417 = arith.constant 5.000000e-01 : f32
    %1318 = vector.broadcast %cst_417 : f32 to vector<8x128xf32>
    %1319 = arith.addf %1317, %1318 : vector<8x128xf32>
    %1320 = arith.mulf %1309, %1233 : vector<8x128xf32>
    %1321 = arith.mulf %1301, %1311 : vector<8x128xf32>
    %1322 = arith.addf %1320, %1321 : vector<8x128xf32>
    %1323 = math.tanh %1322 : vector<8x128xf32>
    %1324 = arith.mulf %1319, %1323 : vector<8x128xf32>
    %1325 = arith.index_cast %1250 : i32 to index
    %c0_418 = arith.constant 0 : index
    %1326 = vector.load %arg3[%1325, %c0_418] : memref<128x1xf32, #tpu.memory_space<vmem>>, vector<8x1xf32>
    %cst_419 = arith.constant 5.000000e-01 : f32
    %1327 = vector.broadcast %cst_419 : f32 to vector<8x1xf32>
    %1328 = arith.cmpf ogt, %1326, %1327 : vector<8x1xf32>
    %1329 = arith.index_cast %1252 : i32 to index
    %c0_420 = arith.constant 0 : index
    %1330 = vector.load %arg4[%1329, %c0_420] : memref<128x1xf32, #tpu.memory_space<vmem>>, vector<8x1xf32>
    %cst_421 = arith.constant 5.000000e-01 : f32
    %1331 = vector.broadcast %cst_421 : f32 to vector<8x1xf32>
    %1332 = arith.cmpf ogt, %1330, %1331 : vector<8x1xf32>
    %1333 = vector.shape_cast %1328 : vector<8x1xi1> to vector<8x1xi1>
    %1334 = vector.broadcast %1333 : vector<8x1xi1> to vector<8x128xi1>
    %1335 = arith.select %1334, %1293, %1224 : vector<8x128xi1>, vector<8x128xf32>
    %1336 = vector.shape_cast %1328 : vector<8x1xi1> to vector<8x1xi1>
    %1337 = vector.broadcast %1336 : vector<8x1xi1> to vector<8x128xi1>
    %1338 = arith.select %1337, %1291, %1227 : vector<8x128xi1>, vector<8x128xf32>
    %1339 = vector.shape_cast %1332 : vector<8x1xi1> to vector<8x1xi1>
    %1340 = vector.broadcast %1339 : vector<8x1xi1> to vector<8x128xi1>
    %1341 = arith.select %1340, %1324, %1230 : vector<8x128xi1>, vector<8x128xf32>
    %1342 = vector.shape_cast %1332 : vector<8x1xi1> to vector<8x1xi1>
    %1343 = vector.broadcast %1342 : vector<8x1xi1> to vector<8x128xi1>
    %1344 = arith.select %1343, %1322, %1233 : vector<8x128xi1>, vector<8x128xf32>
    %cst_422 = arith.constant 0.000000e+00 : f32
    %1345 = vector.shape_cast %1328 : vector<8x1xi1> to vector<8x1xi1>
    %1346 = vector.broadcast %1345 : vector<8x1xi1> to vector<8x128xi1>
    %1347 = vector.broadcast %cst_422 : f32 to vector<8x128xf32>
    %1348 = arith.select %1346, %1335, %1347 : vector<8x128xi1>, vector<8x128xf32>
    %1349 = arith.truncf %1348 : vector<8x128xf32> to vector<8x128xbf16>
    %1350 = arith.index_cast %1250 : i32 to index
    %c0_423 = arith.constant 0 : index
    %1351 = vector.load %arg11[%1350, %c0_423] : memref<128x128xbf16, #tpu.memory_space<vmem>>, vector<8x128xbf16>
    tpu.vector_store %arg11[%1350, %c0_423], %1349 {strides = array<i32>} : memref<128x128xbf16, #tpu.memory_space<vmem>>, vector<8x128xbf16>,
    %cst_424 = arith.constant 0.000000e+00 : f32
    %1352 = vector.shape_cast %1332 : vector<8x1xi1> to vector<8x1xi1>
    %1353 = vector.broadcast %1352 : vector<8x1xi1> to vector<8x128xi1>
    %1354 = vector.broadcast %cst_424 : f32 to vector<8x128xf32>
    %1355 = arith.select %1353, %1341, %1354 : vector<8x128xi1>, vector<8x128xf32>
    %1356 = arith.truncf %1355 : vector<8x128xf32> to vector<8x128xbf16>
    %1357 = arith.index_cast %1252 : i32 to index
    %c0_425 = arith.constant 0 : index
    %1358 = vector.load %arg12[%1357, %c0_425] : memref<128x128xbf16, #tpu.memory_space<vmem>>, vector<8x128xbf16>
    tpu.vector_store %arg12[%1357, %c0_425], %1356 {strides = array<i32>} : memref<128x128xbf16, #tpu.memory_space<vmem>>, vector<8x128xbf16>,
    %c12_i32 = arith.constant 12 : i32
    %c15_i32_426 = arith.constant 15 : i32
    %1359 = arith.subi %c15_i32_426, %c12_i32 : i32
    %c8_i32_427 = arith.constant 8 : i32
    %1360 = arith.muli %c12_i32, %c8_i32_427 : i32
    %1361 = tpu.assume_multiple %1360, 8 : i32
    %c8_i32_428 = arith.constant 8 : i32
    %1362 = arith.muli %1359, %c8_i32_428 : i32
    %1363 = tpu.assume_multiple %1362, 8 : i32
    %1364 = arith.index_cast %1361 : i32 to index
    %c0_429 = arith.constant 0 : index
    %1365 = vector.load %arg13[%1364, %c0_429] : memref<128x512xf32, #tpu.memory_space<vmem>>, vector<8x512xf32>
    %1366 = arith.truncf %1335 : vector<8x128xf32> to vector<8x128xbf16>
    %cst_430 = arith.constant dense<0.000000e+00> : vector<8x512xf32>
    %1367 = tpu.matmul %1366, %17, %cst_430 {dimension_numbers = #tpu.dot_dimension_numbers<[1], [0], [0], [1], [0, 0, 1, 1], [], []>} : vector<8x128xbf16>, vector<128x512xbf16>, vector<8x512xf32> -> vector<8x512xf32>
    %1368 = arith.addf %1365, %1367 : vector<8x512xf32>
    %1369 = arith.index_cast %1363 : i32 to index
    %c0_431 = arith.constant 0 : index
    %1370 = vector.load %arg14[%1369, %c0_431] : memref<128x512xf32, #tpu.memory_space<vmem>>, vector<8x512xf32>
    %1371 = arith.truncf %1341 : vector<8x128xf32> to vector<8x128xbf16>
    %cst_432 = arith.constant dense<0.000000e+00> : vector<8x512xf32>
    %1372 = tpu.matmul %1371, %18, %cst_432 {dimension_numbers = #tpu.dot_dimension_numbers<[1], [0], [0], [1], [0, 0, 1, 1], [], []>} : vector<8x128xbf16>, vector<128x512xbf16>, vector<8x512xf32> -> vector<8x512xf32>
    %1373 = arith.addf %1370, %1372 : vector<8x512xf32>
    %1374 = vector.extract_strided_slice %1368 {offsets = [0, 0], sizes = [8, 128], strides = [1, 1]} : vector<8x512xf32> to vector<8x128xf32>
    %cst_433 = arith.constant 5.000000e-01 : f32
    %1375 = vector.broadcast %cst_433 : f32 to vector<8x128xf32>
    %1376 = arith.mulf %1375, %1374 : vector<8x128xf32>
    %1377 = math.tanh %1376 : vector<8x128xf32>
    %cst_434 = arith.constant 5.000000e-01 : f32
    %1378 = vector.broadcast %cst_434 : f32 to vector<8x128xf32>
    %1379 = arith.mulf %1378, %1377 : vector<8x128xf32>
    %cst_435 = arith.constant 5.000000e-01 : f32
    %1380 = vector.broadcast %cst_435 : f32 to vector<8x128xf32>
    %1381 = arith.addf %1379, %1380 : vector<8x128xf32>
    %1382 = vector.extract_strided_slice %1368 {offsets = [0, 128], sizes = [8, 128], strides = [1, 1]} : vector<8x512xf32> to vector<8x128xf32>
    %cst_436 = arith.constant 5.000000e-01 : f32
    %1383 = vector.broadcast %cst_436 : f32 to vector<8x128xf32>
    %1384 = arith.mulf %1383, %1382 : vector<8x128xf32>
    %1385 = math.tanh %1384 : vector<8x128xf32>
    %cst_437 = arith.constant 5.000000e-01 : f32
    %1386 = vector.broadcast %cst_437 : f32 to vector<8x128xf32>
    %1387 = arith.mulf %1386, %1385 : vector<8x128xf32>
    %cst_438 = arith.constant 5.000000e-01 : f32
    %1388 = vector.broadcast %cst_438 : f32 to vector<8x128xf32>
    %1389 = arith.addf %1387, %1388 : vector<8x128xf32>
    %1390 = vector.extract_strided_slice %1368 {offsets = [0, 256], sizes = [8, 128], strides = [1, 1]} : vector<8x512xf32> to vector<8x128xf32>
    %1391 = math.tanh %1390 : vector<8x128xf32>
    %1392 = vector.extract_strided_slice %1368 {offsets = [0, 384], sizes = [8, 128], strides = [1, 1]} : vector<8x512xf32> to vector<8x128xf32>
    %cst_439 = arith.constant 5.000000e-01 : f32
    %1393 = vector.broadcast %cst_439 : f32 to vector<8x128xf32>
    %1394 = arith.mulf %1393, %1392 : vector<8x128xf32>
    %1395 = math.tanh %1394 : vector<8x128xf32>
    %cst_440 = arith.constant 5.000000e-01 : f32
    %1396 = vector.broadcast %cst_440 : f32 to vector<8x128xf32>
    %1397 = arith.mulf %1396, %1395 : vector<8x128xf32>
    %cst_441 = arith.constant 5.000000e-01 : f32
    %1398 = vector.broadcast %cst_441 : f32 to vector<8x128xf32>
    %1399 = arith.addf %1397, %1398 : vector<8x128xf32>
    %1400 = arith.mulf %1389, %1338 : vector<8x128xf32>
    %1401 = arith.mulf %1381, %1391 : vector<8x128xf32>
    %1402 = arith.addf %1400, %1401 : vector<8x128xf32>
    %1403 = math.tanh %1402 : vector<8x128xf32>
    %1404 = arith.mulf %1399, %1403 : vector<8x128xf32>
    %1405 = vector.extract_strided_slice %1373 {offsets = [0, 0], sizes = [8, 128], strides = [1, 1]} : vector<8x512xf32> to vector<8x128xf32>
    %cst_442 = arith.constant 5.000000e-01 : f32
    %1406 = vector.broadcast %cst_442 : f32 to vector<8x128xf32>
    %1407 = arith.mulf %1406, %1405 : vector<8x128xf32>
    %1408 = math.tanh %1407 : vector<8x128xf32>
    %cst_443 = arith.constant 5.000000e-01 : f32
    %1409 = vector.broadcast %cst_443 : f32 to vector<8x128xf32>
    %1410 = arith.mulf %1409, %1408 : vector<8x128xf32>
    %cst_444 = arith.constant 5.000000e-01 : f32
    %1411 = vector.broadcast %cst_444 : f32 to vector<8x128xf32>
    %1412 = arith.addf %1410, %1411 : vector<8x128xf32>
    %1413 = vector.extract_strided_slice %1373 {offsets = [0, 128], sizes = [8, 128], strides = [1, 1]} : vector<8x512xf32> to vector<8x128xf32>
    %cst_445 = arith.constant 5.000000e-01 : f32
    %1414 = vector.broadcast %cst_445 : f32 to vector<8x128xf32>
    %1415 = arith.mulf %1414, %1413 : vector<8x128xf32>
    %1416 = math.tanh %1415 : vector<8x128xf32>
    %cst_446 = arith.constant 5.000000e-01 : f32
    %1417 = vector.broadcast %cst_446 : f32 to vector<8x128xf32>
    %1418 = arith.mulf %1417, %1416 : vector<8x128xf32>
    %cst_447 = arith.constant 5.000000e-01 : f32
    %1419 = vector.broadcast %cst_447 : f32 to vector<8x128xf32>
    %1420 = arith.addf %1418, %1419 : vector<8x128xf32>
    %1421 = vector.extract_strided_slice %1373 {offsets = [0, 256], sizes = [8, 128], strides = [1, 1]} : vector<8x512xf32> to vector<8x128xf32>
    %1422 = math.tanh %1421 : vector<8x128xf32>
    %1423 = vector.extract_strided_slice %1373 {offsets = [0, 384], sizes = [8, 128], strides = [1, 1]} : vector<8x512xf32> to vector<8x128xf32>
    %cst_448 = arith.constant 5.000000e-01 : f32
    %1424 = vector.broadcast %cst_448 : f32 to vector<8x128xf32>
    %1425 = arith.mulf %1424, %1423 : vector<8x128xf32>
    %1426 = math.tanh %1425 : vector<8x128xf32>
    %cst_449 = arith.constant 5.000000e-01 : f32
    %1427 = vector.broadcast %cst_449 : f32 to vector<8x128xf32>
    %1428 = arith.mulf %1427, %1426 : vector<8x128xf32>
    %cst_450 = arith.constant 5.000000e-01 : f32
    %1429 = vector.broadcast %cst_450 : f32 to vector<8x128xf32>
    %1430 = arith.addf %1428, %1429 : vector<8x128xf32>
    %1431 = arith.mulf %1420, %1344 : vector<8x128xf32>
    %1432 = arith.mulf %1412, %1422 : vector<8x128xf32>
    %1433 = arith.addf %1431, %1432 : vector<8x128xf32>
    %1434 = math.tanh %1433 : vector<8x128xf32>
    %1435 = arith.mulf %1430, %1434 : vector<8x128xf32>
    %1436 = arith.index_cast %1361 : i32 to index
    %c0_451 = arith.constant 0 : index
    %1437 = vector.load %arg3[%1436, %c0_451] : memref<128x1xf32, #tpu.memory_space<vmem>>, vector<8x1xf32>
    %cst_452 = arith.constant 5.000000e-01 : f32
    %1438 = vector.broadcast %cst_452 : f32 to vector<8x1xf32>
    %1439 = arith.cmpf ogt, %1437, %1438 : vector<8x1xf32>
    %1440 = arith.index_cast %1363 : i32 to index
    %c0_453 = arith.constant 0 : index
    %1441 = vector.load %arg4[%1440, %c0_453] : memref<128x1xf32, #tpu.memory_space<vmem>>, vector<8x1xf32>
    %cst_454 = arith.constant 5.000000e-01 : f32
    %1442 = vector.broadcast %cst_454 : f32 to vector<8x1xf32>
    %1443 = arith.cmpf ogt, %1441, %1442 : vector<8x1xf32>
    %1444 = vector.shape_cast %1439 : vector<8x1xi1> to vector<8x1xi1>
    %1445 = vector.broadcast %1444 : vector<8x1xi1> to vector<8x128xi1>
    %1446 = arith.select %1445, %1404, %1335 : vector<8x128xi1>, vector<8x128xf32>
    %1447 = vector.shape_cast %1439 : vector<8x1xi1> to vector<8x1xi1>
    %1448 = vector.broadcast %1447 : vector<8x1xi1> to vector<8x128xi1>
    %1449 = arith.select %1448, %1402, %1338 : vector<8x128xi1>, vector<8x128xf32>
    %1450 = vector.shape_cast %1443 : vector<8x1xi1> to vector<8x1xi1>
    %1451 = vector.broadcast %1450 : vector<8x1xi1> to vector<8x128xi1>
    %1452 = arith.select %1451, %1435, %1341 : vector<8x128xi1>, vector<8x128xf32>
    %1453 = vector.shape_cast %1443 : vector<8x1xi1> to vector<8x1xi1>
    %1454 = vector.broadcast %1453 : vector<8x1xi1> to vector<8x128xi1>
    %1455 = arith.select %1454, %1433, %1344 : vector<8x128xi1>, vector<8x128xf32>
    %cst_455 = arith.constant 0.000000e+00 : f32
    %1456 = vector.shape_cast %1439 : vector<8x1xi1> to vector<8x1xi1>
    %1457 = vector.broadcast %1456 : vector<8x1xi1> to vector<8x128xi1>
    %1458 = vector.broadcast %cst_455 : f32 to vector<8x128xf32>
    %1459 = arith.select %1457, %1446, %1458 : vector<8x128xi1>, vector<8x128xf32>
    %1460 = arith.truncf %1459 : vector<8x128xf32> to vector<8x128xbf16>
    %1461 = arith.index_cast %1361 : i32 to index
    %c0_456 = arith.constant 0 : index
    %1462 = vector.load %arg11[%1461, %c0_456] : memref<128x128xbf16, #tpu.memory_space<vmem>>, vector<8x128xbf16>
    tpu.vector_store %arg11[%1461, %c0_456], %1460 {strides = array<i32>} : memref<128x128xbf16, #tpu.memory_space<vmem>>, vector<8x128xbf16>,
    %cst_457 = arith.constant 0.000000e+00 : f32
    %1463 = vector.shape_cast %1443 : vector<8x1xi1> to vector<8x1xi1>
    %1464 = vector.broadcast %1463 : vector<8x1xi1> to vector<8x128xi1>
    %1465 = vector.broadcast %cst_457 : f32 to vector<8x128xf32>
    %1466 = arith.select %1464, %1452, %1465 : vector<8x128xi1>, vector<8x128xf32>
    %1467 = arith.truncf %1466 : vector<8x128xf32> to vector<8x128xbf16>
    %1468 = arith.index_cast %1363 : i32 to index
    %c0_458 = arith.constant 0 : index
    %1469 = vector.load %arg12[%1468, %c0_458] : memref<128x128xbf16, #tpu.memory_space<vmem>>, vector<8x128xbf16>
    tpu.vector_store %arg12[%1468, %c0_458], %1467 {strides = array<i32>} : memref<128x128xbf16, #tpu.memory_space<vmem>>, vector<8x128xbf16>,
    %c13_i32 = arith.constant 13 : i32
    %c15_i32_459 = arith.constant 15 : i32
    %1470 = arith.subi %c15_i32_459, %c13_i32 : i32
    %c8_i32_460 = arith.constant 8 : i32
    %1471 = arith.muli %c13_i32, %c8_i32_460 : i32
    %1472 = tpu.assume_multiple %1471, 8 : i32
    %c8_i32_461 = arith.constant 8 : i32
    %1473 = arith.muli %1470, %c8_i32_461 : i32
    %1474 = tpu.assume_multiple %1473, 8 : i32
    %1475 = arith.index_cast %1472 : i32 to index
    %c0_462 = arith.constant 0 : index
    %1476 = vector.load %arg13[%1475, %c0_462] : memref<128x512xf32, #tpu.memory_space<vmem>>, vector<8x512xf32>
    %1477 = arith.truncf %1446 : vector<8x128xf32> to vector<8x128xbf16>
    %cst_463 = arith.constant dense<0.000000e+00> : vector<8x512xf32>
    %1478 = tpu.matmul %1477, %17, %cst_463 {dimension_numbers = #tpu.dot_dimension_numbers<[1], [0], [0], [1], [0, 0, 1, 1], [], []>} : vector<8x128xbf16>, vector<128x512xbf16>, vector<8x512xf32> -> vector<8x512xf32>
    %1479 = arith.addf %1476, %1478 : vector<8x512xf32>
    %1480 = arith.index_cast %1474 : i32 to index
    %c0_464 = arith.constant 0 : index
    %1481 = vector.load %arg14[%1480, %c0_464] : memref<128x512xf32, #tpu.memory_space<vmem>>, vector<8x512xf32>
    %1482 = arith.truncf %1452 : vector<8x128xf32> to vector<8x128xbf16>
    %cst_465 = arith.constant dense<0.000000e+00> : vector<8x512xf32>
    %1483 = tpu.matmul %1482, %18, %cst_465 {dimension_numbers = #tpu.dot_dimension_numbers<[1], [0], [0], [1], [0, 0, 1, 1], [], []>} : vector<8x128xbf16>, vector<128x512xbf16>, vector<8x512xf32> -> vector<8x512xf32>
    %1484 = arith.addf %1481, %1483 : vector<8x512xf32>
    %1485 = vector.extract_strided_slice %1479 {offsets = [0, 0], sizes = [8, 128], strides = [1, 1]} : vector<8x512xf32> to vector<8x128xf32>
    %cst_466 = arith.constant 5.000000e-01 : f32
    %1486 = vector.broadcast %cst_466 : f32 to vector<8x128xf32>
    %1487 = arith.mulf %1486, %1485 : vector<8x128xf32>
    %1488 = math.tanh %1487 : vector<8x128xf32>
    %cst_467 = arith.constant 5.000000e-01 : f32
    %1489 = vector.broadcast %cst_467 : f32 to vector<8x128xf32>
    %1490 = arith.mulf %1489, %1488 : vector<8x128xf32>
    %cst_468 = arith.constant 5.000000e-01 : f32
    %1491 = vector.broadcast %cst_468 : f32 to vector<8x128xf32>
    %1492 = arith.addf %1490, %1491 : vector<8x128xf32>
    %1493 = vector.extract_strided_slice %1479 {offsets = [0, 128], sizes = [8, 128], strides = [1, 1]} : vector<8x512xf32> to vector<8x128xf32>
    %cst_469 = arith.constant 5.000000e-01 : f32
    %1494 = vector.broadcast %cst_469 : f32 to vector<8x128xf32>
    %1495 = arith.mulf %1494, %1493 : vector<8x128xf32>
    %1496 = math.tanh %1495 : vector<8x128xf32>
    %cst_470 = arith.constant 5.000000e-01 : f32
    %1497 = vector.broadcast %cst_470 : f32 to vector<8x128xf32>
    %1498 = arith.mulf %1497, %1496 : vector<8x128xf32>
    %cst_471 = arith.constant 5.000000e-01 : f32
    %1499 = vector.broadcast %cst_471 : f32 to vector<8x128xf32>
    %1500 = arith.addf %1498, %1499 : vector<8x128xf32>
    %1501 = vector.extract_strided_slice %1479 {offsets = [0, 256], sizes = [8, 128], strides = [1, 1]} : vector<8x512xf32> to vector<8x128xf32>
    %1502 = math.tanh %1501 : vector<8x128xf32>
    %1503 = vector.extract_strided_slice %1479 {offsets = [0, 384], sizes = [8, 128], strides = [1, 1]} : vector<8x512xf32> to vector<8x128xf32>
    %cst_472 = arith.constant 5.000000e-01 : f32
    %1504 = vector.broadcast %cst_472 : f32 to vector<8x128xf32>
    %1505 = arith.mulf %1504, %1503 : vector<8x128xf32>
    %1506 = math.tanh %1505 : vector<8x128xf32>
    %cst_473 = arith.constant 5.000000e-01 : f32
    %1507 = vector.broadcast %cst_473 : f32 to vector<8x128xf32>
    %1508 = arith.mulf %1507, %1506 : vector<8x128xf32>
    %cst_474 = arith.constant 5.000000e-01 : f32
    %1509 = vector.broadcast %cst_474 : f32 to vector<8x128xf32>
    %1510 = arith.addf %1508, %1509 : vector<8x128xf32>
    %1511 = arith.mulf %1500, %1449 : vector<8x128xf32>
    %1512 = arith.mulf %1492, %1502 : vector<8x128xf32>
    %1513 = arith.addf %1511, %1512 : vector<8x128xf32>
    %1514 = math.tanh %1513 : vector<8x128xf32>
    %1515 = arith.mulf %1510, %1514 : vector<8x128xf32>
    %1516 = vector.extract_strided_slice %1484 {offsets = [0, 0], sizes = [8, 128], strides = [1, 1]} : vector<8x512xf32> to vector<8x128xf32>
    %cst_475 = arith.constant 5.000000e-01 : f32
    %1517 = vector.broadcast %cst_475 : f32 to vector<8x128xf32>
    %1518 = arith.mulf %1517, %1516 : vector<8x128xf32>
    %1519 = math.tanh %1518 : vector<8x128xf32>
    %cst_476 = arith.constant 5.000000e-01 : f32
    %1520 = vector.broadcast %cst_476 : f32 to vector<8x128xf32>
    %1521 = arith.mulf %1520, %1519 : vector<8x128xf32>
    %cst_477 = arith.constant 5.000000e-01 : f32
    %1522 = vector.broadcast %cst_477 : f32 to vector<8x128xf32>
    %1523 = arith.addf %1521, %1522 : vector<8x128xf32>
    %1524 = vector.extract_strided_slice %1484 {offsets = [0, 128], sizes = [8, 128], strides = [1, 1]} : vector<8x512xf32> to vector<8x128xf32>
    %cst_478 = arith.constant 5.000000e-01 : f32
    %1525 = vector.broadcast %cst_478 : f32 to vector<8x128xf32>
    %1526 = arith.mulf %1525, %1524 : vector<8x128xf32>
    %1527 = math.tanh %1526 : vector<8x128xf32>
    %cst_479 = arith.constant 5.000000e-01 : f32
    %1528 = vector.broadcast %cst_479 : f32 to vector<8x128xf32>
    %1529 = arith.mulf %1528, %1527 : vector<8x128xf32>
    %cst_480 = arith.constant 5.000000e-01 : f32
    %1530 = vector.broadcast %cst_480 : f32 to vector<8x128xf32>
    %1531 = arith.addf %1529, %1530 : vector<8x128xf32>
    %1532 = vector.extract_strided_slice %1484 {offsets = [0, 256], sizes = [8, 128], strides = [1, 1]} : vector<8x512xf32> to vector<8x128xf32>
    %1533 = math.tanh %1532 : vector<8x128xf32>
    %1534 = vector.extract_strided_slice %1484 {offsets = [0, 384], sizes = [8, 128], strides = [1, 1]} : vector<8x512xf32> to vector<8x128xf32>
    %cst_481 = arith.constant 5.000000e-01 : f32
    %1535 = vector.broadcast %cst_481 : f32 to vector<8x128xf32>
    %1536 = arith.mulf %1535, %1534 : vector<8x128xf32>
    %1537 = math.tanh %1536 : vector<8x128xf32>
    %cst_482 = arith.constant 5.000000e-01 : f32
    %1538 = vector.broadcast %cst_482 : f32 to vector<8x128xf32>
    %1539 = arith.mulf %1538, %1537 : vector<8x128xf32>
    %cst_483 = arith.constant 5.000000e-01 : f32
    %1540 = vector.broadcast %cst_483 : f32 to vector<8x128xf32>
    %1541 = arith.addf %1539, %1540 : vector<8x128xf32>
    %1542 = arith.mulf %1531, %1455 : vector<8x128xf32>
    %1543 = arith.mulf %1523, %1533 : vector<8x128xf32>
    %1544 = arith.addf %1542, %1543 : vector<8x128xf32>
    %1545 = math.tanh %1544 : vector<8x128xf32>
    %1546 = arith.mulf %1541, %1545 : vector<8x128xf32>
    %1547 = arith.index_cast %1472 : i32 to index
    %c0_484 = arith.constant 0 : index
    %1548 = vector.load %arg3[%1547, %c0_484] : memref<128x1xf32, #tpu.memory_space<vmem>>, vector<8x1xf32>
    %cst_485 = arith.constant 5.000000e-01 : f32
    %1549 = vector.broadcast %cst_485 : f32 to vector<8x1xf32>
    %1550 = arith.cmpf ogt, %1548, %1549 : vector<8x1xf32>
    %1551 = arith.index_cast %1474 : i32 to index
    %c0_486 = arith.constant 0 : index
    %1552 = vector.load %arg4[%1551, %c0_486] : memref<128x1xf32, #tpu.memory_space<vmem>>, vector<8x1xf32>
    %cst_487 = arith.constant 5.000000e-01 : f32
    %1553 = vector.broadcast %cst_487 : f32 to vector<8x1xf32>
    %1554 = arith.cmpf ogt, %1552, %1553 : vector<8x1xf32>
    %1555 = vector.shape_cast %1550 : vector<8x1xi1> to vector<8x1xi1>
    %1556 = vector.broadcast %1555 : vector<8x1xi1> to vector<8x128xi1>
    %1557 = arith.select %1556, %1515, %1446 : vector<8x128xi1>, vector<8x128xf32>
    %1558 = vector.shape_cast %1550 : vector<8x1xi1> to vector<8x1xi1>
    %1559 = vector.broadcast %1558 : vector<8x1xi1> to vector<8x128xi1>
    %1560 = arith.select %1559, %1513, %1449 : vector<8x128xi1>, vector<8x128xf32>
    %1561 = vector.shape_cast %1554 : vector<8x1xi1> to vector<8x1xi1>
    %1562 = vector.broadcast %1561 : vector<8x1xi1> to vector<8x128xi1>
    %1563 = arith.select %1562, %1546, %1452 : vector<8x128xi1>, vector<8x128xf32>
    %1564 = vector.shape_cast %1554 : vector<8x1xi1> to vector<8x1xi1>
    %1565 = vector.broadcast %1564 : vector<8x1xi1> to vector<8x128xi1>
    %1566 = arith.select %1565, %1544, %1455 : vector<8x128xi1>, vector<8x128xf32>
    %cst_488 = arith.constant 0.000000e+00 : f32
    %1567 = vector.shape_cast %1550 : vector<8x1xi1> to vector<8x1xi1>
    %1568 = vector.broadcast %1567 : vector<8x1xi1> to vector<8x128xi1>
    %1569 = vector.broadcast %cst_488 : f32 to vector<8x128xf32>
    %1570 = arith.select %1568, %1557, %1569 : vector<8x128xi1>, vector<8x128xf32>
    %1571 = arith.truncf %1570 : vector<8x128xf32> to vector<8x128xbf16>
    %1572 = arith.index_cast %1472 : i32 to index
    %c0_489 = arith.constant 0 : index
    %1573 = vector.load %arg11[%1572, %c0_489] : memref<128x128xbf16, #tpu.memory_space<vmem>>, vector<8x128xbf16>
    tpu.vector_store %arg11[%1572, %c0_489], %1571 {strides = array<i32>} : memref<128x128xbf16, #tpu.memory_space<vmem>>, vector<8x128xbf16>,
    %cst_490 = arith.constant 0.000000e+00 : f32
    %1574 = vector.shape_cast %1554 : vector<8x1xi1> to vector<8x1xi1>
    %1575 = vector.broadcast %1574 : vector<8x1xi1> to vector<8x128xi1>
    %1576 = vector.broadcast %cst_490 : f32 to vector<8x128xf32>
    %1577 = arith.select %1575, %1563, %1576 : vector<8x128xi1>, vector<8x128xf32>
    %1578 = arith.truncf %1577 : vector<8x128xf32> to vector<8x128xbf16>
    %1579 = arith.index_cast %1474 : i32 to index
    %c0_491 = arith.constant 0 : index
    %1580 = vector.load %arg12[%1579, %c0_491] : memref<128x128xbf16, #tpu.memory_space<vmem>>, vector<8x128xbf16>
    tpu.vector_store %arg12[%1579, %c0_491], %1578 {strides = array<i32>} : memref<128x128xbf16, #tpu.memory_space<vmem>>, vector<8x128xbf16>,
    %c14_i32 = arith.constant 14 : i32
    %c15_i32_492 = arith.constant 15 : i32
    %1581 = arith.subi %c15_i32_492, %c14_i32 : i32
    %c8_i32_493 = arith.constant 8 : i32
    %1582 = arith.muli %c14_i32, %c8_i32_493 : i32
    %1583 = tpu.assume_multiple %1582, 8 : i32
    %c8_i32_494 = arith.constant 8 : i32
    %1584 = arith.muli %1581, %c8_i32_494 : i32
    %1585 = tpu.assume_multiple %1584, 8 : i32
    %1586 = arith.index_cast %1583 : i32 to index
    %c0_495 = arith.constant 0 : index
    %1587 = vector.load %arg13[%1586, %c0_495] : memref<128x512xf32, #tpu.memory_space<vmem>>, vector<8x512xf32>
    %1588 = arith.truncf %1557 : vector<8x128xf32> to vector<8x128xbf16>
    %cst_496 = arith.constant dense<0.000000e+00> : vector<8x512xf32>
    %1589 = tpu.matmul %1588, %17, %cst_496 {dimension_numbers = #tpu.dot_dimension_numbers<[1], [0], [0], [1], [0, 0, 1, 1], [], []>} : vector<8x128xbf16>, vector<128x512xbf16>, vector<8x512xf32> -> vector<8x512xf32>
    %1590 = arith.addf %1587, %1589 : vector<8x512xf32>
    %1591 = arith.index_cast %1585 : i32 to index
    %c0_497 = arith.constant 0 : index
    %1592 = vector.load %arg14[%1591, %c0_497] : memref<128x512xf32, #tpu.memory_space<vmem>>, vector<8x512xf32>
    %1593 = arith.truncf %1563 : vector<8x128xf32> to vector<8x128xbf16>
    %cst_498 = arith.constant dense<0.000000e+00> : vector<8x512xf32>
    %1594 = tpu.matmul %1593, %18, %cst_498 {dimension_numbers = #tpu.dot_dimension_numbers<[1], [0], [0], [1], [0, 0, 1, 1], [], []>} : vector<8x128xbf16>, vector<128x512xbf16>, vector<8x512xf32> -> vector<8x512xf32>
    %1595 = arith.addf %1592, %1594 : vector<8x512xf32>
    %1596 = vector.extract_strided_slice %1590 {offsets = [0, 0], sizes = [8, 128], strides = [1, 1]} : vector<8x512xf32> to vector<8x128xf32>
    %cst_499 = arith.constant 5.000000e-01 : f32
    %1597 = vector.broadcast %cst_499 : f32 to vector<8x128xf32>
    %1598 = arith.mulf %1597, %1596 : vector<8x128xf32>
    %1599 = math.tanh %1598 : vector<8x128xf32>
    %cst_500 = arith.constant 5.000000e-01 : f32
    %1600 = vector.broadcast %cst_500 : f32 to vector<8x128xf32>
    %1601 = arith.mulf %1600, %1599 : vector<8x128xf32>
    %cst_501 = arith.constant 5.000000e-01 : f32
    %1602 = vector.broadcast %cst_501 : f32 to vector<8x128xf32>
    %1603 = arith.addf %1601, %1602 : vector<8x128xf32>
    %1604 = vector.extract_strided_slice %1590 {offsets = [0, 128], sizes = [8, 128], strides = [1, 1]} : vector<8x512xf32> to vector<8x128xf32>
    %cst_502 = arith.constant 5.000000e-01 : f32
    %1605 = vector.broadcast %cst_502 : f32 to vector<8x128xf32>
    %1606 = arith.mulf %1605, %1604 : vector<8x128xf32>
    %1607 = math.tanh %1606 : vector<8x128xf32>
    %cst_503 = arith.constant 5.000000e-01 : f32
    %1608 = vector.broadcast %cst_503 : f32 to vector<8x128xf32>
    %1609 = arith.mulf %1608, %1607 : vector<8x128xf32>
    %cst_504 = arith.constant 5.000000e-01 : f32
    %1610 = vector.broadcast %cst_504 : f32 to vector<8x128xf32>
    %1611 = arith.addf %1609, %1610 : vector<8x128xf32>
    %1612 = vector.extract_strided_slice %1590 {offsets = [0, 256], sizes = [8, 128], strides = [1, 1]} : vector<8x512xf32> to vector<8x128xf32>
    %1613 = math.tanh %1612 : vector<8x128xf32>
    %1614 = vector.extract_strided_slice %1590 {offsets = [0, 384], sizes = [8, 128], strides = [1, 1]} : vector<8x512xf32> to vector<8x128xf32>
    %cst_505 = arith.constant 5.000000e-01 : f32
    %1615 = vector.broadcast %cst_505 : f32 to vector<8x128xf32>
    %1616 = arith.mulf %1615, %1614 : vector<8x128xf32>
    %1617 = math.tanh %1616 : vector<8x128xf32>
    %cst_506 = arith.constant 5.000000e-01 : f32
    %1618 = vector.broadcast %cst_506 : f32 to vector<8x128xf32>
    %1619 = arith.mulf %1618, %1617 : vector<8x128xf32>
    %cst_507 = arith.constant 5.000000e-01 : f32
    %1620 = vector.broadcast %cst_507 : f32 to vector<8x128xf32>
    %1621 = arith.addf %1619, %1620 : vector<8x128xf32>
    %1622 = arith.mulf %1611, %1560 : vector<8x128xf32>
    %1623 = arith.mulf %1603, %1613 : vector<8x128xf32>
    %1624 = arith.addf %1622, %1623 : vector<8x128xf32>
    %1625 = math.tanh %1624 : vector<8x128xf32>
    %1626 = arith.mulf %1621, %1625 : vector<8x128xf32>
    %1627 = vector.extract_strided_slice %1595 {offsets = [0, 0], sizes = [8, 128], strides = [1, 1]} : vector<8x512xf32> to vector<8x128xf32>
    %cst_508 = arith.constant 5.000000e-01 : f32
    %1628 = vector.broadcast %cst_508 : f32 to vector<8x128xf32>
    %1629 = arith.mulf %1628, %1627 : vector<8x128xf32>
    %1630 = math.tanh %1629 : vector<8x128xf32>
    %cst_509 = arith.constant 5.000000e-01 : f32
    %1631 = vector.broadcast %cst_509 : f32 to vector<8x128xf32>
    %1632 = arith.mulf %1631, %1630 : vector<8x128xf32>
    %cst_510 = arith.constant 5.000000e-01 : f32
    %1633 = vector.broadcast %cst_510 : f32 to vector<8x128xf32>
    %1634 = arith.addf %1632, %1633 : vector<8x128xf32>
    %1635 = vector.extract_strided_slice %1595 {offsets = [0, 128], sizes = [8, 128], strides = [1, 1]} : vector<8x512xf32> to vector<8x128xf32>
    %cst_511 = arith.constant 5.000000e-01 : f32
    %1636 = vector.broadcast %cst_511 : f32 to vector<8x128xf32>
    %1637 = arith.mulf %1636, %1635 : vector<8x128xf32>
    %1638 = math.tanh %1637 : vector<8x128xf32>
    %cst_512 = arith.constant 5.000000e-01 : f32
    %1639 = vector.broadcast %cst_512 : f32 to vector<8x128xf32>
    %1640 = arith.mulf %1639, %1638 : vector<8x128xf32>
    %cst_513 = arith.constant 5.000000e-01 : f32
    %1641 = vector.broadcast %cst_513 : f32 to vector<8x128xf32>
    %1642 = arith.addf %1640, %1641 : vector<8x128xf32>
    %1643 = vector.extract_strided_slice %1595 {offsets = [0, 256], sizes = [8, 128], strides = [1, 1]} : vector<8x512xf32> to vector<8x128xf32>
    %1644 = math.tanh %1643 : vector<8x128xf32>
    %1645 = vector.extract_strided_slice %1595 {offsets = [0, 384], sizes = [8, 128], strides = [1, 1]} : vector<8x512xf32> to vector<8x128xf32>
    %cst_514 = arith.constant 5.000000e-01 : f32
    %1646 = vector.broadcast %cst_514 : f32 to vector<8x128xf32>
    %1647 = arith.mulf %1646, %1645 : vector<8x128xf32>
    %1648 = math.tanh %1647 : vector<8x128xf32>
    %cst_515 = arith.constant 5.000000e-01 : f32
    %1649 = vector.broadcast %cst_515 : f32 to vector<8x128xf32>
    %1650 = arith.mulf %1649, %1648 : vector<8x128xf32>
    %cst_516 = arith.constant 5.000000e-01 : f32
    %1651 = vector.broadcast %cst_516 : f32 to vector<8x128xf32>
    %1652 = arith.addf %1650, %1651 : vector<8x128xf32>
    %1653 = arith.mulf %1642, %1566 : vector<8x128xf32>
    %1654 = arith.mulf %1634, %1644 : vector<8x128xf32>
    %1655 = arith.addf %1653, %1654 : vector<8x128xf32>
    %1656 = math.tanh %1655 : vector<8x128xf32>
    %1657 = arith.mulf %1652, %1656 : vector<8x128xf32>
    %1658 = arith.index_cast %1583 : i32 to index
    %c0_517 = arith.constant 0 : index
    %1659 = vector.load %arg3[%1658, %c0_517] : memref<128x1xf32, #tpu.memory_space<vmem>>, vector<8x1xf32>
    %cst_518 = arith.constant 5.000000e-01 : f32
    %1660 = vector.broadcast %cst_518 : f32 to vector<8x1xf32>
    %1661 = arith.cmpf ogt, %1659, %1660 : vector<8x1xf32>
    %1662 = arith.index_cast %1585 : i32 to index
    %c0_519 = arith.constant 0 : index
    %1663 = vector.load %arg4[%1662, %c0_519] : memref<128x1xf32, #tpu.memory_space<vmem>>, vector<8x1xf32>
    %cst_520 = arith.constant 5.000000e-01 : f32
    %1664 = vector.broadcast %cst_520 : f32 to vector<8x1xf32>
    %1665 = arith.cmpf ogt, %1663, %1664 : vector<8x1xf32>
    %1666 = vector.shape_cast %1661 : vector<8x1xi1> to vector<8x1xi1>
    %1667 = vector.broadcast %1666 : vector<8x1xi1> to vector<8x128xi1>
    %1668 = arith.select %1667, %1626, %1557 : vector<8x128xi1>, vector<8x128xf32>
    %1669 = vector.shape_cast %1661 : vector<8x1xi1> to vector<8x1xi1>
    %1670 = vector.broadcast %1669 : vector<8x1xi1> to vector<8x128xi1>
    %1671 = arith.select %1670, %1624, %1560 : vector<8x128xi1>, vector<8x128xf32>
    %1672 = vector.shape_cast %1665 : vector<8x1xi1> to vector<8x1xi1>
    %1673 = vector.broadcast %1672 : vector<8x1xi1> to vector<8x128xi1>
    %1674 = arith.select %1673, %1657, %1563 : vector<8x128xi1>, vector<8x128xf32>
    %1675 = vector.shape_cast %1665 : vector<8x1xi1> to vector<8x1xi1>
    %1676 = vector.broadcast %1675 : vector<8x1xi1> to vector<8x128xi1>
    %1677 = arith.select %1676, %1655, %1566 : vector<8x128xi1>, vector<8x128xf32>
    %cst_521 = arith.constant 0.000000e+00 : f32
    %1678 = vector.shape_cast %1661 : vector<8x1xi1> to vector<8x1xi1>
    %1679 = vector.broadcast %1678 : vector<8x1xi1> to vector<8x128xi1>
    %1680 = vector.broadcast %cst_521 : f32 to vector<8x128xf32>
    %1681 = arith.select %1679, %1668, %1680 : vector<8x128xi1>, vector<8x128xf32>
    %1682 = arith.truncf %1681 : vector<8x128xf32> to vector<8x128xbf16>
    %1683 = arith.index_cast %1583 : i32 to index
    %c0_522 = arith.constant 0 : index
    %1684 = vector.load %arg11[%1683, %c0_522] : memref<128x128xbf16, #tpu.memory_space<vmem>>, vector<8x128xbf16>
    tpu.vector_store %arg11[%1683, %c0_522], %1682 {strides = array<i32>} : memref<128x128xbf16, #tpu.memory_space<vmem>>, vector<8x128xbf16>,
    %cst_523 = arith.constant 0.000000e+00 : f32
    %1685 = vector.shape_cast %1665 : vector<8x1xi1> to vector<8x1xi1>
    %1686 = vector.broadcast %1685 : vector<8x1xi1> to vector<8x128xi1>
    %1687 = vector.broadcast %cst_523 : f32 to vector<8x128xf32>
    %1688 = arith.select %1686, %1674, %1687 : vector<8x128xi1>, vector<8x128xf32>
    %1689 = arith.truncf %1688 : vector<8x128xf32> to vector<8x128xbf16>
    %1690 = arith.index_cast %1585 : i32 to index
    %c0_524 = arith.constant 0 : index
    %1691 = vector.load %arg12[%1690, %c0_524] : memref<128x128xbf16, #tpu.memory_space<vmem>>, vector<8x128xbf16>
    tpu.vector_store %arg12[%1690, %c0_524], %1689 {strides = array<i32>} : memref<128x128xbf16, #tpu.memory_space<vmem>>, vector<8x128xbf16>,
    %c15_i32_525 = arith.constant 15 : i32
    %c15_i32_526 = arith.constant 15 : i32
    %1692 = arith.subi %c15_i32_526, %c15_i32_525 : i32
    %c8_i32_527 = arith.constant 8 : i32
    %1693 = arith.muli %c15_i32_525, %c8_i32_527 : i32
    %1694 = tpu.assume_multiple %1693, 8 : i32
    %c8_i32_528 = arith.constant 8 : i32
    %1695 = arith.muli %1692, %c8_i32_528 : i32
    %1696 = tpu.assume_multiple %1695, 8 : i32
    %1697 = arith.index_cast %1694 : i32 to index
    %c0_529 = arith.constant 0 : index
    %1698 = vector.load %arg13[%1697, %c0_529] : memref<128x512xf32, #tpu.memory_space<vmem>>, vector<8x512xf32>
    %1699 = arith.truncf %1668 : vector<8x128xf32> to vector<8x128xbf16>
    %cst_530 = arith.constant dense<0.000000e+00> : vector<8x512xf32>
    %1700 = tpu.matmul %1699, %17, %cst_530 {dimension_numbers = #tpu.dot_dimension_numbers<[1], [0], [0], [1], [0, 0, 1, 1], [], []>} : vector<8x128xbf16>, vector<128x512xbf16>, vector<8x512xf32> -> vector<8x512xf32>
    %1701 = arith.addf %1698, %1700 : vector<8x512xf32>
    %1702 = arith.index_cast %1696 : i32 to index
    %c0_531 = arith.constant 0 : index
    %1703 = vector.load %arg14[%1702, %c0_531] : memref<128x512xf32, #tpu.memory_space<vmem>>, vector<8x512xf32>
    %1704 = arith.truncf %1674 : vector<8x128xf32> to vector<8x128xbf16>
    %cst_532 = arith.constant dense<0.000000e+00> : vector<8x512xf32>
    %1705 = tpu.matmul %1704, %18, %cst_532 {dimension_numbers = #tpu.dot_dimension_numbers<[1], [0], [0], [1], [0, 0, 1, 1], [], []>} : vector<8x128xbf16>, vector<128x512xbf16>, vector<8x512xf32> -> vector<8x512xf32>
    %1706 = arith.addf %1703, %1705 : vector<8x512xf32>
    %1707 = vector.extract_strided_slice %1701 {offsets = [0, 0], sizes = [8, 128], strides = [1, 1]} : vector<8x512xf32> to vector<8x128xf32>
    %cst_533 = arith.constant 5.000000e-01 : f32
    %1708 = vector.broadcast %cst_533 : f32 to vector<8x128xf32>
    %1709 = arith.mulf %1708, %1707 : vector<8x128xf32>
    %1710 = math.tanh %1709 : vector<8x128xf32>
    %cst_534 = arith.constant 5.000000e-01 : f32
    %1711 = vector.broadcast %cst_534 : f32 to vector<8x128xf32>
    %1712 = arith.mulf %1711, %1710 : vector<8x128xf32>
    %cst_535 = arith.constant 5.000000e-01 : f32
    %1713 = vector.broadcast %cst_535 : f32 to vector<8x128xf32>
    %1714 = arith.addf %1712, %1713 : vector<8x128xf32>
    %1715 = vector.extract_strided_slice %1701 {offsets = [0, 128], sizes = [8, 128], strides = [1, 1]} : vector<8x512xf32> to vector<8x128xf32>
    %cst_536 = arith.constant 5.000000e-01 : f32
    %1716 = vector.broadcast %cst_536 : f32 to vector<8x128xf32>
    %1717 = arith.mulf %1716, %1715 : vector<8x128xf32>
    %1718 = math.tanh %1717 : vector<8x128xf32>
    %cst_537 = arith.constant 5.000000e-01 : f32
    %1719 = vector.broadcast %cst_537 : f32 to vector<8x128xf32>
    %1720 = arith.mulf %1719, %1718 : vector<8x128xf32>
    %cst_538 = arith.constant 5.000000e-01 : f32
    %1721 = vector.broadcast %cst_538 : f32 to vector<8x128xf32>
    %1722 = arith.addf %1720, %1721 : vector<8x128xf32>
    %1723 = vector.extract_strided_slice %1701 {offsets = [0, 256], sizes = [8, 128], strides = [1, 1]} : vector<8x512xf32> to vector<8x128xf32>
    %1724 = math.tanh %1723 : vector<8x128xf32>
    %1725 = vector.extract_strided_slice %1701 {offsets = [0, 384], sizes = [8, 128], strides = [1, 1]} : vector<8x512xf32> to vector<8x128xf32>
    %cst_539 = arith.constant 5.000000e-01 : f32
    %1726 = vector.broadcast %cst_539 : f32 to vector<8x128xf32>
    %1727 = arith.mulf %1726, %1725 : vector<8x128xf32>
    %1728 = math.tanh %1727 : vector<8x128xf32>
    %cst_540 = arith.constant 5.000000e-01 : f32
    %1729 = vector.broadcast %cst_540 : f32 to vector<8x128xf32>
    %1730 = arith.mulf %1729, %1728 : vector<8x128xf32>
    %cst_541 = arith.constant 5.000000e-01 : f32
    %1731 = vector.broadcast %cst_541 : f32 to vector<8x128xf32>
    %1732 = arith.addf %1730, %1731 : vector<8x128xf32>
    %1733 = arith.mulf %1722, %1671 : vector<8x128xf32>
    %1734 = arith.mulf %1714, %1724 : vector<8x128xf32>
    %1735 = arith.addf %1733, %1734 : vector<8x128xf32>
    %1736 = math.tanh %1735 : vector<8x128xf32>
    %1737 = arith.mulf %1732, %1736 : vector<8x128xf32>
    %1738 = vector.extract_strided_slice %1706 {offsets = [0, 0], sizes = [8, 128], strides = [1, 1]} : vector<8x512xf32> to vector<8x128xf32>
    %cst_542 = arith.constant 5.000000e-01 : f32
    %1739 = vector.broadcast %cst_542 : f32 to vector<8x128xf32>
    %1740 = arith.mulf %1739, %1738 : vector<8x128xf32>
    %1741 = math.tanh %1740 : vector<8x128xf32>
    %cst_543 = arith.constant 5.000000e-01 : f32
    %1742 = vector.broadcast %cst_543 : f32 to vector<8x128xf32>
    %1743 = arith.mulf %1742, %1741 : vector<8x128xf32>
    %cst_544 = arith.constant 5.000000e-01 : f32
    %1744 = vector.broadcast %cst_544 : f32 to vector<8x128xf32>
    %1745 = arith.addf %1743, %1744 : vector<8x128xf32>
    %1746 = vector.extract_strided_slice %1706 {offsets = [0, 128], sizes = [8, 128], strides = [1, 1]} : vector<8x512xf32> to vector<8x128xf32>
    %cst_545 = arith.constant 5.000000e-01 : f32
    %1747 = vector.broadcast %cst_545 : f32 to vector<8x128xf32>
    %1748 = arith.mulf %1747, %1746 : vector<8x128xf32>
    %1749 = math.tanh %1748 : vector<8x128xf32>
    %cst_546 = arith.constant 5.000000e-01 : f32
    %1750 = vector.broadcast %cst_546 : f32 to vector<8x128xf32>
    %1751 = arith.mulf %1750, %1749 : vector<8x128xf32>
    %cst_547 = arith.constant 5.000000e-01 : f32
    %1752 = vector.broadcast %cst_547 : f32 to vector<8x128xf32>
    %1753 = arith.addf %1751, %1752 : vector<8x128xf32>
    %1754 = vector.extract_strided_slice %1706 {offsets = [0, 256], sizes = [8, 128], strides = [1, 1]} : vector<8x512xf32> to vector<8x128xf32>
    %1755 = math.tanh %1754 : vector<8x128xf32>
    %1756 = vector.extract_strided_slice %1706 {offsets = [0, 384], sizes = [8, 128], strides = [1, 1]} : vector<8x512xf32> to vector<8x128xf32>
    %cst_548 = arith.constant 5.000000e-01 : f32
    %1757 = vector.broadcast %cst_548 : f32 to vector<8x128xf32>
    %1758 = arith.mulf %1757, %1756 : vector<8x128xf32>
    %1759 = math.tanh %1758 : vector<8x128xf32>
    %cst_549 = arith.constant 5.000000e-01 : f32
    %1760 = vector.broadcast %cst_549 : f32 to vector<8x128xf32>
    %1761 = arith.mulf %1760, %1759 : vector<8x128xf32>
    %cst_550 = arith.constant 5.000000e-01 : f32
    %1762 = vector.broadcast %cst_550 : f32 to vector<8x128xf32>
    %1763 = arith.addf %1761, %1762 : vector<8x128xf32>
    %1764 = arith.mulf %1753, %1677 : vector<8x128xf32>
    %1765 = arith.mulf %1745, %1755 : vector<8x128xf32>
    %1766 = arith.addf %1764, %1765 : vector<8x128xf32>
    %1767 = math.tanh %1766 : vector<8x128xf32>
    %1768 = arith.mulf %1763, %1767 : vector<8x128xf32>
    %1769 = arith.index_cast %1694 : i32 to index
    %c0_551 = arith.constant 0 : index
    %1770 = vector.load %arg3[%1769, %c0_551] : memref<128x1xf32, #tpu.memory_space<vmem>>, vector<8x1xf32>
    %cst_552 = arith.constant 5.000000e-01 : f32
    %1771 = vector.broadcast %cst_552 : f32 to vector<8x1xf32>
    %1772 = arith.cmpf ogt, %1770, %1771 : vector<8x1xf32>
    %1773 = arith.index_cast %1696 : i32 to index
    %c0_553 = arith.constant 0 : index
    %1774 = vector.load %arg4[%1773, %c0_553] : memref<128x1xf32, #tpu.memory_space<vmem>>, vector<8x1xf32>
    %cst_554 = arith.constant 5.000000e-01 : f32
    %1775 = vector.broadcast %cst_554 : f32 to vector<8x1xf32>
    %1776 = arith.cmpf ogt, %1774, %1775 : vector<8x1xf32>
    %1777 = vector.shape_cast %1772 : vector<8x1xi1> to vector<8x1xi1>
    %1778 = vector.broadcast %1777 : vector<8x1xi1> to vector<8x128xi1>
    %1779 = arith.select %1778, %1737, %1668 : vector<8x128xi1>, vector<8x128xf32>
    %1780 = vector.shape_cast %1772 : vector<8x1xi1> to vector<8x1xi1>
    %1781 = vector.broadcast %1780 : vector<8x1xi1> to vector<8x128xi1>
    %1782 = arith.select %1781, %1735, %1671 : vector<8x128xi1>, vector<8x128xf32>
    %1783 = vector.shape_cast %1776 : vector<8x1xi1> to vector<8x1xi1>
    %1784 = vector.broadcast %1783 : vector<8x1xi1> to vector<8x128xi1>
    %1785 = arith.select %1784, %1768, %1674 : vector<8x128xi1>, vector<8x128xf32>
    %1786 = vector.shape_cast %1776 : vector<8x1xi1> to vector<8x1xi1>
    %1787 = vector.broadcast %1786 : vector<8x1xi1> to vector<8x128xi1>
    %1788 = arith.select %1787, %1766, %1677 : vector<8x128xi1>, vector<8x128xf32>
    %cst_555 = arith.constant 0.000000e+00 : f32
    %1789 = vector.shape_cast %1772 : vector<8x1xi1> to vector<8x1xi1>
    %1790 = vector.broadcast %1789 : vector<8x1xi1> to vector<8x128xi1>
    %1791 = vector.broadcast %cst_555 : f32 to vector<8x128xf32>
    %1792 = arith.select %1790, %1779, %1791 : vector<8x128xi1>, vector<8x128xf32>
    %1793 = arith.truncf %1792 : vector<8x128xf32> to vector<8x128xbf16>
    %1794 = arith.index_cast %1694 : i32 to index
    %c0_556 = arith.constant 0 : index
    %1795 = vector.load %arg11[%1794, %c0_556] : memref<128x128xbf16, #tpu.memory_space<vmem>>, vector<8x128xbf16>
    tpu.vector_store %arg11[%1794, %c0_556], %1793 {strides = array<i32>} : memref<128x128xbf16, #tpu.memory_space<vmem>>, vector<8x128xbf16>,
    %cst_557 = arith.constant 0.000000e+00 : f32
    %1796 = vector.shape_cast %1776 : vector<8x1xi1> to vector<8x1xi1>
    %1797 = vector.broadcast %1796 : vector<8x1xi1> to vector<8x128xi1>
    %1798 = vector.broadcast %cst_557 : f32 to vector<8x128xf32>
    %1799 = arith.select %1797, %1785, %1798 : vector<8x128xi1>, vector<8x128xf32>
    %1800 = arith.truncf %1799 : vector<8x128xf32> to vector<8x128xbf16>
    %1801 = arith.index_cast %1696 : i32 to index
    %c0_558 = arith.constant 0 : index
    %1802 = vector.load %arg12[%1801, %c0_558] : memref<128x128xbf16, #tpu.memory_space<vmem>>, vector<8x128xbf16>
    tpu.vector_store %arg12[%1801, %c0_558], %1800 {strides = array<i32>} : memref<128x128xbf16, #tpu.memory_space<vmem>>, vector<8x128xbf16>,
    %c16_i32 = arith.constant 16 : i32
    %c0_559 = arith.constant 0 : index
    %c0_560 = arith.constant 0 : index
    %c0_561 = arith.constant 0 : index
    %1803 = vector.load %arg15[%c0_559, %c0_560, %c0_561] : memref<4x8x128xf32, #tpu.memory_space<vmem>>, vector<1x8x128xf32>
    %1804 = vector.shape_cast %1803 : vector<1x8x128xf32> to vector<8x128xf32>
    %1805 = vector.shape_cast %1779 : vector<8x128xf32> to vector<1x8x128xf32>
    tpu.vector_store %arg15[%c0_559, %c0_560, %c0_561], %1805 {strides = array<i32>} : memref<4x8x128xf32, #tpu.memory_space<vmem>>, vector<1x8x128xf32>,
    %c1_562 = arith.constant 1 : index
    %c0_563 = arith.constant 0 : index
    %c0_564 = arith.constant 0 : index
    %1806 = vector.load %arg15[%c1_562, %c0_563, %c0_564] : memref<4x8x128xf32, #tpu.memory_space<vmem>>, vector<1x8x128xf32>
    %1807 = vector.shape_cast %1806 : vector<1x8x128xf32> to vector<8x128xf32>
    %1808 = vector.shape_cast %1782 : vector<8x128xf32> to vector<1x8x128xf32>
    tpu.vector_store %arg15[%c1_562, %c0_563, %c0_564], %1808 {strides = array<i32>} : memref<4x8x128xf32, #tpu.memory_space<vmem>>, vector<1x8x128xf32>,
    %c2_565 = arith.constant 2 : index
    %c0_566 = arith.constant 0 : index
    %c0_567 = arith.constant 0 : index
    %1809 = vector.load %arg15[%c2_565, %c0_566, %c0_567] : memref<4x8x128xf32, #tpu.memory_space<vmem>>, vector<1x8x128xf32>
    %1810 = vector.shape_cast %1809 : vector<1x8x128xf32> to vector<8x128xf32>
    %1811 = vector.shape_cast %1785 : vector<8x128xf32> to vector<1x8x128xf32>
    tpu.vector_store %arg15[%c2_565, %c0_566, %c0_567], %1811 {strides = array<i32>} : memref<4x8x128xf32, #tpu.memory_space<vmem>>, vector<1x8x128xf32>,
    %c3_568 = arith.constant 3 : index
    %c0_569 = arith.constant 0 : index
    %c0_570 = arith.constant 0 : index
    %1812 = vector.load %arg15[%c3_568, %c0_569, %c0_570] : memref<4x8x128xf32, #tpu.memory_space<vmem>>, vector<1x8x128xf32>
    %1813 = vector.shape_cast %1812 : vector<1x8x128xf32> to vector<8x128xf32>
    %1814 = vector.shape_cast %1788 : vector<8x128xf32> to vector<1x8x128xf32>
    tpu.vector_store %arg15[%c3_568, %c0_569, %c0_570], %1814 {strides = array<i32>} : memref<4x8x128xf32, #tpu.memory_space<vmem>>, vector<1x8x128xf32>,
    return
  }
  func.func @transform_0(%arg0: i32) -> (i32, i32) {
    %c0_i32 = arith.constant 0 : i32
    %c0_i32_0 = arith.constant 0 : i32
    return %arg0, %c0_i32 : i32, i32
  }
  func.func @transform_1(%arg0: i32) -> (i32, i32) {
    %c0_i32 = arith.constant 0 : i32
    %0 = arith.subi %c0_i32, %arg0 : i32
    %c0_i32_0 = arith.constant 0 : i32
    %c0_i32_1 = arith.constant 0 : i32
    return %0, %c0_i32_0 : i32, i32
  }
  func.func @transform_2(%arg0: i32) -> (i32, i32) {
    %c0_i32 = arith.constant 0 : i32
    %c0_i32_0 = arith.constant 0 : i32
    return %arg0, %c0_i32 : i32, i32
  }
  func.func @transform_3(%arg0: i32) -> (i32, i32) {
    %c0_i32 = arith.constant 0 : i32
    %0 = arith.subi %c0_i32, %arg0 : i32
    %c0_i32_0 = arith.constant 0 : i32
    %c0_i32_1 = arith.constant 0 : i32
    return %0, %c0_i32_0 : i32, i32
  }
  func.func @transform_4(%arg0: i32) -> (i32, i32) {
    %c0_i32 = arith.constant 0 : i32
    %c0_i32_0 = arith.constant 0 : i32
    %c0_i32_1 = arith.constant 0 : i32
    return %c0_i32, %c0_i32_0 : i32, i32
  }
  func.func @transform_5(%arg0: i32) -> (i32, i32) {
    %c0_i32 = arith.constant 0 : i32
    %c0_i32_0 = arith.constant 0 : i32
    %c0_i32_1 = arith.constant 0 : i32
    return %c0_i32, %c0_i32_0 : i32, i32
  }
  func.func @transform_6(%arg0: i32) -> (i32, i32) {
    %c0_i32 = arith.constant 0 : i32
    %c0_i32_0 = arith.constant 0 : i32
    %c0_i32_1 = arith.constant 0 : i32
    return %c0_i32, %c0_i32_0 : i32, i32
  }
  func.func @transform_7(%arg0: i32) -> (i32, i32) {
    %c0_i32 = arith.constant 0 : i32
    %c0_i32_0 = arith.constant 0 : i32
    %c0_i32_1 = arith.constant 0 : i32
    return %c0_i32, %c0_i32_0 : i32, i32
  }
  func.func @transform_8(%arg0: i32) -> (i32, i32) {
    %c0_i32 = arith.constant 0 : i32
    %c0_i32_0 = arith.constant 0 : i32
    %c0_i32_1 = arith.constant 0 : i32
    return %c0_i32, %c0_i32_0 : i32, i32
  }
  func.func @transform_9(%arg0: i32) -> (i32, i32) {
    %c0_i32 = arith.constant 0 : i32
    %c0_i32_0 = arith.constant 0 : i32
    %c0_i32_1 = arith.constant 0 : i32
    return %c0_i32, %c0_i32_0 : i32, i32
  }
  func.func @transform_10(%arg0: i32) -> (i32, i32) {
    %c0_i32 = arith.constant 0 : i32
    %c0_i32_0 = arith.constant 0 : i32
    return %arg0, %c0_i32 : i32, i32
  }
  func.func @transform_11(%arg0: i32) -> (i32, i32) {
    %c0_i32 = arith.constant 0 : i32
    %0 = arith.subi %c0_i32, %arg0 : i32
    %c0_i32_0 = arith.constant 0 : i32
    %c0_i32_1 = arith.constant 0 : i32
    return %0, %c0_i32_0 : i32, i32
  }
}

</mosaic_0001>

<bundles_post_ra>
// kernel: tpu_custom_call.1
= control target key start
LH: loop header
LB: loop body
LE: loop exit
PB: predicated region body
PF: predicated region fallthrough
CT: control target
= control target key end

     0   :  { %17 = vsyncpa [#allocation6], 0  ;;  %s8107_s0 = inlined_call_operand.vmem [shape: bf16[128,32], index: 0, kind: input, shape index: {}]   ;;  %s8108_s1 = inlined_call_operand.vmem [shape: bf16[128,32], index: 1, kind: input, shape index: {}]   ;;  %s8109_s2 = inlined_call_operand.vmem [shape: f32[128,1], index: 2, kind: input, shape index: {}]   ;;  %s8110_s3 = inlined_call_operand.vmem [shape: f32[128,1], index: 3, kind: input, shape index: {}]   ;;  %s8111_s4 = inlined_call_operand.vmem [shape: bf16[32,512], index: 4, kind: input, shape index: {}]   ;;  %s8112_s5 = inlined_call_operand.vmem [shape: bf16[32,512], index: 5, kind: input, shape index: {}]   ;;  %s8113_s6 = inlined_call_operand.vmem [shape: f32[1,512], index: 6, kind: input, shape index: {}]   ;;  %s8114_s7 = inlined_call_operand.vmem [shape: f32[1,512], index: 7, kind: input, shape index: {}]   ;;  %s8115_s8 = inlined_call_operand.vmem [shape: bf16[128,512], index: 8, kind: input, shape index: {}]   ;;  %s8116_s9 = inlined_call_operand.hbm [shape: bf16[128,512], index: 9, kind: input, shape index: {}]   ;;  %s8117_s10 = inlined_call_operand.hbm [shape: bf16[128,128], index: 10, kind: output, shape index: {0}]   ;;  %s8118_s11 = inlined_call_operand.hbm [shape: bf16[128,128], index: 11, kind: output, shape index: {1}]  }
   0x1   :  { %18 = vsyncpa [#allocation7], 0 }
   0x2   :  { %19 = vsyncpa [#allocation10], 0  ;;  %s58_s19 = sshll.u32 %s8116_s9, 4  ;;  %s5447_s20 = smov [#allocation5]   ;;  %s59_s19 = int_to_ptr.hbm [resolvable:$true] %s58_s19 }
   0x3   :  { %s60_s21 = sshll.u32 %s5447_s20, 4  ;;  %s5448_s22 = smov 256   ;;  %s61_s21 = int_to_ptr.vmem [resolvable:$true] %s60_s21 }
   0x4   :  { %s5449_s23 = smov 16  }
   0x5   :  { %66 = dma.hbm_to_vmem [thread:$0]  %s59_s19, 4096, %s61_s21, [#allocation6], %s5448_s22, %s5448_s22, %s5449_s23  }
   0x6   :  { %5441 = dma.done.wait [#allocation6], 4096  }
   0x7   :  { %5442 = vsyncadd [#allocation6], 4294963200  ;;  %v4489_v0 = vld [vmem:[%s8111_s4 + $0x20] sm:$0xf]  ;;  %v4931_v1 = vld [vmem:[%s8111_s4 + $0x2c] sm:$0xf0] }
   0x8   :  { %v4929_v2 = vld [vmem:[%s8111_s4 + $0x24] sm:$0xf]  ;;  %v4490_v3 = vor.u32 %v4931_v1, %v4489_v0  ;;  %v4491_v4 = vld [vmem:[%s8111_s4 + $0x30] sm:$0xf0]  ;;  %v4497_v5 = vld [vmem:[%s8111_s4 + $0x28] sm:$0xf] }
   0x9   :  { %v4932_v6 = vld [vmem:[%s8111_s4 + $0x34] sm:$0xf0]  ;;  %v4494_v7 = vor.u32 %v4929_v2, %v4491_v4  ;;  %v4930_v9 = vld [vmem:[%s8111_s4 + $0x2c] sm:$0xf]  ;;  %v4499_v10 = vld [vmem:[%s8111_s4 + $0x38] sm:$0xf0] }
   0xa   :  { %v4498_v8 = vor.u32 %v4932_v6, %v4497_v5  ;;  %v4473_v11 = vld [vmem:[%s8111_s4] sm:$0xf]  ;;  %255 = vmatpush.bf16.msra.mxu0 %v4490_v3  ;;  %v4502_v12 = vor.u32 %v4930_v9, %v4499_v10  ;;  %v4927_v13 = vld [vmem:[%s8111_s4 + $0xc] sm:$0xf0]  ;;  %v4925_v14 = vld [vmem:[%s8111_s4 + $0x4] sm:$0xf] }
   0xb   :  { %v4475_v15 = vld [vmem:[%s8111_s4 + $0x10] sm:$0xf0]  ;;  %304 = vmatpush.bf16.msra.mxu1 %v4494_v7  ;;  %v4474_v16 = vor.u32 %v4927_v13, %v4473_v11  ;;  %v4481_v18 = vld [vmem:[%s8111_s4 + $0x8] sm:$0xf]  ;;  %v4928_v19 = vld [vmem:[%s8111_s4 + $0x14] sm:$0xf0] }
   0xc   :  { %353 = vmatpush.bf16.msra.mxu2 %v4498_v8  ;;  %v4478_v17 = vor.u32 %v4925_v14, %v4475_v15  ;;  %v4926_v20 = vld [vmem:[%s8111_s4 + $0xc] sm:$0xf]  ;;  %402 = vmatpush.bf16.msra.mxu3 %v4502_v12  ;;  %v4482_v21 = vor.u32 %v4928_v19, %v4481_v18  ;;  %v4483_v22 = vld [vmem:[%s8111_s4 + $0x18] sm:$0xf0]  ;;  %v4917_v23 = vld [vmem:[%s8107_s0] sm:$0xff]  ;;  %vm224_vm0 = vcmask 261120  }
   0xd   :  { %v4585_v24 = vld [vmem:[%s8112_s5 + $0x20] sm:$0xf]  ;;  %v4486_v25 = vor.u32 %v4926_v20, %v4483_v22  ;;  %v4947_v26 = vld [vmem:[%s8112_s5 + $0x2c] sm:$0xf0]  ;;  %v4945_v27 = vld [vmem:[%s8112_s5 + $0x24] sm:$0xf] }
   0xe   :  { %v4587_v28 = vld [vmem:[%s8112_s5 + $0x30] sm:$0xf0]  ;;  %256 = vmatpush.bf16.msra.mxu0 %v4474_v16  ;;  %v4586_v29 = vor.u32 %v4947_v26, %v4585_v24  ;;  %v4593_v31 = vld [vmem:[%s8112_s5 + $0x28] sm:$0xf]  ;;  %v4948_v32 = vld [vmem:[%s8112_s5 + $0x34] sm:$0xf0] }
   0xf   :  { %v4590_v30 = vor.u32 %v4945_v27, %v4587_v28  ;;  %v4946_v33 = vld [vmem:[%s8112_s5 + $0x2c] sm:$0xf]  ;;  %305 = vmatpush.bf16.msra.mxu1 %v4478_v17  ;;  %v4594_v34 = vor.u32 %v4948_v32, %v4593_v31  ;;  %v4595_v35 = vld [vmem:[%s8112_s5 + $0x38] sm:$0xf0]  ;;  %v4919_v38 = vld [vmem:[%s8107_s0 + $0x10] sm:$0xff]  ;;  %s4360_s19 = sshll.u32 %s8117_s10, 4  ;;  %s4361_s19 = int_to_ptr.hbm [resolvable:$true] %s4360_s19 }
  0x10   :  { %354 = vmatpush.bf16.msra.mxu2 %v4482_v21  ;;  %403 = vmatpush.bf16.msra.mxu3 %v4486_v25  ;;  %v4598_v36 = vor.u32 %v4946_v33, %v4595_v35  ;;  %v4918_v37 = vld [vmem:[%s8107_s0 + $0x8] sm:$0xff]  ;;  %v4569_v39 = vld [vmem:[%s8112_s5] sm:$0xf]  ;;  %v4943_v40 = vld [vmem:[%s8112_s5 + $0xc] sm:$0xf0]  ;;  %s5453_s10 = smov 64  }
  0x11   :  { %4503 = vmatmul.msk.bf16.vlgmr.msra.gmra.mxu0 %vm224_vm0, %v4917_v23  ;;  %v4941_v41 = vld [vmem:[%s8112_s5 + $0x4] sm:$0xf]  ;;  %v4570_v42 = vor.u32 %v4943_v40, %v4569_v39  ;;  %v4571_v43 = vld [vmem:[%s8112_s5 + $0x10] sm:$0xf0]  ;;  %v4577_v44 = vld [vmem:[%s8112_s5 + $0x8] sm:$0xf] }
  0x12   :  { %653 = vmatpush.bf16.msrb.mxu0 %v4586_v29  ;;  %4511 = vmatmul.msk.bf16.vlgmr.msra.gmra.mxu1 %vm224_vm0, %v4917_v23  ;;  %v4944_v45 = vld [vmem:[%s8112_s5 + $0x14] sm:$0xf0]  ;;  %v4574_v46 = vor.u32 %v4941_v41, %v4571_v43  ;;  %v4942_v48 = vld [vmem:[%s8112_s5 + $0xc] sm:$0xf]  ;;  %v4579_v49 = vld [vmem:[%s8112_s5 + $0x18] sm:$0xf0] }
  0x13   :  { %702 = vmatpush.bf16.msrb.mxu1 %v4590_v30  ;;  %4519 = vmatmul.msk.bf16.vlgmr.msra.gmra.mxu2 %vm224_vm0, %v4917_v23  ;;  %v4578_v47 = vor.u32 %v4944_v45, %v4577_v44  ;;  %v4582_v50 = vor.u32 %v4942_v48, %v4579_v49  ;;  %v4920_v51 = vld [vmem:[%s8107_s0 + $0x18] sm:$0xff]  ;;  %v4921_v52 = vld [vmem:[%s8107_s0 + $0x20] sm:$0xff]  ;;  %v4922_v53 = vld [vmem:[%s8107_s0 + $0x28] sm:$0xff]  ;;  %s5454_s20 = smov 4   ;;  %s4377_s24 = sshll.u32 %s8118_s11, 4  ;;  %s4378_s24 = int_to_ptr.hbm [resolvable:$true] %s4377_s24 }
  0x14   :  { %4527 = vmatmul.msk.bf16.vlgmr.msra.gmra.mxu3 %vm224_vm0, %v4917_v23  ;;  %751 = vmatpush.bf16.msrb.mxu2 %v4594_v34  ;;  %v4923_v54 = vld [vmem:[%s8107_s0 + $0x30] sm:$0xff]  ;;  %v4745_v55 = vld [vmem:[%s8115_s8 + $0xe0] sm:$0xf]  ;;  %v4977_v57 = vld [vmem:[%s8115_s8 + $0xe4] sm:$0xf] }
  0x15   :  { %800 = vmatpush.bf16.msrb.mxu3 %v4598_v36  ;;  %v4979_v56 = vld [vmem:[%s8115_s8 + $0xec] sm:$0xf0]  ;;  %v4747_v59 = vld [vmem:[%s8115_s8 + $0xf0] sm:$0xf0]  ;;  %v4753_v60 = vld [vmem:[%s8115_s8 + $0xe8] sm:$0xf] }
  0x16   :  { %654 = vmatpush.bf16.msrb.mxu0 %v4570_v42  ;;  %v5673_v58 = vor.u32 %v4979_v56, %v4745_v55  ;;  %v4980_v61 = vld [vmem:[%s8115_s8 + $0xf4] sm:$0xf0]  ;;  %v5684_v62 = vor.u32 %v4977_v57, %v4747_v59  ;;  %v4978_v0 = vld [vmem:[%s8115_s8 + $0xec] sm:$0xf]  ;;  %v4755_v1 = vld [vmem:[%s8115_s8 + $0xf8] sm:$0xf0] }
  0x17   :  { %703 = vmatpush.bf16.msrb.mxu1 %v4574_v46  ;;  %v5686_v63 = vor.u32 %v4980_v61, %v4753_v60  ;;  %v5697_v2 = vor.u32 %v4978_v0, %v4755_v1  ;;  %v4924_v3 = vld [vmem:[%s8107_s0 + $0x38] sm:$0xff]  ;;  %v4729_v4 = vld [vmem:[%s8115_s8 + $0xc0] sm:$0xf]  ;;  %v4975_v5 = vld [vmem:[%s8115_s8 + $0xcc] sm:$0xf0]  ;;  %s5455_s0 = smov [#allocation9]  }
  0x18   :  { %752 = vmatpush.bf16.msrb.mxu2 %v4578_v47  ;;  %v4973_v6 = vld [vmem:[%s8115_s8 + $0xc4] sm:$0xf]  ;;  %v5716_v7 = vor.u32 %v4975_v5, %v4729_v4  ;;  %v4731_v8 = vld [vmem:[%s8115_s8 + $0xd0] sm:$0xf0]  ;;  %v4737_v9 = vld [vmem:[%s8115_s8 + $0xc8] sm:$0xf] }
  0x19   :  { %801 = vmatpush.bf16.msrb.mxu3 %v4582_v50  ;;  %v4976_v10 = vld [vmem:[%s8115_s8 + $0xd4] sm:$0xf0]  ;;  %v5727_v11 = vor.u32 %v4973_v6, %v4731_v8  ;;  %v4974_v13 = vld [vmem:[%s8115_s8 + $0xcc] sm:$0xf]  ;;  %v4739_v14 = vld [vmem:[%s8115_s8 + $0xd8] sm:$0xf0] }
  0x1a   :  { %1146 = vmatpush.bf16.msra.mxu0 %v5673_v58  ;;  %v5729_v12 = vor.u32 %v4976_v10, %v4737_v9  ;;  %v5740_v15 = vor.u32 %v4974_v13, %v4739_v14  ;;  %v4933_v16 = vld [vmem:[%s8108_s1] sm:$0xff]  ;;  %v4971_v20 = vld [vmem:[%s8115_s8 + $0xac] sm:$0xf0]  ;;  %v4715_v23 = vld [vmem:[%s8115_s8 + $0xb0] sm:$0xf0]  ;;  %s4375_s21 = sshll.u32 %s5455_s0, 4  ;;  %s4376_s21 = int_to_ptr.vmem [resolvable:$true] %s4375_s21 }
  0x1b   :  { %1159 = vmatpush.bf16.msra.mxu1 %v5684_v62  ;;  %v4713_v19 = vld [vmem:[%s8115_s8 + $0xa0] sm:$0xf]  ;;  %v4969_v21 = vld [vmem:[%s8115_s8 + $0xa4] sm:$0xf]  ;;  %v4721_v24 = vld [vmem:[%s8115_s8 + $0xa8] sm:$0xf] }
  0x1c   :  { %1172 = vmatpush.bf16.msra.mxu2 %v5686_v63  ;;  %v5763_v22 = vor.u32 %v4971_v20, %v4713_v19  ;;  %v4972_v25 = vld [vmem:[%s8115_s8 + $0xb4] sm:$0xf0]  ;;  %v5776_v27 = vor.u32 %v4969_v21, %v4715_v23  ;;  %v4970_v32 = vld [vmem:[%s8115_s8 + $0xac] sm:$0xf]  ;;  %v4723_v33 = vld [vmem:[%s8115_s8 + $0xb8] sm:$0xf0] }
  0x1d   :  { %1185 = vmatpush.bf16.msra.mxu3 %v5697_v2  ;;  %v5778_v28 = vor.u32 %v4972_v25, %v4721_v24  ;;  %v5795_v34 = vor.u32 %v4970_v32, %v4723_v33  ;;  %v4934_v36 = vld [vmem:[%s8108_s1 + $0x8] sm:$0xff]  ;;  %v4697_v40 = vld [vmem:[%s8115_s8 + $0x80] sm:$0xf]  ;;  %v4967_v41 = vld [vmem:[%s8115_s8 + $0x8c] sm:$0xf0] }
  0x1e   :  { %1147 = vmatpush.bf16.msra.mxu0 %v5716_v7  ;;  %v4965_v42 = vld [vmem:[%s8115_s8 + $0x84] sm:$0xf]  ;;  %v5822_v43 = vor.u32 %v4967_v41, %v4697_v40  ;;  %v4699_v44 = vld [vmem:[%s8115_s8 + $0x90] sm:$0xf0]  ;;  %v4705_v45 = vld [vmem:[%s8115_s8 + $0x88] sm:$0xf] }
  0x1f   :  { %1160 = vmatpush.bf16.msra.mxu1 %v5727_v11  ;;  %v4968_v46 = vld [vmem:[%s8115_s8 + $0x94] sm:$0xf0]  ;;  %v5835_v48 = vor.u32 %v4965_v42, %v4699_v44  ;;  %v4935_v57 = vld [vmem:[%s8108_s1 + $0x10] sm:$0xff]  ;;  %v4681_v0 = vld [vmem:[%s8115_s8 + $0x60] sm:$0xf] }
  0x20   :  { %1173 = vmatpush.bf16.msra.mxu2 %v5729_v12  ;;  %v5837_v49 = vor.u32 %v4968_v46, %v4705_v45  ;;  %v4963_v1 = vld [vmem:[%s8115_s8 + $0x6c] sm:$0xf0]  ;;  %v4683_v5 = vld [vmem:[%s8115_s8 + $0x70] sm:$0xf0]  ;;  %v4689_v6 = vld [vmem:[%s8115_s8 + $0x68] sm:$0xf] }
  0x21   :  { %4504 = vmatmul.msk.bf16.gmra.mxu0 %vm224_vm0, %v4918_v37  ;;  %1186 = vmatpush.bf16.msra.mxu3 %v5740_v15  ;;  %v5881_v4 = vor.u32 %v4963_v1, %v4681_v0  ;;  %v4964_v8 = vld [vmem:[%s8115_s8 + $0x74] sm:$0xf0]  ;;  %v4962_v20 = vld [vmem:[%s8115_s8 + $0x6c] sm:$0xf]  ;;  %v4691_v21 = vld [vmem:[%s8115_s8 + $0x78] sm:$0xf0] }
  0x22   :  { %4512 = vmatmul.msk.bf16.gmra.mxu1 %vm224_vm0, %v4918_v37  ;;  %1148 = vmatpush.bf16.msra.mxu0 %v5763_v22  ;;  %v5896_v13 = vor.u32 %v4964_v8, %v4689_v6  ;;  %v5913_v23 = vor.u32 %v4962_v20, %v4691_v21  ;;  %v4936_v25 = vld [vmem:[%s8108_s1 + $0x18] sm:$0xff]  ;;  %v4665_v40 = vld [vmem:[%s8115_s8 + $0x40] sm:$0xf]  ;;  %v4959_v41 = vld [vmem:[%s8115_s8 + $0x4c] sm:$0xf0] }
  0x23   :  { %4520 = vmatmul.msk.bf16.gmra.mxu2 %vm224_vm0, %v4918_v37  ;;  %1161 = vmatpush.bf16.msra.mxu1 %v5776_v27  ;;  %v4957_v42 = vld [vmem:[%s8115_s8 + $0x44] sm:$0xf]  ;;  %v5940_v44 = vor.u32 %v4959_v41, %v4665_v40  ;;  %v4667_v45 = vld [vmem:[%s8115_s8 + $0x50] sm:$0xf0]  ;;  %v4673_v46 = vld [vmem:[%s8115_s8 + $0x48] sm:$0xf] }
  0x24   :  { %4528 = vmatmul.msk.bf16.gmra.mxu3 %vm224_vm0, %v4918_v37  ;;  %1174 = vmatpush.bf16.msra.mxu2 %v5778_v28  ;;  %v1462_v6 = vld [vmem:[%s8109_s2] sm:$0xff]  ;;  %v4958_v8 = vld [vmem:[%s8115_s8 + $0x4c] sm:$0xf]  ;;  %v4675_v20 = vld [vmem:[%s8115_s8 + $0x58] sm:$0xf0] }
  0x25   :  { %1187 = vmatpush.bf16.msra.mxu3 %v5795_v34  ;;  %vm1463_vm1 = vcmp.gt.f32.partialorder %v1462_v6, 0.5  ;;  %v5975_v21 = vor.u32 %v4958_v8, %v4675_v20  ;;  %v4887_v6 = vld [vmem:[%s8110_s3 + $0x78] sm:$0xff]  ;;  %v4649_v20 = vld [vmem:[%s8115_s8 + $0x20] sm:$0xf] }
  0x26   :  { %1149 = vmatpush.bf16.msra.mxu0 %v5822_v43  ;;  %vm1466_vm2 = vcmp.gt.f32.partialorder %v4887_v6, 0.5  ;;  %v4953_v6 = vld [vmem:[%s8115_s8 + $0x24] sm:$0xf] }
  0x27   :  { %1162 = vmatpush.bf16.msra.mxu1 %v5835_v48 }
  0x28   :  { %1175 = vmatpush.bf16.msra.mxu2 %v5837_v49 }
  0x2a   :  { %1150 = vmatpush.bf16.msra.mxu0 %v5881_v4 }
  0x2c   :  { %1176 = vmatpush.bf16.msra.mxu2 %v5896_v13 }
  0x2e   :  { %1151 = vmatpush.bf16.msra.mxu0 %v5940_v44 }
  0x31   :  { %4505 = vmatmul.msk.bf16.gmra.mxu0 %vm224_vm0, %v4919_v38 }
  0x32   :  { %4513 = vmatmul.msk.bf16.gmra.mxu1 %vm224_vm0, %v4919_v38 }
  0x33   :  { %4521 = vmatmul.msk.bf16.gmra.mxu2 %vm224_vm0, %v4919_v38 }
  0x34   :  { %4529 = vmatmul.msk.bf16.gmra.mxu3 %vm224_vm0, %v4919_v38 }
  0x41   :  { %4506 = vmatmul.msk.bf16.gmra.mxu0 %vm224_vm0, %v4920_v51 }
  0x42   :  { %4514 = vmatmul.msk.bf16.gmra.mxu1 %vm224_vm0, %v4920_v51 }
  0x43   :  { %4522 = vmatmul.msk.bf16.gmra.mxu2 %vm224_vm0, %v4920_v51 }
  0x44   :  { %4530 = vmatmul.msk.bf16.gmra.mxu3 %vm224_vm0, %v4920_v51 }
  0x51   :  { %4507 = vmatmul.msk.bf16.gmra.mxu0 %vm224_vm0, %v4921_v52 }
  0x52   :  { %4515 = vmatmul.msk.bf16.gmra.mxu1 %vm224_vm0, %v4921_v52 }
  0x53   :  { %4523 = vmatmul.msk.bf16.gmra.mxu2 %vm224_vm0, %v4921_v52 }
  0x54   :  { %4531 = vmatmul.msk.bf16.gmra.mxu3 %vm224_vm0, %v4921_v52 }
  0x61   :  { %4508 = vmatmul.msk.bf16.gmra.mxu0 %vm224_vm0, %v4922_v53 }
  0x62   :  { %4516 = vmatmul.msk.bf16.gmra.mxu1 %vm224_vm0, %v4922_v53 }
  0x63   :  { %4524 = vmatmul.msk.bf16.gmra.mxu2 %vm224_vm0, %v4922_v53 }
  0x64   :  { %4532 = vmatmul.msk.bf16.gmra.mxu3 %vm224_vm0, %v4922_v53  ;;  %v4966_v53 = vld [vmem:[%s8115_s8 + $0x8c] sm:$0xf] }
  0x71   :  { %4509 = vmatmul.msk.bf16.gmra.mxu0 %vm224_vm0, %v4923_v54 }
  0x72   :  { %4517 = vmatmul.msk.bf16.gmra.mxu1 %vm224_vm0, %v4923_v54 }
  0x73   :  { %4525 = vmatmul.msk.bf16.gmra.mxu2 %vm224_vm0, %v4923_v54 }
  0x74   :  { %4533 = vmatmul.msk.bf16.gmra.mxu3 %vm224_vm0, %v4923_v54  ;;  %v4707_v54 = vld [vmem:[%s8115_s8 + $0x98] sm:$0xf0] }
  0x75   :  { %v5854_v55 = vor.u32 %v4966_v53, %v4707_v54  ;;  %v4960_v53 = vld [vmem:[%s8115_s8 + $0x54] sm:$0xf0] }
  0x76   :  { %v5955_v0 = vor.u32 %v4960_v53, %v4673_v46 }
  0x77   :  { %1188 = vmatpush.bf16.msra.mxu3 %v5854_v55 }
  0x78   :  { %1177 = vmatpush.bf16.msra.mxu2 %v5955_v0 }
  0x7b   :  { %1189 = vmatpush.bf16.msra.mxu3 %v5913_v23 }
  0x7f   :  { %1190 = vmatpush.bf16.msra.mxu3 %v5975_v21 }
  0x81   :  { %4510 = vmatmul.msk.bf16.gmra.mxu0 %vm224_vm0, %v4924_v3 }
  0x82   :  { %4518 = vmatmul.msk.bf16.gmra.mxu1 %vm224_vm0, %v4924_v3 }
  0x83   :  { %4526 = vmatmul.msk.bf16.gmra.mxu2 %vm224_vm0, %v4924_v3 }
  0x84   :  { %4534 = vmatmul.msk.bf16.gmra.mxu3 %vm224_vm0, %v4924_v3  ;;  %v4961_v3 = vld [vmem:[%s8115_s8 + $0x64] sm:$0xf] }
  0x85   :  { %v5894_v10 = vor.u32 %v4961_v3, %v4683_v5 }
  0x87   :  { %1163 = vmatpush.bf16.msra.mxu1 %v5894_v10 }
  0x8e   :  { %v5746_v17 = vpop.f32.mrf.mxu0 }
  0x8f   :  { %8212 = vst [vmem:[#allocation14_spill] sm:$0xff] %v5746_v17  ;;  %v5748_v18 = vpop.f32.mrf.mxu1  ;;  %v4989_v17 = vld [vmem:[#allocation5 + $0x44] sm:$0xf] }
  0x90   :  { %8213 = vst [vmem:[#allocation15_spill] sm:$0xff] %v5748_v18 }
  0x91   :  { %4599 = vmatmul.msk.bf16.vlgmr.msrb.gmra.mxu0 %vm224_vm0, %v4933_v16 }
  0x92   :  { %4607 = vmatmul.msk.bf16.vlgmr.msrb.gmra.mxu1 %vm224_vm0, %v4933_v16 }
  0x93   :  { %4615 = vmatmul.msk.bf16.vlgmr.msrb.gmra.mxu2 %vm224_vm0, %v4933_v16 }
  0x94   :  { %4623 = vmatmul.msk.bf16.vlgmr.msrb.gmra.mxu3 %vm224_vm0, %v4933_v16 }
  0x96   :  { %v5774_v26 = vpop.f32.mrf.mxu2  ;;  %v5782_v30 = vpop.f32.mrf.mxu0 }
  0x97   :  { %8214 = vst [vmem:[#allocation16_spill] sm:$0xff] %v5774_v26  ;;  %v5780_v29 = vpop.f32.mrf.mxu3  ;;  %v5785_v31 = vpop.f32.mrf.mxu1  ;;  %v4819_v26 = vld [vmem:[#allocation5 + $0x78] sm:$0xf0] }
  0x98   :  { %8215 = vst [vmem:[#allocation17_spill] sm:$0xff] %v5780_v29 }
  0x99   :  { %8216 = vst [vmem:[#allocation18_spill] sm:$0xff] %v5782_v30  ;;  %v4817_v30 = vld [vmem:[#allocation5 + $0x68] sm:$0xf] }
  0x9a   :  { %8217 = vst [vmem:[#allocation19_spill] sm:$0xff] %v5785_v31 }
  0x9e   :  { %v5798_v35 = vpop.f32.mrf.mxu2  ;;  %v5805_v38 = vpop.f32.mrf.mxu0 }
  0x9f   :  { %8218 = vst [vmem:[#allocation20_spill] sm:$0xff] %v5798_v35  ;;  %v5803_v37 = vpop.f32.mrf.mxu3  ;;  %v5807_v39 = vpop.f32.mrf.mxu1  ;;  %v4833_v35 = vld [vmem:[#allocation5 + $0x88] sm:$0xf] }
  0xa0   :  { %8219 = vst [vmem:[#allocation21_spill] sm:$0xff] %v5803_v37  ;;  %v4827_v37 = vld [vmem:[#allocation5 + $0x90] sm:$0xf0] }
  0xa1   :  { %8220 = vst [vmem:[#allocation22_spill] sm:$0xff] %v5805_v38  ;;  %4600 = vmatmul.msk.bf16.gmra.mxu0 %vm224_vm0, %v4934_v36 }
  0xa2   :  { %8221 = vst [vmem:[#allocation23_spill] sm:$0xff] %v5807_v39  ;;  %4608 = vmatmul.msk.bf16.gmra.mxu1 %vm224_vm0, %v4934_v36 }
  0xa3   :  { %4616 = vmatmul.msk.bf16.gmra.mxu2 %vm224_vm0, %v4934_v36 }
  0xa4   :  { %4624 = vmatmul.msk.bf16.gmra.mxu3 %vm224_vm0, %v4934_v36 }
  0xa6   :  { %v5833_v47 = vpop.f32.mrf.mxu2  ;;  %v5841_v51 = vpop.f32.mrf.mxu0 }
  0xa7   :  { %8222 = vst [vmem:[#allocation24_spill] sm:$0xff] %v5833_v47  ;;  %v5839_v50 = vpop.f32.mrf.mxu3  ;;  %v5844_v52 = vpop.f32.mrf.mxu1 }
  0xa8   :  { %8223 = vst [vmem:[#allocation25_spill] sm:$0xff] %v5839_v50  ;;  %v5004_v50 = vld [vmem:[#allocation5 + $0xb4] sm:$0xf0] }
  0xa9   :  { %8224 = vst [vmem:[#allocation26_spill] sm:$0xff] %v5841_v51 }
  0xaa   :  { %8225 = vst [vmem:[#allocation27_spill] sm:$0xff] %v5844_v52 }
  0xae   :  { %v5857_v56 = vpop.f32.mrf.mxu2  ;;  %v5864_v60 = vpop.f32.mrf.mxu0 }
  0xaf   :  { %8226 = vst [vmem:[#allocation28_spill] sm:$0xff] %v5857_v56  ;;  %v5862_v59 = vpop.f32.mrf.mxu3  ;;  %v5866_v61 = vpop.f32.mrf.mxu1 }
  0xb0   :  { %8227 = vst [vmem:[#allocation29_spill] sm:$0xff] %v5862_v59  ;;  %v4865_v59 = vld [vmem:[#allocation5 + $0xc8] sm:$0xf] }
  0xb1   :  { %8228 = vst [vmem:[#allocation30_spill] sm:$0xff] %v5864_v60  ;;  %4601 = vmatmul.msk.bf16.gmra.mxu0 %vm224_vm0, %v4935_v57 }
  0xb2   :  { %8229 = vst [vmem:[#allocation31_spill] sm:$0xff] %v5866_v61  ;;  %4609 = vmatmul.msk.bf16.gmra.mxu1 %vm224_vm0, %v4935_v57 }
  0xb3   :  { %4617 = vmatmul.msk.bf16.gmra.mxu2 %vm224_vm0, %v4935_v57 }
  0xb4   :  { %4625 = vmatmul.msk.bf16.gmra.mxu3 %vm224_vm0, %v4935_v57  ;;  %v5953_v57 = vor.u32 %v4957_v42, %v4667_v45  ;;  %v4937_v42 = vld [vmem:[%s8108_s1 + $0x20] sm:$0xff] }
  0xb6   :  { %v5892_v9 = vpop.f32.mrf.mxu2  ;;  %v5900_v16 = vpop.f32.mrf.mxu0  ;;  %1164 = vmatpush.bf16.msra.mxu1 %v5953_v57 }
  0xb7   :  { %8230 = vst [vmem:[#allocation32_spill] sm:$0xff] %v5892_v9  ;;  %v5898_v14 = vpop.f32.mrf.mxu3  ;;  %v5903_v19 = vpop.f32.mrf.mxu1  ;;  %v4883_v9 = vld [vmem:[#allocation5 + $0xf8] sm:$0xf0] }
  0xb8   :  { %8231 = vst [vmem:[#allocation33_spill] sm:$0xff] %v5898_v14  ;;  %v5010_v14 = vld [vmem:[#allocation5 + $0xec] sm:$0xf] }
  0xb9   :  { %8232 = vst [vmem:[#allocation34_spill] sm:$0xff] %v5900_v16  ;;  %v4875_v16 = vld [vmem:[#allocation5 + $0xf0] sm:$0xf0] }
  0xba   :  { %8233 = vst [vmem:[#allocation35_spill] sm:$0xff] %v5903_v19  ;;  %v5009_v19 = vld [vmem:[#allocation5 + $0xe4] sm:$0xf] }
  0xbe   :  { %v5916_v24 = vpop.f32.mrf.mxu2  ;;  %v5923_v33 = vpop.f32.mrf.mxu0 }
  0xbf   :  { %8234 = vst [vmem:[#allocation36_spill] sm:$0xff] %v5916_v24  ;;  %v5921_v32 = vpop.f32.mrf.mxu3  ;;  %v5925_v36 = vpop.f32.mrf.mxu1 }
  0xc0   :  { %8235 = vst [vmem:[#allocation37_spill] sm:$0xff] %v5921_v32 }
  0xc1   :  { %8236 = vst [vmem:[#allocation38_spill] sm:$0xff] %v5923_v33  ;;  %4602 = vmatmul.msk.bf16.gmra.mxu0 %vm224_vm0, %v4936_v25  ;;  %v5011_v33 = vld [vmem:[#allocation5 + $0xec] sm:$0xf0] }
  0xc2   :  { %8237 = vst [vmem:[#allocation39_spill] sm:$0xff] %v5925_v36  ;;  %4610 = vmatmul.msk.bf16.gmra.mxu1 %vm224_vm0, %v4936_v25 }
  0xc3   :  { %4618 = vmatmul.msk.bf16.gmra.mxu2 %vm224_vm0, %v4936_v25 }
  0xc4   :  { %4626 = vmatmul.msk.bf16.gmra.mxu3 %vm224_vm0, %v4936_v25  ;;  %v8119_v25 = vmov 0  }
  0xc5   :  { %5046 = vset.pattern.permute.xlu0 %v8119_v25  ;;  %v1467_v40 = vsel %vm1463_vm1, 1, %v8119_v25  ;;  %5047 = vset.pattern.permute.xlu1 %v8119_v25  ;;  %v1474_v8 = vsel %vm1466_vm2, 1, %v8119_v25 }
  0xc6   :  { %v5951_v54 = vpop.f32.mrf.mxu2  ;;  %v5959_v3 = vpop.f32.mrf.mxu0  ;;  %1469 = vperm.xlu0 %5046, %v1467_v40   ;;  %5048 = vset.pattern.permute.xlu2 %v8119_v25  ;;  %v4955_v40 = vld [vmem:[%s8115_s8 + $0x2c] sm:$0xf0] }
  0xc7   :  { %8238 = vst [vmem:[#allocation40_spill] sm:$0xff] %v5951_v54  ;;  %v5957_v1 = vpop.f32.mrf.mxu3  ;;  %v5962_v5 = vpop.f32.mrf.mxu1  ;;  %v6010_v25 = vor.u32 %v4955_v40, %v4649_v20 }
  0xc8   :  { %8239 = vst [vmem:[#allocation41_spill] sm:$0xff] %v5957_v1 }
  0xc9   :  { %8240 = vst [vmem:[#allocation42_spill] sm:$0xff] %v5959_v3  ;;  %1152 = vmatpush.bf16.msra.mxu0 %v6010_v25 }
  0xca   :  { %8241 = vst [vmem:[#allocation43_spill] sm:$0xff] %v5962_v5 }
  0xce   :  { %v5982_v41 = vpop.f32.mrf.mxu2  ;;  %v5989_v46 = vpop.f32.mrf.mxu0  ;;  %1476 = vperm.xlu0 %5046, %v1474_v8   ;;  %v4956_v8 = vld [vmem:[%s8115_s8 + $0x34] sm:$0xf0] }
  0xcf   :  { %8242 = vst [vmem:[#allocation44_spill] sm:$0xff] %v5982_v41  ;;  %v5987_v45 = vpop.f32.mrf.mxu3  ;;  %v5991_v53 = vpop.f32.mrf.mxu1 }
  0xd0   :  { %8243 = vst [vmem:[#allocation45_spill] sm:$0xff] %v5987_v45 }
  0xd1   :  { %8244 = vst [vmem:[#allocation46_spill] sm:$0xff] %v5989_v46  ;;  %4603 = vmatmul.msk.bf16.gmra.mxu0 %vm224_vm0, %v4937_v42 }
  0xd2   :  { %8245 = vst [vmem:[#allocation47_spill] sm:$0xff] %v5991_v53  ;;  %4611 = vmatmul.msk.bf16.gmra.mxu1 %vm224_vm0, %v4937_v42  ;;  %v4651_v53 = vld [vmem:[%s8115_s8 + $0x30] sm:$0xf0] }
  0xd3   :  { %4619 = vmatmul.msk.bf16.gmra.mxu2 %vm224_vm0, %v4937_v42  ;;  %v6023_v45 = vor.u32 %v4953_v6, %v4651_v53  ;;  %v4954_v53 = vld [vmem:[%s8115_s8 + $0x2c] sm:$0xf]  ;;  %v4659_v6 = vld [vmem:[%s8115_s8 + $0x38] sm:$0xf0] }
  0xd4   :  { %4627 = vmatmul.msk.bf16.gmra.mxu3 %vm224_vm0, %v4937_v42  ;;  %v4657_v42 = vld [vmem:[%s8115_s8 + $0x28] sm:$0xf] }
  0xd5   :  { %v6025_v41 = vor.u32 %v4956_v8, %v4657_v42  ;;  %1165 = vmatpush.bf16.msra.mxu1 %v6023_v45  ;;  %v6045_v42 = vor.u32 %v4954_v53, %v4659_v6  ;;  %v8250_v8 = vmov 0   ;;  %v4951_v53 = vld [vmem:[%s8115_s8 + $0xc] sm:$0xf0] }
  0xd6   :  { %v6021_v46 = vpop.f32.mrf.mxu2  ;;  %v6029_v40 = vpop.f32.mrf.mxu0 }
  0xd7   :  { %8246 = vst [vmem:[#allocation48_spill] sm:$0xff] %v6021_v46  ;;  %v6027_v20 = vpop.f32.mrf.mxu3  ;;  %v6032_v5 = vpop.f32.mrf.mxu1  ;;  %1178 = vmatpush.bf16.msra.mxu2 %v6025_v41  ;;  %v4892_v46 = vld [vmem:[%s8109_s2 + $0x18] sm:$0xff]  ;;  %1191 = vmatpush.bf16.msra.mxu3 %v6045_v42 }
  0xd8   :  { %8247 = vst [vmem:[#allocation49_spill] sm:$0xff] %v6027_v20  ;;  %vm2038_vm3 = vcmp.gt.f32.partialorder %v4892_v46, 0.5  ;;  %v4938_v20 = vld [vmem:[%s8108_s1 + $0x28] sm:$0xff]  ;;  %v4895_v46 = vld [vmem:[%s8110_s3 + $0x58] sm:$0xff] }
  0xd9   :  { %8248 = vst [vmem:[#allocation50_spill] sm:$0xff] %v6029_v40  ;;  %vm2233_vm4 = vcmp.gt.f32.partialorder %v4895_v46, 0.5  ;;  %v4635_v46 = vld [vmem:[%s8115_s8 + $0x10] sm:$0xf0] }
  0xda   :  { %8249 = vst [vmem:[#allocation51_spill] sm:$0xff] %v6032_v5  ;;  %v2042_v5 = vsel %vm2038_vm3, 1, %v8250_v8  ;;  %v2241_v6 = vsel %vm2233_vm4, 1, %v8250_v8 }
  0xdb   :  { %2044 = vperm.xlu0 %5046, %v2042_v5   ;;  %v4633_v5 = vld [vmem:[%s8115_s8] sm:$0xf] }
  0xde   :  { %v6049_v40 = vpop.f32.mrf.mxu2  ;;  %v6056_v1 = vpop.f32.mrf.mxu0 }
  0xdf   :  { %8251 = vst [vmem:[#allocation52_spill] sm:$0xff] %v6049_v40  ;;  %v6054_v3 = vpop.f32.mrf.mxu3  ;;  %v6058_v54 = vpop.f32.mrf.mxu1  ;;  %v4641_v40 = vld [vmem:[%s8115_s8 + $0x8] sm:$0xf] }
  0xe0   :  { %8252 = vst [vmem:[#allocation53_spill] sm:$0xff] %v6054_v3 }
  0xe1   :  { %8253 = vst [vmem:[#allocation54_spill] sm:$0xff] %v6056_v1  ;;  %4604 = vmatmul.msk.bf16.gmra.mxu0 %vm224_vm0, %v4938_v20  ;;  %v6071_v1 = vor.u32 %v4951_v53, %v4633_v5  ;;  %v4952_v5 = vld [vmem:[%s8115_s8 + $0x14] sm:$0xf0]  ;;  %v4950_v53 = vld [vmem:[%s8115_s8 + $0xc] sm:$0xf] }
  0xe2   :  { %8254 = vst [vmem:[#allocation55_spill] sm:$0xff] %v6058_v54  ;;  %v4949_v54 = vld [vmem:[%s8115_s8 + $0x4] sm:$0xf]  ;;  %4612 = vmatmul.msk.bf16.gmra.mxu1 %vm224_vm0, %v4938_v20  ;;  %v6093_v36 = vor.u32 %v4952_v5, %v4641_v40  ;;  %v6107_v40 = vor.u32 %v5009_v19, %v4875_v16  ;;  %v5012_v5 = vld [vmem:[#allocation5 + $0xf4] sm:$0xf0] }
  0xe3   :  { %4620 = vmatmul.msk.bf16.gmra.mxu2 %vm224_vm0, %v4938_v20  ;;  %v6081_v3 = vor.u32 %v4949_v54, %v4635_v46  ;;  %2243 = vperm.xlu0 %5046, %v2241_v6   ;;  %v4643_v54 = vld [vmem:[%s8115_s8 + $0x18] sm:$0xf0]  ;;  %v4873_v46 = vld [vmem:[#allocation5 + $0xe0] sm:$0xf] }
  0xe4   :  { %4628 = vmatmul.msk.bf16.gmra.mxu3 %vm224_vm0, %v4938_v20  ;;  %1153 = vmatpush.bf16.msra.mxu0 %v6071_v1  ;;  %v6100_v32 = vor.u32 %v4950_v53, %v4643_v54  ;;  %v6102_v24 = vor.u32 %v5011_v33, %v4873_v46  ;;  %v4881_v20 = vld [vmem:[#allocation5 + $0xe8] sm:$0xf]  ;;  %v6117_v53 = vor.u32 %v5010_v14, %v4883_v9  ;;  %v4857_v54 = vld [vmem:[#allocation5 + $0xc0] sm:$0xf]  ;;  %v5007_v46 = vld [vmem:[#allocation5 + $0xcc] sm:$0xf0] }
  0xe5   :  { %1166 = vmatpush.bf16.msra.mxu1 %v6081_v3  ;;  %1179 = vmatpush.bf16.msra.mxu2 %v6093_v36  ;;  %v6115_v33 = vor.u32 %v5012_v5, %v4881_v20  ;;  %v6122_v19 = vor.u32 %v5007_v46, %v4857_v54  ;;  %v5006_v14 = vld [vmem:[#allocation5 + $0xcc] sm:$0xf]  ;;  %v4867_v5 = vld [vmem:[#allocation5 + $0xd8] sm:$0xf0]  ;;  %v4841_v54 = vld [vmem:[#allocation5 + $0xa0] sm:$0xf] }
  0xe6   :  { %v6104_v6 = vpop.f32.mrf.mxu2  ;;  %v6111_v60 = vpop.f32.mrf.mxu0  ;;  %1192 = vmatpush.bf16.msra.mxu3 %v6100_v32  ;;  %8259 = vst [vmem:[#allocation60_spill] sm:$0xff] %v6117_v53  ;;  %v6133_v56 = vor.u32 %v5006_v14, %v4867_v5  ;;  %v5003_v46 = vld [vmem:[#allocation5 + $0xac] sm:$0xf0]  ;;  %v5002_v14 = vld [vmem:[#allocation5 + $0xac] sm:$0xf] }
  0xe7   :  { %8255 = vst [vmem:[#allocation56_spill] sm:$0xff] %v6104_v6  ;;  %v6109_v61 = vpop.f32.mrf.mxu3  ;;  %v5005_v6 = vld [vmem:[#allocation5 + $0xc4] sm:$0xf]  ;;  %v6119_v16 = vpop.f32.mrf.mxu1  ;;  %v6137_v51 = vor.u32 %v5003_v46, %v4841_v54  ;;  %v4851_v54 = vld [vmem:[#allocation5 + $0xb8] sm:$0xf0] }
  0xe8   :  { %8256 = vst [vmem:[#allocation57_spill] sm:$0xff] %v6109_v61  ;;  %1370 = vmatpush.bf16.msrb.mxu0 %v6102_v24  ;;  %v4859_v61 = vld [vmem:[#allocation5 + $0xd0] sm:$0xf0]  ;;  %v6151_v47 = vor.u32 %v5002_v14, %v4851_v54  ;;  %v4998_v14 = vld [vmem:[#allocation5 + $0x8c] sm:$0xf] }
  0xe9   :  { %8257 = vst [vmem:[#allocation58_spill] sm:$0xff] %v6111_v60  ;;  %1383 = vmatpush.bf16.msrb.mxu1 %v6107_v40  ;;  %v5008_v60 = vld [vmem:[#allocation5 + $0xd4] sm:$0xf0]  ;;  %1396 = vmatpush.bf16.msrb.mxu2 %v6115_v33  ;;  %v6126_v20 = vor.u32 %v5005_v6, %v4859_v61  ;;  %v5001_v61 = vld [vmem:[#allocation5 + $0xa4] sm:$0xf] }
  0xea   :  { %8258 = vst [vmem:[#allocation59_spill] sm:$0xff] %v6115_v33  ;;  %1409 = vmatpush.bf16.msrb.mxu3 %v6117_v53  ;;  %v6128_v9 = vor.u32 %v5008_v60, %v4865_v59  ;;  %v4843_v59 = vld [vmem:[#allocation5 + $0xb0] sm:$0xf0]  ;;  %v4849_v6 = vld [vmem:[#allocation5 + $0xa8] sm:$0xf] }
  0xeb   :  { %8260 = vst [vmem:[#allocation61_spill] sm:$0xff] %v6119_v16  ;;  %v4898_v16 = vld [vmem:[%s8109_s2 + $0x30] sm:$0xff]  ;;  %v6140_v60 = vor.u32 %v5001_v61, %v4843_v59  ;;  %v6147_v5 = vor.u32 %v5004_v50, %v4849_v6  ;;  %v4997_v59 = vld [vmem:[#allocation5 + $0x84] sm:$0xf]  ;;  %v5000_v6 = vld [vmem:[#allocation5 + $0x94] sm:$0xf0] }
  0xec   :  { %8261 = vst [vmem:[#allocation62_spill] sm:$0xff] %v6122_v19  ;;  %vm2614_vm5 = vcmp.gt.f32.partialorder %v4898_v16, 0.5  ;;  %1371 = vmatpush.bf16.msrb.mxu0 %v6122_v19  ;;  %v4939_v16 = vld [vmem:[%s8108_s1 + $0x30] sm:$0xff]  ;;  %v6165_v54 = vor.u32 %v4997_v59, %v4827_v37 }
  0xed   :  { %8262 = vst [vmem:[#allocation63_spill] sm:$0xff] %v6126_v20  ;;  %v2618_v52 = vsel %vm2614_vm5, 1, %v8250_v8  ;;  %1384 = vmatpush.bf16.msrb.mxu1 %v6126_v20  ;;  %1397 = vmatpush.bf16.msrb.mxu2 %v6128_v9  ;;  %v4999_v61 = vld [vmem:[#allocation5 + $0x8c] sm:$0xf0]  ;;  %v4811_v59 = vld [vmem:[#allocation5 + $0x70] sm:$0xf0] }
  0xee   :  { %8263 = vst [vmem:[#allocation64_spill] sm:$0xff] %v6128_v9  ;;  %2620 = vperm.xlu0 %5046, %v2618_v52   ;;  %1410 = vmatpush.bf16.msrb.mxu3 %v6133_v56  ;;  %v6149_v46 = vpop.f32.mrf.mxu2  ;;  %v4825_v52 = vld [vmem:[#allocation5 + $0x80] sm:$0xf]  ;;  %v6155_v38 = vpop.f32.mrf.mxu0 }
  0xef   :  { %8264 = vst [vmem:[#allocation65_spill] sm:$0xff] %v6133_v56  ;;  %v6153_v39 = vpop.f32.mrf.mxu3  ;;  %v6158_v31 = vpop.f32.mrf.mxu1  ;;  %v6161_v50 = vor.u32 %v4999_v61, %v4825_v52  ;;  %v4809_v52 = vld [vmem:[#allocation5 + $0x60] sm:$0xf]  ;;  %v4995_v61 = vld [vmem:[#allocation5 + $0x6c] sm:$0xf0] }
  0xf0   :  { %8265 = vst [vmem:[#allocation66_spill] sm:$0xff] %v6137_v51  ;;  %1372 = vmatpush.bf16.msrb.mxu0 %v6137_v51 }
  0xf1   :  { %8266 = vst [vmem:[#allocation67_spill] sm:$0xff] %v6140_v60  ;;  %1385 = vmatpush.bf16.msrb.mxu1 %v6140_v60  ;;  %1398 = vmatpush.bf16.msrb.mxu2 %v6147_v5 }
  0xf2   :  { %8267 = vst [vmem:[#allocation68_spill] sm:$0xff] %v6147_v5  ;;  %1411 = vmatpush.bf16.msrb.mxu3 %v6151_v47  ;;  %4605 = vmatmul.msk.bf16.gmra.mxu0 %vm224_vm0, %v4939_v16 }
  0xf3   :  { %8268 = vst [vmem:[#allocation69_spill] sm:$0xff] %v6149_v46  ;;  %v4901_v46 = vld [vmem:[%s8110_s3 + $0x40] sm:$0xff]  ;;  %4613 = vmatmul.msk.bf16.gmra.mxu1 %vm224_vm0, %v4939_v16  ;;  %4621 = vmatmul.msk.bf16.gmra.mxu2 %vm224_vm0, %v4939_v16 }
  0xf4   :  { %8269 = vst [vmem:[#allocation70_spill] sm:$0xff] %v6151_v47  ;;  %vm2809_vm6 = vcmp.gt.f32.partialorder %v4901_v46, 0.5  ;;  %4629 = vmatmul.msk.bf16.gmra.mxu3 %vm224_vm0, %v4939_v16  ;;  %1373 = vmatpush.bf16.msrb.mxu0 %v6161_v50 }
  0xf5   :  { %8270 = vst [vmem:[#allocation71_spill] sm:$0xff] %v6153_v39  ;;  %v6167_v39 = vor.u32 %v5000_v6, %v4833_v35  ;;  %v2817_v37 = vsel %vm2809_vm6, 1, %v8250_v8  ;;  %v4993_v35 = vld [vmem:[#allocation5 + $0x64] sm:$0xf]  ;;  %v6180_v6 = vor.u32 %v4995_v61, %v4809_v52  ;;  %1386 = vmatpush.bf16.msrb.mxu1 %v6165_v54  ;;  %v4793_v52 = vld [vmem:[#allocation5 + $0x40] sm:$0xf] }
  0xf6   :  { %8271 = vst [vmem:[#allocation72_spill] sm:$0xff] %v6155_v38  ;;  %v4835_v38 = vld [vmem:[#allocation5 + $0x98] sm:$0xf0]  ;;  %v6184_v46 = vor.u32 %v4993_v35, %v4811_v59  ;;  %v6188_v18 = vpop.f32.mrf.mxu2  ;;  %2819 = vperm.xlu0 %5046, %v2817_v37   ;;  %v4991_v61 = vld [vmem:[#allocation5 + $0x4c] sm:$0xf0] }
  0xf7   :  { %8272 = vst [vmem:[#allocation73_spill] sm:$0xff] %v6158_v31  ;;  %v6173_v31 = vor.u32 %v4998_v14, %v4835_v38  ;;  %v4996_v38 = vld [vmem:[#allocation5 + $0x74] sm:$0xf0]  ;;  %v4994_v14 = vld [vmem:[#allocation5 + $0x6c] sm:$0xf]  ;;  %1399 = vmatpush.bf16.msrb.mxu2 %v6167_v39  ;;  %v6197_v59 = vpop.f32.mrf.mxu1 }
  0xf8   :  { %8273 = vst [vmem:[#allocation74_spill] sm:$0xff] %v6161_v50  ;;  %v6186_v29 = vor.u32 %v4996_v38, %v4817_v30  ;;  %v6191_v16 = vor.u32 %v4994_v14, %v4819_v26  ;;  %v6193_v50 = vpop.f32.mrf.mxu3  ;;  %v4801_v35 = vld [vmem:[#allocation5 + $0x48] sm:$0xf]  ;;  %1374 = vmatpush.bf16.msrb.mxu0 %v6180_v6  ;;  %v6200_v30 = vor.u32 %v4991_v61, %v4793_v52  ;;  %v4992_v38 = vld [vmem:[#allocation5 + $0x54] sm:$0xf0] }
  0xf9   :  { %8274 = vst [vmem:[#allocation75_spill] sm:$0xff] %v6165_v54  ;;  %1412 = vmatpush.bf16.msrb.mxu3 %v6173_v31  ;;  %v6195_v54 = vpop.f32.mrf.mxu0  ;;  %v4803_v37 = vld [vmem:[#allocation5 + $0x58] sm:$0xf0]  ;;  %1387 = vmatpush.bf16.msrb.mxu1 %v6184_v46  ;;  %v6206_v14 = vor.u32 %v4992_v38, %v4801_v35  ;;  %v4985_v61 = vld [vmem:[#allocation5 + $0x24] sm:$0xf] }
  0xfa   :  { %8275 = vst [vmem:[#allocation76_spill] sm:$0xff] %v6167_v39  ;;  %v4795_v39 = vld [vmem:[#allocation5 + $0x50] sm:$0xf0]  ;;  %v4986_v35 = vld [vmem:[#allocation5 + $0x2c] sm:$0xf] }
  0xfb   :  { %8276 = vst [vmem:[#allocation77_spill] sm:$0xff] %v6173_v31  ;;  %1400 = vmatpush.bf16.msrb.mxu2 %v6186_v29  ;;  %v6204_v26 = vor.u32 %v4989_v17, %v4795_v39  ;;  %v4988_v17 = vld [vmem:[#allocation5 + $0x34] sm:$0xf0]  ;;  %v4787_v38 = vld [vmem:[#allocation5 + $0x38] sm:$0xf0] }
  0xfc   :  { %8277 = vst [vmem:[#allocation78_spill] sm:$0xff] %v6180_v6  ;;  %v4779_v6 = vld [vmem:[#allocation5 + $0x30] sm:$0xf0]  ;;  %1375 = vmatpush.bf16.msrb.mxu0 %v6200_v30  ;;  %v4940_v31 = vld [vmem:[%s8108_s1 + $0x38] sm:$0xff] }
  0xfd   :  { %8278 = vst [vmem:[#allocation79_spill] sm:$0xff] %v6184_v46  ;;  %1413 = vmatpush.bf16.msrb.mxu3 %v6191_v16  ;;  %1388 = vmatpush.bf16.msrb.mxu1 %v6204_v26 }
  0xfe   :  { %8279 = vst [vmem:[#allocation80_spill] sm:$0xff] %v6186_v29  ;;  %v4785_v29 = vld [vmem:[#allocation5 + $0x28] sm:$0xf] }
  0xff   :  { %8280 = vst [vmem:[#allocation81_spill] sm:$0xff] %v6188_v18  ;;  %v4990_v18 = vld [vmem:[#allocation5 + $0x4c] sm:$0xf]  ;;  %1401 = vmatpush.bf16.msrb.mxu2 %v6206_v14 }
 0x100   :  { %8281 = vst [vmem:[#allocation82_spill] sm:$0xff] %v6191_v16  ;;  %v6212_v52 = vor.u32 %v4990_v18, %v4803_v37  ;;  %v6223_v18 = vor.u32 %v4985_v61, %v4779_v6  ;;  %v6227_v37 = vpop.f32.mrf.mxu2  ;;  %v4981_v16 = vld [vmem:[#allocation5 + $0x4] sm:$0xf]  ;;  %v6232_v47 = vpop.f32.mrf.mxu3  ;;  %v4984_v6 = vld [vmem:[#allocation5 + $0x14] sm:$0xf0] }
 0x101   :  { %8282 = vst [vmem:[#allocation83_spill] sm:$0xff] %v6193_v50  ;;  %v4987_v50 = vld [vmem:[#allocation5 + $0x2c] sm:$0xf0]  ;;  %v6234_v5 = vpop.f32.mrf.mxu0  ;;  %v6236_v61 = vpop.f32.mrf.mxu1 }
 0x102   :  { %8283 = vst [vmem:[#allocation84_spill] sm:$0xff] %v6195_v54  ;;  %v4904_v54 = vld [vmem:[%s8109_s2 + $0x48] sm:$0xff]  ;;  %1414 = vmatpush.bf16.msrb.mxu3 %v6212_v52  ;;  %1389 = vmatpush.bf16.msrb.mxu1 %v6223_v18 }
 0x103   :  { %8284 = vst [vmem:[#allocation85_spill] sm:$0xff] %v6197_v59  ;;  %v4777_v59 = vld [vmem:[#allocation5 + $0x20] sm:$0xf]  ;;  %vm3186_vm7 = vcmp.gt.f32.partialorder %v4904_v54, 0.5  ;;  %v6225_v54 = vor.u32 %v4988_v17, %v4785_v29  ;;  %v4982_v17 = vld [vmem:[#allocation5 + $0xc] sm:$0xf]  ;;  %4606 = vmatmul.msk.bf16.gmra.mxu0 %vm224_vm0, %v4940_v31  ;;  %4614 = vmatmul.msk.bf16.gmra.mxu1 %vm224_vm0, %v4940_v31 }
 0x104   :  { %8285 = vst [vmem:[#allocation86_spill] sm:$0xff] %v6200_v30  ;;  %v3190_v46 = vsel %vm3186_vm7, 1, %v8250_v8  ;;  %v6216_v39 = vor.u32 %v4987_v50, %v4777_v59  ;;  %v6230_v50 = vor.u32 %v4986_v35, %v4787_v38  ;;  %v4761_v59 = vld [vmem:[#allocation5] sm:$0xf]  ;;  %v4983_v30 = vld [vmem:[#allocation5 + $0xc] sm:$0xf0]  ;;  %4622 = vmatmul.msk.bf16.gmra.mxu2 %vm224_vm0, %v4940_v31  ;;  %4630 = vmatmul.msk.bf16.gmra.mxu3 %vm224_vm0, %v4940_v31 }
 0x105   :  { %8286 = vst [vmem:[#allocation87_spill] sm:$0xff] %v6204_v26  ;;  %3192 = vperm.xlu0 %5046, %v3190_v46   ;;  %v4763_v26 = vld [vmem:[#allocation5 + $0x10] sm:$0xf0]  ;;  %v6239_v29 = vor.u32 %v4983_v30, %v4761_v59  ;;  %v4771_v46 = vld [vmem:[#allocation5 + $0x18] sm:$0xf0]  ;;  %v4907_v35 = vld [vmem:[%s8110_s3 + $0x28] sm:$0xff]  ;;  %1402 = vmatpush.bf16.msrb.mxu2 %v6225_v54 }
 0x106   :  { %8287 = vst [vmem:[#allocation88_spill] sm:$0xff] %v6206_v14  ;;  %v4769_v14 = vld [vmem:[#allocation5 + $0x8] sm:$0xf]  ;;  %1376 = vmatpush.bf16.msrb.mxu0 %v6216_v39  ;;  %v6246_v38 = vor.u32 %v4981_v16, %v4763_v26  ;;  %vm3379_vm8 = vcmp.gt.f32.partialorder %v4907_v35, 0.5  ;;  %1415 = vmatpush.bf16.msrb.mxu3 %v6230_v50  ;;  %v6252_v30 = vor.u32 %v4982_v17, %v4771_v46  ;;  %v4910_v31 = vld [vmem:[%s8109_s2 + $0x60] sm:$0xff] }
 0x107   :  { %8288 = vst [vmem:[#allocation89_spill] sm:$0xff] %v6212_v52  ;;  %v3387_v59 = vsel %vm3379_vm8, 1, %v8250_v8  ;;  %vm3756_vm9 = vcmp.gt.f32.partialorder %v4910_v31, 0.5 }
 0x108   :  { %8289 = vst [vmem:[#allocation90_spill] sm:$0xff] %v6216_v39  ;;  %1390 = vmatpush.bf16.msrb.mxu1 %v6246_v38  ;;  %v6261_v16 = vpop.f32.mrf.mxu2  ;;  %v6264_v26 = vpop.f32.mrf.mxu3  ;;  %v3760_v17 = vsel %vm3756_vm9, 1, %v8250_v8 }
 0x109   :  { %8290 = vst [vmem:[#allocation91_spill] sm:$0xff] %v6223_v18 }
 0x10a   :  { %8291 = vst [vmem:[#allocation92_spill] sm:$0xff] %v6225_v54  ;;  %1377 = vmatpush.bf16.msrb.mxu0 %v6239_v29  ;;  %1416 = vmatpush.bf16.msrb.mxu3 %v6252_v30 }
 0x10b   :  { %8292 = vst [vmem:[#allocation93_spill] sm:$0xff] %v6227_v37  ;;  %v8330_v37 = vld [vmem:[#allocation70_spill] sm:$0xff] }
 0x10c   :  { %8293 = vst [vmem:[#allocation94_spill] sm:$0xff] %v6230_v50 }
 0x10d   :  { %8294 = vst [vmem:[#allocation95_spill] sm:$0xff] %v6232_v47  ;;  %3389 = vperm.xlu0 %5046, %v3387_v59   ;;  %v8329_v47 = vld [vmem:[#allocation68_spill] sm:$0xff] }
 0x10e   :  { %8295 = vst [vmem:[#allocation96_spill] sm:$0xff] %v6234_v5  ;;  %v6248_v5 = vor.u32 %v4984_v6, %v4769_v14  ;;  %v6266_v14 = vpop.f32.mrf.mxu0  ;;  %v6268_v6 = vpop.f32.mrf.mxu1 }
 0x10f   :  { %8296 = vst [vmem:[#allocation97_spill] sm:$0xff] %v6236_v61 }
 0x110   :  { %8297 = vst [vmem:[#allocation98_spill] sm:$0xff] %v6239_v29  ;;  %1403 = vmatpush.bf16.msrb.mxu2 %v6248_v5  ;;  %v6274_v46 = vpop.f32.mrf.mxu2  ;;  %v6276_v35 = vpop.f32.mrf.mxu3 }
 0x111   :  { %8298 = vst [vmem:[#allocation99_spill] sm:$0xff] %v6246_v38 }
 0x112   :  { %8299 = vst [vmem:[#allocation100_spill] sm:$0xff] %v6248_v5 }
 0x113   :  { %8300 = vst [vmem:[#allocation101_spill] sm:$0xff] %v6252_v30 }
 0x114   :  { %8301 = vst [vmem:[#allocation102_spill] sm:$0xff] %v6261_v16 }
 0x115   :  { %8302 = vst [vmem:[#allocation103_spill] sm:$0xff] %v6264_v26  ;;  %3762 = vperm.xlu0 %5046, %v3760_v17  }
 0x116   :  { %8303 = vst [vmem:[#allocation104_spill] sm:$0xff] %v6266_v14  ;;  %v6278_v16 = vpop.f32.mrf.mxu0  ;;  %v6280_v59 = vpop.f32.mrf.mxu1  ;;  %v5451_v14 = vmov 0.0|0.0  }
 0x117   :  { %8304 = vst [vmem:[#allocation105_spill] sm:$0xff] %v6268_v6  ;;  %v4913_v6 = vld [vmem:[%s8110_s3 + $0x10] sm:$0xff]  ;;  %1154 = vmatmul.bf16.vlgmr.msra.gmra.mxu0 %v5451_v14  ;;  %1167 = vmatmul.bf16.vlgmr.msra.gmra.mxu1 %v5451_v14 }
 0x118   :  { %8305 = vst [vmem:[#allocation106_spill] sm:$0xff] %v6274_v46  ;;  %vm3949_vm10 = vcmp.gt.f32.partialorder %v4913_v6, 0.5  ;;  %1180 = vmatmul.bf16.vlgmr.msra.gmra.mxu2 %v5451_v14  ;;  %1193 = vmatmul.bf16.vlgmr.msra.gmra.mxu3 %v5451_v14  ;;  %v6289_v17 = vpop.f32.mrf.mxu2 }
 0x119   :  { %8306 = vst [vmem:[#allocation107_spill] sm:$0xff] %v6276_v35  ;;  %v3957_v31 = vsel %vm3949_vm10, 1, %v8250_v8  ;;  %1496 = vmatpush.bf16.msra.mxu0 %v5673_v58  ;;  %1509 = vmatpush.bf16.msra.mxu1 %v5684_v62  ;;  %v4916_v35 = vld [vmem:[%s8109_s2 + $0x78] sm:$0xff] }
 0x11a   :  { %8307 = vst [vmem:[#allocation108_spill] sm:$0xff] %v6278_v16  ;;  %1522 = vmatpush.bf16.msra.mxu2 %v5686_v63  ;;  %1535 = vmatpush.bf16.msra.mxu3 %v5697_v2  ;;  %vm4326_vm11 = vcmp.gt.f32.partialorder %v4916_v35, 0.5 }
 0x11b   :  { %8308 = vst [vmem:[#allocation109_spill] sm:$0xff] %v6280_v59  ;;  %v6292_v59 = vpop.f32.mrf.mxu3 }
 0x11c   :  { %8309 = vst [vmem:[#allocation110_spill] sm:$0xff] %v6289_v17 }
 0x11d   :  { %3959 = vperm.xlu0 %5046, %v3957_v31   ;;  %8310 = vst [vmem:[#allocation111_spill] sm:$0xff] %v6292_v59  ;;  %1497 = vmatpush.bf16.msra.mxu0 %v5716_v7  ;;  %v4329_v31 = vsel %vm4326_vm11, 1, %v8250_v8 }
 0x11e   :  { %v6294_v6 = vpop.f32.mrf.mxu0  ;;  %v6296_v16 = vpop.f32.mrf.mxu1  ;;  %1510 = vmatpush.bf16.msra.mxu1 %v5727_v11  ;;  %1523 = vmatpush.bf16.msra.mxu2 %v5729_v12 }
 0x11f   :  { %8311 = vst [vmem:[#allocation112_spill] sm:$0xff] %v6294_v6  ;;  %1536 = vmatpush.bf16.msra.mxu3 %v5740_v15 }
 0x120   :  { %8312 = vst [vmem:[#allocation113_spill] sm:$0xff] %v6296_v16  ;;  %v6309_v59 = vpop.f32.mrf.mxu2 }
 0x121   :  { %1498 = vmatpush.bf16.msra.mxu0 %v5763_v22  ;;  %8313 = vst [vmem:[#allocation114_spill] sm:$0xff] %v6309_v59 }
 0x122   :  { %1511 = vmatpush.bf16.msra.mxu1 %v5776_v27  ;;  %1524 = vmatpush.bf16.msra.mxu2 %v5778_v28 }
 0x123   :  { %1537 = vmatpush.bf16.msra.mxu3 %v5795_v34  ;;  %v6312_v35 = vpop.f32.mrf.mxu3 }
 0x124   :  { %8314 = vst [vmem:[#allocation115_spill] sm:$0xff] %v6312_v35 }
 0x125   :  { %4331 = vperm.xlu0 %5046, %v4329_v31   ;;  %1499 = vmatpush.bf16.msra.mxu0 %v5822_v43 }
 0x126   :  { %v6314_v17 = vpop.f32.mrf.mxu0  ;;  %v6316_v46 = vpop.f32.mrf.mxu1  ;;  %1512 = vmatpush.bf16.msra.mxu1 %v5835_v48  ;;  %1525 = vmatpush.bf16.msra.mxu2 %v5837_v49 }
 0x127   :  { %8315 = vst [vmem:[#allocation116_spill] sm:$0xff] %v6314_v17  ;;  %1378 = vmatmul.bf16.vlgmr.msrb.gmra.mxu0 %v5451_v14  ;;  %1538 = vmatpush.bf16.msra.mxu3 %v5854_v55 }
 0x128   :  { %8316 = vst [vmem:[#allocation117_spill] sm:$0xff] %v6316_v46  ;;  %1391 = vmatmul.bf16.vlgmr.msrb.gmra.mxu1 %v5451_v14  ;;  %1404 = vmatmul.bf16.vlgmr.msrb.gmra.mxu2 %v5451_v14  ;;  %v6325_v31 = vpop.f32.mrf.mxu2 }
 0x129   :  { %1417 = vmatmul.bf16.vlgmr.msrb.gmra.mxu3 %v5451_v14  ;;  %1500 = vmatpush.bf16.msra.mxu0 %v5881_v4  ;;  %8317 = vst [vmem:[#allocation118_spill] sm:$0xff] %v6325_v31 }
 0x12a   :  { %1513 = vmatpush.bf16.msra.mxu1 %v5894_v10  ;;  %1526 = vmatpush.bf16.msra.mxu2 %v5896_v13 }
 0x12b   :  { %1539 = vmatpush.bf16.msra.mxu3 %v5913_v23  ;;  %v6328_v35 = vpop.f32.mrf.mxu3 }
 0x12c   :  { %8318 = vst [vmem:[#allocation119_spill] sm:$0xff] %v6328_v35 }
 0x12d   :  { %1501 = vmatpush.bf16.msra.mxu0 %v5940_v44 }
 0x12e   :  { %v6330_v59 = vpop.f32.mrf.mxu0  ;;  %v6332_v16 = vpop.f32.mrf.mxu1  ;;  %1514 = vmatpush.bf16.msra.mxu1 %v5953_v57  ;;  %1527 = vmatpush.bf16.msra.mxu2 %v5955_v0 }
 0x12f   :  { %8319 = vst [vmem:[#allocation120_spill] sm:$0xff] %v6330_v59  ;;  %1540 = vmatpush.bf16.msra.mxu3 %v5975_v21 }
 0x130   :  { %8320 = vst [vmem:[#allocation121_spill] sm:$0xff] %v6332_v16  ;;  %v6341_v14 = vpop.f32.mrf.mxu2 }
 0x131   :  { %1502 = vmatpush.bf16.msra.mxu0 %v6010_v25  ;;  %8321 = vst [vmem:[#allocation122_spill] sm:$0xff] %v6341_v14  ;;  %v8332_v14 = vld [vmem:[#allocation74_spill] sm:$0xff] }
 0x132   :  { %1515 = vmatpush.bf16.msra.mxu1 %v6023_v45  ;;  %1528 = vmatpush.bf16.msra.mxu2 %v6025_v41 }
 0x133   :  { %1541 = vmatpush.bf16.msra.mxu3 %v6045_v42  ;;  %v6344_v6 = vpop.f32.mrf.mxu3 }
 0x134   :  { %8322 = vst [vmem:[#allocation123_spill] sm:$0xff] %v6344_v6 }
 0x135   :  { %1503 = vmatpush.bf16.msra.mxu0 %v6071_v1 }
 0x136   :  { %v6346_v26 = vpop.f32.mrf.mxu0  ;;  %v6348_v61 = vpop.f32.mrf.mxu1  ;;  %1516 = vmatpush.bf16.msra.mxu1 %v6081_v3  ;;  %1529 = vmatpush.bf16.msra.mxu2 %v6093_v36 }
 0x137   :  { %8323 = vst [vmem:[#allocation124_spill] sm:$0xff] %v6346_v26  ;;  %1542 = vmatpush.bf16.msra.mxu3 %v6100_v32  ;;  %v8338_v26 = vld [vmem:[#allocation77_spill] sm:$0xff] }
 0x138   :  { %8324 = vst [vmem:[#allocation125_spill] sm:$0xff] %v6348_v61  ;;  %v6358_v35 = vpop.f32.mrf.mxu2 }
 0x139   :  { %1560 = vmatpush.bf16.msrb.mxu0 %v6102_v24  ;;  %8325 = vst [vmem:[#allocation126_spill] sm:$0xff] %v6358_v35  ;;  %v8336_v35 = vld [vmem:[#allocation76_spill] sm:$0xff] }
 0x13a   :  { %1573 = vmatpush.bf16.msrb.mxu1 %v6107_v40  ;;  %1586 = vmatpush.bf16.msrb.mxu2 %v6115_v33 }
 0x13b   :  { %1599 = vmatpush.bf16.msrb.mxu3 %v6117_v53  ;;  %v6361_v31 = vpop.f32.mrf.mxu3 }
 0x13c   :  { %8326 = vst [vmem:[#allocation127_spill] sm:$0xff] %v6361_v31  ;;  %v8335_v31 = vld [vmem:[#allocation75_spill] sm:$0xff] }
 0x13d   :  { %1561 = vmatpush.bf16.msrb.mxu0 %v6122_v19 }
 0x13e   :  { %v6363_v46 = vpop.f32.mrf.mxu0  ;;  %1574 = vmatpush.bf16.msrb.mxu1 %v6126_v20  ;;  %1587 = vmatpush.bf16.msrb.mxu2 %v6128_v9  ;;  %v6367_v17 = vpop.f32.mrf.mxu1 }
 0x13f   :  { %8327 = vst [vmem:[#allocation128_spill] sm:$0xff] %v6363_v46  ;;  %1600 = vmatpush.bf16.msrb.mxu3 %v6133_v56  ;;  %v8340_v46 = vld [vmem:[#allocation79_spill] sm:$0xff] }
 0x140   :  { %8328 = vst [vmem:[#allocation129_spill] sm:$0xff] %v6367_v17  ;;  %v6374_v6 = vpop.f32.mrf.mxu2  ;;  %v8339_v17 = vld [vmem:[#allocation78_spill] sm:$0xff] }
 0x141   :  { %1562 = vmatpush.bf16.msrb.mxu0 %v6137_v51  ;;  %8331 = vst [vmem:[#allocation130_spill] sm:$0xff] %v6374_v6  ;;  %v8342_v6 = vld [vmem:[#allocation82_spill] sm:$0xff] }
 0x142   :  { %1575 = vmatpush.bf16.msrb.mxu1 %v6140_v60  ;;  %1588 = vmatpush.bf16.msrb.mxu2 %v8329_v47 }
 0x143   :  { %1601 = vmatpush.bf16.msrb.mxu3 %v8330_v37  ;;  %v6377_v16 = vpop.f32.mrf.mxu3  ;;  %v8341_v37 = vld [vmem:[#allocation80_spill] sm:$0xff] }
 0x144   :  { %8333 = vst [vmem:[#allocation131_spill] sm:$0xff] %v6377_v16  ;;  %v8344_v16 = vld [vmem:[#allocation86_spill] sm:$0xff] }
 0x145   :  { %1563 = vmatpush.bf16.msrb.mxu0 %v8332_v14 }
 0x146   :  { %v6379_v59 = vpop.f32.mrf.mxu0  ;;  %1576 = vmatpush.bf16.msrb.mxu1 %v8335_v31  ;;  %1589 = vmatpush.bf16.msrb.mxu2 %v8336_v35  ;;  %v6383_v61 = vpop.f32.mrf.mxu1  ;;  %v8347_v35 = vld [vmem:[#allocation87_spill] sm:$0xff] }
 0x147   :  { %8334 = vst [vmem:[#allocation132_spill] sm:$0xff] %v6379_v59  ;;  %1602 = vmatpush.bf16.msrb.mxu3 %v8338_v26 }
 0x148   :  { %8337 = vst [vmem:[#allocation133_spill] sm:$0xff] %v6383_v61  ;;  %v6390_v14 = vpop.f32.mrf.mxu2  ;;  %v8348_v61 = vld [vmem:[#allocation88_spill] sm:$0xff] }
 0x149   :  { %1564 = vmatpush.bf16.msrb.mxu0 %v8339_v17  ;;  %8343 = vst [vmem:[#allocation134_spill] sm:$0xff] %v6390_v14 }
 0x14a   :  { %1577 = vmatpush.bf16.msrb.mxu1 %v8340_v46  ;;  %1590 = vmatpush.bf16.msrb.mxu2 %v8341_v37 }
 0x14b   :  { %1603 = vmatpush.bf16.msrb.mxu3 %v8342_v6  ;;  %v6393_v59 = vpop.f32.mrf.mxu3 }
 0x14c   :  { %8345 = vst [vmem:[#allocation135_spill] sm:$0xff] %v6393_v59 }
 0x14d   :  { %1565 = vmatpush.bf16.msrb.mxu0 %v8344_v16 }
 0x14e   :  { %v6395_v31 = vpop.f32.mrf.mxu0  ;;  %1578 = vmatpush.bf16.msrb.mxu1 %v8347_v35  ;;  %1591 = vmatpush.bf16.msrb.mxu2 %v8348_v61  ;;  %v6399_v26 = vpop.f32.mrf.mxu1 }
 0x14f   :  { %8346 = vst [vmem:[#allocation136_spill] sm:$0xff] %v6395_v31  ;;  %1604 = vmatpush.bf16.msrb.mxu3 %v6212_v52 }
 0x150   :  { %8349 = vst [vmem:[#allocation137_spill] sm:$0xff] %v6399_v26  ;;  %v6406_v14 = vpop.f32.mrf.mxu2 }
 0x151   :  { %1566 = vmatpush.bf16.msrb.mxu0 %v6216_v39  ;;  %8350 = vst [vmem:[#allocation138_spill] sm:$0xff] %v6406_v14 }
 0x152   :  { %1579 = vmatpush.bf16.msrb.mxu1 %v6223_v18  ;;  %1592 = vmatpush.bf16.msrb.mxu2 %v6225_v54 }
 0x153   :  { %1605 = vmatpush.bf16.msrb.mxu3 %v6230_v50  ;;  %v6409_v59 = vpop.f32.mrf.mxu3 }
 0x154   :  { %8351 = vst [vmem:[#allocation139_spill] sm:$0xff] %v6409_v59 }
 0x155   :  { %1567 = vmatpush.bf16.msrb.mxu0 %v6239_v29 }
 0x156   :  { %v6411_v31 = vpop.f32.mrf.mxu0  ;;  %1580 = vmatpush.bf16.msrb.mxu1 %v6246_v38  ;;  %1593 = vmatpush.bf16.msrb.mxu2 %v6248_v5  ;;  %v6415_v26 = vpop.f32.mrf.mxu1 }
 0x157   :  { %8352 = vst [vmem:[#allocation140_spill] sm:$0xff] %v6411_v31  ;;  %1606 = vmatpush.bf16.msrb.mxu3 %v6252_v30 }
 0x158   :  { %8353 = vst [vmem:[#allocation141_spill] sm:$0xff] %v6415_v26  ;;  %v6418_v18 = vpop.f32.mrf.mxu2  ;;  %v4888_v26 = vld [vmem:[%s8109_s2 + $0x8] sm:$0xff] }
 0x159   :  { %8354 = vst [vmem:[#allocation142_spill] sm:$0xff] %v6418_v18  ;;  %vm1654_vm12 = vcmp.gt.f32.partialorder %v4888_v26, 0.5 }
 0x15a   :  { %v1658_v18 = vsel %vm1654_vm12, 1, %v8250_v8 }
 0x15b   :  { %v6420_v54 = vpop.f32.mrf.mxu3  ;;  %1660 = vperm.xlu1 %5047, %v1658_v18  }
 0x15c   :  { %8355 = vst [vmem:[#allocation143_spill] sm:$0xff] %v6420_v54 }
 0x15e   :  { %v6422_v50 = vpop.f32.mrf.mxu0  ;;  %v6424_v14 = vpop.f32.mrf.mxu1 }
 0x15f   :  { %8356 = vst [vmem:[#allocation144_spill] sm:$0xff] %v6422_v50 }
 0x160   :  { %8357 = vst [vmem:[#allocation145_spill] sm:$0xff] %v6424_v14  ;;  %v6426_v29 = vpop.f32.mrf.mxu2 }
 0x161   :  { %8358 = vst [vmem:[#allocation146_spill] sm:$0xff] %v6426_v29 }
 0x163   :  { %v6428_v59 = vpop.f32.mrf.mxu3 }
 0x164   :  { %8359 = vst [vmem:[#allocation147_spill] sm:$0xff] %v6428_v59  ;;  %v4889_v59 = vld [vmem:[%s8110_s3 + $0x70] sm:$0xff] }
 0x165   :  { %vm1657_vm13 = vcmp.gt.f32.partialorder %v4889_v59, 0.5 }
 0x166   :  { %v6430_v31 = vpop.f32.mrf.mxu0  ;;  %v6432_v38 = vpop.f32.mrf.mxu1 }
 0x167   :  { %8360 = vst [vmem:[#allocation148_spill] sm:$0xff] %v6430_v31 }
 0x168   :  { %8361 = vst [vmem:[#allocation149_spill] sm:$0xff] %v6432_v38  ;;  %v6438_v54 = vpop.f32.mrf.mxu2  ;;  %v1665_v38 = vsel %vm1657_vm13, 1, %v8250_v8 }
 0x169   :  { %8362 = vst [vmem:[#allocation150_spill] sm:$0xff] %v6438_v54  ;;  %1667 = vperm.xlu1 %5047, %v1665_v38  }
 0x16b   :  { %v6440_v50 = vpop.f32.mrf.mxu3 }
 0x16c   :  { %8363 = vst [vmem:[#allocation151_spill] sm:$0xff] %v6440_v50  ;;  %v4893_v50 = vld [vmem:[%s8110_s3 + $0x60] sm:$0xff] }
 0x16d   :  { %vm2041_vm14 = vcmp.gt.f32.partialorder %v4893_v50, 0.5 }
 0x16e   :  { %v6442_v14 = vpop.f32.mrf.mxu0  ;;  %v6444_v29 = vpop.f32.mrf.mxu1 }
 0x16f   :  { %8364 = vst [vmem:[#allocation152_spill] sm:$0xff] %v6442_v14 }
 0x170   :  { %8365 = vst [vmem:[#allocation153_spill] sm:$0xff] %v6444_v29  ;;  %v6450_v26 = vpop.f32.mrf.mxu2  ;;  %v2049_v29 = vsel %vm2041_vm14, 1, %v8250_v8 }
 0x171   :  { %8366 = vst [vmem:[#allocation154_spill] sm:$0xff] %v6450_v26  ;;  %2051 = vperm.xlu1 %5047, %v2049_v29  }
 0x173   :  { %v6452_v31 = vpop.f32.mrf.mxu3 }
 0x174   :  { %8367 = vst [vmem:[#allocation155_spill] sm:$0xff] %v6452_v31  ;;  %v4896_v31 = vld [vmem:[%s8109_s2 + $0x28] sm:$0xff] }
 0x175   :  { %vm2422_vm15 = vcmp.gt.f32.partialorder %v4896_v31, 0.5 }
 0x176   :  { %v6454_v18 = vpop.f32.mrf.mxu0  ;;  %v6456_v54 = vpop.f32.mrf.mxu1 }
 0x177   :  { %8368 = vst [vmem:[#allocation156_spill] sm:$0xff] %v6454_v18 }
 0x178   :  { %8369 = vst [vmem:[#allocation157_spill] sm:$0xff] %v6456_v54  ;;  %v6462_v14 = vpop.f32.mrf.mxu2  ;;  %v2426_v54 = vsel %vm2422_vm15, 1, %v8250_v8 }
 0x179   :  { %8370 = vst [vmem:[#allocation158_spill] sm:$0xff] %v6462_v14  ;;  %2428 = vperm.xlu1 %5047, %v2426_v54   ;;  %v134_v54 = vld [vmem:[%s8113_s6] sm:$0xf] }
 0x17a   :  { %v6509_v6 = vperm.slane %v134_v54, 2 }
 0x17b   :  { %v6464_v59 = vpop.f32.mrf.mxu3 }
 0x17c   :  { %8371 = vst [vmem:[#allocation159_spill] sm:$0xff] %v6464_v59  ;;  %v4899_v59 = vld [vmem:[%s8110_s3 + $0x48] sm:$0xff] }
 0x17d   :  { %vm2617_vm0 = vcmp.gt.f32.partialorder %v4899_v59, 0.5  ;;  %v4902_v59 = vld [vmem:[%s8109_s2 + $0x40] sm:$0xff] }
 0x17e   :  { %v6466_v38 = vpop.f32.mrf.mxu0  ;;  %v6468_v26 = vpop.f32.mrf.mxu1  ;;  %vm2996_vm1 = vcmp.gt.f32.partialorder %v4902_v59, 0.5  ;;  %v6511_v59 = vperm.slane %v134_v54, 3 }
 0x17f   :  { %8372 = vst [vmem:[#allocation160_spill] sm:$0xff] %v6466_v38 }
 0x180   :  { %8373 = vst [vmem:[#allocation161_spill] sm:$0xff] %v6468_v26  ;;  %v6474_v18 = vpop.f32.mrf.mxu2  ;;  %v2625_v26 = vsel %vm2617_vm0, 1, %v8250_v8 }
 0x181   :  { %8374 = vst [vmem:[#allocation162_spill] sm:$0xff] %v6474_v18  ;;  %2627 = vperm.xlu1 %5047, %v2625_v26   ;;  %v8382_v26 = vld [vmem:[#allocation14_spill] sm:$0xff] }
 0x182   :  { %8384 = vst [vmem:[#allocation14_spill] sm:$0xff] %v6509_v6 }
 0x183   :  { %v6476_v50 = vpop.f32.mrf.mxu3 }
 0x184   :  { %8375 = vst [vmem:[#allocation163_spill] sm:$0xff] %v6476_v50 }
 0x186   :  { %v6478_v14 = vpop.f32.mrf.mxu0  ;;  %v6480_v29 = vpop.f32.mrf.mxu1 }
 0x187   :  { %8376 = vst [vmem:[#allocation164_spill] sm:$0xff] %v6478_v14  ;;  %v6493_v14 = vperm.slane %v134_v54, 0 }
 0x188   :  { %8377 = vst [vmem:[#allocation165_spill] sm:$0xff] %v6480_v29  ;;  %v6486_v38 = vpop.f32.mrf.mxu2  ;;  %v6495_v29 = vperm.slane %v134_v54, 1 }
 0x189   :  { %8378 = vst [vmem:[#allocation166_spill] sm:$0xff] %v6486_v38  ;;  %v3000_v38 = vsel %vm2996_vm1, 1, %v8250_v8  ;;  %v259_v30 = vadd.f32 %v8382_v26, %v6493_v14  ;;  %v4905_v26 = vld [vmem:[%s8110_s3 + $0x30] sm:$0xff] }
 0x18a   :  { %8380 = vst [vmem:[#allocation168_spill] sm:$0xff] %v6493_v14  ;;  %3002 = vperm.xlu1 %5047, %v3000_v38   ;;  %vm3189_vm2 = vcmp.gt.f32.partialorder %v4905_v26, 0.5  ;;  %v8386_v38 = vld [vmem:[#allocation16_spill] sm:$0xff] }
 0x18b   :  { %v6491_v31 = vpop.f32.mrf.mxu3  ;;  %8381 = vst [vmem:[#allocation169_spill] sm:$0xff] %v6495_v29 }
 0x18c   :  { %8379 = vst [vmem:[#allocation167_spill] sm:$0xff] %v6491_v31  ;;  %v8383_v31 = vld [vmem:[#allocation15_spill] sm:$0xff] }
 0x18d   :  { %v308_v39 = vadd.f32 %v8383_v31, %v6495_v29  ;;  %8385 = vst [vmem:[#allocation15_spill] sm:$0xff] %v6511_v59  ;;  %v357_v31 = vadd.f32 %v8386_v38, %v6509_v6 }
 0x18e   :  { %v693_v50 = vpop.f32.mrf.mxu0  ;;  %v742_v18 = vpop.f32.mrf.mxu1 }
 0x190   :  { %v6503_v5 = vpop.f32.mrf.mxu2 }
 0x193   :  { %v6507_v52 = vpop.f32.mrf.mxu3 }
 0x196   :  { %v1155_v61 = vpop.f32.mrf.mxu0  ;;  %v1168_v16 = vpop.f32.mrf.mxu1 }
 0x197   :  { %v1198_v35 = vadd.f32 %v1155_v61, %v259_v30  ;;  %v1199_v37 = vadd.f32 %v1168_v16, %v308_v39  ;;  %v3197_v61 = vsel %vm3189_vm2, 1, %v8250_v8  ;;  %v8387_v30 = vld [vmem:[#allocation17_spill] sm:$0xff] }
 0x198   :  { %v406_v29 = vadd.f32 %v8387_v30, %v6511_v59  ;;  %3199 = vperm.xlu1 %5047, %v3197_v61   ;;  %v4908_v30 = vld [vmem:[%s8109_s2 + $0x58] sm:$0xff] }
 0x199   :  { %v1426_v46 = vmul.f32 0.5, %v1198_v35  ;;  %v1430_v17 = vmul.f32 0.5, %v1199_v37  ;;  %vm3566_vm3 = vcmp.gt.f32.partialorder %v4908_v30, 0.5 }
 0x19a   :  { %v3570_v61 = vsel %vm3566_vm3, 1, %v8250_v8 }
 0x19b   :  { %5049 = vtanh.f32 %v1426_v46  ;;  %v1181_v39 = vpop.f32.mrf.mxu2  ;;  %v1194_v35 = vpop.f32.mrf.mxu3  ;;  %v533_v46 = vld [vmem:[%s8114_s7] sm:$0xf] }
 0x19c   :  { %5051 = vtanh.f32 %v1430_v17  ;;  %v1200_v16 = vadd.f32 %v1181_v39, %v357_v31  ;;  %v1201_v54 = vadd.f32 %v1194_v35, %v406_v29  ;;  %v6527_v59 = vperm.slane %v533_v46, 0 }
 0x19d   :  { %v6529_v29 = vperm.slane %v533_v46, 1 }
 0x19e   :  { %v1157_v37 = vpop.f32.mrf.mxu0  ;;  %v1170_v14 = vpop.f32.mrf.mxu1  ;;  %5053 = vtanh.f32 %v1200_v16  ;;  %v1435_v38 = vmul.f32 0.5, %v1201_v54  ;;  %8388 = vst [vmem:[#allocation16_spill] sm:$0xff] %v6527_v59  ;;  %v694_v39 = vadd.f32 %v693_v50, %v6527_v59 }
 0x19f   :  { %8389 = vst [vmem:[#allocation17_spill] sm:$0xff] %v6529_v29  ;;  %v743_v54 = vadd.f32 %v742_v18, %v6529_v29 }
 0x1a0   :  { %5055 = vtanh.f32 %v1435_v38  ;;  %3572 = vperm.xlu1 %5047, %v3570_v61  }
 0x1a1   :  { %v5050_v26 = vpop.eup %5049 }
 0x1a2   :  { %v5052_v17 = vpop.eup %5051  ;;  %v1428_v6 = vmul.f32 0.5, %v5050_v26 }
 0x1a3   :  { %v1432_v31 = vmul.f32 0.5, %v5052_v17  ;;  %v1183_v35 = vpop.f32.mrf.mxu2  ;;  %v1196_v26 = vpop.f32.mrf.mxu3 }
 0x1a4   :  { %v1429_v14 = vadd.f32 0.5, %v1428_v6  ;;  %v5054_v37 = vpop.eup %5053  ;;  %v4911_v6 = vld [vmem:[%s8110_s3 + $0x18] sm:$0xff]  ;;  %v6542_v35 = vperm.slane %v533_v46, 3 }
 0x1a5   :  { %v1433_v16 = vadd.f32 0.5, %v1432_v31  ;;  %vm3759_vm4 = vcmp.gt.f32.partialorder %v4911_v6, 0.5  ;;  %v6539_v31 = vperm.slane %v533_v46, 2 }
 0x1a6   :  { %v1379_v47 = vpop.f32.mrf.mxu0  ;;  %v1440_v51 = vmul.f32 %v5054_v37, %v1429_v14  ;;  %v1392_v38 = vpop.f32.mrf.mxu1  ;;  %v3767_v18 = vsel %vm3759_vm4, 1, %v8250_v8  ;;  %8391 = vst [vmem:[#allocation171_spill] sm:$0xff] %v6542_v35 }
 0x1a7   :  { %v1439_v60 = vmul.f32 0.0, %v1433_v16  ;;  %v1422_v17 = vadd.f32 %v1379_v47, %v694_v39  ;;  %v1423_v30 = vadd.f32 %v1392_v38, %v743_v54  ;;  %v5056_v56 = vpop.eup %5055  ;;  %8390 = vst [vmem:[#allocation170_spill] sm:$0xff] %v6539_v31  ;;  %v792_v47 = vadd.f32 %v6503_v5, %v6539_v31  ;;  %v6552_v5 = vpop.permute.xlu0 %1469 }
 0x1a8   :  { %v1437_v14 = vmul.f32 0.5, %v5056_v56  ;;  %3769 = vperm.xlu1 %5047, %v3767_v18   ;;  %vm1471_vm6 = vcmp.eq.s32.totalorder %v6552_v5, 1 }
 0x1a9   :  { %v6537_v9 = vadd.f32 %v1440_v51, %v1439_v60  ;;  %v1444_v50 = vmul.f32 0.5, %v1422_v17  ;;  %v1448_v61 = vmul.f32 0.5, %v1423_v30  ;;  %v4914_v51 = vld [vmem:[%s8109_s2 + $0x70] sm:$0xff]  ;;  %v841_v60 = vadd.f32 %v6507_v52, %v6542_v35  ;;  %vm6559_vm7 = vmpackc.low %vm1471_vm6, %vm1471_vm6 }
 0x1aa   :  { %vm4136_vm5 = vcmp.gt.f32.partialorder %v4914_v51, 0.5  ;;  %v1438_v17 = vadd.f32 0.5, %v1437_v14 }
 0x1ab   :  { %5057 = vtanh.f32 %v6537_v9  ;;  %v1405_v39 = vpop.f32.mrf.mxu2  ;;  %v4140_v52 = vsel %vm4136_vm5, 1, %v8250_v8 }
 0x1ac   :  { %5059 = vtanh.f32 %v1444_v50  ;;  %v1424_v16 = vadd.f32 %v1405_v39, %v792_v47  ;;  %v1418_v46 = vpop.f32.mrf.mxu3 }
 0x1ad   :  { %5061 = vtanh.f32 %v1448_v61  ;;  %v1425_v54 = vadd.f32 %v1418_v46, %v841_v60  ;;  %v4327_v60 = vld [vmem:[%s8110_s3] sm:$0xff] }
 0x1ae   :  { %v1381_v37 = vpop.f32.mrf.mxu0  ;;  %v1394_v26 = vpop.f32.mrf.mxu1  ;;  %5063 = vtanh.f32 %v1424_v16  ;;  %vm4328_vm8 = vcmp.gt.f32.partialorder %v4327_v60, 0.5 }
 0x1af   :  { %v1453_v38 = vmul.f32 0.5, %v1425_v54 }
 0x1b0   :  { %4142 = vperm.xlu1 %5047, %v4140_v52  }
 0x1b1   :  { %v5058_v56 = vpop.eup %5057  ;;  %5065 = vtanh.f32 %v1453_v38 }
 0x1b2   :  { %v5060_v30 = vpop.eup %5059  ;;  %v1443_v6 = vmul.f32 %v5058_v56, %v1438_v17 }
 0x1b3   :  { %v5062_v50 = vpop.eup %5061  ;;  %v1446_v18 = vmul.f32 0.5, %v5060_v30  ;;  %v1407_v46 = vpop.f32.mrf.mxu2 }
 0x1b4   :  { %v6565_v47 = vsel %vm1471_vm6, %v1443_v6, 0.0  ;;  %v5014_v14 = vpack.c.bf16 %v1443_v6, %v1443_v6  ;;  %v1450_v51 = vmul.f32 0.5, %v5062_v50  ;;  %v5064_v37 = vpop.eup %5063  ;;  %v1420_v26 = vpop.f32.mrf.mxu3  ;;  %v4336_v6 = vsel %vm4328_vm8, 1, %v8250_v8  ;;  %v8395_v46 = vld [vmem:[#allocation65_spill] sm:$0xff] }
 0x1b5   :  { %v1482_v39 = vpack.c.bf16 %v6565_v47, %v6565_v47  ;;  %v1447_v16 = vadd.f32 0.5, %v1446_v18  ;;  %v6595_v18 = vpop.permute.xlu0 %1476  ;;  %v8398_v26 = vld [vmem:[#allocation68_spill] sm:$0xff] }
 0x1b6   :  { %v1451_v54 = vadd.f32 0.5, %v1450_v51  ;;  %5015 = vmatmul.msk.bf16.vlgmr.msra.gmra.mxu0 %vm6559_vm7, %v5014_v14  ;;  %5018 = vmatmul.msk.bf16.vlgmr.msra.gmra.mxu1 %vm6559_vm7, %v5014_v14  ;;  %vm1478_vm9 = vcmp.eq.s32.totalorder %v6595_v18, 1 }
 0x1b7   :  { %1483 = vst [vmem:[#allocation8] sm:$0xf] %v1482_v39  ;;  %v1458_v17 = vmul.f32 %v5064_v37, %v1447_v16  ;;  %5021 = vmatmul.msk.bf16.vlgmr.msra.gmra.mxu2 %vm6559_vm7, %v5014_v14  ;;  %5024 = vmatmul.msk.bf16.vlgmr.msra.gmra.mxu3 %vm6559_vm7, %v5014_v14  ;;  %v5066_v38 = vpop.eup %5065  ;;  %vm5025_vm10 = vmpackc.low %vm1478_vm9, %vm1478_vm9  ;;  %v8394_v16 = vld [vmem:[#allocation64_spill] sm:$0xff]  ;;  %v8396_v37 = vld [vmem:[#allocation66_spill] sm:$0xff] }
 0x1b8   :  { %v1457_v56 = vmul.f32 0.0, %v1451_v54  ;;  %1688 = vmatpush.bf16.msra.mxu0 %v5673_v58  ;;  %1701 = vmatpush.bf16.msra.mxu1 %v5684_v62  ;;  %v1455_v52 = vmul.f32 0.5, %v5066_v38  ;;  %v8397_v54 = vld [vmem:[#allocation67_spill] sm:$0xff] }
 0x1b9   :  { %1714 = vmatpush.bf16.msra.mxu2 %v5686_v63  ;;  %1727 = vmatpush.bf16.msra.mxu3 %v5697_v2  ;;  %v8401_v38 = vld [vmem:[#allocation75_spill] sm:$0xff] }
 0x1ba   :  { %v6584_v30 = vadd.f32 %v1458_v17, %v1457_v56  ;;  %4338 = vperm.xlu1 %5047, %v4336_v6   ;;  %v1456_v50 = vadd.f32 0.5, %v1455_v52  ;;  %v8399_v17 = vld [vmem:[#allocation70_spill] sm:$0xff]  ;;  %v8402_v6 = vld [vmem:[#allocation76_spill] sm:$0xff]  ;;  %v8403_v52 = vld [vmem:[#allocation77_spill] sm:$0xff] }
 0x1bb   :  { %v8400_v56 = vld [vmem:[#allocation74_spill] sm:$0xff] }
 0x1bc   :  { %5067 = vtanh.f32 %v6584_v30  ;;  %1689 = vmatpush.bf16.msra.mxu0 %v5716_v7  ;;  %1702 = vmatpush.bf16.msra.mxu1 %v5727_v11 }
 0x1bd   :  { %1715 = vmatpush.bf16.msra.mxu2 %v5729_v12  ;;  %1728 = vmatpush.bf16.msra.mxu3 %v5740_v15 }
 0x1c0   :  { %1690 = vmatpush.bf16.msra.mxu0 %v5763_v22  ;;  %1703 = vmatpush.bf16.msra.mxu1 %v5776_v27 }
 0x1c1   :  { %1716 = vmatpush.bf16.msra.mxu2 %v5778_v28  ;;  %1729 = vmatpush.bf16.msra.mxu3 %v5795_v34 }
 0x1c2   :  { %v5068_v61 = vpop.eup %5067 }
 0x1c3   :  { %v1461_v14 = vmul.f32 %v5068_v61, %v1456_v50  ;;  %v8404_v50 = vld [vmem:[#allocation78_spill] sm:$0xff]  ;;  %v8405_v61 = vld [vmem:[#allocation79_spill] sm:$0xff] }
 0x1c4   :  { %1691 = vmatpush.bf16.msra.mxu0 %v5822_v43  ;;  %1704 = vmatpush.bf16.msra.mxu1 %v5835_v48 }
 0x1c5   :  { %v6603_v51 = vsel %vm1478_vm9, %v1461_v14, 0.0  ;;  %v5026_v60 = vpack.c.bf16 %v1461_v14, %v1461_v14  ;;  %1717 = vmatpush.bf16.msra.mxu2 %v5837_v49  ;;  %1730 = vmatpush.bf16.msra.mxu3 %v5854_v55  ;;  %v8406_v14 = vld [vmem:[#allocation80_spill] sm:$0xff] }
 0x1c6   :  { %v1485_v39 = vpack.c.bf16 %v6603_v51, %v6603_v51 }
 0x1c7   :  { %5027 = vmatmul.msk.bf16.vlgmr.msrb.gmra.mxu0 %vm5025_vm10, %v5026_v60  ;;  %5030 = vmatmul.msk.bf16.vlgmr.msrb.gmra.mxu1 %vm5025_vm10, %v5026_v60 }
 0x1c8   :  { %1487 = vst [vmem:[#allocation9 + $0x3c] sm:$0xf] %v1485_v39  ;;  %5033 = vmatmul.msk.bf16.vlgmr.msrb.gmra.mxu2 %vm5025_vm10, %v5026_v60  ;;  %5036 = vmatmul.msk.bf16.vlgmr.msrb.gmra.mxu3 %vm5025_vm10, %v5026_v60  ;;  %v8407_v60 = vld [vmem:[#allocation82_spill] sm:$0xff] }
 0x1c9   :  { %1692 = vmatpush.bf16.msra.mxu0 %v5881_v4  ;;  %1705 = vmatpush.bf16.msra.mxu1 %v5894_v10  ;;  %v8408_v39 = vld [vmem:[#allocation86_spill] sm:$0xff] }
 0x1ca   :  { %1718 = vmatpush.bf16.msra.mxu2 %v5896_v13  ;;  %1731 = vmatpush.bf16.msra.mxu3 %v5913_v23 }
 0x1cd   :  { %1693 = vmatpush.bf16.msra.mxu0 %v5940_v44  ;;  %1706 = vmatpush.bf16.msra.mxu1 %v5953_v57 }
 0x1ce   :  { %1719 = vmatpush.bf16.msra.mxu2 %v5955_v0  ;;  %1732 = vmatpush.bf16.msra.mxu3 %v5975_v21 }
 0x1d1   :  { %1694 = vmatpush.bf16.msra.mxu0 %v6010_v25  ;;  %1707 = vmatpush.bf16.msra.mxu1 %v6023_v45 }
 0x1d2   :  { %1720 = vmatpush.bf16.msra.mxu2 %v6025_v41  ;;  %1733 = vmatpush.bf16.msra.mxu3 %v6045_v42 }
 0x1d5   :  { %1695 = vmatpush.bf16.msra.mxu0 %v6071_v1  ;;  %1708 = vmatpush.bf16.msra.mxu1 %v6081_v3 }
 0x1d6   :  { %1721 = vmatpush.bf16.msra.mxu2 %v6093_v36  ;;  %1734 = vmatpush.bf16.msra.mxu3 %v6100_v32 }
 0x1d9   :  { %1752 = vmatpush.bf16.msrb.mxu0 %v6102_v24  ;;  %1765 = vmatpush.bf16.msrb.mxu1 %v6107_v40 }
 0x1da   :  { %1778 = vmatpush.bf16.msrb.mxu2 %v6115_v33  ;;  %1791 = vmatpush.bf16.msrb.mxu3 %v6117_v53 }
 0x1dd   :  { %1753 = vmatpush.bf16.msrb.mxu0 %v6122_v19  ;;  %1766 = vmatpush.bf16.msrb.mxu1 %v6126_v20  ;;  %v8425_v20 = vld [vmem:[#allocation20_spill] sm:$0xff]  ;;  %v8427_v19 = vld [vmem:[#allocation21_spill] sm:$0xff] }
 0x1de   :  { %1779 = vmatpush.bf16.msrb.mxu2 %v8394_v16  ;;  %1792 = vmatpush.bf16.msrb.mxu3 %v8395_v46  ;;  %v8424_v16 = vld [vmem:[#allocation14_spill] sm:$0xff] }
 0x1e1   :  { %1754 = vmatpush.bf16.msrb.mxu0 %v8396_v37  ;;  %1767 = vmatpush.bf16.msrb.mxu1 %v8397_v54 }
 0x1e2   :  { %1780 = vmatpush.bf16.msrb.mxu2 %v8398_v26  ;;  %1793 = vmatpush.bf16.msrb.mxu3 %v8399_v17  ;;  %v8409_v26 = vld [vmem:[#allocation87_spill] sm:$0xff]  ;;  %v8410_v17 = vld [vmem:[#allocation88_spill] sm:$0xff] }
 0x1e5   :  { %1755 = vmatpush.bf16.msrb.mxu0 %v8400_v56  ;;  %1768 = vmatpush.bf16.msrb.mxu1 %v8401_v38  ;;  %v8411_v56 = vld [vmem:[#allocation89_spill] sm:$0xff]  ;;  %v8412_v38 = vld [vmem:[#allocation90_spill] sm:$0xff] }
 0x1e6   :  { %1781 = vmatpush.bf16.msrb.mxu2 %v8402_v6  ;;  %1794 = vmatpush.bf16.msrb.mxu3 %v8403_v52  ;;  %v8413_v6 = vld [vmem:[#allocation91_spill] sm:$0xff]  ;;  %v8414_v52 = vld [vmem:[#allocation92_spill] sm:$0xff] }
 0x1e9   :  { %1756 = vmatpush.bf16.msrb.mxu0 %v8404_v50  ;;  %1769 = vmatpush.bf16.msrb.mxu1 %v8405_v61  ;;  %v8415_v50 = vld [vmem:[#allocation94_spill] sm:$0xff] }
 0x1ea   :  { %1782 = vmatpush.bf16.msrb.mxu2 %v8406_v14  ;;  %1795 = vmatpush.bf16.msrb.mxu3 %v8407_v60  ;;  %v8416_v61 = vld [vmem:[#allocation98_spill] sm:$0xff]  ;;  %v8417_v14 = vld [vmem:[#allocation99_spill] sm:$0xff]  ;;  %v8418_v60 = vld [vmem:[#allocation100_spill] sm:$0xff] }
 0x1ed   :  { %1757 = vmatpush.bf16.msrb.mxu0 %v8408_v39  ;;  %1770 = vmatpush.bf16.msrb.mxu1 %v8409_v26  ;;  %v8419_v39 = vld [vmem:[#allocation101_spill] sm:$0xff] }
 0x1ee   :  { %1783 = vmatpush.bf16.msrb.mxu2 %v8410_v17  ;;  %1796 = vmatpush.bf16.msrb.mxu3 %v8411_v56  ;;  %v4890_v56 = vld [vmem:[%s8109_s2 + $0x10] sm:$0xff] }
 0x1ef   :  { %vm1846_vm11 = vcmp.gt.f32.partialorder %v4890_v56, 0.5 }
 0x1f1   :  { %1758 = vmatpush.bf16.msrb.mxu0 %v8412_v38  ;;  %1771 = vmatpush.bf16.msrb.mxu1 %v8413_v6  ;;  %v1850_v38 = vsel %vm1846_vm11, 1, %v8250_v8  ;;  %v8422_v6 = vld [vmem:[#allocation169_spill] sm:$0xff] }
 0x1f2   :  { %1784 = vmatpush.bf16.msrb.mxu2 %v8414_v52  ;;  %1797 = vmatpush.bf16.msrb.mxu3 %v8415_v50  ;;  %v4891_v50 = vld [vmem:[%s8110_s3 + $0x68] sm:$0xff]  ;;  %v8421_v52 = vld [vmem:[#allocation18_spill] sm:$0xff] }
 0x1f3   :  { %1852 = vperm.xlu2 %5048, %v1850_v38   ;;  %vm1849_vm12 = vcmp.gt.f32.partialorder %v4891_v50, 0.5  ;;  %v4894_v50 = vld [vmem:[%s8109_s2 + $0x20] sm:$0xff] }
 0x1f4   :  { %vm2230_vm13 = vcmp.gt.f32.partialorder %v4894_v50, 0.5 }
 0x1f5   :  { %1759 = vmatpush.bf16.msrb.mxu0 %v8416_v61  ;;  %1772 = vmatpush.bf16.msrb.mxu1 %v8417_v14  ;;  %v8420_v61 = vld [vmem:[#allocation168_spill] sm:$0xff] }
 0x1f6   :  { %1785 = vmatpush.bf16.msrb.mxu2 %v8418_v60  ;;  %1798 = vmatpush.bf16.msrb.mxu3 %v8419_v39  ;;  %v261_v14 = vadd.f32 %v8421_v52, %v8420_v61  ;;  %v8423_v60 = vld [vmem:[#allocation19_spill] sm:$0xff]  ;;  %v1857_v39 = vsel %vm1849_vm12, 1, %v8250_v8  ;;  %v359_v52 = vadd.f32 %v8425_v20, %v8424_v16 }
 0x1f7   :  { %v310_v17 = vadd.f32 %v8423_v60, %v8422_v6  ;;  %v8426_v61 = vld [vmem:[#allocation15_spill] sm:$0xff] }
 0x1f8   :  { %v408_v60 = vadd.f32 %v8427_v19, %v8426_v61  ;;  %v4897_v19 = vld [vmem:[%s8110_s3 + $0x50] sm:$0xff] }
 0x1f9   :  { %vm2425_vm14 = vcmp.gt.f32.partialorder %v4897_v19, 0.5 }
 0x1fb   :  { %1859 = vperm.xlu2 %5048, %v1857_v39  }
 0x233   :  { %v1505_v26 = vpop.f32.mrf.mxu0  ;;  %v1518_v54 = vpop.f32.mrf.mxu1 }
 0x234   :  { %v1548_v56 = vadd.f32 %v1505_v26, %v261_v14  ;;  %v1549_v37 = vadd.f32 %v1518_v54, %v310_v17  ;;  %v2234_v26 = vsel %vm2230_vm13, 1, %v8250_v8 }
 0x235   :  { %2236 = vperm.xlu2 %5048, %v2234_v26  }
 0x236   :  { %v1616_v46 = vmul.f32 0.5, %v1548_v56  ;;  %v1620_v38 = vmul.f32 0.5, %v1549_v37 }
 0x238   :  { %5069 = vtanh.f32 %v1616_v46 }
 0x239   :  { %5071 = vtanh.f32 %v1620_v38 }
 0x23a   :  { %v1531_v6 = vpop.f32.mrf.mxu2  ;;  %v1544_v53 = vpop.f32.mrf.mxu3 }
 0x23b   :  { %v1550_v54 = vadd.f32 %v1531_v6, %v359_v52  ;;  %v1551_v17 = vadd.f32 %v1544_v53, %v408_v60  ;;  %v1507_v37 = vpop.f32.mrf.mxu0  ;;  %v1520_v46 = vpop.f32.mrf.mxu1  ;;  %v2433_v53 = vsel %vm2425_vm14, 1, %v8250_v8  ;;  %v8428_v60 = vld [vmem:[#allocation164_spill] sm:$0xff] }
 0x23c   :  { %v692_v26 = vadd.f32 %v8428_v60, %v6527_v59  ;;  %v1473_v37 = vsel %vm1471_vm6, %v6537_v9, 0.0  ;;  %v1661_v60 = vpop.permute.xlu1 %1660 }
 0x23d   :  { %5073 = vtanh.f32 %v1550_v54  ;;  %v1625_v14 = vmul.f32 0.5, %v1551_v17  ;;  %v8429_v54 = vld [vmem:[#allocation165_spill] sm:$0xff]  ;;  %2435 = vperm.xlu2 %5048, %v2433_v53   ;;  %vm1662_vm0 = vcmp.eq.s32.totalorder %v1661_v60, 1  ;;  %v8431_v53 = vld [vmem:[#allocation167_spill] sm:$0xff] }
 0x23e   :  { %v5070_v39 = vpop.eup %5069  ;;  %v741_v17 = vadd.f32 %v8429_v54, %v6529_v29 }
 0x23f   :  { %v5072_v56 = vpop.eup %5071  ;;  %v1618_v33 = vmul.f32 0.5, %v5070_v39  ;;  %5075 = vtanh.f32 %v1625_v14 }
 0x240   :  { %v1622_v20 = vmul.f32 0.5, %v5072_v56 }
 0x241   :  { %v1619_v38 = vadd.f32 0.5, %v1618_v33 }
 0x242   :  { %v1623_v50 = vadd.f32 0.5, %v1622_v20  ;;  %v1533_v61 = vpop.f32.mrf.mxu2  ;;  %v1546_v6 = vpop.f32.mrf.mxu3 }
 0x243   :  { %v5074_v52 = vpop.eup %5073  ;;  %v4900_v6 = vld [vmem:[%s8109_s2 + $0x38] sm:$0xff] }
 0x244   :  { %v1629_v46 = vmul.f32 %v1623_v50, %v1473_v37  ;;  %v1630_v33 = vmul.f32 %v5074_v52, %v1619_v38  ;;  %v1569_v14 = vpop.f32.mrf.mxu0  ;;  %v1582_v39 = vpop.f32.mrf.mxu1  ;;  %vm2806_vm15 = vcmp.gt.f32.partialorder %v4900_v6, 0.5  ;;  %v8430_v38 = vld [vmem:[#allocation166_spill] sm:$0xff]  ;;  %v839_v52 = vadd.f32 %v8431_v53, %v6542_v35 }
 0x245   :  { %v1612_v61 = vadd.f32 %v1569_v14, %v692_v26  ;;  %v1613_v56 = vadd.f32 %v1582_v39, %v741_v17  ;;  %v5076_v20 = vpop.eup %5075  ;;  %v2810_v9 = vsel %vm2806_vm15, 1, %v8250_v8  ;;  %v790_v50 = vadd.f32 %v8430_v38, %v6539_v31  ;;  %v4903_v26 = vld [vmem:[%s8110_s3 + $0x38] sm:$0xff] }
 0x246   :  { %v1631_v19 = vadd.f32 %v1630_v33, %v1629_v46  ;;  %v1627_v5 = vmul.f32 0.5, %v5076_v20  ;;  %2812 = vperm.xlu2 %5048, %v2810_v9   ;;  %vm2999_vm1 = vcmp.gt.f32.partialorder %v4903_v26, 0.5  ;;  %v4906_v26 = vld [vmem:[%s8109_s2 + $0x50] sm:$0xff] }
 0x247   :  { %v1634_v59 = vmul.f32 0.5, %v1612_v61  ;;  %v1638_v54 = vmul.f32 0.5, %v1613_v56  ;;  %v3007_v31 = vsel %vm2999_vm1, 1, %v8250_v8  ;;  %vm3376_vm2 = vcmp.gt.f32.partialorder %v4906_v26, 0.5  ;;  %v4915_v26 = vld [vmem:[%s8110_s3 + $0x8] sm:$0xff] }
 0x248   :  { %5077 = vtanh.f32 %v1631_v19  ;;  %v6703_v33 = vsel %vm1662_vm0, %v1631_v19, %v1473_v37  ;;  %v1628_v56 = vadd.f32 0.5, %v1627_v5  ;;  %vm4139_vm6 = vcmp.gt.f32.partialorder %v4915_v26, 0.5  ;;  %v8454_v26 = vld [vmem:[#allocation90_spill] sm:$0xff] }
 0x249   :  { %5079 = vtanh.f32 %v1634_v59 }
 0x24a   :  { %5081 = vtanh.f32 %v1638_v54 }
 0x24b   :  { %v1595_v17 = vpop.f32.mrf.mxu2  ;;  %v1608_v46 = vpop.f32.mrf.mxu3 }
 0x24c   :  { %v1614_v14 = vadd.f32 %v1595_v17, %v790_v50  ;;  %v1615_v39 = vadd.f32 %v1608_v46, %v839_v52  ;;  %v1571_v59 = vpop.f32.mrf.mxu0  ;;  %v1584_v61 = vpop.f32.mrf.mxu1 }
 0x24d   :  { %v1668_v61 = vpop.permute.xlu1 %1667 }
 0x24e   :  { %v5078_v20 = vpop.eup %5077  ;;  %5083 = vtanh.f32 %v1614_v14  ;;  %v1643_v6 = vmul.f32 0.5, %v1615_v39  ;;  %3009 = vperm.xlu2 %5048, %v3007_v31   ;;  %vm1669_vm3 = vcmp.eq.s32.totalorder %v1668_v61, 1  ;;  %v8440_v61 = vld [vmem:[#allocation68_spill] sm:$0xff] }
 0x24f   :  { %v5080_v54 = vpop.eup %5079  ;;  %v1633_v38 = vmul.f32 %v5078_v20, %v1628_v56  ;;  %v4909_v20 = vld [vmem:[%s8110_s3 + $0x20] sm:$0xff]  ;;  %s5452_s3 = smov [#allocation8]  }
 0x250   :  { %v5082_v53 = vpop.eup %5081  ;;  %v1636_v35 = vmul.f32 0.5, %v5080_v54  ;;  %5085 = vtanh.f32 %v1643_v6  ;;  %vm3569_vm4 = vcmp.gt.f32.partialorder %v4909_v20, 0.5  ;;  %v8444_v20 = vld [vmem:[#allocation76_spill] sm:$0xff]  ;;  %s4358_s1 = sshll.u32 %s5452_s3, 4  ;;  %s4359_s1 = int_to_ptr.vmem [resolvable:$true] %s4358_s1 }
 0x251   :  { %v6708_v9 = vsel %vm1662_vm0, %v1633_v38, %v6565_v47  ;;  %v1672_v37 = vsel %vm1662_vm0, %v1633_v38, 0.0  ;;  %v1640_v19 = vmul.f32 0.5, %v5082_v53  ;;  %v1480_v47 = vsel %vm1478_vm9, %v6584_v30, 0.0 }
 0x252   :  { %v1673_v50 = vpack.c.bf16 %v1672_v37, %v1672_v37  ;;  %v1687_v5 = vpack.c.bf16 %v6708_v9, %v6708_v9  ;;  %v1637_v52 = vadd.f32 0.5, %v1636_v35  ;;  %v3380_v30 = vsel %vm3376_vm2, 1, %v8250_v8 }
 0x253   :  { %v1641_v17 = vadd.f32 0.5, %v1640_v19  ;;  %v1597_v46 = vpop.f32.mrf.mxu2  ;;  %v1610_v14 = vpop.f32.mrf.mxu3  ;;  %v3577_v53 = vsel %vm3569_vm4, 1, %v8250_v8 }
 0x254   :  { %v5084_v39 = vpop.eup %5083  ;;  %1675 = vst [vmem:[#allocation8 + $0x4] sm:$0xf] %v1673_v50  ;;  %1696 = vmatmul.bf16.vlgmr.msra.gmra.mxu0 %v1687_v5  ;;  %1709 = vmatmul.bf16.vlgmr.msra.gmra.mxu1 %v1687_v5  ;;  %v4912_v50 = vld [vmem:[%s8109_s2 + $0x68] sm:$0xff]  ;;  %v8433_v46 = vld [vmem:[#allocation60_spill] sm:$0xff]  ;;  %v8434_v14 = vld [vmem:[#allocation62_spill] sm:$0xff] }
 0x255   :  { %v1647_v60 = vmul.f32 %v1641_v17, %v1480_v47  ;;  %v1648_v59 = vmul.f32 %v5084_v39, %v1637_v52  ;;  %1722 = vmatmul.bf16.vlgmr.msra.gmra.mxu2 %v1687_v5  ;;  %1735 = vmatmul.bf16.vlgmr.msra.gmra.mxu3 %v1687_v5  ;;  %vm3946_vm5 = vcmp.gt.f32.partialorder %v4912_v50, 0.5  ;;  %v4147_v17 = vsel %vm4139_vm6, 1, %v8250_v8  ;;  %v8435_v39 = vld [vmem:[#allocation63_spill] sm:$0xff]  ;;  %v8450_v50 = vld [vmem:[#allocation86_spill] sm:$0xff] }
 0x256   :  { %1880 = vmatpush.bf16.msra.mxu0 %v5673_v58  ;;  %1893 = vmatpush.bf16.msra.mxu1 %v5684_v62  ;;  %v5086_v35 = vpop.eup %5085 }
 0x257   :  { %v1649_v31 = vadd.f32 %v1648_v59, %v1647_v60  ;;  %1906 = vmatpush.bf16.msra.mxu2 %v5686_v63  ;;  %1919 = vmatpush.bf16.msra.mxu3 %v5697_v2  ;;  %v1645_v56 = vmul.f32 0.5, %v5086_v35  ;;  %v8437_v60 = vld [vmem:[#allocation65_spill] sm:$0xff]  ;;  %v8438_v59 = vld [vmem:[#allocation66_spill] sm:$0xff]  ;;  %v8439_v35 = vld [vmem:[#allocation67_spill] sm:$0xff] }
 0x258   :  { %3382 = vperm.xlu2 %5048, %v3380_v30   ;;  %v8442_v30 = vld [vmem:[#allocation74_spill] sm:$0xff] }
 0x259   :  { %5087 = vtanh.f32 %v1649_v31  ;;  %v6725_v18 = vsel %vm1669_vm3, %v1649_v31, %v1480_v47  ;;  %v1646_v6 = vadd.f32 0.5, %v1645_v56  ;;  %v8436_v47 = vld [vmem:[#allocation64_spill] sm:$0xff]  ;;  %v8441_v31 = vld [vmem:[#allocation70_spill] sm:$0xff]  ;;  %v8443_v56 = vld [vmem:[#allocation75_spill] sm:$0xff] }
 0x25a   :  { %1881 = vmatpush.bf16.msra.mxu0 %v5716_v7  ;;  %1894 = vmatpush.bf16.msra.mxu1 %v5727_v11 }
 0x25b   :  { %1907 = vmatpush.bf16.msra.mxu2 %v5729_v12  ;;  %1920 = vmatpush.bf16.msra.mxu3 %v5740_v15 }
 0x25e   :  { %1882 = vmatpush.bf16.msra.mxu0 %v5763_v22  ;;  %1895 = vmatpush.bf16.msra.mxu1 %v5776_v27 }
 0x25f   :  { %v5088_v54 = vpop.eup %5087  ;;  %1908 = vmatpush.bf16.msra.mxu2 %v5778_v28  ;;  %1921 = vmatpush.bf16.msra.mxu3 %v5795_v34 }
 0x260   :  { %v1651_v38 = vmul.f32 %v5088_v54, %v1646_v6  ;;  %3579 = vperm.xlu2 %5048, %v3577_v53   ;;  %v8445_v6 = vld [vmem:[#allocation77_spill] sm:$0xff]  ;;  %v8446_v54 = vld [vmem:[#allocation78_spill] sm:$0xff]  ;;  %v8448_v53 = vld [vmem:[#allocation80_spill] sm:$0xff] }
 0x262   :  { %v6741_v37 = vsel %vm1669_vm3, %v1651_v38, %v6603_v51  ;;  %v1676_v19 = vsel %vm1669_vm3, %v1651_v38, 0.0  ;;  %1883 = vmatpush.bf16.msra.mxu0 %v5822_v43  ;;  %1896 = vmatpush.bf16.msra.mxu1 %v5835_v48  ;;  %v3950_v51 = vsel %vm3946_vm5, 1, %v8250_v8  ;;  %v8432_v8 = vld [vmem:[#allocation59_spill] sm:$0xff] }
 0x263   :  { %v1677_v5 = vpack.c.bf16 %v1676_v19, %v1676_v19  ;;  %v1751_v52 = vpack.c.bf16 %v6741_v37, %v6741_v37  ;;  %1909 = vmatpush.bf16.msra.mxu2 %v5837_v49  ;;  %1922 = vmatpush.bf16.msra.mxu3 %v5854_v55  ;;  %v8447_v38 = vld [vmem:[#allocation79_spill] sm:$0xff]  ;;  %v8449_v19 = vld [vmem:[#allocation82_spill] sm:$0xff] }
 0x265   :  { %1679 = vst [vmem:[#allocation9 + $0x38] sm:$0xf] %v1677_v5  ;;  %1760 = vmatmul.bf16.vlgmr.msrb.gmra.mxu0 %v1751_v52  ;;  %1773 = vmatmul.bf16.vlgmr.msrb.gmra.mxu1 %v1751_v52  ;;  %v8451_v5 = vld [vmem:[#allocation87_spill] sm:$0xff] }
 0x266   :  { %1786 = vmatmul.bf16.vlgmr.msrb.gmra.mxu2 %v1751_v52  ;;  %1799 = vmatmul.bf16.vlgmr.msrb.gmra.mxu3 %v1751_v52  ;;  %v8452_v52 = vld [vmem:[#allocation88_spill] sm:$0xff] }
 0x267   :  { %1884 = vmatpush.bf16.msra.mxu0 %v5881_v4  ;;  %1897 = vmatpush.bf16.msra.mxu1 %v5894_v10 }
 0x268   :  { %1910 = vmatpush.bf16.msra.mxu2 %v5896_v13  ;;  %1923 = vmatpush.bf16.msra.mxu3 %v5913_v23 }
 0x269   :  { %3952 = vperm.xlu2 %5048, %v3950_v51   ;;  %v8453_v51 = vld [vmem:[#allocation89_spill] sm:$0xff] }
 0x26b   :  { %1885 = vmatpush.bf16.msra.mxu0 %v5940_v44  ;;  %1898 = vmatpush.bf16.msra.mxu1 %v5953_v57 }
 0x26c   :  { %1911 = vmatpush.bf16.msra.mxu2 %v5955_v0  ;;  %1924 = vmatpush.bf16.msra.mxu3 %v5975_v21 }
 0x26f   :  { %1886 = vmatpush.bf16.msra.mxu0 %v6010_v25  ;;  %1899 = vmatpush.bf16.msra.mxu1 %v6023_v45 }
 0x270   :  { %1912 = vmatpush.bf16.msra.mxu2 %v6025_v41  ;;  %1925 = vmatpush.bf16.msra.mxu3 %v6045_v42 }
 0x271   :  { %4149 = vperm.xlu2 %5048, %v4147_v17   ;;  %v8455_v17 = vld [vmem:[#allocation91_spill] sm:$0xff] }
 0x273   :  { %1887 = vmatpush.bf16.msra.mxu0 %v6071_v1  ;;  %1900 = vmatpush.bf16.msra.mxu1 %v6081_v3 }
 0x274   :  { %1913 = vmatpush.bf16.msra.mxu2 %v6093_v36  ;;  %1926 = vmatpush.bf16.msra.mxu3 %v6100_v32 }
 0x277   :  { %1944 = vmatpush.bf16.msrb.mxu0 %v6102_v24  ;;  %1957 = vmatpush.bf16.msrb.mxu1 %v6107_v40 }
 0x278   :  { %1970 = vmatpush.bf16.msrb.mxu2 %v8432_v8  ;;  %1983 = vmatpush.bf16.msrb.mxu3 %v8433_v46 }
 0x27b   :  { %1945 = vmatpush.bf16.msrb.mxu0 %v8434_v14  ;;  %1958 = vmatpush.bf16.msrb.mxu1 %v8435_v39 }
 0x27c   :  { %1971 = vmatpush.bf16.msrb.mxu2 %v8436_v47  ;;  %1984 = vmatpush.bf16.msrb.mxu3 %v8437_v60 }
 0x27f   :  { %1946 = vmatpush.bf16.msrb.mxu0 %v8438_v59  ;;  %1959 = vmatpush.bf16.msrb.mxu1 %v8439_v35  ;;  %v8467_v35 = vld [vmem:[#allocation15_spill] sm:$0xff] }
 0x280   :  { %1972 = vmatpush.bf16.msrb.mxu2 %v8440_v61  ;;  %1985 = vmatpush.bf16.msrb.mxu3 %v8441_v31 }
 0x283   :  { %1947 = vmatpush.bf16.msrb.mxu0 %v8442_v30  ;;  %1960 = vmatpush.bf16.msrb.mxu1 %v8443_v56  ;;  %v8465_v56 = vld [vmem:[#allocation23_spill] sm:$0xff] }
 0x284   :  { %1973 = vmatpush.bf16.msrb.mxu2 %v8444_v20  ;;  %1986 = vmatpush.bf16.msrb.mxu3 %v8445_v6  ;;  %v8456_v6 = vld [vmem:[#allocation92_spill] sm:$0xff] }
 0x287   :  { %1948 = vmatpush.bf16.msrb.mxu0 %v8446_v54  ;;  %1961 = vmatpush.bf16.msrb.mxu1 %v8447_v38  ;;  %v8457_v54 = vld [vmem:[#allocation94_spill] sm:$0xff] }
 0x288   :  { %1974 = vmatpush.bf16.msrb.mxu2 %v8448_v53  ;;  %1987 = vmatpush.bf16.msrb.mxu3 %v8449_v19  ;;  %v8458_v38 = vld [vmem:[#allocation98_spill] sm:$0xff]  ;;  %v8459_v53 = vld [vmem:[#allocation99_spill] sm:$0xff]  ;;  %v8460_v19 = vld [vmem:[#allocation100_spill] sm:$0xff] }
 0x28b   :  { %1949 = vmatpush.bf16.msrb.mxu0 %v8450_v50  ;;  %1962 = vmatpush.bf16.msrb.mxu1 %v8451_v5  ;;  %v8461_v50 = vld [vmem:[#allocation101_spill] sm:$0xff]  ;;  %v8462_v5 = vld [vmem:[#allocation168_spill] sm:$0xff] }
 0x28c   :  { %1975 = vmatpush.bf16.msrb.mxu2 %v8452_v52  ;;  %1988 = vmatpush.bf16.msrb.mxu3 %v8453_v51  ;;  %v8463_v52 = vld [vmem:[#allocation22_spill] sm:$0xff]  ;;  %v8464_v51 = vld [vmem:[#allocation169_spill] sm:$0xff] }
 0x28d   :  { %v264_v20 = vadd.f32 %v8463_v52, %v8462_v5 }
 0x28f   :  { %1950 = vmatpush.bf16.msrb.mxu0 %v8454_v26  ;;  %1963 = vmatpush.bf16.msrb.mxu1 %v8455_v17  ;;  %v313_v26 = vadd.f32 %v8465_v56, %v8464_v51 }
 0x290   :  { %1976 = vmatpush.bf16.msrb.mxu2 %v8456_v6  ;;  %1989 = vmatpush.bf16.msrb.mxu3 %v8457_v54 }
 0x293   :  { %1951 = vmatpush.bf16.msrb.mxu0 %v8458_v38  ;;  %1964 = vmatpush.bf16.msrb.mxu1 %v8459_v53  ;;  %v8466_v38 = vld [vmem:[#allocation24_spill] sm:$0xff] }
 0x294   :  { %1977 = vmatpush.bf16.msrb.mxu2 %v8460_v19  ;;  %1990 = vmatpush.bf16.msrb.mxu3 %v8461_v50  ;;  %v362_v53 = vadd.f32 %v8466_v38, %v8424_v16  ;;  %v8468_v19 = vld [vmem:[#allocation25_spill] sm:$0xff] }
 0x295   :  { %v411_v59 = vadd.f32 %v8468_v19, %v8467_v35  ;;  %v8469_v19 = vld [vmem:[#allocation16_spill] sm:$0xff] }
 0x2d1   :  { %v1697_v30 = vpop.f32.mrf.mxu0  ;;  %v1710_v17 = vpop.f32.mrf.mxu1 }
 0x2d2   :  { %v1740_v31 = vadd.f32 %v1697_v30, %v264_v20  ;;  %v1741_v6 = vadd.f32 %v1710_v17, %v313_v26 }
 0x2d4   :  { %v1808_v61 = vmul.f32 0.5, %v1740_v31  ;;  %v1812_v54 = vmul.f32 0.5, %v1741_v6 }
 0x2d6   :  { %5089 = vtanh.f32 %v1808_v61 }
 0x2d7   :  { %5091 = vtanh.f32 %v1812_v54  ;;  %v8470_v54 = vld [vmem:[#allocation160_spill] sm:$0xff] }
 0x2d8   :  { %v1723_v50 = vpop.f32.mrf.mxu2  ;;  %v1736_v60 = vpop.f32.mrf.mxu3  ;;  %v689_v35 = vadd.f32 %v8470_v54, %v8469_v19  ;;  %v8473_v54 = vld [vmem:[#allocation170_spill] sm:$0xff] }
 0x2d9   :  { %v1742_v52 = vadd.f32 %v1723_v50, %v362_v53  ;;  %v1743_v5 = vadd.f32 %v1736_v60, %v411_v59  ;;  %v1699_v47 = vpop.f32.mrf.mxu0  ;;  %v1712_v56 = vpop.f32.mrf.mxu1  ;;  %v8471_v53 = vld [vmem:[#allocation161_spill] sm:$0xff] }
 0x2da   :  { %v738_v60 = vadd.f32 %v8471_v53, %v6529_v29  ;;  %v1853_v47 = vpop.permute.xlu2 %1852  ;;  %v8474_v53 = vld [vmem:[#allocation162_spill] sm:$0xff] }
 0x2db   :  { %5093 = vtanh.f32 %v1742_v52  ;;  %v1817_v51 = vmul.f32 0.5, %v1743_v5  ;;  %vm1854_vm7 = vcmp.eq.s32.totalorder %v1853_v47, 1 }
 0x2dc   :  { %v5090_v30 = vpop.eup %5089 }
 0x2dd   :  { %v5092_v20 = vpop.eup %5091  ;;  %v1810_v31 = vmul.f32 0.5, %v5090_v30  ;;  %5095 = vtanh.f32 %v1817_v51 }
 0x2de   :  { %v1814_v6 = vmul.f32 0.5, %v5092_v20 }
 0x2df   :  { %v1811_v61 = vadd.f32 0.5, %v1810_v31 }
 0x2e0   :  { %v1815_v26 = vadd.f32 0.5, %v1814_v6  ;;  %v1725_v38 = vpop.f32.mrf.mxu2  ;;  %v1738_v17 = vpop.f32.mrf.mxu3 }
 0x2e1   :  { %v5094_v16 = vpop.eup %5093 }
 0x2e2   :  { %v1821_v59 = vmul.f32 %v1815_v26, %v6703_v33  ;;  %v1822_v50 = vmul.f32 %v5094_v16, %v1811_v61  ;;  %v1761_v5 = vpop.f32.mrf.mxu0  ;;  %v1774_v52 = vpop.f32.mrf.mxu1  ;;  %v787_v26 = vadd.f32 %v8474_v53, %v8473_v54  ;;  %v8475_v16 = vld [vmem:[#allocation171_spill] sm:$0xff] }
 0x2e3   :  { %v1804_v56 = vadd.f32 %v1761_v5, %v689_v35  ;;  %v1805_v51 = vadd.f32 %v1774_v52, %v738_v60  ;;  %v5096_v30 = vpop.eup %5095  ;;  %v8476_v61 = vld [vmem:[#allocation163_spill] sm:$0xff] }
 0x2e4   :  { %v1823_v20 = vadd.f32 %v1822_v50, %v1821_v59  ;;  %v1819_v17 = vmul.f32 0.5, %v5096_v30  ;;  %v836_v29 = vadd.f32 %v8476_v61, %v8475_v16 }
 0x2e5   :  { %v1826_v31 = vmul.f32 0.5, %v1804_v56  ;;  %v1830_v6 = vmul.f32 0.5, %v1805_v51 }
 0x2e6   :  { %5097 = vtanh.f32 %v1823_v20  ;;  %v6821_v38 = vsel %vm1854_vm7, %v1823_v20, %v6703_v33  ;;  %v1820_v56 = vadd.f32 0.5, %v1819_v17 }
 0x2e7   :  { %8472 = vst [vmem:[#allocation18_spill] sm:$0xff] %v6821_v38  ;;  %5099 = vtanh.f32 %v1826_v31 }
 0x2e8   :  { %5101 = vtanh.f32 %v1830_v6 }
 0x2e9   :  { %v1787_v35 = vpop.f32.mrf.mxu2  ;;  %v1800_v60 = vpop.f32.mrf.mxu3 }
 0x2ea   :  { %v1806_v5 = vadd.f32 %v1787_v35, %v787_v26  ;;  %v1807_v59 = vadd.f32 %v1800_v60, %v836_v29  ;;  %v1763_v50 = vpop.f32.mrf.mxu0  ;;  %v1776_v52 = vpop.f32.mrf.mxu1 }
 0x2eb   :  { %v1860_v52 = vpop.permute.xlu2 %1859 }
 0x2ec   :  { %v5098_v51 = vpop.eup %5097  ;;  %5103 = vtanh.f32 %v1806_v5  ;;  %v1835_v33 = vmul.f32 0.5, %v1807_v59  ;;  %vm1861_vm8 = vcmp.eq.s32.totalorder %v1860_v52, 1  ;;  %v8488_v52 = vld [vmem:[#allocation79_spill] sm:$0xff] }
 0x2ed   :  { %v5100_v20 = vpop.eup %5099  ;;  %v1825_v30 = vmul.f32 %v5098_v51, %v1820_v56 }
 0x2ee   :  { %v5102_v31 = vpop.eup %5101  ;;  %v1828_v38 = vmul.f32 0.5, %v5100_v20  ;;  %5105 = vtanh.f32 %v1835_v33 }
 0x2ef   :  { %v6829_v53 = vsel %vm1854_vm7, %v1825_v30, %v6708_v9  ;;  %v1864_v6 = vsel %vm1854_vm7, %v1825_v30, 0.0  ;;  %v1832_v61 = vmul.f32 0.5, %v5102_v31 }
 0x2f0   :  { %v1865_v26 = vpack.c.bf16 %v1864_v6, %v1864_v6  ;;  %v1879_v29 = vpack.c.bf16 %v6829_v53, %v6829_v53  ;;  %v1829_v17 = vadd.f32 0.5, %v1828_v38 }
 0x2f1   :  { %v1833_v35 = vadd.f32 0.5, %v1832_v61  ;;  %v1789_v60 = vpop.f32.mrf.mxu2  ;;  %v1802_v5 = vpop.f32.mrf.mxu3 }
 0x2f2   :  { %v5104_v59 = vpop.eup %5103  ;;  %1867 = vst [vmem:[#allocation8 + $0x8] sm:$0xf] %v1865_v26  ;;  %1888 = vmatmul.bf16.vlgmr.msra.gmra.mxu0 %v1879_v29  ;;  %1901 = vmatmul.bf16.vlgmr.msra.gmra.mxu1 %v1879_v29  ;;  %v8478_v26 = vld [vmem:[#allocation65_spill] sm:$0xff]  ;;  %v8482_v60 = vld [vmem:[#allocation70_spill] sm:$0xff] }
 0x2f3   :  { %v1839_v50 = vmul.f32 %v1833_v35, %v6725_v18  ;;  %v1840_v9 = vmul.f32 %v5104_v59, %v1829_v17  ;;  %1914 = vmatmul.bf16.vlgmr.msra.gmra.mxu2 %v1879_v29  ;;  %1927 = vmatmul.bf16.vlgmr.msra.gmra.mxu3 %v1879_v29  ;;  %v8479_v29 = vld [vmem:[#allocation66_spill] sm:$0xff]  ;;  %v8480_v17 = vld [vmem:[#allocation67_spill] sm:$0xff]  ;;  %v8481_v35 = vld [vmem:[#allocation68_spill] sm:$0xff] }
 0x2f4   :  { %2072 = vmatpush.bf16.msra.mxu0 %v5673_v58  ;;  %2085 = vmatpush.bf16.msra.mxu1 %v5684_v62  ;;  %v5106_v47 = vpop.eup %5105  ;;  %v8483_v5 = vld [vmem:[#allocation74_spill] sm:$0xff]  ;;  %v8484_v59 = vld [vmem:[#allocation75_spill] sm:$0xff] }
 0x2f5   :  { %v1841_v56 = vadd.f32 %v1840_v9, %v1839_v50  ;;  %2098 = vmatpush.bf16.msra.mxu2 %v5686_v63  ;;  %2111 = vmatpush.bf16.msra.mxu3 %v5697_v2  ;;  %v1837_v51 = vmul.f32 0.5, %v5106_v47  ;;  %v8485_v50 = vld [vmem:[#allocation76_spill] sm:$0xff]  ;;  %v8486_v9 = vld [vmem:[#allocation77_spill] sm:$0xff]  ;;  %v8487_v47 = vld [vmem:[#allocation78_spill] sm:$0xff] }
 0x2f7   :  { %5107 = vtanh.f32 %v1841_v56  ;;  %v6841_v38 = vsel %vm1861_vm8, %v1841_v56, %v6725_v18  ;;  %v1838_v33 = vadd.f32 0.5, %v1837_v51  ;;  %v8489_v56 = vld [vmem:[#allocation80_spill] sm:$0xff]  ;;  %v8490_v51 = vld [vmem:[#allocation82_spill] sm:$0xff] }
 0x2f8   :  { %2073 = vmatpush.bf16.msra.mxu0 %v5716_v7  ;;  %2086 = vmatpush.bf16.msra.mxu1 %v5727_v11 }
 0x2f9   :  { %2099 = vmatpush.bf16.msra.mxu2 %v5729_v12  ;;  %2112 = vmatpush.bf16.msra.mxu3 %v5740_v15 }
 0x2fc   :  { %2074 = vmatpush.bf16.msra.mxu0 %v5763_v22  ;;  %2087 = vmatpush.bf16.msra.mxu1 %v5776_v27 }
 0x2fd   :  { %v5108_v20 = vpop.eup %5107  ;;  %2100 = vmatpush.bf16.msra.mxu2 %v5778_v28  ;;  %2113 = vmatpush.bf16.msra.mxu3 %v5795_v34 }
 0x2fe   :  { %v1843_v18 = vmul.f32 %v5108_v20, %v1838_v33  ;;  %v8491_v33 = vld [vmem:[#allocation86_spill] sm:$0xff]  ;;  %v8492_v20 = vld [vmem:[#allocation87_spill] sm:$0xff] }
 0x300   :  { %v6853_v30 = vsel %vm1861_vm8, %v1843_v18, %v6741_v37  ;;  %v1868_v31 = vsel %vm1861_vm8, %v1843_v18, 0.0  ;;  %2075 = vmatpush.bf16.msra.mxu0 %v5822_v43  ;;  %2088 = vmatpush.bf16.msra.mxu1 %v5835_v48  ;;  %v8477_v37 = vld [vmem:[#allocation64_spill] sm:$0xff] }
 0x301   :  { %v1869_v6 = vpack.c.bf16 %v1868_v31, %v1868_v31  ;;  %v1943_v61 = vpack.c.bf16 %v6853_v30, %v6853_v30  ;;  %2101 = vmatpush.bf16.msra.mxu2 %v5837_v49  ;;  %2114 = vmatpush.bf16.msra.mxu3 %v5854_v55  ;;  %v8493_v18 = vld [vmem:[#allocation88_spill] sm:$0xff]  ;;  %v8494_v31 = vld [vmem:[#allocation89_spill] sm:$0xff] }
 0x303   :  { %1871 = vst [vmem:[#allocation9 + $0x34] sm:$0xf] %v1869_v6  ;;  %1952 = vmatmul.bf16.vlgmr.msrb.gmra.mxu0 %v1943_v61  ;;  %1965 = vmatmul.bf16.vlgmr.msrb.gmra.mxu1 %v1943_v61  ;;  %v8495_v6 = vld [vmem:[#allocation90_spill] sm:$0xff] }
 0x304   :  { %1978 = vmatmul.bf16.vlgmr.msrb.gmra.mxu2 %v1943_v61  ;;  %1991 = vmatmul.bf16.vlgmr.msrb.gmra.mxu3 %v1943_v61  ;;  %v8496_v61 = vld [vmem:[#allocation91_spill] sm:$0xff] }
 0x305   :  { %2076 = vmatpush.bf16.msra.mxu0 %v5881_v4  ;;  %2089 = vmatpush.bf16.msra.mxu1 %v5894_v10 }
 0x306   :  { %2102 = vmatpush.bf16.msra.mxu2 %v5896_v13  ;;  %2115 = vmatpush.bf16.msra.mxu3 %v5913_v23 }
 0x309   :  { %2077 = vmatpush.bf16.msra.mxu0 %v5940_v44  ;;  %2090 = vmatpush.bf16.msra.mxu1 %v5953_v57 }
 0x30a   :  { %2103 = vmatpush.bf16.msra.mxu2 %v5955_v0  ;;  %2116 = vmatpush.bf16.msra.mxu3 %v5975_v21 }
 0x30d   :  { %2078 = vmatpush.bf16.msra.mxu0 %v6010_v25  ;;  %2091 = vmatpush.bf16.msra.mxu1 %v6023_v45 }
 0x30e   :  { %2104 = vmatpush.bf16.msra.mxu2 %v6025_v41  ;;  %2117 = vmatpush.bf16.msra.mxu3 %v6045_v42 }
 0x311   :  { %2079 = vmatpush.bf16.msra.mxu0 %v6071_v1  ;;  %2092 = vmatpush.bf16.msra.mxu1 %v6081_v3 }
 0x312   :  { %2105 = vmatpush.bf16.msra.mxu2 %v6093_v36  ;;  %2118 = vmatpush.bf16.msra.mxu3 %v6100_v32 }
 0x315   :  { %2136 = vmatpush.bf16.msrb.mxu0 %v6102_v24  ;;  %2149 = vmatpush.bf16.msrb.mxu1 %v6107_v40 }
 0x316   :  { %2162 = vmatpush.bf16.msrb.mxu2 %v8432_v8  ;;  %2175 = vmatpush.bf16.msrb.mxu3 %v8433_v46 }
 0x319   :  { %2137 = vmatpush.bf16.msrb.mxu0 %v8434_v14  ;;  %2150 = vmatpush.bf16.msrb.mxu1 %v8435_v39 }
 0x31a   :  { %2163 = vmatpush.bf16.msrb.mxu2 %v8477_v37  ;;  %2176 = vmatpush.bf16.msrb.mxu3 %v8478_v26 }
 0x31d   :  { %2138 = vmatpush.bf16.msrb.mxu0 %v8479_v29  ;;  %2151 = vmatpush.bf16.msrb.mxu1 %v8480_v17  ;;  %v8508_v17 = vld [vmem:[#allocation28_spill] sm:$0xff]  ;;  %v8509_v29 = vld [vmem:[#allocation15_spill] sm:$0xff] }
 0x31e   :  { %2164 = vmatpush.bf16.msrb.mxu2 %v8481_v35  ;;  %2177 = vmatpush.bf16.msrb.mxu3 %v8482_v60 }
 0x321   :  { %2139 = vmatpush.bf16.msrb.mxu0 %v8483_v5  ;;  %2152 = vmatpush.bf16.msrb.mxu1 %v8484_v59  ;;  %v8506_v59 = vld [vmem:[#allocation27_spill] sm:$0xff] }
 0x322   :  { %2165 = vmatpush.bf16.msrb.mxu2 %v8485_v50  ;;  %2178 = vmatpush.bf16.msrb.mxu3 %v8486_v9  ;;  %v8497_v9 = vld [vmem:[#allocation92_spill] sm:$0xff] }
 0x325   :  { %2140 = vmatpush.bf16.msrb.mxu0 %v8487_v47  ;;  %2153 = vmatpush.bf16.msrb.mxu1 %v8488_v52  ;;  %v8498_v47 = vld [vmem:[#allocation94_spill] sm:$0xff] }
 0x326   :  { %2166 = vmatpush.bf16.msrb.mxu2 %v8489_v56  ;;  %2179 = vmatpush.bf16.msrb.mxu3 %v8490_v51  ;;  %v8499_v52 = vld [vmem:[#allocation98_spill] sm:$0xff]  ;;  %v8500_v56 = vld [vmem:[#allocation99_spill] sm:$0xff]  ;;  %v8501_v51 = vld [vmem:[#allocation100_spill] sm:$0xff] }
 0x329   :  { %2141 = vmatpush.bf16.msrb.mxu0 %v8491_v33  ;;  %2154 = vmatpush.bf16.msrb.mxu1 %v8492_v20  ;;  %v8502_v33 = vld [vmem:[#allocation101_spill] sm:$0xff]  ;;  %v8503_v20 = vld [vmem:[#allocation168_spill] sm:$0xff] }
 0x32a   :  { %2167 = vmatpush.bf16.msrb.mxu2 %v8493_v18  ;;  %2180 = vmatpush.bf16.msrb.mxu3 %v8494_v31  ;;  %v8504_v18 = vld [vmem:[#allocation26_spill] sm:$0xff]  ;;  %v8505_v31 = vld [vmem:[#allocation169_spill] sm:$0xff] }
 0x32b   :  { %v266_v50 = vadd.f32 %v8504_v18, %v8503_v20 }
 0x32d   :  { %2142 = vmatpush.bf16.msrb.mxu0 %v8495_v6  ;;  %2155 = vmatpush.bf16.msrb.mxu1 %v8496_v61  ;;  %v315_v6 = vadd.f32 %v8506_v59, %v8505_v31 }
 0x32e   :  { %2168 = vmatpush.bf16.msrb.mxu2 %v8497_v9  ;;  %2181 = vmatpush.bf16.msrb.mxu3 %v8498_v47 }
 0x331   :  { %2143 = vmatpush.bf16.msrb.mxu0 %v8499_v52  ;;  %2156 = vmatpush.bf16.msrb.mxu1 %v8500_v56  ;;  %v8507_v52 = vld [vmem:[#allocation14_spill] sm:$0xff] }
 0x332   :  { %2169 = vmatpush.bf16.msrb.mxu2 %v8501_v51  ;;  %2182 = vmatpush.bf16.msrb.mxu3 %v8502_v33  ;;  %v364_v56 = vadd.f32 %v8508_v17, %v8507_v52  ;;  %v8510_v51 = vld [vmem:[#allocation29_spill] sm:$0xff] }
 0x333   :  { %v413_v26 = vadd.f32 %v8510_v51, %v8509_v29  ;;  %v8512_v29 = vld [vmem:[#allocation17_spill] sm:$0xff] }
 0x36f   :  { %v1889_v5 = vpop.f32.mrf.mxu0  ;;  %v1902_v61 = vpop.f32.mrf.mxu1 }
 0x370   :  { %v1932_v60 = vadd.f32 %v1889_v5, %v266_v50  ;;  %v1933_v9 = vadd.f32 %v1902_v61, %v315_v6 }
 0x372   :  { %v2000_v35 = vmul.f32 0.5, %v1932_v60  ;;  %v2004_v47 = vmul.f32 0.5, %v1933_v9 }
 0x374   :  { %5109 = vtanh.f32 %v2000_v35 }
 0x375   :  { %5111 = vtanh.f32 %v2004_v47  ;;  %v8511_v47 = vld [vmem:[#allocation156_spill] sm:$0xff] }
 0x376   :  { %v1915_v33 = vpop.f32.mrf.mxu2  ;;  %v1928_v37 = vpop.f32.mrf.mxu3  ;;  %v687_v51 = vadd.f32 %v8511_v47, %v8469_v19 }
 0x377   :  { %v1934_v18 = vadd.f32 %v1915_v33, %v364_v56  ;;  %v1935_v20 = vadd.f32 %v1928_v37, %v413_v26  ;;  %v1891_v39 = vpop.f32.mrf.mxu0  ;;  %v1904_v59 = vpop.f32.mrf.mxu1  ;;  %v8513_v56 = vld [vmem:[#allocation157_spill] sm:$0xff] }
 0x378   :  { %v736_v37 = vadd.f32 %v8513_v56, %v8512_v29  ;;  %v8514_v39 = vld [vmem:[#allocation18_spill] sm:$0xff] }
 0x379   :  { %5113 = vtanh.f32 %v1934_v18  ;;  %v2009_v31 = vmul.f32 0.5, %v1935_v20 }
 0x37a   :  { %v5110_v5 = vpop.eup %5109 }
 0x37b   :  { %v5112_v50 = vpop.eup %5111  ;;  %v2002_v60 = vmul.f32 0.5, %v5110_v5  ;;  %5115 = vtanh.f32 %v2009_v31  ;;  %v2045_v31 = vpop.permute.xlu0 %2044 }
 0x37c   :  { %v2006_v9 = vmul.f32 0.5, %v5112_v50  ;;  %vm2046_vm9 = vcmp.eq.s32.totalorder %v2045_v31, 1 }
 0x37d   :  { %v2003_v35 = vadd.f32 0.5, %v2002_v60 }
 0x37e   :  { %v2007_v6 = vadd.f32 0.5, %v2006_v9  ;;  %v1917_v17 = vpop.f32.mrf.mxu2  ;;  %v1930_v61 = vpop.f32.mrf.mxu3 }
 0x37f   :  { %v5114_v52 = vpop.eup %5113 }
 0x380   :  { %v2013_v26 = vmul.f32 %v2007_v6, %v8514_v39  ;;  %v2014_v33 = vmul.f32 %v5114_v52, %v2003_v35  ;;  %v1953_v20 = vpop.f32.mrf.mxu0  ;;  %v1966_v18 = vpop.f32.mrf.mxu1  ;;  %v8516_v6 = vld [vmem:[#allocation158_spill] sm:$0xff]  ;;  %v8517_v35 = vld [vmem:[#allocation159_spill] sm:$0xff] }
 0x381   :  { %v1996_v59 = vadd.f32 %v1953_v20, %v687_v51  ;;  %v1997_v5 = vadd.f32 %v1966_v18, %v736_v37  ;;  %v5116_v50 = vpop.eup %5115  ;;  %v785_v52 = vadd.f32 %v8516_v6, %v8473_v54  ;;  %v834_v51 = vadd.f32 %v8517_v35, %v8475_v16 }
 0x382   :  { %v2015_v60 = vadd.f32 %v2014_v33, %v2013_v26  ;;  %v2011_v47 = vmul.f32 0.5, %v5116_v50 }
 0x383   :  { %v2018_v9 = vmul.f32 0.5, %v1996_v59  ;;  %v2022_v17 = vmul.f32 0.5, %v1997_v5 }
 0x384   :  { %5117 = vtanh.f32 %v2015_v60  ;;  %v6925_v61 = vsel %vm2046_vm9, %v2015_v60, %v8514_v39  ;;  %v2012_v59 = vadd.f32 0.5, %v2011_v47 }
 0x385   :  { %8515 = vst [vmem:[#allocation19_spill] sm:$0xff] %v6925_v61  ;;  %5119 = vtanh.f32 %v2018_v9 }
 0x386   :  { %5121 = vtanh.f32 %v2022_v17 }
 0x387   :  { %v1979_v56 = vpop.f32.mrf.mxu2  ;;  %v1992_v37 = vpop.f32.mrf.mxu3 }
 0x388   :  { %v1998_v26 = vadd.f32 %v1979_v56, %v785_v52  ;;  %v1999_v33 = vadd.f32 %v1992_v37, %v834_v51  ;;  %v1955_v20 = vpop.f32.mrf.mxu0  ;;  %v1968_v18 = vpop.f32.mrf.mxu1 }
 0x389   :  { %v2052_v18 = vpop.permute.xlu1 %2051 }
 0x38a   :  { %v5118_v5 = vpop.eup %5117  ;;  %5123 = vtanh.f32 %v1998_v26  ;;  %v2027_v39 = vmul.f32 0.5, %v1999_v33  ;;  %vm2053_vm10 = vcmp.eq.s32.totalorder %v2052_v18, 1  ;;  %v8529_v18 = vld [vmem:[#allocation78_spill] sm:$0xff] }
 0x38b   :  { %v5120_v60 = vpop.eup %5119  ;;  %v2017_v50 = vmul.f32 %v5118_v5, %v2012_v59 }
 0x38c   :  { %v5122_v9 = vpop.eup %5121  ;;  %v2020_v61 = vmul.f32 0.5, %v5120_v60  ;;  %5125 = vtanh.f32 %v2027_v39 }
 0x38d   :  { %v6933_v6 = vsel %vm2046_vm9, %v2017_v50, %v6829_v53  ;;  %v2056_v17 = vsel %vm2046_vm9, %v2017_v50, 0.0  ;;  %v2024_v35 = vmul.f32 0.5, %v5122_v9 }
 0x38e   :  { %v2057_v52 = vpack.c.bf16 %v2056_v17, %v2056_v17  ;;  %v2071_v51 = vpack.c.bf16 %v6933_v6, %v6933_v6  ;;  %v2021_v47 = vadd.f32 0.5, %v2020_v61 }
 0x38f   :  { %v2025_v56 = vadd.f32 0.5, %v2024_v35  ;;  %v1981_v37 = vpop.f32.mrf.mxu2  ;;  %v1994_v26 = vpop.f32.mrf.mxu3 }
 0x390   :  { %v5124_v33 = vpop.eup %5123  ;;  %2059 = vst [vmem:[#allocation8 + $0xc] sm:$0xf] %v2057_v52  ;;  %2080 = vmatmul.bf16.vlgmr.msra.gmra.mxu0 %v2071_v51  ;;  %2093 = vmatmul.bf16.vlgmr.msra.gmra.mxu1 %v2071_v51  ;;  %v8519_v52 = vld [vmem:[#allocation64_spill] sm:$0xff]  ;;  %v8524_v26 = vld [vmem:[#allocation70_spill] sm:$0xff] }
 0x391   :  { %v2031_v20 = vmul.f32 %v2025_v56, %v6841_v38  ;;  %v2032_v53 = vmul.f32 %v5124_v33, %v2021_v47  ;;  %2106 = vmatmul.bf16.vlgmr.msra.gmra.mxu2 %v2071_v51  ;;  %2119 = vmatmul.bf16.vlgmr.msra.gmra.mxu3 %v2071_v51  ;;  %v8520_v51 = vld [vmem:[#allocation65_spill] sm:$0xff]  ;;  %v8521_v47 = vld [vmem:[#allocation66_spill] sm:$0xff]  ;;  %v8522_v56 = vld [vmem:[#allocation67_spill] sm:$0xff] }
 0x392   :  { %2264 = vmatpush.bf16.msra.mxu0 %v5673_v58  ;;  %2277 = vmatpush.bf16.msra.mxu1 %v5684_v62  ;;  %v5126_v31 = vpop.eup %5125  ;;  %v8523_v37 = vld [vmem:[#allocation68_spill] sm:$0xff]  ;;  %v8525_v33 = vld [vmem:[#allocation74_spill] sm:$0xff] }
 0x393   :  { %v2033_v59 = vadd.f32 %v2032_v53, %v2031_v20  ;;  %2290 = vmatpush.bf16.msra.mxu2 %v5686_v63  ;;  %2303 = vmatpush.bf16.msra.mxu3 %v5697_v2  ;;  %v2029_v5 = vmul.f32 0.5, %v5126_v31  ;;  %v8526_v20 = vld [vmem:[#allocation75_spill] sm:$0xff]  ;;  %v8527_v53 = vld [vmem:[#allocation76_spill] sm:$0xff]  ;;  %v8528_v31 = vld [vmem:[#allocation77_spill] sm:$0xff] }
 0x395   :  { %5127 = vtanh.f32 %v2033_v59  ;;  %v6945_v61 = vsel %vm2053_vm10, %v2033_v59, %v6841_v38  ;;  %v2030_v39 = vadd.f32 0.5, %v2029_v5  ;;  %v8530_v59 = vld [vmem:[#allocation79_spill] sm:$0xff]  ;;  %v8531_v5 = vld [vmem:[#allocation80_spill] sm:$0xff] }
 0x396   :  { %2265 = vmatpush.bf16.msra.mxu0 %v5716_v7  ;;  %2278 = vmatpush.bf16.msra.mxu1 %v5727_v11 }
 0x397   :  { %2291 = vmatpush.bf16.msra.mxu2 %v5729_v12  ;;  %2304 = vmatpush.bf16.msra.mxu3 %v5740_v15 }
 0x39a   :  { %2266 = vmatpush.bf16.msra.mxu0 %v5763_v22  ;;  %2279 = vmatpush.bf16.msra.mxu1 %v5776_v27 }
 0x39b   :  { %v5128_v60 = vpop.eup %5127  ;;  %2292 = vmatpush.bf16.msra.mxu2 %v5778_v28  ;;  %2305 = vmatpush.bf16.msra.mxu3 %v5795_v34 }
 0x39c   :  { %v2035_v38 = vmul.f32 %v5128_v60, %v2030_v39  ;;  %v8532_v39 = vld [vmem:[#allocation82_spill] sm:$0xff] }
 0x39d   :  { %v8533_v60 = vld [vmem:[#allocation86_spill] sm:$0xff] }
 0x39e   :  { %v6957_v50 = vsel %vm2053_vm10, %v2035_v38, %v6853_v30  ;;  %v2060_v9 = vsel %vm2053_vm10, %v2035_v38, 0.0  ;;  %2267 = vmatpush.bf16.msra.mxu0 %v5822_v43  ;;  %2280 = vmatpush.bf16.msra.mxu1 %v5835_v48  ;;  %v8518_v30 = vld [vmem:[#allocation63_spill] sm:$0xff] }
 0x39f   :  { %v2061_v17 = vpack.c.bf16 %v2060_v9, %v2060_v9  ;;  %v2135_v35 = vpack.c.bf16 %v6957_v50, %v6957_v50  ;;  %2293 = vmatpush.bf16.msra.mxu2 %v5837_v49  ;;  %2306 = vmatpush.bf16.msra.mxu3 %v5854_v55  ;;  %v8534_v38 = vld [vmem:[#allocation87_spill] sm:$0xff]  ;;  %v8535_v9 = vld [vmem:[#allocation88_spill] sm:$0xff] }
 0x3a1   :  { %2063 = vst [vmem:[#allocation9 + $0x30] sm:$0xf] %v2061_v17  ;;  %2144 = vmatmul.bf16.vlgmr.msrb.gmra.mxu0 %v2135_v35  ;;  %2157 = vmatmul.bf16.vlgmr.msrb.gmra.mxu1 %v2135_v35  ;;  %v8536_v17 = vld [vmem:[#allocation89_spill] sm:$0xff] }
 0x3a2   :  { %2170 = vmatmul.bf16.vlgmr.msrb.gmra.mxu2 %v2135_v35  ;;  %2183 = vmatmul.bf16.vlgmr.msrb.gmra.mxu3 %v2135_v35  ;;  %v8537_v35 = vld [vmem:[#allocation90_spill] sm:$0xff] }
 0x3a3   :  { %2268 = vmatpush.bf16.msra.mxu0 %v5881_v4  ;;  %2281 = vmatpush.bf16.msra.mxu1 %v5894_v10 }
 0x3a4   :  { %2294 = vmatpush.bf16.msra.mxu2 %v5896_v13  ;;  %2307 = vmatpush.bf16.msra.mxu3 %v5913_v23 }
 0x3a7   :  { %2269 = vmatpush.bf16.msra.mxu0 %v5940_v44  ;;  %2282 = vmatpush.bf16.msra.mxu1 %v5953_v57 }
 0x3a8   :  { %2295 = vmatpush.bf16.msra.mxu2 %v5955_v0  ;;  %2308 = vmatpush.bf16.msra.mxu3 %v5975_v21 }
 0x3ab   :  { %2270 = vmatpush.bf16.msra.mxu0 %v6010_v25  ;;  %2283 = vmatpush.bf16.msra.mxu1 %v6023_v45 }
 0x3ac   :  { %2296 = vmatpush.bf16.msra.mxu2 %v6025_v41  ;;  %2309 = vmatpush.bf16.msra.mxu3 %v6045_v42 }
 0x3af   :  { %2271 = vmatpush.bf16.msra.mxu0 %v6071_v1  ;;  %2284 = vmatpush.bf16.msra.mxu1 %v6081_v3 }
 0x3b0   :  { %2297 = vmatpush.bf16.msra.mxu2 %v6093_v36  ;;  %2310 = vmatpush.bf16.msra.mxu3 %v6100_v32 }
 0x3b3   :  { %2328 = vmatpush.bf16.msrb.mxu0 %v6102_v24  ;;  %2341 = vmatpush.bf16.msrb.mxu1 %v6107_v40 }
 0x3b4   :  { %2354 = vmatpush.bf16.msrb.mxu2 %v8432_v8  ;;  %2367 = vmatpush.bf16.msrb.mxu3 %v8433_v46 }
 0x3b7   :  { %2329 = vmatpush.bf16.msrb.mxu0 %v8434_v14  ;;  %2342 = vmatpush.bf16.msrb.mxu1 %v8518_v30 }
 0x3b8   :  { %2355 = vmatpush.bf16.msrb.mxu2 %v8519_v52  ;;  %2368 = vmatpush.bf16.msrb.mxu3 %v8520_v51  ;;  %v8551_v51 = vld [vmem:[#allocation15_spill] sm:$0xff] }
 0x3bb   :  { %2330 = vmatpush.bf16.msrb.mxu0 %v8521_v47  ;;  %2343 = vmatpush.bf16.msrb.mxu1 %v8522_v56  ;;  %v8550_v47 = vld [vmem:[#allocation32_spill] sm:$0xff] }
 0x3bc   :  { %2356 = vmatpush.bf16.msrb.mxu2 %v8523_v37  ;;  %2369 = vmatpush.bf16.msrb.mxu3 %v8524_v26 }
 0x3bf   :  { %2331 = vmatpush.bf16.msrb.mxu0 %v8525_v33  ;;  %2344 = vmatpush.bf16.msrb.mxu1 %v8526_v20  ;;  %v8548_v33 = vld [vmem:[#allocation31_spill] sm:$0xff] }
 0x3c0   :  { %2357 = vmatpush.bf16.msrb.mxu2 %v8527_v53  ;;  %2370 = vmatpush.bf16.msrb.mxu3 %v8528_v31  ;;  %v8538_v53 = vld [vmem:[#allocation91_spill] sm:$0xff]  ;;  %v8539_v31 = vld [vmem:[#allocation92_spill] sm:$0xff] }
 0x3c3   :  { %2332 = vmatpush.bf16.msrb.mxu0 %v8529_v18  ;;  %2345 = vmatpush.bf16.msrb.mxu1 %v8530_v59  ;;  %v8540_v18 = vld [vmem:[#allocation94_spill] sm:$0xff] }
 0x3c4   :  { %2358 = vmatpush.bf16.msrb.mxu2 %v8531_v5  ;;  %2371 = vmatpush.bf16.msrb.mxu3 %v8532_v39  ;;  %v8541_v59 = vld [vmem:[#allocation98_spill] sm:$0xff]  ;;  %v8542_v5 = vld [vmem:[#allocation99_spill] sm:$0xff]  ;;  %v8543_v39 = vld [vmem:[#allocation100_spill] sm:$0xff] }
 0x3c7   :  { %2333 = vmatpush.bf16.msrb.mxu0 %v8533_v60  ;;  %2346 = vmatpush.bf16.msrb.mxu1 %v8534_v38  ;;  %v8544_v60 = vld [vmem:[#allocation101_spill] sm:$0xff]  ;;  %v8545_v38 = vld [vmem:[#allocation168_spill] sm:$0xff] }
 0x3c8   :  { %2359 = vmatpush.bf16.msrb.mxu2 %v8535_v9  ;;  %2372 = vmatpush.bf16.msrb.mxu3 %v8536_v17  ;;  %v8546_v9 = vld [vmem:[#allocation30_spill] sm:$0xff]  ;;  %v8547_v17 = vld [vmem:[#allocation169_spill] sm:$0xff] }
 0x3c9   :  { %v269_v20 = vadd.f32 %v8546_v9, %v8545_v38 }
 0x3cb   :  { %2334 = vmatpush.bf16.msrb.mxu0 %v8537_v35  ;;  %2347 = vmatpush.bf16.msrb.mxu1 %v8538_v53  ;;  %v318_v35 = vadd.f32 %v8548_v33, %v8547_v17 }
 0x3cc   :  { %2360 = vmatpush.bf16.msrb.mxu2 %v8539_v31  ;;  %2373 = vmatpush.bf16.msrb.mxu3 %v8540_v18 }
 0x3cf   :  { %2335 = vmatpush.bf16.msrb.mxu0 %v8541_v59  ;;  %2348 = vmatpush.bf16.msrb.mxu1 %v8542_v5  ;;  %v8549_v59 = vld [vmem:[#allocation14_spill] sm:$0xff] }
 0x3d0   :  { %2361 = vmatpush.bf16.msrb.mxu2 %v8543_v39  ;;  %2374 = vmatpush.bf16.msrb.mxu3 %v8544_v60  ;;  %v367_v5 = vadd.f32 %v8550_v47, %v8549_v59  ;;  %v8552_v39 = vld [vmem:[#allocation33_spill] sm:$0xff] }
 0x3d1   :  { %v416_v52 = vadd.f32 %v8552_v39, %v8551_v51 }
 0x40d   :  { %v2081_v26 = vpop.f32.mrf.mxu0  ;;  %v2094_v53 = vpop.f32.mrf.mxu1 }
 0x40e   :  { %v2124_v37 = vadd.f32 %v2081_v26, %v269_v20  ;;  %v2125_v31 = vadd.f32 %v2094_v53, %v318_v35 }
 0x410   :  { %v2192_v56 = vmul.f32 0.5, %v2124_v37  ;;  %v2196_v18 = vmul.f32 0.5, %v2125_v31 }
 0x412   :  { %5129 = vtanh.f32 %v2192_v56 }
 0x413   :  { %5131 = vtanh.f32 %v2196_v18  ;;  %v8553_v18 = vld [vmem:[#allocation152_spill] sm:$0xff] }
 0x414   :  { %v2107_v60 = vpop.f32.mrf.mxu2  ;;  %v2120_v30 = vpop.f32.mrf.mxu3  ;;  %v684_v39 = vadd.f32 %v8553_v18, %v8469_v19 }
 0x415   :  { %v2126_v9 = vadd.f32 %v2107_v60, %v367_v5  ;;  %v2127_v38 = vadd.f32 %v2120_v30, %v416_v52  ;;  %v2083_v14 = vpop.f32.mrf.mxu0  ;;  %v2096_v33 = vpop.f32.mrf.mxu1  ;;  %v8554_v5 = vld [vmem:[#allocation153_spill] sm:$0xff] }
 0x416   :  { %v733_v30 = vadd.f32 %v8554_v5, %v8512_v29  ;;  %v8555_v14 = vld [vmem:[#allocation19_spill] sm:$0xff] }
 0x417   :  { %5133 = vtanh.f32 %v2126_v9  ;;  %v2201_v17 = vmul.f32 0.5, %v2127_v38 }
 0x418   :  { %v5130_v26 = vpop.eup %5129 }
 0x419   :  { %v5132_v20 = vpop.eup %5131  ;;  %v2194_v37 = vmul.f32 0.5, %v5130_v26  ;;  %5135 = vtanh.f32 %v2201_v17  ;;  %v2237_v17 = vpop.permute.xlu2 %2236 }
 0x41a   :  { %v2198_v53 = vmul.f32 0.5, %v5132_v20  ;;  %vm2238_vm11 = vcmp.eq.s32.totalorder %v2237_v17, 1 }
 0x41b   :  { %v2195_v56 = vadd.f32 0.5, %v2194_v37 }
 0x41c   :  { %v2199_v31 = vadd.f32 0.5, %v2198_v53  ;;  %v2109_v47 = vpop.f32.mrf.mxu2  ;;  %v2122_v35 = vpop.f32.mrf.mxu3 }
 0x41d   :  { %v5134_v59 = vpop.eup %5133 }
 0x41e   :  { %v2205_v52 = vmul.f32 %v2199_v31, %v8555_v14  ;;  %v2206_v60 = vmul.f32 %v5134_v59, %v2195_v56  ;;  %v2145_v38 = vpop.f32.mrf.mxu0  ;;  %v2158_v9 = vpop.f32.mrf.mxu1  ;;  %v8557_v31 = vld [vmem:[#allocation154_spill] sm:$0xff]  ;;  %v8558_v56 = vld [vmem:[#allocation155_spill] sm:$0xff] }
 0x41f   :  { %v2188_v33 = vadd.f32 %v2145_v38, %v684_v39  ;;  %v2189_v26 = vadd.f32 %v2158_v9, %v733_v30  ;;  %v5136_v20 = vpop.eup %5135  ;;  %v782_v59 = vadd.f32 %v8557_v31, %v8473_v54  ;;  %v831_v39 = vadd.f32 %v8558_v56, %v8475_v16 }
 0x420   :  { %v2207_v37 = vadd.f32 %v2206_v60, %v2205_v52  ;;  %v2203_v18 = vmul.f32 0.5, %v5136_v20 }
 0x421   :  { %v2210_v53 = vmul.f32 0.5, %v2188_v33  ;;  %v2214_v47 = vmul.f32 0.5, %v2189_v26 }
 0x422   :  { %5137 = vtanh.f32 %v2207_v37  ;;  %v7029_v35 = vsel %vm2238_vm11, %v2207_v37, %v8555_v14  ;;  %v2204_v33 = vadd.f32 0.5, %v2203_v18 }
 0x423   :  { %8556 = vst [vmem:[#allocation20_spill] sm:$0xff] %v7029_v35  ;;  %5139 = vtanh.f32 %v2210_v53 }
 0x424   :  { %5141 = vtanh.f32 %v2214_v47 }
 0x425   :  { %v2171_v5 = vpop.f32.mrf.mxu2  ;;  %v2184_v30 = vpop.f32.mrf.mxu3 }
 0x426   :  { %v2190_v52 = vadd.f32 %v2171_v5, %v782_v59  ;;  %v2191_v60 = vadd.f32 %v2184_v30, %v831_v39  ;;  %v2147_v38 = vpop.f32.mrf.mxu0  ;;  %v2160_v9 = vpop.f32.mrf.mxu1 }
 0x427   :  { %v2244_v9 = vpop.permute.xlu0 %2243 }
 0x428   :  { %v5138_v26 = vpop.eup %5137  ;;  %5143 = vtanh.f32 %v2190_v52  ;;  %v2219_v14 = vmul.f32 0.5, %v2191_v60  ;;  %vm2245_vm12 = vcmp.eq.s32.totalorder %v2244_v9, 1  ;;  %v8570_v9 = vld [vmem:[#allocation77_spill] sm:$0xff] }
 0x429   :  { %v5140_v37 = vpop.eup %5139  ;;  %v2209_v20 = vmul.f32 %v5138_v26, %v2204_v33 }
 0x42a   :  { %v5142_v53 = vpop.eup %5141  ;;  %v2212_v35 = vmul.f32 0.5, %v5140_v37  ;;  %5145 = vtanh.f32 %v2219_v14 }
 0x42b   :  { %v7037_v31 = vsel %vm2238_vm11, %v2209_v20, %v6933_v6  ;;  %v2248_v47 = vsel %vm2238_vm11, %v2209_v20, 0.0  ;;  %v2216_v56 = vmul.f32 0.5, %v5142_v53 }
 0x42c   :  { %v2249_v59 = vpack.c.bf16 %v2248_v47, %v2248_v47  ;;  %v2263_v39 = vpack.c.bf16 %v7037_v31, %v7037_v31  ;;  %v2213_v18 = vadd.f32 0.5, %v2212_v35 }
 0x42d   :  { %v2217_v5 = vadd.f32 0.5, %v2216_v56  ;;  %v2173_v30 = vpop.f32.mrf.mxu2  ;;  %v2186_v52 = vpop.f32.mrf.mxu3 }
 0x42e   :  { %v5144_v60 = vpop.eup %5143  ;;  %2251 = vst [vmem:[#allocation8 + $0x10] sm:$0xf] %v2249_v59  ;;  %2272 = vmatmul.bf16.vlgmr.msra.gmra.mxu0 %v2263_v39  ;;  %2285 = vmatmul.bf16.vlgmr.msra.gmra.mxu1 %v2263_v39  ;;  %v8560_v59 = vld [vmem:[#allocation63_spill] sm:$0xff]  ;;  %v8565_v52 = vld [vmem:[#allocation68_spill] sm:$0xff] }
 0x42f   :  { %v2223_v38 = vmul.f32 %v2217_v5, %v6945_v61  ;;  %v2224_v6 = vmul.f32 %v5144_v60, %v2213_v18  ;;  %2298 = vmatmul.bf16.vlgmr.msra.gmra.mxu2 %v2263_v39  ;;  %2311 = vmatmul.bf16.vlgmr.msra.gmra.mxu3 %v2263_v39  ;;  %v8561_v39 = vld [vmem:[#allocation64_spill] sm:$0xff]  ;;  %v8562_v18 = vld [vmem:[#allocation65_spill] sm:$0xff]  ;;  %v8563_v5 = vld [vmem:[#allocation66_spill] sm:$0xff] }
 0x430   :  { %2456 = vmatpush.bf16.msra.mxu0 %v5673_v58  ;;  %2469 = vmatpush.bf16.msra.mxu1 %v5684_v62  ;;  %v5146_v17 = vpop.eup %5145  ;;  %v8564_v30 = vld [vmem:[#allocation67_spill] sm:$0xff]  ;;  %v8566_v60 = vld [vmem:[#allocation70_spill] sm:$0xff] }
 0x431   :  { %v2225_v33 = vadd.f32 %v2224_v6, %v2223_v38  ;;  %2482 = vmatpush.bf16.msra.mxu2 %v5686_v63  ;;  %2495 = vmatpush.bf16.msra.mxu3 %v5697_v2  ;;  %v2221_v26 = vmul.f32 0.5, %v5146_v17  ;;  %v8567_v38 = vld [vmem:[#allocation74_spill] sm:$0xff]  ;;  %v8568_v6 = vld [vmem:[#allocation75_spill] sm:$0xff]  ;;  %v8569_v17 = vld [vmem:[#allocation76_spill] sm:$0xff] }
 0x433   :  { %5147 = vtanh.f32 %v2225_v33  ;;  %v7049_v35 = vsel %vm2245_vm12, %v2225_v33, %v6945_v61  ;;  %v2222_v14 = vadd.f32 0.5, %v2221_v26  ;;  %v8571_v33 = vld [vmem:[#allocation78_spill] sm:$0xff]  ;;  %v8572_v26 = vld [vmem:[#allocation79_spill] sm:$0xff] }
 0x434   :  { %2457 = vmatpush.bf16.msra.mxu0 %v5716_v7  ;;  %2470 = vmatpush.bf16.msra.mxu1 %v5727_v11 }
 0x435   :  { %2483 = vmatpush.bf16.msra.mxu2 %v5729_v12  ;;  %2496 = vmatpush.bf16.msra.mxu3 %v5740_v15 }
 0x438   :  { %2458 = vmatpush.bf16.msra.mxu0 %v5763_v22  ;;  %2471 = vmatpush.bf16.msra.mxu1 %v5776_v27 }
 0x439   :  { %v5148_v37 = vpop.eup %5147  ;;  %2484 = vmatpush.bf16.msra.mxu2 %v5778_v28  ;;  %2497 = vmatpush.bf16.msra.mxu3 %v5795_v34 }
 0x43a   :  { %v2227_v61 = vmul.f32 %v5148_v37, %v2222_v14  ;;  %v8573_v14 = vld [vmem:[#allocation80_spill] sm:$0xff]  ;;  %v8574_v37 = vld [vmem:[#allocation82_spill] sm:$0xff] }
 0x43c   :  { %v7061_v20 = vsel %vm2245_vm12, %v2227_v61, %v6957_v50  ;;  %v2252_v53 = vsel %vm2245_vm12, %v2227_v61, 0.0  ;;  %2459 = vmatpush.bf16.msra.mxu0 %v5822_v43  ;;  %2472 = vmatpush.bf16.msra.mxu1 %v5835_v48  ;;  %v8559_v50 = vld [vmem:[#allocation62_spill] sm:$0xff] }
 0x43d   :  { %v2253_v47 = vpack.c.bf16 %v2252_v53, %v2252_v53  ;;  %v2327_v56 = vpack.c.bf16 %v7061_v20, %v7061_v20  ;;  %2485 = vmatpush.bf16.msra.mxu2 %v5837_v49  ;;  %2498 = vmatpush.bf16.msra.mxu3 %v5854_v55  ;;  %v8575_v61 = vld [vmem:[#allocation86_spill] sm:$0xff]  ;;  %v8576_v53 = vld [vmem:[#allocation87_spill] sm:$0xff] }
 0x43f   :  { %2255 = vst [vmem:[#allocation9 + $0x2c] sm:$0xf] %v2253_v47  ;;  %2336 = vmatmul.bf16.vlgmr.msrb.gmra.mxu0 %v2327_v56  ;;  %2349 = vmatmul.bf16.vlgmr.msrb.gmra.mxu1 %v2327_v56  ;;  %v8577_v47 = vld [vmem:[#allocation88_spill] sm:$0xff] }
 0x440   :  { %2362 = vmatmul.bf16.vlgmr.msrb.gmra.mxu2 %v2327_v56  ;;  %2375 = vmatmul.bf16.vlgmr.msrb.gmra.mxu3 %v2327_v56  ;;  %v8578_v56 = vld [vmem:[#allocation89_spill] sm:$0xff] }
 0x441   :  { %2460 = vmatpush.bf16.msra.mxu0 %v5881_v4  ;;  %2473 = vmatpush.bf16.msra.mxu1 %v5894_v10 }
 0x442   :  { %2486 = vmatpush.bf16.msra.mxu2 %v5896_v13  ;;  %2499 = vmatpush.bf16.msra.mxu3 %v5913_v23 }
 0x445   :  { %2461 = vmatpush.bf16.msra.mxu0 %v5940_v44  ;;  %2474 = vmatpush.bf16.msra.mxu1 %v5953_v57 }
 0x446   :  { %2487 = vmatpush.bf16.msra.mxu2 %v5955_v0  ;;  %2500 = vmatpush.bf16.msra.mxu3 %v5975_v21 }
 0x449   :  { %2462 = vmatpush.bf16.msra.mxu0 %v6010_v25  ;;  %2475 = vmatpush.bf16.msra.mxu1 %v6023_v45 }
 0x44a   :  { %2488 = vmatpush.bf16.msra.mxu2 %v6025_v41  ;;  %2501 = vmatpush.bf16.msra.mxu3 %v6045_v42 }
 0x44d   :  { %2463 = vmatpush.bf16.msra.mxu0 %v6071_v1  ;;  %2476 = vmatpush.bf16.msra.mxu1 %v6081_v3 }
 0x44e   :  { %2489 = vmatpush.bf16.msra.mxu2 %v6093_v36  ;;  %2502 = vmatpush.bf16.msra.mxu3 %v6100_v32 }
 0x451   :  { %2520 = vmatpush.bf16.msrb.mxu0 %v6102_v24  ;;  %2533 = vmatpush.bf16.msrb.mxu1 %v6107_v40 }
 0x452   :  { %2546 = vmatpush.bf16.msrb.mxu2 %v8432_v8  ;;  %2559 = vmatpush.bf16.msrb.mxu3 %v8433_v46 }
 0x455   :  { %2521 = vmatpush.bf16.msrb.mxu0 %v8559_v50  ;;  %2534 = vmatpush.bf16.msrb.mxu1 %v8560_v59 }
 0x456   :  { %2547 = vmatpush.bf16.msrb.mxu2 %v8561_v39  ;;  %2560 = vmatpush.bf16.msrb.mxu3 %v8562_v18  ;;  %v8592_v18 = vld [vmem:[#allocation36_spill] sm:$0xff] }
 0x459   :  { %2522 = vmatpush.bf16.msrb.mxu0 %v8563_v5  ;;  %2535 = vmatpush.bf16.msrb.mxu1 %v8564_v30 }
 0x45a   :  { %2548 = vmatpush.bf16.msrb.mxu2 %v8565_v52  ;;  %2561 = vmatpush.bf16.msrb.mxu3 %v8566_v60  ;;  %v8590_v60 = vld [vmem:[#allocation35_spill] sm:$0xff] }
 0x45d   :  { %2523 = vmatpush.bf16.msrb.mxu0 %v8567_v38  ;;  %2536 = vmatpush.bf16.msrb.mxu1 %v8568_v6  ;;  %v8579_v6 = vld [vmem:[#allocation90_spill] sm:$0xff] }
 0x45e   :  { %2549 = vmatpush.bf16.msrb.mxu2 %v8569_v17  ;;  %2562 = vmatpush.bf16.msrb.mxu3 %v8570_v9  ;;  %v8580_v17 = vld [vmem:[#allocation91_spill] sm:$0xff]  ;;  %v8581_v9 = vld [vmem:[#allocation92_spill] sm:$0xff] }
 0x461   :  { %2524 = vmatpush.bf16.msrb.mxu0 %v8571_v33  ;;  %2537 = vmatpush.bf16.msrb.mxu1 %v8572_v26  ;;  %v8582_v33 = vld [vmem:[#allocation94_spill] sm:$0xff] }
 0x462   :  { %2550 = vmatpush.bf16.msrb.mxu2 %v8573_v14  ;;  %2563 = vmatpush.bf16.msrb.mxu3 %v8574_v37  ;;  %v8583_v26 = vld [vmem:[#allocation98_spill] sm:$0xff]  ;;  %v8584_v14 = vld [vmem:[#allocation99_spill] sm:$0xff]  ;;  %v8585_v37 = vld [vmem:[#allocation100_spill] sm:$0xff] }
 0x465   :  { %2525 = vmatpush.bf16.msrb.mxu0 %v8575_v61  ;;  %2538 = vmatpush.bf16.msrb.mxu1 %v8576_v53  ;;  %v8586_v61 = vld [vmem:[#allocation101_spill] sm:$0xff]  ;;  %v8587_v53 = vld [vmem:[#allocation168_spill] sm:$0xff] }
 0x466   :  { %2551 = vmatpush.bf16.msrb.mxu2 %v8577_v47  ;;  %2564 = vmatpush.bf16.msrb.mxu3 %v8578_v56  ;;  %v8588_v47 = vld [vmem:[#allocation34_spill] sm:$0xff]  ;;  %v8589_v56 = vld [vmem:[#allocation169_spill] sm:$0xff] }
 0x467   :  { %v271_v38 = vadd.f32 %v8588_v47, %v8587_v53 }
 0x469   :  { %2526 = vmatpush.bf16.msrb.mxu0 %v8579_v6  ;;  %2539 = vmatpush.bf16.msrb.mxu1 %v8580_v17  ;;  %v320_v6 = vadd.f32 %v8590_v60, %v8589_v56 }
 0x46a   :  { %2552 = vmatpush.bf16.msrb.mxu2 %v8581_v9  ;;  %2565 = vmatpush.bf16.msrb.mxu3 %v8582_v33 }
 0x46d   :  { %2527 = vmatpush.bf16.msrb.mxu0 %v8583_v26  ;;  %2540 = vmatpush.bf16.msrb.mxu1 %v8584_v14  ;;  %v8591_v26 = vld [vmem:[#allocation14_spill] sm:$0xff] }
 0x46e   :  { %2553 = vmatpush.bf16.msrb.mxu2 %v8585_v37  ;;  %2566 = vmatpush.bf16.msrb.mxu3 %v8586_v61  ;;  %v369_v14 = vadd.f32 %v8592_v18, %v8591_v26  ;;  %v8593_v37 = vld [vmem:[#allocation37_spill] sm:$0xff] }
 0x46f   :  { %v418_v39 = vadd.f32 %v8593_v37, %v8551_v51 }
 0x4ab   :  { %v2273_v52 = vpop.f32.mrf.mxu0  ;;  %v2286_v17 = vpop.f32.mrf.mxu1 }
 0x4ac   :  { %v2316_v30 = vadd.f32 %v2273_v52, %v271_v38  ;;  %v2317_v9 = vadd.f32 %v2286_v17, %v320_v6 }
 0x4ae   :  { %v2384_v5 = vmul.f32 0.5, %v2316_v30  ;;  %v2388_v33 = vmul.f32 0.5, %v2317_v9 }
 0x4b0   :  { %5149 = vtanh.f32 %v2384_v5 }
 0x4b1   :  { %5151 = vtanh.f32 %v2388_v33  ;;  %v8594_v33 = vld [vmem:[#allocation148_spill] sm:$0xff] }
 0x4b2   :  { %v2299_v61 = vpop.f32.mrf.mxu2  ;;  %v2312_v59 = vpop.f32.mrf.mxu3  ;;  %v682_v37 = vadd.f32 %v8594_v33, %v8469_v19 }
 0x4b3   :  { %v2318_v47 = vadd.f32 %v2299_v61, %v369_v14  ;;  %v2319_v53 = vadd.f32 %v2312_v59, %v418_v39  ;;  %v2275_v50 = vpop.f32.mrf.mxu0  ;;  %v2288_v60 = vpop.f32.mrf.mxu1  ;;  %v8595_v14 = vld [vmem:[#allocation149_spill] sm:$0xff] }
 0x4b4   :  { %v731_v59 = vadd.f32 %v8595_v14, %v8512_v29  ;;  %v8596_v50 = vld [vmem:[#allocation20_spill] sm:$0xff] }
 0x4b5   :  { %5153 = vtanh.f32 %v2318_v47  ;;  %v2393_v56 = vmul.f32 0.5, %v2319_v53 }
 0x4b6   :  { %v5150_v52 = vpop.eup %5149 }
 0x4b7   :  { %v5152_v38 = vpop.eup %5151  ;;  %v2386_v30 = vmul.f32 0.5, %v5150_v52  ;;  %5155 = vtanh.f32 %v2393_v56  ;;  %v2429_v56 = vpop.permute.xlu1 %2428 }
 0x4b8   :  { %v2390_v6 = vmul.f32 0.5, %v5152_v38  ;;  %vm2430_vm13 = vcmp.eq.s32.totalorder %v2429_v56, 1 }
 0x4b9   :  { %v2387_v5 = vadd.f32 0.5, %v2386_v30 }
 0x4ba   :  { %v2391_v17 = vadd.f32 0.5, %v2390_v6  ;;  %v2301_v18 = vpop.f32.mrf.mxu2  ;;  %v2314_v9 = vpop.f32.mrf.mxu3 }
 0x4bb   :  { %v5154_v26 = vpop.eup %5153 }
 0x4bc   :  { %v2397_v39 = vmul.f32 %v2391_v17, %v8596_v50  ;;  %v2398_v61 = vmul.f32 %v5154_v26, %v2387_v5  ;;  %v2337_v53 = vpop.f32.mrf.mxu0  ;;  %v2350_v47 = vpop.f32.mrf.mxu1  ;;  %v8598_v17 = vld [vmem:[#allocation150_spill] sm:$0xff]  ;;  %v8599_v5 = vld [vmem:[#allocation151_spill] sm:$0xff] }
 0x4bd   :  { %v2380_v60 = vadd.f32 %v2337_v53, %v682_v37  ;;  %v2381_v52 = vadd.f32 %v2350_v47, %v731_v59  ;;  %v5156_v38 = vpop.eup %5155  ;;  %v780_v26 = vadd.f32 %v8598_v17, %v8473_v54  ;;  %v829_v37 = vadd.f32 %v8599_v5, %v8475_v16 }
 0x4be   :  { %v2399_v30 = vadd.f32 %v2398_v61, %v2397_v39  ;;  %v2395_v33 = vmul.f32 0.5, %v5156_v38 }
 0x4bf   :  { %v2402_v6 = vmul.f32 0.5, %v2380_v60  ;;  %v2406_v18 = vmul.f32 0.5, %v2381_v52 }
 0x4c0   :  { %5157 = vtanh.f32 %v2399_v30  ;;  %v7133_v9 = vsel %vm2430_vm13, %v2399_v30, %v8596_v50  ;;  %v2396_v60 = vadd.f32 0.5, %v2395_v33 }
 0x4c1   :  { %8597 = vst [vmem:[#allocation21_spill] sm:$0xff] %v7133_v9  ;;  %5159 = vtanh.f32 %v2402_v6 }
 0x4c2   :  { %5161 = vtanh.f32 %v2406_v18 }
 0x4c3   :  { %v2363_v14 = vpop.f32.mrf.mxu2  ;;  %v2376_v59 = vpop.f32.mrf.mxu3 }
 0x4c4   :  { %v2382_v39 = vadd.f32 %v2363_v14, %v780_v26  ;;  %v2383_v61 = vadd.f32 %v2376_v59, %v829_v37  ;;  %v2339_v53 = vpop.f32.mrf.mxu0  ;;  %v2352_v47 = vpop.f32.mrf.mxu1 }
 0x4c5   :  { %v2436_v47 = vpop.permute.xlu2 %2435 }
 0x4c6   :  { %v5158_v52 = vpop.eup %5157  ;;  %5163 = vtanh.f32 %v2382_v39  ;;  %v2411_v50 = vmul.f32 0.5, %v2383_v61  ;;  %vm2437_vm14 = vcmp.eq.s32.totalorder %v2436_v47, 1  ;;  %v8611_v47 = vld [vmem:[#allocation77_spill] sm:$0xff] }
 0x4c7   :  { %v5160_v30 = vpop.eup %5159  ;;  %v2401_v38 = vmul.f32 %v5158_v52, %v2396_v60 }
 0x4c8   :  { %v5162_v6 = vpop.eup %5161  ;;  %v2404_v9 = vmul.f32 0.5, %v5160_v30  ;;  %5165 = vtanh.f32 %v2411_v50 }
 0x4c9   :  { %v7141_v17 = vsel %vm2430_vm13, %v2401_v38, %v7037_v31  ;;  %v2440_v18 = vsel %vm2430_vm13, %v2401_v38, 0.0  ;;  %v2408_v5 = vmul.f32 0.5, %v5162_v6 }
 0x4ca   :  { %v2441_v26 = vpack.c.bf16 %v2440_v18, %v2440_v18  ;;  %v2455_v37 = vpack.c.bf16 %v7141_v17, %v7141_v17  ;;  %v2405_v33 = vadd.f32 0.5, %v2404_v9 }
 0x4cb   :  { %v2409_v14 = vadd.f32 0.5, %v2408_v5  ;;  %v2365_v59 = vpop.f32.mrf.mxu2  ;;  %v2378_v39 = vpop.f32.mrf.mxu3 }
 0x4cc   :  { %v5164_v61 = vpop.eup %5163  ;;  %2443 = vst [vmem:[#allocation8 + $0x14] sm:$0xf] %v2441_v26  ;;  %2464 = vmatmul.bf16.vlgmr.msra.gmra.mxu0 %v2455_v37  ;;  %2477 = vmatmul.bf16.vlgmr.msra.gmra.mxu1 %v2455_v37  ;;  %v8601_v26 = vld [vmem:[#allocation63_spill] sm:$0xff]  ;;  %v8606_v39 = vld [vmem:[#allocation68_spill] sm:$0xff] }
 0x4cd   :  { %v2415_v53 = vmul.f32 %v2409_v14, %v7049_v35  ;;  %v2416_v31 = vmul.f32 %v5164_v61, %v2405_v33  ;;  %2490 = vmatmul.bf16.vlgmr.msra.gmra.mxu2 %v2455_v37  ;;  %2503 = vmatmul.bf16.vlgmr.msra.gmra.mxu3 %v2455_v37  ;;  %v8602_v37 = vld [vmem:[#allocation64_spill] sm:$0xff]  ;;  %v8603_v33 = vld [vmem:[#allocation65_spill] sm:$0xff]  ;;  %v8604_v14 = vld [vmem:[#allocation66_spill] sm:$0xff] }
 0x4ce   :  { %2648 = vmatpush.bf16.msra.mxu0 %v5673_v58  ;;  %2661 = vmatpush.bf16.msra.mxu1 %v5684_v62  ;;  %v5166_v56 = vpop.eup %5165  ;;  %v8605_v59 = vld [vmem:[#allocation67_spill] sm:$0xff]  ;;  %v8607_v61 = vld [vmem:[#allocation70_spill] sm:$0xff] }
 0x4cf   :  { %v2417_v60 = vadd.f32 %v2416_v31, %v2415_v53  ;;  %2674 = vmatpush.bf16.msra.mxu2 %v5686_v63  ;;  %2687 = vmatpush.bf16.msra.mxu3 %v5697_v2  ;;  %v2413_v52 = vmul.f32 0.5, %v5166_v56  ;;  %v8608_v53 = vld [vmem:[#allocation74_spill] sm:$0xff]  ;;  %v8609_v31 = vld [vmem:[#allocation75_spill] sm:$0xff]  ;;  %v8610_v56 = vld [vmem:[#allocation76_spill] sm:$0xff] }
 0x4d1   :  { %5167 = vtanh.f32 %v2417_v60  ;;  %v7153_v9 = vsel %vm2437_vm14, %v2417_v60, %v7049_v35  ;;  %v2414_v50 = vadd.f32 0.5, %v2413_v52  ;;  %v8612_v60 = vld [vmem:[#allocation78_spill] sm:$0xff]  ;;  %v8613_v52 = vld [vmem:[#allocation79_spill] sm:$0xff] }
 0x4d2   :  { %2649 = vmatpush.bf16.msra.mxu0 %v5716_v7  ;;  %2662 = vmatpush.bf16.msra.mxu1 %v5727_v11 }
 0x4d3   :  { %2675 = vmatpush.bf16.msra.mxu2 %v5729_v12  ;;  %2688 = vmatpush.bf16.msra.mxu3 %v5740_v15 }
 0x4d6   :  { %2650 = vmatpush.bf16.msra.mxu0 %v5763_v22  ;;  %2663 = vmatpush.bf16.msra.mxu1 %v5776_v27 }
 0x4d7   :  { %v5168_v30 = vpop.eup %5167  ;;  %2676 = vmatpush.bf16.msra.mxu2 %v5778_v28  ;;  %2689 = vmatpush.bf16.msra.mxu3 %v5795_v34 }
 0x4d8   :  { %v2419_v35 = vmul.f32 %v5168_v30, %v2414_v50  ;;  %v8614_v50 = vld [vmem:[#allocation80_spill] sm:$0xff]  ;;  %v8615_v30 = vld [vmem:[#allocation82_spill] sm:$0xff] }
 0x4da   :  { %v7165_v38 = vsel %vm2437_vm14, %v2419_v35, %v7061_v20  ;;  %v2444_v6 = vsel %vm2437_vm14, %v2419_v35, 0.0  ;;  %2651 = vmatpush.bf16.msra.mxu0 %v5822_v43  ;;  %2664 = vmatpush.bf16.msra.mxu1 %v5835_v48  ;;  %v8600_v20 = vld [vmem:[#allocation62_spill] sm:$0xff] }
 0x4db   :  { %v2445_v18 = vpack.c.bf16 %v2444_v6, %v2444_v6  ;;  %v2519_v5 = vpack.c.bf16 %v7165_v38, %v7165_v38  ;;  %2677 = vmatpush.bf16.msra.mxu2 %v5837_v49  ;;  %2690 = vmatpush.bf16.msra.mxu3 %v5854_v55  ;;  %v8616_v35 = vld [vmem:[#allocation86_spill] sm:$0xff]  ;;  %v8617_v6 = vld [vmem:[#allocation87_spill] sm:$0xff] }
 0x4dd   :  { %2447 = vst [vmem:[#allocation9 + $0x28] sm:$0xf] %v2445_v18  ;;  %2528 = vmatmul.bf16.vlgmr.msrb.gmra.mxu0 %v2519_v5  ;;  %2541 = vmatmul.bf16.vlgmr.msrb.gmra.mxu1 %v2519_v5  ;;  %v8618_v18 = vld [vmem:[#allocation88_spill] sm:$0xff] }
 0x4de   :  { %2554 = vmatmul.bf16.vlgmr.msrb.gmra.mxu2 %v2519_v5  ;;  %2567 = vmatmul.bf16.vlgmr.msrb.gmra.mxu3 %v2519_v5  ;;  %v8619_v5 = vld [vmem:[#allocation89_spill] sm:$0xff] }
 0x4df   :  { %2652 = vmatpush.bf16.msra.mxu0 %v5881_v4  ;;  %2665 = vmatpush.bf16.msra.mxu1 %v5894_v10 }
 0x4e0   :  { %2678 = vmatpush.bf16.msra.mxu2 %v5896_v13  ;;  %2691 = vmatpush.bf16.msra.mxu3 %v5913_v23 }
 0x4e3   :  { %2653 = vmatpush.bf16.msra.mxu0 %v5940_v44  ;;  %2666 = vmatpush.bf16.msra.mxu1 %v5953_v57 }
 0x4e4   :  { %2679 = vmatpush.bf16.msra.mxu2 %v5955_v0  ;;  %2692 = vmatpush.bf16.msra.mxu3 %v5975_v21 }
 0x4e7   :  { %2654 = vmatpush.bf16.msra.mxu0 %v6010_v25  ;;  %2667 = vmatpush.bf16.msra.mxu1 %v6023_v45 }
 0x4e8   :  { %2680 = vmatpush.bf16.msra.mxu2 %v6025_v41  ;;  %2693 = vmatpush.bf16.msra.mxu3 %v6045_v42 }
 0x4eb   :  { %2655 = vmatpush.bf16.msra.mxu0 %v6071_v1  ;;  %2668 = vmatpush.bf16.msra.mxu1 %v6081_v3 }
 0x4ec   :  { %2681 = vmatpush.bf16.msra.mxu2 %v6093_v36  ;;  %2694 = vmatpush.bf16.msra.mxu3 %v6100_v32 }
 0x4ef   :  { %2712 = vmatpush.bf16.msrb.mxu0 %v6102_v24  ;;  %2725 = vmatpush.bf16.msrb.mxu1 %v6107_v40 }
 0x4f0   :  { %2738 = vmatpush.bf16.msrb.mxu2 %v8432_v8  ;;  %2751 = vmatpush.bf16.msrb.mxu3 %v8433_v46 }
 0x4f3   :  { %2713 = vmatpush.bf16.msrb.mxu0 %v8600_v20  ;;  %2726 = vmatpush.bf16.msrb.mxu1 %v8601_v26 }
 0x4f4   :  { %2739 = vmatpush.bf16.msrb.mxu2 %v8602_v37  ;;  %2752 = vmatpush.bf16.msrb.mxu3 %v8603_v33  ;;  %v8633_v33 = vld [vmem:[#allocation40_spill] sm:$0xff] }
 0x4f7   :  { %2714 = vmatpush.bf16.msrb.mxu0 %v8604_v14  ;;  %2727 = vmatpush.bf16.msrb.mxu1 %v8605_v59 }
 0x4f8   :  { %2740 = vmatpush.bf16.msrb.mxu2 %v8606_v39  ;;  %2753 = vmatpush.bf16.msrb.mxu3 %v8607_v61  ;;  %v8631_v61 = vld [vmem:[#allocation39_spill] sm:$0xff] }
 0x4fb   :  { %2715 = vmatpush.bf16.msrb.mxu0 %v8608_v53  ;;  %2728 = vmatpush.bf16.msrb.mxu1 %v8609_v31  ;;  %v8620_v31 = vld [vmem:[#allocation90_spill] sm:$0xff] }
 0x4fc   :  { %2741 = vmatpush.bf16.msrb.mxu2 %v8610_v56  ;;  %2754 = vmatpush.bf16.msrb.mxu3 %v8611_v47  ;;  %v8621_v56 = vld [vmem:[#allocation91_spill] sm:$0xff]  ;;  %v8622_v47 = vld [vmem:[#allocation92_spill] sm:$0xff] }
 0x4ff   :  { %2716 = vmatpush.bf16.msrb.mxu0 %v8612_v60  ;;  %2729 = vmatpush.bf16.msrb.mxu1 %v8613_v52  ;;  %v8623_v60 = vld [vmem:[#allocation94_spill] sm:$0xff] }
 0x500   :  { %2742 = vmatpush.bf16.msrb.mxu2 %v8614_v50  ;;  %2755 = vmatpush.bf16.msrb.mxu3 %v8615_v30  ;;  %v8624_v52 = vld [vmem:[#allocation98_spill] sm:$0xff]  ;;  %v8625_v50 = vld [vmem:[#allocation99_spill] sm:$0xff]  ;;  %v8626_v30 = vld [vmem:[#allocation100_spill] sm:$0xff] }
 0x503   :  { %2717 = vmatpush.bf16.msrb.mxu0 %v8616_v35  ;;  %2730 = vmatpush.bf16.msrb.mxu1 %v8617_v6  ;;  %v8627_v35 = vld [vmem:[#allocation101_spill] sm:$0xff]  ;;  %v8628_v6 = vld [vmem:[#allocation168_spill] sm:$0xff] }
 0x504   :  { %2743 = vmatpush.bf16.msrb.mxu2 %v8618_v18  ;;  %2756 = vmatpush.bf16.msrb.mxu3 %v8619_v5  ;;  %v8629_v18 = vld [vmem:[#allocation38_spill] sm:$0xff]  ;;  %v8630_v5 = vld [vmem:[#allocation169_spill] sm:$0xff] }
 0x505   :  { %v274_v53 = vadd.f32 %v8629_v18, %v8628_v6 }
 0x507   :  { %2718 = vmatpush.bf16.msrb.mxu0 %v8620_v31  ;;  %2731 = vmatpush.bf16.msrb.mxu1 %v8621_v56  ;;  %v323_v31 = vadd.f32 %v8631_v61, %v8630_v5 }
 0x508   :  { %2744 = vmatpush.bf16.msrb.mxu2 %v8622_v47  ;;  %2757 = vmatpush.bf16.msrb.mxu3 %v8623_v60 }
 0x50b   :  { %2719 = vmatpush.bf16.msrb.mxu0 %v8624_v52  ;;  %2732 = vmatpush.bf16.msrb.mxu1 %v8625_v50  ;;  %v8632_v52 = vld [vmem:[#allocation14_spill] sm:$0xff] }
 0x50c   :  { %2745 = vmatpush.bf16.msrb.mxu2 %v8626_v30  ;;  %2758 = vmatpush.bf16.msrb.mxu3 %v8627_v35  ;;  %v372_v50 = vadd.f32 %v8633_v33, %v8632_v52  ;;  %v8634_v30 = vld [vmem:[#allocation41_spill] sm:$0xff] }
 0x50d   :  { %v421_v37 = vadd.f32 %v8634_v30, %v8551_v51 }
 0x549   :  { %v2465_v39 = vpop.f32.mrf.mxu0  ;;  %v2478_v56 = vpop.f32.mrf.mxu1 }
 0x54a   :  { %v2508_v59 = vadd.f32 %v2465_v39, %v274_v53  ;;  %v2509_v47 = vadd.f32 %v2478_v56, %v323_v31 }
 0x54c   :  { %v2576_v14 = vmul.f32 0.5, %v2508_v59  ;;  %v2580_v60 = vmul.f32 0.5, %v2509_v47 }
 0x54e   :  { %5169 = vtanh.f32 %v2576_v14 }
 0x54f   :  { %5171 = vtanh.f32 %v2580_v60  ;;  %v8635_v60 = vld [vmem:[#allocation144_spill] sm:$0xff] }
 0x550   :  { %v2491_v35 = vpop.f32.mrf.mxu2  ;;  %v2504_v26 = vpop.f32.mrf.mxu3  ;;  %v679_v30 = vadd.f32 %v8635_v60, %v8469_v19 }
 0x551   :  { %v2510_v18 = vadd.f32 %v2491_v35, %v372_v50  ;;  %v2511_v6 = vadd.f32 %v2504_v26, %v421_v37  ;;  %v2467_v20 = vpop.f32.mrf.mxu0  ;;  %v2480_v61 = vpop.f32.mrf.mxu1  ;;  %v8636_v50 = vld [vmem:[#allocation145_spill] sm:$0xff] }
 0x552   :  { %v728_v26 = vadd.f32 %v8636_v50, %v8512_v29  ;;  %v8637_v20 = vld [vmem:[#allocation21_spill] sm:$0xff] }
 0x553   :  { %5173 = vtanh.f32 %v2510_v18  ;;  %v2585_v5 = vmul.f32 0.5, %v2511_v6 }
 0x554   :  { %v5170_v39 = vpop.eup %5169 }
 0x555   :  { %v5172_v53 = vpop.eup %5171  ;;  %v2578_v59 = vmul.f32 0.5, %v5170_v39  ;;  %5175 = vtanh.f32 %v2585_v5  ;;  %v2621_v5 = vpop.permute.xlu0 %2620 }
 0x556   :  { %v2582_v31 = vmul.f32 0.5, %v5172_v53  ;;  %vm2622_vm15 = vcmp.eq.s32.totalorder %v2621_v5, 1 }
 0x557   :  { %v2579_v14 = vadd.f32 0.5, %v2578_v59 }
 0x558   :  { %v2583_v56 = vadd.f32 0.5, %v2582_v31  ;;  %v2493_v33 = vpop.f32.mrf.mxu2  ;;  %v2506_v47 = vpop.f32.mrf.mxu3 }
 0x559   :  { %v5174_v52 = vpop.eup %5173 }
 0x55a   :  { %v2589_v37 = vmul.f32 %v2583_v56, %v8637_v20  ;;  %v2590_v35 = vmul.f32 %v5174_v52, %v2579_v14  ;;  %v2529_v6 = vpop.f32.mrf.mxu0  ;;  %v2542_v18 = vpop.f32.mrf.mxu1  ;;  %v8639_v56 = vld [vmem:[#allocation146_spill] sm:$0xff]  ;;  %v8640_v14 = vld [vmem:[#allocation147_spill] sm:$0xff] }
 0x55b   :  { %v2572_v61 = vadd.f32 %v2529_v6, %v679_v30  ;;  %v2573_v39 = vadd.f32 %v2542_v18, %v728_v26  ;;  %v5176_v53 = vpop.eup %5175  ;;  %v777_v52 = vadd.f32 %v8639_v56, %v8473_v54  ;;  %v826_v30 = vadd.f32 %v8640_v14, %v8475_v16 }
 0x55c   :  { %v2591_v59 = vadd.f32 %v2590_v35, %v2589_v37  ;;  %v2587_v60 = vmul.f32 0.5, %v5176_v53 }
 0x55d   :  { %v2594_v31 = vmul.f32 0.5, %v2572_v61  ;;  %v2598_v33 = vmul.f32 0.5, %v2573_v39 }
 0x55e   :  { %5177 = vtanh.f32 %v2591_v59  ;;  %v7237_v47 = vsel %vm2622_vm15, %v2591_v59, %v8637_v20  ;;  %v2588_v61 = vadd.f32 0.5, %v2587_v60 }
 0x55f   :  { %8638 = vst [vmem:[#allocation164_spill] sm:$0xff] %v7237_v47  ;;  %5179 = vtanh.f32 %v2594_v31 }
 0x560   :  { %5181 = vtanh.f32 %v2598_v33 }
 0x561   :  { %v2555_v50 = vpop.f32.mrf.mxu2  ;;  %v2568_v26 = vpop.f32.mrf.mxu3 }
 0x562   :  { %v2574_v37 = vadd.f32 %v2555_v50, %v777_v52  ;;  %v2575_v35 = vadd.f32 %v2568_v26, %v826_v30  ;;  %v2531_v6 = vpop.f32.mrf.mxu0  ;;  %v2544_v18 = vpop.f32.mrf.mxu1 }
 0x563   :  { %v2628_v18 = vpop.permute.xlu1 %2627 }
 0x564   :  { %v5178_v39 = vpop.eup %5177  ;;  %5183 = vtanh.f32 %v2574_v37  ;;  %v2603_v20 = vmul.f32 0.5, %v2575_v35  ;;  %vm2629_vm0 = vcmp.eq.s32.totalorder %v2628_v18, 1  ;;  %v8652_v18 = vld [vmem:[#allocation77_spill] sm:$0xff] }
 0x565   :  { %v5180_v59 = vpop.eup %5179  ;;  %v2593_v53 = vmul.f32 %v5178_v39, %v2588_v61 }
 0x566   :  { %v5182_v31 = vpop.eup %5181  ;;  %v2596_v47 = vmul.f32 0.5, %v5180_v59  ;;  %5185 = vtanh.f32 %v2603_v20 }
 0x567   :  { %v7245_v56 = vsel %vm2622_vm15, %v2593_v53, %v7141_v17  ;;  %v2632_v33 = vsel %vm2622_vm15, %v2593_v53, 0.0  ;;  %v2600_v14 = vmul.f32 0.5, %v5182_v31 }
 0x568   :  { %v2633_v52 = vpack.c.bf16 %v2632_v33, %v2632_v33  ;;  %v2647_v30 = vpack.c.bf16 %v7245_v56, %v7245_v56  ;;  %v2597_v60 = vadd.f32 0.5, %v2596_v47 }
 0x569   :  { %v2601_v50 = vadd.f32 0.5, %v2600_v14  ;;  %v2557_v26 = vpop.f32.mrf.mxu2  ;;  %v2570_v37 = vpop.f32.mrf.mxu3 }
 0x56a   :  { %v5184_v35 = vpop.eup %5183  ;;  %2635 = vst [vmem:[#allocation8 + $0x18] sm:$0xf] %v2633_v52  ;;  %2656 = vmatmul.bf16.vlgmr.msra.gmra.mxu0 %v2647_v30  ;;  %2669 = vmatmul.bf16.vlgmr.msra.gmra.mxu1 %v2647_v30  ;;  %v8642_v52 = vld [vmem:[#allocation63_spill] sm:$0xff]  ;;  %v8647_v37 = vld [vmem:[#allocation68_spill] sm:$0xff] }
 0x56b   :  { %v2607_v6 = vmul.f32 %v2601_v50, %v7153_v9  ;;  %v2608_v17 = vmul.f32 %v5184_v35, %v2597_v60  ;;  %2682 = vmatmul.bf16.vlgmr.msra.gmra.mxu2 %v2647_v30  ;;  %2695 = vmatmul.bf16.vlgmr.msra.gmra.mxu3 %v2647_v30  ;;  %v8643_v30 = vld [vmem:[#allocation64_spill] sm:$0xff]  ;;  %v8644_v60 = vld [vmem:[#allocation65_spill] sm:$0xff]  ;;  %v8645_v50 = vld [vmem:[#allocation66_spill] sm:$0xff] }
 0x56c   :  { %2839 = vmatpush.bf16.msra.mxu0 %v5673_v58  ;;  %2852 = vmatpush.bf16.msra.mxu1 %v5684_v62  ;;  %v5186_v5 = vpop.eup %5185  ;;  %v8646_v26 = vld [vmem:[#allocation67_spill] sm:$0xff]  ;;  %v8648_v35 = vld [vmem:[#allocation70_spill] sm:$0xff] }
 0x56d   :  { %v2609_v61 = vadd.f32 %v2608_v17, %v2607_v6  ;;  %2865 = vmatpush.bf16.msra.mxu2 %v5686_v63  ;;  %2878 = vmatpush.bf16.msra.mxu3 %v5697_v2  ;;  %v2605_v39 = vmul.f32 0.5, %v5186_v5  ;;  %v8649_v6 = vld [vmem:[#allocation74_spill] sm:$0xff]  ;;  %v8650_v17 = vld [vmem:[#allocation75_spill] sm:$0xff]  ;;  %v8651_v5 = vld [vmem:[#allocation76_spill] sm:$0xff] }
 0x56f   :  { %5187 = vtanh.f32 %v2609_v61  ;;  %v7257_v47 = vsel %vm2629_vm0, %v2609_v61, %v7153_v9  ;;  %v2606_v20 = vadd.f32 0.5, %v2605_v39  ;;  %v8653_v61 = vld [vmem:[#allocation78_spill] sm:$0xff]  ;;  %v8654_v39 = vld [vmem:[#allocation79_spill] sm:$0xff] }
 0x570   :  { %2840 = vmatpush.bf16.msra.mxu0 %v5716_v7  ;;  %2853 = vmatpush.bf16.msra.mxu1 %v5727_v11 }
 0x571   :  { %2866 = vmatpush.bf16.msra.mxu2 %v5729_v12  ;;  %2879 = vmatpush.bf16.msra.mxu3 %v5740_v15 }
 0x574   :  { %2841 = vmatpush.bf16.msra.mxu0 %v5763_v22  ;;  %2854 = vmatpush.bf16.msra.mxu1 %v5776_v27 }
 0x575   :  { %v5188_v59 = vpop.eup %5187  ;;  %2867 = vmatpush.bf16.msra.mxu2 %v5778_v28  ;;  %2880 = vmatpush.bf16.msra.mxu3 %v5795_v34 }
 0x576   :  { %v2611_v9 = vmul.f32 %v5188_v59, %v2606_v20  ;;  %v8655_v20 = vld [vmem:[#allocation80_spill] sm:$0xff]  ;;  %v8656_v59 = vld [vmem:[#allocation82_spill] sm:$0xff] }
 0x578   :  { %v7269_v53 = vsel %vm2629_vm0, %v2611_v9, %v7165_v38  ;;  %v2636_v31 = vsel %vm2629_vm0, %v2611_v9, 0.0  ;;  %2842 = vmatpush.bf16.msra.mxu0 %v5822_v43  ;;  %2855 = vmatpush.bf16.msra.mxu1 %v5835_v48  ;;  %v8641_v38 = vld [vmem:[#allocation62_spill] sm:$0xff] }
 0x579   :  { %v2637_v33 = vpack.c.bf16 %v2636_v31, %v2636_v31  ;;  %v2711_v14 = vpack.c.bf16 %v7269_v53, %v7269_v53  ;;  %2868 = vmatpush.bf16.msra.mxu2 %v5837_v49  ;;  %2881 = vmatpush.bf16.msra.mxu3 %v5854_v55  ;;  %v8657_v9 = vld [vmem:[#allocation86_spill] sm:$0xff]  ;;  %v8658_v31 = vld [vmem:[#allocation87_spill] sm:$0xff] }
 0x57b   :  { %2639 = vst [vmem:[#allocation9 + $0x24] sm:$0xf] %v2637_v33  ;;  %2720 = vmatmul.bf16.vlgmr.msrb.gmra.mxu0 %v2711_v14  ;;  %2733 = vmatmul.bf16.vlgmr.msrb.gmra.mxu1 %v2711_v14  ;;  %v8659_v33 = vld [vmem:[#allocation88_spill] sm:$0xff] }
 0x57c   :  { %2746 = vmatmul.bf16.vlgmr.msrb.gmra.mxu2 %v2711_v14  ;;  %2759 = vmatmul.bf16.vlgmr.msrb.gmra.mxu3 %v2711_v14  ;;  %v8660_v14 = vld [vmem:[#allocation89_spill] sm:$0xff] }
 0x57d   :  { %2843 = vmatpush.bf16.msra.mxu0 %v5881_v4  ;;  %2856 = vmatpush.bf16.msra.mxu1 %v5894_v10 }
 0x57e   :  { %2869 = vmatpush.bf16.msra.mxu2 %v5896_v13  ;;  %2882 = vmatpush.bf16.msra.mxu3 %v5913_v23 }
 0x581   :  { %2844 = vmatpush.bf16.msra.mxu0 %v5940_v44  ;;  %2857 = vmatpush.bf16.msra.mxu1 %v5953_v57 }
 0x582   :  { %2870 = vmatpush.bf16.msra.mxu2 %v5955_v0  ;;  %2883 = vmatpush.bf16.msra.mxu3 %v5975_v21 }
 0x585   :  { %2845 = vmatpush.bf16.msra.mxu0 %v6010_v25  ;;  %2858 = vmatpush.bf16.msra.mxu1 %v6023_v45 }
 0x586   :  { %2871 = vmatpush.bf16.msra.mxu2 %v6025_v41  ;;  %2884 = vmatpush.bf16.msra.mxu3 %v6045_v42 }
 0x589   :  { %2846 = vmatpush.bf16.msra.mxu0 %v6071_v1  ;;  %2859 = vmatpush.bf16.msra.mxu1 %v6081_v3 }
 0x58a   :  { %2872 = vmatpush.bf16.msra.mxu2 %v6093_v36  ;;  %2885 = vmatpush.bf16.msra.mxu3 %v6100_v32 }
 0x58d   :  { %2902 = vmatpush.bf16.msrb.mxu0 %v6102_v24  ;;  %2915 = vmatpush.bf16.msrb.mxu1 %v6107_v40 }
 0x58e   :  { %2928 = vmatpush.bf16.msrb.mxu2 %v8432_v8  ;;  %2941 = vmatpush.bf16.msrb.mxu3 %v8433_v46 }
 0x591   :  { %2903 = vmatpush.bf16.msrb.mxu0 %v8641_v38  ;;  %2916 = vmatpush.bf16.msrb.mxu1 %v8642_v52 }
 0x592   :  { %2929 = vmatpush.bf16.msrb.mxu2 %v8643_v30  ;;  %2942 = vmatpush.bf16.msrb.mxu3 %v8644_v60  ;;  %v8674_v60 = vld [vmem:[#allocation44_spill] sm:$0xff] }
 0x595   :  { %2904 = vmatpush.bf16.msrb.mxu0 %v8645_v50  ;;  %2917 = vmatpush.bf16.msrb.mxu1 %v8646_v26 }
 0x596   :  { %2930 = vmatpush.bf16.msrb.mxu2 %v8647_v37  ;;  %2943 = vmatpush.bf16.msrb.mxu3 %v8648_v35  ;;  %v8672_v35 = vld [vmem:[#allocation43_spill] sm:$0xff] }
 0x599   :  { %2905 = vmatpush.bf16.msrb.mxu0 %v8649_v6  ;;  %2918 = vmatpush.bf16.msrb.mxu1 %v8650_v17  ;;  %v8661_v17 = vld [vmem:[#allocation90_spill] sm:$0xff] }
 0x59a   :  { %2931 = vmatpush.bf16.msrb.mxu2 %v8651_v5  ;;  %2944 = vmatpush.bf16.msrb.mxu3 %v8652_v18  ;;  %v8662_v5 = vld [vmem:[#allocation91_spill] sm:$0xff]  ;;  %v8663_v18 = vld [vmem:[#allocation92_spill] sm:$0xff] }
 0x59d   :  { %2906 = vmatpush.bf16.msrb.mxu0 %v8653_v61  ;;  %2919 = vmatpush.bf16.msrb.mxu1 %v8654_v39  ;;  %v8664_v61 = vld [vmem:[#allocation94_spill] sm:$0xff] }
 0x59e   :  { %2932 = vmatpush.bf16.msrb.mxu2 %v8655_v20  ;;  %2945 = vmatpush.bf16.msrb.mxu3 %v8656_v59  ;;  %v8665_v39 = vld [vmem:[#allocation98_spill] sm:$0xff]  ;;  %v8666_v20 = vld [vmem:[#allocation99_spill] sm:$0xff]  ;;  %v8667_v59 = vld [vmem:[#allocation100_spill] sm:$0xff] }
 0x5a1   :  { %2907 = vmatpush.bf16.msrb.mxu0 %v8657_v9  ;;  %2920 = vmatpush.bf16.msrb.mxu1 %v8658_v31  ;;  %v8668_v9 = vld [vmem:[#allocation101_spill] sm:$0xff]  ;;  %v8669_v31 = vld [vmem:[#allocation168_spill] sm:$0xff] }
 0x5a2   :  { %2933 = vmatpush.bf16.msrb.mxu2 %v8659_v33  ;;  %2946 = vmatpush.bf16.msrb.mxu3 %v8660_v14  ;;  %v8670_v33 = vld [vmem:[#allocation42_spill] sm:$0xff]  ;;  %v8671_v14 = vld [vmem:[#allocation169_spill] sm:$0xff] }
 0x5a3   :  { %v276_v6 = vadd.f32 %v8670_v33, %v8669_v31 }
 0x5a5   :  { %2908 = vmatpush.bf16.msrb.mxu0 %v8661_v17  ;;  %2921 = vmatpush.bf16.msrb.mxu1 %v8662_v5  ;;  %v325_v17 = vadd.f32 %v8672_v35, %v8671_v14 }
 0x5a6   :  { %2934 = vmatpush.bf16.msrb.mxu2 %v8663_v18  ;;  %2947 = vmatpush.bf16.msrb.mxu3 %v8664_v61 }
 0x5a9   :  { %2909 = vmatpush.bf16.msrb.mxu0 %v8665_v39  ;;  %2922 = vmatpush.bf16.msrb.mxu1 %v8666_v20  ;;  %v8673_v39 = vld [vmem:[#allocation14_spill] sm:$0xff] }
 0x5aa   :  { %2935 = vmatpush.bf16.msrb.mxu2 %v8667_v59  ;;  %2948 = vmatpush.bf16.msrb.mxu3 %v8668_v9  ;;  %v374_v20 = vadd.f32 %v8674_v60, %v8673_v39  ;;  %v8675_v59 = vld [vmem:[#allocation45_spill] sm:$0xff] }
 0x5ab   :  { %v423_v30 = vadd.f32 %v8675_v59, %v8551_v51 }
 0x5e7   :  { %v2657_v37 = vpop.f32.mrf.mxu0  ;;  %v2670_v5 = vpop.f32.mrf.mxu1 }
 0x5e8   :  { %v2700_v26 = vadd.f32 %v2657_v37, %v276_v6  ;;  %v2701_v18 = vadd.f32 %v2670_v5, %v325_v17 }
 0x5ea   :  { %v2768_v50 = vmul.f32 0.5, %v2700_v26  ;;  %v2772_v61 = vmul.f32 0.5, %v2701_v18 }
 0x5ec   :  { %5189 = vtanh.f32 %v2768_v50 }
 0x5ed   :  { %5191 = vtanh.f32 %v2772_v61  ;;  %v8676_v61 = vld [vmem:[#allocation140_spill] sm:$0xff] }
 0x5ee   :  { %v2683_v9 = vpop.f32.mrf.mxu2  ;;  %v2696_v52 = vpop.f32.mrf.mxu3  ;;  %v677_v59 = vadd.f32 %v8676_v61, %v8469_v19 }
 0x5ef   :  { %v2702_v33 = vadd.f32 %v2683_v9, %v374_v20  ;;  %v2703_v31 = vadd.f32 %v2696_v52, %v423_v30  ;;  %v2659_v38 = vpop.f32.mrf.mxu0  ;;  %v2672_v35 = vpop.f32.mrf.mxu1  ;;  %v8677_v20 = vld [vmem:[#allocation141_spill] sm:$0xff] }
 0x5f0   :  { %v726_v52 = vadd.f32 %v8677_v20, %v8512_v29  ;;  %v8678_v38 = vld [vmem:[#allocation164_spill] sm:$0xff] }
 0x5f1   :  { %5193 = vtanh.f32 %v2702_v33  ;;  %v2777_v14 = vmul.f32 0.5, %v2703_v31 }
 0x5f2   :  { %v5190_v37 = vpop.eup %5189 }
 0x5f3   :  { %v5192_v6 = vpop.eup %5191  ;;  %v2770_v26 = vmul.f32 0.5, %v5190_v37  ;;  %5195 = vtanh.f32 %v2777_v14  ;;  %v2813_v14 = vpop.permute.xlu2 %2812 }
 0x5f4   :  { %v2774_v17 = vmul.f32 0.5, %v5192_v6  ;;  %vm2814_vm1 = vcmp.eq.s32.totalorder %v2813_v14, 1 }
 0x5f5   :  { %v2771_v50 = vadd.f32 0.5, %v2770_v26 }
 0x5f6   :  { %v2775_v5 = vadd.f32 0.5, %v2774_v17  ;;  %v2685_v60 = vpop.f32.mrf.mxu2  ;;  %v2698_v18 = vpop.f32.mrf.mxu3 }
 0x5f7   :  { %v5194_v39 = vpop.eup %5193 }
 0x5f8   :  { %v2781_v30 = vmul.f32 %v2775_v5, %v8678_v38  ;;  %v2782_v9 = vmul.f32 %v5194_v39, %v2771_v50  ;;  %v2721_v31 = vpop.f32.mrf.mxu0  ;;  %v2734_v33 = vpop.f32.mrf.mxu1  ;;  %v8680_v5 = vld [vmem:[#allocation142_spill] sm:$0xff]  ;;  %v8681_v50 = vld [vmem:[#allocation143_spill] sm:$0xff] }
 0x5f9   :  { %v2764_v35 = vadd.f32 %v2721_v31, %v677_v59  ;;  %v2765_v37 = vadd.f32 %v2734_v33, %v726_v52  ;;  %v5196_v6 = vpop.eup %5195  ;;  %v775_v39 = vadd.f32 %v8680_v5, %v8473_v54  ;;  %v824_v59 = vadd.f32 %v8681_v50, %v8475_v16 }
 0x5fa   :  { %v2783_v26 = vadd.f32 %v2782_v9, %v2781_v30  ;;  %v2779_v61 = vmul.f32 0.5, %v5196_v6 }
 0x5fb   :  { %v2786_v17 = vmul.f32 0.5, %v2764_v35  ;;  %v2790_v60 = vmul.f32 0.5, %v2765_v37 }
 0x5fc   :  { %5197 = vtanh.f32 %v2783_v26  ;;  %v7341_v18 = vsel %vm2814_vm1, %v2783_v26, %v8678_v38  ;;  %v2780_v35 = vadd.f32 0.5, %v2779_v61 }
 0x5fd   :  { %8679 = vst [vmem:[#allocation165_spill] sm:$0xff] %v7341_v18  ;;  %5199 = vtanh.f32 %v2786_v17 }
 0x5fe   :  { %5201 = vtanh.f32 %v2790_v60 }
 0x5ff   :  { %v2747_v20 = vpop.f32.mrf.mxu2  ;;  %v2760_v52 = vpop.f32.mrf.mxu3 }
 0x600   :  { %v2766_v30 = vadd.f32 %v2747_v20, %v775_v39  ;;  %v2767_v9 = vadd.f32 %v2760_v52, %v824_v59  ;;  %v2723_v31 = vpop.f32.mrf.mxu0  ;;  %v2736_v33 = vpop.f32.mrf.mxu1 }
 0x601   :  { %v2820_v33 = vpop.permute.xlu0 %2819 }
 0x602   :  { %v5198_v37 = vpop.eup %5197  ;;  %5203 = vtanh.f32 %v2766_v30  ;;  %v2795_v38 = vmul.f32 0.5, %v2767_v9  ;;  %vm2821_vm2 = vcmp.eq.s32.totalorder %v2820_v33, 1  ;;  %v8693_v33 = vld [vmem:[#allocation77_spill] sm:$0xff] }
 0x603   :  { %v5200_v26 = vpop.eup %5199  ;;  %v2785_v6 = vmul.f32 %v5198_v37, %v2780_v35 }
 0x604   :  { %v5202_v17 = vpop.eup %5201  ;;  %v2788_v18 = vmul.f32 0.5, %v5200_v26  ;;  %5205 = vtanh.f32 %v2795_v38 }
 0x605   :  { %v7349_v5 = vsel %vm2814_vm1, %v2785_v6, %v7245_v56  ;;  %v2824_v60 = vsel %vm2814_vm1, %v2785_v6, 0.0  ;;  %v2792_v50 = vmul.f32 0.5, %v5202_v17 }
 0x606   :  { %v2825_v39 = vpack.c.bf16 %v2824_v60, %v2824_v60  ;;  %v2838_v59 = vpack.c.bf16 %v7349_v5, %v7349_v5  ;;  %v2789_v61 = vadd.f32 0.5, %v2788_v18 }
 0x607   :  { %v2793_v20 = vadd.f32 0.5, %v2792_v50  ;;  %v2749_v52 = vpop.f32.mrf.mxu2  ;;  %v2762_v30 = vpop.f32.mrf.mxu3 }
 0x608   :  { %v5204_v9 = vpop.eup %5203  ;;  %2827 = vst [vmem:[#allocation8 + $0x1c] sm:$0xf] %v2825_v39  ;;  %2847 = vmatmul.bf16.vlgmr.msra.gmra.mxu0 %v2838_v59  ;;  %2860 = vmatmul.bf16.vlgmr.msra.gmra.mxu1 %v2838_v59  ;;  %v8683_v39 = vld [vmem:[#allocation63_spill] sm:$0xff]  ;;  %v8688_v30 = vld [vmem:[#allocation68_spill] sm:$0xff] }
 0x609   :  { %v2799_v31 = vmul.f32 %v2793_v20, %v7257_v47  ;;  %v2800_v56 = vmul.f32 %v5204_v9, %v2789_v61  ;;  %2873 = vmatmul.bf16.vlgmr.msra.gmra.mxu2 %v2838_v59  ;;  %2886 = vmatmul.bf16.vlgmr.msra.gmra.mxu3 %v2838_v59  ;;  %v8684_v59 = vld [vmem:[#allocation64_spill] sm:$0xff]  ;;  %v8685_v61 = vld [vmem:[#allocation65_spill] sm:$0xff]  ;;  %v8686_v20 = vld [vmem:[#allocation66_spill] sm:$0xff] }
 0x60a   :  { %3029 = vmatpush.bf16.msra.mxu0 %v5673_v58  ;;  %3042 = vmatpush.bf16.msra.mxu1 %v5684_v62  ;;  %v5206_v14 = vpop.eup %5205  ;;  %v8687_v52 = vld [vmem:[#allocation67_spill] sm:$0xff]  ;;  %v8689_v9 = vld [vmem:[#allocation70_spill] sm:$0xff] }
 0x60b   :  { %v2801_v35 = vadd.f32 %v2800_v56, %v2799_v31  ;;  %3055 = vmatpush.bf16.msra.mxu2 %v5686_v63  ;;  %3068 = vmatpush.bf16.msra.mxu3 %v5697_v2  ;;  %v2797_v37 = vmul.f32 0.5, %v5206_v14  ;;  %v8690_v31 = vld [vmem:[#allocation74_spill] sm:$0xff]  ;;  %v8691_v56 = vld [vmem:[#allocation75_spill] sm:$0xff]  ;;  %v8692_v14 = vld [vmem:[#allocation76_spill] sm:$0xff] }
 0x60d   :  { %5207 = vtanh.f32 %v2801_v35  ;;  %v7361_v18 = vsel %vm2821_vm2, %v2801_v35, %v7257_v47  ;;  %v2798_v38 = vadd.f32 0.5, %v2797_v37  ;;  %v8694_v35 = vld [vmem:[#allocation78_spill] sm:$0xff]  ;;  %v8695_v37 = vld [vmem:[#allocation79_spill] sm:$0xff] }
 0x60e   :  { %3030 = vmatpush.bf16.msra.mxu0 %v5716_v7  ;;  %3043 = vmatpush.bf16.msra.mxu1 %v5727_v11 }
 0x60f   :  { %3056 = vmatpush.bf16.msra.mxu2 %v5729_v12  ;;  %3069 = vmatpush.bf16.msra.mxu3 %v5740_v15 }
 0x612   :  { %3031 = vmatpush.bf16.msra.mxu0 %v5763_v22  ;;  %3044 = vmatpush.bf16.msra.mxu1 %v5776_v27 }
 0x613   :  { %v5208_v26 = vpop.eup %5207  ;;  %3057 = vmatpush.bf16.msra.mxu2 %v5778_v28  ;;  %3070 = vmatpush.bf16.msra.mxu3 %v5795_v34 }
 0x614   :  { %v2803_v47 = vmul.f32 %v5208_v26, %v2798_v38  ;;  %v8696_v38 = vld [vmem:[#allocation80_spill] sm:$0xff]  ;;  %v8697_v26 = vld [vmem:[#allocation82_spill] sm:$0xff] }
 0x616   :  { %v7373_v6 = vsel %vm2821_vm2, %v2803_v47, %v7269_v53  ;;  %v2828_v17 = vsel %vm2821_vm2, %v2803_v47, 0.0  ;;  %3032 = vmatpush.bf16.msra.mxu0 %v5822_v43  ;;  %3045 = vmatpush.bf16.msra.mxu1 %v5835_v48  ;;  %v8682_v53 = vld [vmem:[#allocation62_spill] sm:$0xff] }
 0x617   :  { %v2829_v60 = vpack.c.bf16 %v2828_v17, %v2828_v17  ;;  %v2901_v50 = vpack.c.bf16 %v7373_v6, %v7373_v6  ;;  %3058 = vmatpush.bf16.msra.mxu2 %v5837_v49  ;;  %3071 = vmatpush.bf16.msra.mxu3 %v5854_v55  ;;  %v8698_v47 = vld [vmem:[#allocation86_spill] sm:$0xff]  ;;  %v8699_v17 = vld [vmem:[#allocation87_spill] sm:$0xff] }
 0x619   :  { %2831 = vst [vmem:[#allocation9 + $0x20] sm:$0xf] %v2829_v60  ;;  %2910 = vmatmul.bf16.vlgmr.msrb.gmra.mxu0 %v2901_v50  ;;  %2923 = vmatmul.bf16.vlgmr.msrb.gmra.mxu1 %v2901_v50  ;;  %v8700_v60 = vld [vmem:[#allocation88_spill] sm:$0xff] }
 0x61a   :  { %2936 = vmatmul.bf16.vlgmr.msrb.gmra.mxu2 %v2901_v50  ;;  %2949 = vmatmul.bf16.vlgmr.msrb.gmra.mxu3 %v2901_v50  ;;  %v8701_v50 = vld [vmem:[#allocation89_spill] sm:$0xff] }
 0x61b   :  { %3033 = vmatpush.bf16.msra.mxu0 %v5881_v4  ;;  %3046 = vmatpush.bf16.msra.mxu1 %v5894_v10 }
 0x61c   :  { %3059 = vmatpush.bf16.msra.mxu2 %v5896_v13  ;;  %3072 = vmatpush.bf16.msra.mxu3 %v5913_v23 }
 0x61f   :  { %3034 = vmatpush.bf16.msra.mxu0 %v5940_v44  ;;  %3047 = vmatpush.bf16.msra.mxu1 %v5953_v57 }
 0x620   :  { %3060 = vmatpush.bf16.msra.mxu2 %v5955_v0  ;;  %3073 = vmatpush.bf16.msra.mxu3 %v5975_v21 }
 0x623   :  { %3035 = vmatpush.bf16.msra.mxu0 %v6010_v25  ;;  %3048 = vmatpush.bf16.msra.mxu1 %v6023_v45 }
 0x624   :  { %3061 = vmatpush.bf16.msra.mxu2 %v6025_v41  ;;  %3074 = vmatpush.bf16.msra.mxu3 %v6045_v42 }
 0x627   :  { %3036 = vmatpush.bf16.msra.mxu0 %v6071_v1  ;;  %3049 = vmatpush.bf16.msra.mxu1 %v6081_v3 }
 0x628   :  { %3062 = vmatpush.bf16.msra.mxu2 %v6093_v36  ;;  %3075 = vmatpush.bf16.msra.mxu3 %v6100_v32 }
 0x62b   :  { %3092 = vmatpush.bf16.msrb.mxu0 %v6102_v24  ;;  %3105 = vmatpush.bf16.msrb.mxu1 %v6107_v40 }
 0x62c   :  { %3118 = vmatpush.bf16.msrb.mxu2 %v8432_v8  ;;  %3131 = vmatpush.bf16.msrb.mxu3 %v8433_v46 }
 0x62f   :  { %3093 = vmatpush.bf16.msrb.mxu0 %v8682_v53  ;;  %3106 = vmatpush.bf16.msrb.mxu1 %v8683_v39 }
 0x630   :  { %3119 = vmatpush.bf16.msrb.mxu2 %v8684_v59  ;;  %3132 = vmatpush.bf16.msrb.mxu3 %v8685_v61  ;;  %v8715_v61 = vld [vmem:[#allocation48_spill] sm:$0xff] }
 0x633   :  { %3094 = vmatpush.bf16.msrb.mxu0 %v8686_v20  ;;  %3107 = vmatpush.bf16.msrb.mxu1 %v8687_v52 }
 0x634   :  { %3120 = vmatpush.bf16.msrb.mxu2 %v8688_v30  ;;  %3133 = vmatpush.bf16.msrb.mxu3 %v8689_v9  ;;  %v8713_v9 = vld [vmem:[#allocation47_spill] sm:$0xff] }
 0x637   :  { %3095 = vmatpush.bf16.msrb.mxu0 %v8690_v31  ;;  %3108 = vmatpush.bf16.msrb.mxu1 %v8691_v56  ;;  %v8702_v56 = vld [vmem:[#allocation90_spill] sm:$0xff] }
 0x638   :  { %3121 = vmatpush.bf16.msrb.mxu2 %v8692_v14  ;;  %3134 = vmatpush.bf16.msrb.mxu3 %v8693_v33  ;;  %v8703_v14 = vld [vmem:[#allocation91_spill] sm:$0xff]  ;;  %v8704_v33 = vld [vmem:[#allocation92_spill] sm:$0xff] }
 0x63b   :  { %3096 = vmatpush.bf16.msrb.mxu0 %v8694_v35  ;;  %3109 = vmatpush.bf16.msrb.mxu1 %v8695_v37  ;;  %v8705_v35 = vld [vmem:[#allocation94_spill] sm:$0xff] }
 0x63c   :  { %3122 = vmatpush.bf16.msrb.mxu2 %v8696_v38  ;;  %3135 = vmatpush.bf16.msrb.mxu3 %v8697_v26  ;;  %v8706_v37 = vld [vmem:[#allocation98_spill] sm:$0xff]  ;;  %v8707_v38 = vld [vmem:[#allocation99_spill] sm:$0xff]  ;;  %v8708_v26 = vld [vmem:[#allocation100_spill] sm:$0xff] }
 0x63f   :  { %3097 = vmatpush.bf16.msrb.mxu0 %v8698_v47  ;;  %3110 = vmatpush.bf16.msrb.mxu1 %v8699_v17  ;;  %v8709_v47 = vld [vmem:[#allocation101_spill] sm:$0xff]  ;;  %v8710_v17 = vld [vmem:[#allocation168_spill] sm:$0xff] }
 0x640   :  { %3123 = vmatpush.bf16.msrb.mxu2 %v8700_v60  ;;  %3136 = vmatpush.bf16.msrb.mxu3 %v8701_v50  ;;  %v8711_v60 = vld [vmem:[#allocation46_spill] sm:$0xff]  ;;  %v8712_v50 = vld [vmem:[#allocation169_spill] sm:$0xff] }
 0x641   :  { %v279_v31 = vadd.f32 %v8711_v60, %v8710_v17 }
 0x643   :  { %3098 = vmatpush.bf16.msrb.mxu0 %v8702_v56  ;;  %3111 = vmatpush.bf16.msrb.mxu1 %v8703_v14  ;;  %v328_v56 = vadd.f32 %v8713_v9, %v8712_v50 }
 0x644   :  { %3124 = vmatpush.bf16.msrb.mxu2 %v8704_v33  ;;  %3137 = vmatpush.bf16.msrb.mxu3 %v8705_v35 }
 0x647   :  { %3099 = vmatpush.bf16.msrb.mxu0 %v8706_v37  ;;  %3112 = vmatpush.bf16.msrb.mxu1 %v8707_v38  ;;  %v8714_v37 = vld [vmem:[#allocation14_spill] sm:$0xff] }
 0x648   :  { %3125 = vmatpush.bf16.msrb.mxu2 %v8708_v26  ;;  %3138 = vmatpush.bf16.msrb.mxu3 %v8709_v47  ;;  %v377_v38 = vadd.f32 %v8715_v61, %v8714_v37  ;;  %v8716_v26 = vld [vmem:[#allocation49_spill] sm:$0xff] }
 0x649   :  { %v426_v59 = vadd.f32 %v8716_v26, %v8551_v51 }
 0x685   :  { %v2848_v30 = vpop.f32.mrf.mxu0  ;;  %v2861_v14 = vpop.f32.mrf.mxu1 }
 0x686   :  { %v2891_v52 = vadd.f32 %v2848_v30, %v279_v31  ;;  %v2892_v33 = vadd.f32 %v2861_v14, %v328_v56 }
 0x688   :  { %v2958_v20 = vmul.f32 0.5, %v2891_v52  ;;  %v2962_v35 = vmul.f32 0.5, %v2892_v33 }
 0x68a   :  { %5209 = vtanh.f32 %v2958_v20 }
 0x68b   :  { %5211 = vtanh.f32 %v2962_v35  ;;  %v8717_v35 = vld [vmem:[#allocation136_spill] sm:$0xff] }
 0x68c   :  { %v2874_v47 = vpop.f32.mrf.mxu2  ;;  %v2887_v39 = vpop.f32.mrf.mxu3  ;;  %v674_v26 = vadd.f32 %v8717_v35, %v8469_v19 }
 0x68d   :  { %v2893_v60 = vadd.f32 %v2874_v47, %v377_v38  ;;  %v2894_v17 = vadd.f32 %v2887_v39, %v426_v59  ;;  %v2850_v53 = vpop.f32.mrf.mxu0  ;;  %v2863_v9 = vpop.f32.mrf.mxu1  ;;  %v8718_v38 = vld [vmem:[#allocation137_spill] sm:$0xff] }
 0x68e   :  { %v723_v39 = vadd.f32 %v8718_v38, %v8512_v29  ;;  %v8719_v53 = vld [vmem:[#allocation165_spill] sm:$0xff] }
 0x68f   :  { %5213 = vtanh.f32 %v2893_v60  ;;  %v2967_v50 = vmul.f32 0.5, %v2894_v17 }
 0x690   :  { %v5210_v30 = vpop.eup %5209 }
 0x691   :  { %v5212_v31 = vpop.eup %5211  ;;  %v2960_v52 = vmul.f32 0.5, %v5210_v30  ;;  %5215 = vtanh.f32 %v2967_v50  ;;  %v3003_v50 = vpop.permute.xlu1 %3002 }
 0x692   :  { %v2964_v56 = vmul.f32 0.5, %v5212_v31  ;;  %vm3004_vm3 = vcmp.eq.s32.totalorder %v3003_v50, 1 }
 0x693   :  { %v2961_v20 = vadd.f32 0.5, %v2960_v52 }
 0x694   :  { %v2965_v14 = vadd.f32 0.5, %v2964_v56  ;;  %v2876_v61 = vpop.f32.mrf.mxu2  ;;  %v2889_v33 = vpop.f32.mrf.mxu3 }
 0x695   :  { %v5214_v37 = vpop.eup %5213 }
 0x696   :  { %v2971_v59 = vmul.f32 %v2965_v14, %v8719_v53  ;;  %v2972_v47 = vmul.f32 %v5214_v37, %v2961_v20  ;;  %v2911_v17 = vpop.f32.mrf.mxu0  ;;  %v2924_v60 = vpop.f32.mrf.mxu1  ;;  %v8721_v14 = vld [vmem:[#allocation138_spill] sm:$0xff]  ;;  %v8722_v20 = vld [vmem:[#allocation139_spill] sm:$0xff] }
 0x697   :  { %v2954_v9 = vadd.f32 %v2911_v17, %v674_v26  ;;  %v2955_v30 = vadd.f32 %v2924_v60, %v723_v39  ;;  %v5216_v31 = vpop.eup %5215  ;;  %v772_v37 = vadd.f32 %v8721_v14, %v8473_v54  ;;  %v821_v26 = vadd.f32 %v8722_v20, %v8475_v16 }
 0x698   :  { %v2973_v52 = vadd.f32 %v2972_v47, %v2971_v59  ;;  %v2969_v35 = vmul.f32 0.5, %v5216_v31 }
 0x699   :  { %v2976_v56 = vmul.f32 0.5, %v2954_v9  ;;  %v2980_v61 = vmul.f32 0.5, %v2955_v30 }
 0x69a   :  { %5217 = vtanh.f32 %v2973_v52  ;;  %v7445_v33 = vsel %vm3004_vm3, %v2973_v52, %v8719_v53  ;;  %v2970_v9 = vadd.f32 0.5, %v2969_v35 }
 0x69b   :  { %8720 = vst [vmem:[#allocation166_spill] sm:$0xff] %v7445_v33  ;;  %5219 = vtanh.f32 %v2976_v56 }
 0x69c   :  { %5221 = vtanh.f32 %v2980_v61 }
 0x69d   :  { %v2937_v38 = vpop.f32.mrf.mxu2  ;;  %v2950_v39 = vpop.f32.mrf.mxu3 }
 0x69e   :  { %v2956_v59 = vadd.f32 %v2937_v38, %v772_v37  ;;  %v2957_v47 = vadd.f32 %v2950_v39, %v821_v26  ;;  %v2913_v17 = vpop.f32.mrf.mxu0  ;;  %v2926_v60 = vpop.f32.mrf.mxu1 }
 0x69f   :  { %v3010_v60 = vpop.permute.xlu2 %3009 }
 0x6a0   :  { %v5218_v30 = vpop.eup %5217  ;;  %5223 = vtanh.f32 %v2956_v59  ;;  %v2985_v53 = vmul.f32 0.5, %v2957_v47  ;;  %vm3011_vm4 = vcmp.eq.s32.totalorder %v3010_v60, 1  ;;  %v8734_v60 = vld [vmem:[#allocation77_spill] sm:$0xff] }
 0x6a1   :  { %v5220_v52 = vpop.eup %5219  ;;  %v2975_v31 = vmul.f32 %v5218_v30, %v2970_v9 }
 0x6a2   :  { %v5222_v56 = vpop.eup %5221  ;;  %v2978_v33 = vmul.f32 0.5, %v5220_v52  ;;  %5225 = vtanh.f32 %v2985_v53 }
 0x6a3   :  { %v7453_v14 = vsel %vm3004_vm3, %v2975_v31, %v7349_v5  ;;  %v3014_v61 = vsel %vm3004_vm3, %v2975_v31, 0.0  ;;  %v2982_v20 = vmul.f32 0.5, %v5222_v56 }
 0x6a4   :  { %v3015_v37 = vpack.c.bf16 %v3014_v61, %v3014_v61  ;;  %v3028_v26 = vpack.c.bf16 %v7453_v14, %v7453_v14  ;;  %v2979_v35 = vadd.f32 0.5, %v2978_v33 }
 0x6a5   :  { %v2983_v38 = vadd.f32 0.5, %v2982_v20  ;;  %v2939_v39 = vpop.f32.mrf.mxu2  ;;  %v2952_v59 = vpop.f32.mrf.mxu3 }
 0x6a6   :  { %v5224_v47 = vpop.eup %5223  ;;  %3017 = vst [vmem:[#allocation8 + $0x20] sm:$0xf] %v3015_v37  ;;  %3037 = vmatmul.bf16.vlgmr.msra.gmra.mxu0 %v3028_v26  ;;  %3050 = vmatmul.bf16.vlgmr.msra.gmra.mxu1 %v3028_v26  ;;  %v8724_v37 = vld [vmem:[#allocation63_spill] sm:$0xff]  ;;  %v8729_v59 = vld [vmem:[#allocation68_spill] sm:$0xff] }
 0x6a7   :  { %v2989_v17 = vmul.f32 %v2983_v38, %v7361_v18  ;;  %v2990_v5 = vmul.f32 %v5224_v47, %v2979_v35  ;;  %3063 = vmatmul.bf16.vlgmr.msra.gmra.mxu2 %v3028_v26  ;;  %3076 = vmatmul.bf16.vlgmr.msra.gmra.mxu3 %v3028_v26  ;;  %v8725_v26 = vld [vmem:[#allocation64_spill] sm:$0xff]  ;;  %v8726_v35 = vld [vmem:[#allocation65_spill] sm:$0xff]  ;;  %v8727_v38 = vld [vmem:[#allocation66_spill] sm:$0xff] }
 0x6a8   :  { %3219 = vmatpush.bf16.msra.mxu0 %v5673_v58  ;;  %3232 = vmatpush.bf16.msra.mxu1 %v5684_v62  ;;  %v5226_v50 = vpop.eup %5225  ;;  %v8728_v39 = vld [vmem:[#allocation67_spill] sm:$0xff]  ;;  %v8730_v47 = vld [vmem:[#allocation70_spill] sm:$0xff] }
 0x6a9   :  { %v2991_v9 = vadd.f32 %v2990_v5, %v2989_v17  ;;  %3245 = vmatpush.bf16.msra.mxu2 %v5686_v63  ;;  %3258 = vmatpush.bf16.msra.mxu3 %v5697_v2  ;;  %v2987_v30 = vmul.f32 0.5, %v5226_v50  ;;  %v8731_v17 = vld [vmem:[#allocation74_spill] sm:$0xff]  ;;  %v8732_v5 = vld [vmem:[#allocation75_spill] sm:$0xff]  ;;  %v8733_v50 = vld [vmem:[#allocation76_spill] sm:$0xff] }
 0x6ab   :  { %5227 = vtanh.f32 %v2991_v9  ;;  %v7465_v33 = vsel %vm3011_vm4, %v2991_v9, %v7361_v18  ;;  %v2988_v53 = vadd.f32 0.5, %v2987_v30  ;;  %v8735_v9 = vld [vmem:[#allocation78_spill] sm:$0xff]  ;;  %v8736_v30 = vld [vmem:[#allocation79_spill] sm:$0xff] }
 0x6ac   :  { %3220 = vmatpush.bf16.msra.mxu0 %v5716_v7  ;;  %3233 = vmatpush.bf16.msra.mxu1 %v5727_v11 }
 0x6ad   :  { %3246 = vmatpush.bf16.msra.mxu2 %v5729_v12  ;;  %3259 = vmatpush.bf16.msra.mxu3 %v5740_v15 }
 0x6b0   :  { %3221 = vmatpush.bf16.msra.mxu0 %v5763_v22  ;;  %3234 = vmatpush.bf16.msra.mxu1 %v5776_v27 }
 0x6b1   :  { %v5228_v52 = vpop.eup %5227  ;;  %3247 = vmatpush.bf16.msra.mxu2 %v5778_v28  ;;  %3260 = vmatpush.bf16.msra.mxu3 %v5795_v34 }
 0x6b2   :  { %v2993_v18 = vmul.f32 %v5228_v52, %v2988_v53  ;;  %v8737_v53 = vld [vmem:[#allocation80_spill] sm:$0xff]  ;;  %v8738_v52 = vld [vmem:[#allocation82_spill] sm:$0xff] }
 0x6b4   :  { %v7477_v31 = vsel %vm3011_vm4, %v2993_v18, %v7373_v6  ;;  %v3018_v56 = vsel %vm3011_vm4, %v2993_v18, 0.0  ;;  %3222 = vmatpush.bf16.msra.mxu0 %v5822_v43  ;;  %3235 = vmatpush.bf16.msra.mxu1 %v5835_v48  ;;  %v8723_v6 = vld [vmem:[#allocation62_spill] sm:$0xff] }
 0x6b5   :  { %v3019_v61 = vpack.c.bf16 %v3018_v56, %v3018_v56  ;;  %v3091_v20 = vpack.c.bf16 %v7477_v31, %v7477_v31  ;;  %3248 = vmatpush.bf16.msra.mxu2 %v5837_v49  ;;  %3261 = vmatpush.bf16.msra.mxu3 %v5854_v55  ;;  %v8739_v18 = vld [vmem:[#allocation86_spill] sm:$0xff]  ;;  %v8740_v56 = vld [vmem:[#allocation87_spill] sm:$0xff] }
 0x6b7   :  { %3021 = vst [vmem:[#allocation9 + $0x1c] sm:$0xf] %v3019_v61  ;;  %3100 = vmatmul.bf16.vlgmr.msrb.gmra.mxu0 %v3091_v20  ;;  %3113 = vmatmul.bf16.vlgmr.msrb.gmra.mxu1 %v3091_v20  ;;  %v8741_v61 = vld [vmem:[#allocation88_spill] sm:$0xff] }
 0x6b8   :  { %3126 = vmatmul.bf16.vlgmr.msrb.gmra.mxu2 %v3091_v20  ;;  %3139 = vmatmul.bf16.vlgmr.msrb.gmra.mxu3 %v3091_v20  ;;  %v8742_v20 = vld [vmem:[#allocation89_spill] sm:$0xff] }
 0x6b9   :  { %3223 = vmatpush.bf16.msra.mxu0 %v5881_v4  ;;  %3236 = vmatpush.bf16.msra.mxu1 %v5894_v10 }
 0x6ba   :  { %3249 = vmatpush.bf16.msra.mxu2 %v5896_v13  ;;  %3262 = vmatpush.bf16.msra.mxu3 %v5913_v23 }
 0x6bd   :  { %3224 = vmatpush.bf16.msra.mxu0 %v5940_v44  ;;  %3237 = vmatpush.bf16.msra.mxu1 %v5953_v57 }
 0x6be   :  { %3250 = vmatpush.bf16.msra.mxu2 %v5955_v0  ;;  %3263 = vmatpush.bf16.msra.mxu3 %v5975_v21 }
 0x6c1   :  { %3225 = vmatpush.bf16.msra.mxu0 %v6010_v25  ;;  %3238 = vmatpush.bf16.msra.mxu1 %v6023_v45 }
 0x6c2   :  { %3251 = vmatpush.bf16.msra.mxu2 %v6025_v41  ;;  %3264 = vmatpush.bf16.msra.mxu3 %v6045_v42 }
 0x6c5   :  { %3226 = vmatpush.bf16.msra.mxu0 %v6071_v1  ;;  %3239 = vmatpush.bf16.msra.mxu1 %v6081_v3 }
 0x6c6   :  { %3252 = vmatpush.bf16.msra.mxu2 %v6093_v36  ;;  %3265 = vmatpush.bf16.msra.mxu3 %v6100_v32 }
 0x6c9   :  { %3282 = vmatpush.bf16.msrb.mxu0 %v6102_v24  ;;  %3295 = vmatpush.bf16.msrb.mxu1 %v6107_v40 }
 0x6ca   :  { %3308 = vmatpush.bf16.msrb.mxu2 %v8432_v8  ;;  %3321 = vmatpush.bf16.msrb.mxu3 %v8433_v46 }
 0x6cd   :  { %3283 = vmatpush.bf16.msrb.mxu0 %v8723_v6  ;;  %3296 = vmatpush.bf16.msrb.mxu1 %v8724_v37 }
 0x6ce   :  { %3309 = vmatpush.bf16.msrb.mxu2 %v8725_v26  ;;  %3322 = vmatpush.bf16.msrb.mxu3 %v8726_v35  ;;  %v8756_v35 = vld [vmem:[#allocation52_spill] sm:$0xff] }
 0x6d1   :  { %3284 = vmatpush.bf16.msrb.mxu0 %v8727_v38  ;;  %3297 = vmatpush.bf16.msrb.mxu1 %v8728_v39 }
 0x6d2   :  { %3310 = vmatpush.bf16.msrb.mxu2 %v8729_v59  ;;  %3323 = vmatpush.bf16.msrb.mxu3 %v8730_v47  ;;  %v8754_v47 = vld [vmem:[#allocation51_spill] sm:$0xff] }
 0x6d5   :  { %3285 = vmatpush.bf16.msrb.mxu0 %v8731_v17  ;;  %3298 = vmatpush.bf16.msrb.mxu1 %v8732_v5  ;;  %v8743_v5 = vld [vmem:[#allocation90_spill] sm:$0xff] }
 0x6d6   :  { %3311 = vmatpush.bf16.msrb.mxu2 %v8733_v50  ;;  %3324 = vmatpush.bf16.msrb.mxu3 %v8734_v60  ;;  %v8744_v50 = vld [vmem:[#allocation91_spill] sm:$0xff]  ;;  %v8745_v60 = vld [vmem:[#allocation92_spill] sm:$0xff] }
 0x6d9   :  { %3286 = vmatpush.bf16.msrb.mxu0 %v8735_v9  ;;  %3299 = vmatpush.bf16.msrb.mxu1 %v8736_v30  ;;  %v8746_v9 = vld [vmem:[#allocation94_spill] sm:$0xff] }
 0x6da   :  { %3312 = vmatpush.bf16.msrb.mxu2 %v8737_v53  ;;  %3325 = vmatpush.bf16.msrb.mxu3 %v8738_v52  ;;  %v8747_v30 = vld [vmem:[#allocation98_spill] sm:$0xff]  ;;  %v8748_v53 = vld [vmem:[#allocation99_spill] sm:$0xff]  ;;  %v8749_v52 = vld [vmem:[#allocation100_spill] sm:$0xff] }
 0x6dd   :  { %3287 = vmatpush.bf16.msrb.mxu0 %v8739_v18  ;;  %3300 = vmatpush.bf16.msrb.mxu1 %v8740_v56  ;;  %v8750_v18 = vld [vmem:[#allocation101_spill] sm:$0xff]  ;;  %v8751_v56 = vld [vmem:[#allocation168_spill] sm:$0xff] }
 0x6de   :  { %3313 = vmatpush.bf16.msrb.mxu2 %v8741_v61  ;;  %3326 = vmatpush.bf16.msrb.mxu3 %v8742_v20  ;;  %v8752_v61 = vld [vmem:[#allocation50_spill] sm:$0xff]  ;;  %v8753_v20 = vld [vmem:[#allocation169_spill] sm:$0xff] }
 0x6df   :  { %v281_v17 = vadd.f32 %v8752_v61, %v8751_v56 }
 0x6e1   :  { %3288 = vmatpush.bf16.msrb.mxu0 %v8743_v5  ;;  %3301 = vmatpush.bf16.msrb.mxu1 %v8744_v50  ;;  %v330_v5 = vadd.f32 %v8754_v47, %v8753_v20 }
 0x6e2   :  { %3314 = vmatpush.bf16.msrb.mxu2 %v8745_v60  ;;  %3327 = vmatpush.bf16.msrb.mxu3 %v8746_v9 }
 0x6e5   :  { %3289 = vmatpush.bf16.msrb.mxu0 %v8747_v30  ;;  %3302 = vmatpush.bf16.msrb.mxu1 %v8748_v53  ;;  %v8755_v30 = vld [vmem:[#allocation14_spill] sm:$0xff] }
 0x6e6   :  { %3315 = vmatpush.bf16.msrb.mxu2 %v8749_v52  ;;  %3328 = vmatpush.bf16.msrb.mxu3 %v8750_v18  ;;  %v379_v53 = vadd.f32 %v8756_v35, %v8755_v30  ;;  %v8757_v52 = vld [vmem:[#allocation53_spill] sm:$0xff] }
 0x6e7   :  { %v428_v26 = vadd.f32 %v8757_v52, %v8551_v51 }
 0x723   :  { %v3038_v59 = vpop.f32.mrf.mxu0  ;;  %v3051_v50 = vpop.f32.mrf.mxu1 }
 0x724   :  { %v3081_v39 = vadd.f32 %v3038_v59, %v281_v17  ;;  %v3082_v60 = vadd.f32 %v3051_v50, %v330_v5 }
 0x726   :  { %v3148_v38 = vmul.f32 0.5, %v3081_v39  ;;  %v3152_v9 = vmul.f32 0.5, %v3082_v60 }
 0x728   :  { %5229 = vtanh.f32 %v3148_v38 }
 0x729   :  { %5231 = vtanh.f32 %v3152_v9  ;;  %v8758_v9 = vld [vmem:[#allocation132_spill] sm:$0xff] }
 0x72a   :  { %v3064_v18 = vpop.f32.mrf.mxu2  ;;  %v3077_v37 = vpop.f32.mrf.mxu3  ;;  %v672_v52 = vadd.f32 %v8758_v9, %v8469_v19 }
 0x72b   :  { %v3083_v61 = vadd.f32 %v3064_v18, %v379_v53  ;;  %v3084_v56 = vadd.f32 %v3077_v37, %v428_v26  ;;  %v3040_v6 = vpop.f32.mrf.mxu0  ;;  %v3053_v47 = vpop.f32.mrf.mxu1  ;;  %v8759_v53 = vld [vmem:[#allocation133_spill] sm:$0xff] }
 0x72c   :  { %v721_v37 = vadd.f32 %v8759_v53, %v8512_v29  ;;  %v8760_v6 = vld [vmem:[#allocation166_spill] sm:$0xff] }
 0x72d   :  { %5233 = vtanh.f32 %v3083_v61  ;;  %v3157_v20 = vmul.f32 0.5, %v3084_v56 }
 0x72e   :  { %v5230_v59 = vpop.eup %5229 }
 0x72f   :  { %v5232_v17 = vpop.eup %5231  ;;  %v3150_v39 = vmul.f32 0.5, %v5230_v59  ;;  %5235 = vtanh.f32 %v3157_v20  ;;  %v3193_v20 = vpop.permute.xlu0 %3192 }
 0x730   :  { %v3154_v5 = vmul.f32 0.5, %v5232_v17  ;;  %vm3194_vm5 = vcmp.eq.s32.totalorder %v3193_v20, 1 }
 0x731   :  { %v3151_v38 = vadd.f32 0.5, %v3150_v39 }
 0x732   :  { %v3155_v50 = vadd.f32 0.5, %v3154_v5  ;;  %v3066_v35 = vpop.f32.mrf.mxu2  ;;  %v3079_v60 = vpop.f32.mrf.mxu3 }
 0x733   :  { %v5234_v30 = vpop.eup %5233 }
 0x734   :  { %v3161_v26 = vmul.f32 %v3155_v50, %v8760_v6  ;;  %v3162_v18 = vmul.f32 %v5234_v30, %v3151_v38  ;;  %v3101_v56 = vpop.f32.mrf.mxu0  ;;  %v3114_v61 = vpop.f32.mrf.mxu1  ;;  %v8762_v50 = vld [vmem:[#allocation134_spill] sm:$0xff]  ;;  %v8763_v38 = vld [vmem:[#allocation135_spill] sm:$0xff] }
 0x735   :  { %v3144_v47 = vadd.f32 %v3101_v56, %v672_v52  ;;  %v3145_v59 = vadd.f32 %v3114_v61, %v721_v37  ;;  %v5236_v17 = vpop.eup %5235  ;;  %v770_v30 = vadd.f32 %v8762_v50, %v8473_v54  ;;  %v819_v52 = vadd.f32 %v8763_v38, %v8475_v16 }
 0x736   :  { %v3163_v39 = vadd.f32 %v3162_v18, %v3161_v26  ;;  %v3159_v9 = vmul.f32 0.5, %v5236_v17 }
 0x737   :  { %v3166_v5 = vmul.f32 0.5, %v3144_v47  ;;  %v3170_v35 = vmul.f32 0.5, %v3145_v59 }
 0x738   :  { %5237 = vtanh.f32 %v3163_v39  ;;  %v7549_v60 = vsel %vm3194_vm5, %v3163_v39, %v8760_v6  ;;  %v3160_v47 = vadd.f32 0.5, %v3159_v9 }
 0x739   :  { %8761 = vst [vmem:[#allocation167_spill] sm:$0xff] %v7549_v60  ;;  %5239 = vtanh.f32 %v3166_v5 }
 0x73a   :  { %5241 = vtanh.f32 %v3170_v35 }
 0x73b   :  { %v3127_v53 = vpop.f32.mrf.mxu2  ;;  %v3140_v37 = vpop.f32.mrf.mxu3 }
 0x73c   :  { %v3146_v26 = vadd.f32 %v3127_v53, %v770_v30  ;;  %v3147_v18 = vadd.f32 %v3140_v37, %v819_v52  ;;  %v3103_v56 = vpop.f32.mrf.mxu0  ;;  %v3116_v61 = vpop.f32.mrf.mxu1 }
 0x73d   :  { %v3200_v61 = vpop.permute.xlu1 %3199 }
 0x73e   :  { %v5238_v59 = vpop.eup %5237  ;;  %5243 = vtanh.f32 %v3146_v26  ;;  %v3175_v6 = vmul.f32 0.5, %v3147_v18  ;;  %vm3201_vm6 = vcmp.eq.s32.totalorder %v3200_v61, 1  ;;  %v8775_v61 = vld [vmem:[#allocation77_spill] sm:$0xff] }
 0x73f   :  { %v5240_v39 = vpop.eup %5239  ;;  %v3165_v17 = vmul.f32 %v5238_v59, %v3160_v47 }
 0x740   :  { %v5242_v5 = vpop.eup %5241  ;;  %v3168_v60 = vmul.f32 0.5, %v5240_v39  ;;  %5245 = vtanh.f32 %v3175_v6 }
 0x741   :  { %v7557_v50 = vsel %vm3194_vm5, %v3165_v17, %v7453_v14  ;;  %v3204_v35 = vsel %vm3194_vm5, %v3165_v17, 0.0  ;;  %v3172_v38 = vmul.f32 0.5, %v5242_v5 }
 0x742   :  { %v3205_v30 = vpack.c.bf16 %v3204_v35, %v3204_v35  ;;  %v3218_v52 = vpack.c.bf16 %v7557_v50, %v7557_v50  ;;  %v3169_v9 = vadd.f32 0.5, %v3168_v60 }
 0x743   :  { %v3173_v53 = vadd.f32 0.5, %v3172_v38  ;;  %v3129_v37 = vpop.f32.mrf.mxu2  ;;  %v3142_v26 = vpop.f32.mrf.mxu3 }
 0x744   :  { %v5244_v18 = vpop.eup %5243  ;;  %3207 = vst [vmem:[#allocation8 + $0x24] sm:$0xf] %v3205_v30  ;;  %3227 = vmatmul.bf16.vlgmr.msra.gmra.mxu0 %v3218_v52  ;;  %3240 = vmatmul.bf16.vlgmr.msra.gmra.mxu1 %v3218_v52  ;;  %v8765_v30 = vld [vmem:[#allocation63_spill] sm:$0xff]  ;;  %v8770_v26 = vld [vmem:[#allocation68_spill] sm:$0xff] }
 0x745   :  { %v3179_v56 = vmul.f32 %v3173_v53, %v7465_v33  ;;  %v3180_v14 = vmul.f32 %v5244_v18, %v3169_v9  ;;  %3253 = vmatmul.bf16.vlgmr.msra.gmra.mxu2 %v3218_v52  ;;  %3266 = vmatmul.bf16.vlgmr.msra.gmra.mxu3 %v3218_v52  ;;  %v8766_v52 = vld [vmem:[#allocation64_spill] sm:$0xff]  ;;  %v8767_v9 = vld [vmem:[#allocation65_spill] sm:$0xff]  ;;  %v8768_v53 = vld [vmem:[#allocation66_spill] sm:$0xff] }
 0x746   :  { %3409 = vmatpush.bf16.msra.mxu0 %v5673_v58  ;;  %3422 = vmatpush.bf16.msra.mxu1 %v5684_v62  ;;  %v5246_v20 = vpop.eup %5245  ;;  %v8769_v37 = vld [vmem:[#allocation67_spill] sm:$0xff]  ;;  %v8771_v18 = vld [vmem:[#allocation70_spill] sm:$0xff] }
 0x747   :  { %v3181_v47 = vadd.f32 %v3180_v14, %v3179_v56  ;;  %3435 = vmatpush.bf16.msra.mxu2 %v5686_v63  ;;  %3448 = vmatpush.bf16.msra.mxu3 %v5697_v2  ;;  %v3177_v59 = vmul.f32 0.5, %v5246_v20  ;;  %v8772_v56 = vld [vmem:[#allocation74_spill] sm:$0xff]  ;;  %v8773_v14 = vld [vmem:[#allocation75_spill] sm:$0xff]  ;;  %v8774_v20 = vld [vmem:[#allocation76_spill] sm:$0xff] }
 0x749   :  { %5247 = vtanh.f32 %v3181_v47  ;;  %v7569_v60 = vsel %vm3201_vm6, %v3181_v47, %v7465_v33  ;;  %v3178_v6 = vadd.f32 0.5, %v3177_v59  ;;  %v8776_v47 = vld [vmem:[#allocation78_spill] sm:$0xff]  ;;  %v8777_v59 = vld [vmem:[#allocation79_spill] sm:$0xff] }
 0x74a   :  { %3410 = vmatpush.bf16.msra.mxu0 %v5716_v7  ;;  %3423 = vmatpush.bf16.msra.mxu1 %v5727_v11 }
 0x74b   :  { %3436 = vmatpush.bf16.msra.mxu2 %v5729_v12  ;;  %3449 = vmatpush.bf16.msra.mxu3 %v5740_v15 }
 0x74e   :  { %3411 = vmatpush.bf16.msra.mxu0 %v5763_v22  ;;  %3424 = vmatpush.bf16.msra.mxu1 %v5776_v27 }
 0x74f   :  { %v5248_v39 = vpop.eup %5247  ;;  %3437 = vmatpush.bf16.msra.mxu2 %v5778_v28  ;;  %3450 = vmatpush.bf16.msra.mxu3 %v5795_v34 }
 0x750   :  { %v3183_v33 = vmul.f32 %v5248_v39, %v3178_v6  ;;  %v8778_v6 = vld [vmem:[#allocation80_spill] sm:$0xff]  ;;  %v8779_v39 = vld [vmem:[#allocation82_spill] sm:$0xff] }
 0x752   :  { %v7581_v17 = vsel %vm3201_vm6, %v3183_v33, %v7477_v31  ;;  %v3208_v5 = vsel %vm3201_vm6, %v3183_v33, 0.0  ;;  %3412 = vmatpush.bf16.msra.mxu0 %v5822_v43  ;;  %3425 = vmatpush.bf16.msra.mxu1 %v5835_v48  ;;  %v8764_v31 = vld [vmem:[#allocation62_spill] sm:$0xff] }
 0x753   :  { %v3209_v35 = vpack.c.bf16 %v3208_v5, %v3208_v5  ;;  %v3281_v38 = vpack.c.bf16 %v7581_v17, %v7581_v17  ;;  %3438 = vmatpush.bf16.msra.mxu2 %v5837_v49  ;;  %3451 = vmatpush.bf16.msra.mxu3 %v5854_v55  ;;  %v8780_v33 = vld [vmem:[#allocation86_spill] sm:$0xff]  ;;  %v8781_v5 = vld [vmem:[#allocation87_spill] sm:$0xff] }
 0x755   :  { %3211 = vst [vmem:[#allocation9 + $0x18] sm:$0xf] %v3209_v35  ;;  %3290 = vmatmul.bf16.vlgmr.msrb.gmra.mxu0 %v3281_v38  ;;  %3303 = vmatmul.bf16.vlgmr.msrb.gmra.mxu1 %v3281_v38  ;;  %v8782_v35 = vld [vmem:[#allocation88_spill] sm:$0xff] }
 0x756   :  { %3316 = vmatmul.bf16.vlgmr.msrb.gmra.mxu2 %v3281_v38  ;;  %3329 = vmatmul.bf16.vlgmr.msrb.gmra.mxu3 %v3281_v38  ;;  %v8783_v38 = vld [vmem:[#allocation89_spill] sm:$0xff] }
 0x757   :  { %3413 = vmatpush.bf16.msra.mxu0 %v5881_v4  ;;  %3426 = vmatpush.bf16.msra.mxu1 %v5894_v10 }
 0x758   :  { %3439 = vmatpush.bf16.msra.mxu2 %v5896_v13  ;;  %3452 = vmatpush.bf16.msra.mxu3 %v5913_v23 }
 0x75b   :  { %3414 = vmatpush.bf16.msra.mxu0 %v5940_v44  ;;  %3427 = vmatpush.bf16.msra.mxu1 %v5953_v57 }
 0x75c   :  { %3440 = vmatpush.bf16.msra.mxu2 %v5955_v0  ;;  %3453 = vmatpush.bf16.msra.mxu3 %v5975_v21 }
 0x75f   :  { %3415 = vmatpush.bf16.msra.mxu0 %v6010_v25  ;;  %3428 = vmatpush.bf16.msra.mxu1 %v6023_v45 }
 0x760   :  { %3441 = vmatpush.bf16.msra.mxu2 %v6025_v41  ;;  %3454 = vmatpush.bf16.msra.mxu3 %v6045_v42 }
 0x763   :  { %3416 = vmatpush.bf16.msra.mxu0 %v6071_v1  ;;  %3429 = vmatpush.bf16.msra.mxu1 %v6081_v3 }
 0x764   :  { %3442 = vmatpush.bf16.msra.mxu2 %v6093_v36  ;;  %3455 = vmatpush.bf16.msra.mxu3 %v6100_v32 }
 0x767   :  { %3472 = vmatpush.bf16.msrb.mxu0 %v6102_v24  ;;  %3485 = vmatpush.bf16.msrb.mxu1 %v6107_v40 }
 0x768   :  { %3498 = vmatpush.bf16.msrb.mxu2 %v8432_v8  ;;  %3511 = vmatpush.bf16.msrb.mxu3 %v8433_v46 }
 0x76b   :  { %3473 = vmatpush.bf16.msrb.mxu0 %v8764_v31  ;;  %3486 = vmatpush.bf16.msrb.mxu1 %v8765_v30 }
 0x76c   :  { %3499 = vmatpush.bf16.msrb.mxu2 %v8766_v52  ;;  %3512 = vmatpush.bf16.msrb.mxu3 %v8767_v9  ;;  %v8797_v9 = vld [vmem:[#allocation56_spill] sm:$0xff] }
 0x76f   :  { %3474 = vmatpush.bf16.msrb.mxu0 %v8768_v53  ;;  %3487 = vmatpush.bf16.msrb.mxu1 %v8769_v37 }
 0x770   :  { %3500 = vmatpush.bf16.msrb.mxu2 %v8770_v26  ;;  %3513 = vmatpush.bf16.msrb.mxu3 %v8771_v18  ;;  %v8795_v18 = vld [vmem:[#allocation55_spill] sm:$0xff] }
 0x773   :  { %3475 = vmatpush.bf16.msrb.mxu0 %v8772_v56  ;;  %3488 = vmatpush.bf16.msrb.mxu1 %v8773_v14  ;;  %v8784_v14 = vld [vmem:[#allocation90_spill] sm:$0xff] }
 0x774   :  { %3501 = vmatpush.bf16.msrb.mxu2 %v8774_v20  ;;  %3514 = vmatpush.bf16.msrb.mxu3 %v8775_v61  ;;  %v8785_v20 = vld [vmem:[#allocation91_spill] sm:$0xff]  ;;  %v8786_v61 = vld [vmem:[#allocation92_spill] sm:$0xff] }
 0x777   :  { %3476 = vmatpush.bf16.msrb.mxu0 %v8776_v47  ;;  %3489 = vmatpush.bf16.msrb.mxu1 %v8777_v59  ;;  %v8787_v47 = vld [vmem:[#allocation94_spill] sm:$0xff] }
 0x778   :  { %3502 = vmatpush.bf16.msrb.mxu2 %v8778_v6  ;;  %3515 = vmatpush.bf16.msrb.mxu3 %v8779_v39  ;;  %v8788_v59 = vld [vmem:[#allocation98_spill] sm:$0xff]  ;;  %v8789_v6 = vld [vmem:[#allocation99_spill] sm:$0xff]  ;;  %v8790_v39 = vld [vmem:[#allocation100_spill] sm:$0xff] }
 0x77b   :  { %3477 = vmatpush.bf16.msrb.mxu0 %v8780_v33  ;;  %3490 = vmatpush.bf16.msrb.mxu1 %v8781_v5  ;;  %v8791_v33 = vld [vmem:[#allocation101_spill] sm:$0xff]  ;;  %v8792_v5 = vld [vmem:[#allocation168_spill] sm:$0xff] }
 0x77c   :  { %3503 = vmatpush.bf16.msrb.mxu2 %v8782_v35  ;;  %3516 = vmatpush.bf16.msrb.mxu3 %v8783_v38  ;;  %v8793_v35 = vld [vmem:[#allocation54_spill] sm:$0xff]  ;;  %v8794_v38 = vld [vmem:[#allocation169_spill] sm:$0xff] }
 0x77d   :  { %v284_v56 = vadd.f32 %v8793_v35, %v8792_v5 }
 0x77f   :  { %3478 = vmatpush.bf16.msrb.mxu0 %v8784_v14  ;;  %3491 = vmatpush.bf16.msrb.mxu1 %v8785_v20  ;;  %v333_v14 = vadd.f32 %v8795_v18, %v8794_v38 }
 0x780   :  { %3504 = vmatpush.bf16.msrb.mxu2 %v8786_v61  ;;  %3517 = vmatpush.bf16.msrb.mxu3 %v8787_v47 }
 0x783   :  { %3479 = vmatpush.bf16.msrb.mxu0 %v8788_v59  ;;  %3492 = vmatpush.bf16.msrb.mxu1 %v8789_v6  ;;  %v8796_v59 = vld [vmem:[#allocation14_spill] sm:$0xff] }
 0x784   :  { %3505 = vmatpush.bf16.msrb.mxu2 %v8790_v39  ;;  %3518 = vmatpush.bf16.msrb.mxu3 %v8791_v33  ;;  %v382_v6 = vadd.f32 %v8797_v9, %v8796_v59  ;;  %v8798_v39 = vld [vmem:[#allocation57_spill] sm:$0xff] }
 0x785   :  { %v431_v52 = vadd.f32 %v8798_v39, %v8551_v51 }
 0x7c1   :  { %v3228_v26 = vpop.f32.mrf.mxu0  ;;  %v3241_v20 = vpop.f32.mrf.mxu1 }
 0x7c2   :  { %v3271_v37 = vadd.f32 %v3228_v26, %v284_v56  ;;  %v3272_v61 = vadd.f32 %v3241_v20, %v333_v14 }
 0x7c4   :  { %v3338_v53 = vmul.f32 0.5, %v3271_v37  ;;  %v3342_v47 = vmul.f32 0.5, %v3272_v61 }
 0x7c6   :  { %5249 = vtanh.f32 %v3338_v53 }
 0x7c7   :  { %5251 = vtanh.f32 %v3342_v47  ;;  %v8799_v47 = vld [vmem:[#allocation128_spill] sm:$0xff] }
 0x7c8   :  { %v3254_v33 = vpop.f32.mrf.mxu2  ;;  %v3267_v30 = vpop.f32.mrf.mxu3  ;;  %v669_v39 = vadd.f32 %v8799_v47, %v8469_v19 }
 0x7c9   :  { %v3273_v35 = vadd.f32 %v3254_v33, %v382_v6  ;;  %v3274_v5 = vadd.f32 %v3267_v30, %v431_v52  ;;  %v3230_v31 = vpop.f32.mrf.mxu0  ;;  %v3243_v18 = vpop.f32.mrf.mxu1  ;;  %v8800_v6 = vld [vmem:[#allocation129_spill] sm:$0xff] }
 0x7ca   :  { %v718_v30 = vadd.f32 %v8800_v6, %v8512_v29  ;;  %v8801_v31 = vld [vmem:[#allocation167_spill] sm:$0xff] }
 0x7cb   :  { %5253 = vtanh.f32 %v3273_v35  ;;  %v3347_v38 = vmul.f32 0.5, %v3274_v5 }
 0x7cc   :  { %v5250_v26 = vpop.eup %5249 }
 0x7cd   :  { %v5252_v56 = vpop.eup %5251  ;;  %v3340_v37 = vmul.f32 0.5, %v5250_v26  ;;  %5255 = vtanh.f32 %v3347_v38  ;;  %v3383_v38 = vpop.permute.xlu2 %3382 }
 0x7ce   :  { %v3344_v14 = vmul.f32 0.5, %v5252_v56  ;;  %vm3384_vm7 = vcmp.eq.s32.totalorder %v3383_v38, 1 }
 0x7cf   :  { %v3341_v53 = vadd.f32 0.5, %v3340_v37 }
 0x7d0   :  { %v3345_v20 = vadd.f32 0.5, %v3344_v14  ;;  %v3256_v9 = vpop.f32.mrf.mxu2  ;;  %v3269_v61 = vpop.f32.mrf.mxu3 }
 0x7d1   :  { %v5254_v59 = vpop.eup %5253 }
 0x7d2   :  { %v3351_v52 = vmul.f32 %v3345_v20, %v8801_v31  ;;  %v3352_v33 = vmul.f32 %v5254_v59, %v3341_v53  ;;  %v3291_v5 = vpop.f32.mrf.mxu0  ;;  %v3304_v35 = vpop.f32.mrf.mxu1  ;;  %v8803_v20 = vld [vmem:[#allocation130_spill] sm:$0xff]  ;;  %v8804_v53 = vld [vmem:[#allocation131_spill] sm:$0xff] }
 0x7d3   :  { %v3334_v18 = vadd.f32 %v3291_v5, %v669_v39  ;;  %v3335_v26 = vadd.f32 %v3304_v35, %v718_v30  ;;  %v5256_v56 = vpop.eup %5255  ;;  %v767_v59 = vadd.f32 %v8803_v20, %v8473_v54  ;;  %v816_v39 = vadd.f32 %v8804_v53, %v8475_v16 }
 0x7d4   :  { %v3353_v37 = vadd.f32 %v3352_v33, %v3351_v52  ;;  %v3349_v47 = vmul.f32 0.5, %v5256_v56 }
 0x7d5   :  { %v3356_v14 = vmul.f32 0.5, %v3334_v18  ;;  %v3360_v9 = vmul.f32 0.5, %v3335_v26 }
 0x7d6   :  { %5257 = vtanh.f32 %v3353_v37  ;;  %v7653_v61 = vsel %vm3384_vm7, %v3353_v37, %v8801_v31  ;;  %v3350_v18 = vadd.f32 0.5, %v3349_v47 }
 0x7d7   :  { %8802 = vst [vmem:[#allocation59_spill] sm:$0xff] %v7653_v61  ;;  %5259 = vtanh.f32 %v3356_v14 }
 0x7d8   :  { %5261 = vtanh.f32 %v3360_v9 }
 0x7d9   :  { %v3317_v6 = vpop.f32.mrf.mxu2  ;;  %v3330_v30 = vpop.f32.mrf.mxu3 }
 0x7da   :  { %v3336_v52 = vadd.f32 %v3317_v6, %v767_v59  ;;  %v3337_v33 = vadd.f32 %v3330_v30, %v816_v39  ;;  %v3293_v5 = vpop.f32.mrf.mxu0  ;;  %v3306_v35 = vpop.f32.mrf.mxu1 }
 0x7db   :  { %v3390_v35 = vpop.permute.xlu0 %3389 }
 0x7dc   :  { %v5258_v26 = vpop.eup %5257  ;;  %5263 = vtanh.f32 %v3336_v52  ;;  %v3365_v31 = vmul.f32 0.5, %v3337_v33  ;;  %vm3391_vm8 = vcmp.eq.s32.totalorder %v3390_v35, 1  ;;  %v8816_v35 = vld [vmem:[#allocation77_spill] sm:$0xff] }
 0x7dd   :  { %v5260_v37 = vpop.eup %5259  ;;  %v3355_v56 = vmul.f32 %v5258_v26, %v3350_v18 }
 0x7de   :  { %v5262_v14 = vpop.eup %5261  ;;  %v3358_v61 = vmul.f32 0.5, %v5260_v37  ;;  %5265 = vtanh.f32 %v3365_v31 }
 0x7df   :  { %v7661_v20 = vsel %vm3384_vm7, %v3355_v56, %v7557_v50  ;;  %v3394_v9 = vsel %vm3384_vm7, %v3355_v56, 0.0  ;;  %v3362_v53 = vmul.f32 0.5, %v5262_v14 }
 0x7e0   :  { %v3395_v59 = vpack.c.bf16 %v3394_v9, %v3394_v9  ;;  %v3408_v39 = vpack.c.bf16 %v7661_v20, %v7661_v20  ;;  %v3359_v47 = vadd.f32 0.5, %v3358_v61 }
 0x7e1   :  { %v3363_v6 = vadd.f32 0.5, %v3362_v53  ;;  %v3319_v30 = vpop.f32.mrf.mxu2  ;;  %v3332_v52 = vpop.f32.mrf.mxu3 }
 0x7e2   :  { %v5264_v33 = vpop.eup %5263  ;;  %3397 = vst [vmem:[#allocation8 + $0x28] sm:$0xf] %v3395_v59  ;;  %3417 = vmatmul.bf16.vlgmr.msra.gmra.mxu0 %v3408_v39  ;;  %3430 = vmatmul.bf16.vlgmr.msra.gmra.mxu1 %v3408_v39  ;;  %v8806_v59 = vld [vmem:[#allocation63_spill] sm:$0xff]  ;;  %v8811_v52 = vld [vmem:[#allocation68_spill] sm:$0xff] }
 0x7e3   :  { %v3369_v5 = vmul.f32 %v3363_v6, %v7569_v60  ;;  %v3370_v50 = vmul.f32 %v5264_v33, %v3359_v47  ;;  %3443 = vmatmul.bf16.vlgmr.msra.gmra.mxu2 %v3408_v39  ;;  %3456 = vmatmul.bf16.vlgmr.msra.gmra.mxu3 %v3408_v39  ;;  %v8807_v39 = vld [vmem:[#allocation64_spill] sm:$0xff]  ;;  %v8808_v47 = vld [vmem:[#allocation65_spill] sm:$0xff]  ;;  %v8809_v6 = vld [vmem:[#allocation66_spill] sm:$0xff] }
 0x7e4   :  { %3599 = vmatpush.bf16.msra.mxu0 %v5673_v58  ;;  %3612 = vmatpush.bf16.msra.mxu1 %v5684_v62  ;;  %v5266_v38 = vpop.eup %5265  ;;  %v8810_v30 = vld [vmem:[#allocation67_spill] sm:$0xff]  ;;  %v8812_v33 = vld [vmem:[#allocation70_spill] sm:$0xff] }
 0x7e5   :  { %v3371_v18 = vadd.f32 %v3370_v50, %v3369_v5  ;;  %3625 = vmatpush.bf16.msra.mxu2 %v5686_v63  ;;  %3638 = vmatpush.bf16.msra.mxu3 %v5697_v2  ;;  %v3367_v26 = vmul.f32 0.5, %v5266_v38  ;;  %v8813_v5 = vld [vmem:[#allocation74_spill] sm:$0xff]  ;;  %v8814_v50 = vld [vmem:[#allocation75_spill] sm:$0xff]  ;;  %v8815_v38 = vld [vmem:[#allocation76_spill] sm:$0xff] }
 0x7e7   :  { %5267 = vtanh.f32 %v3371_v18  ;;  %v7673_v61 = vsel %vm3391_vm8, %v3371_v18, %v7569_v60  ;;  %v3368_v31 = vadd.f32 0.5, %v3367_v26  ;;  %v8817_v18 = vld [vmem:[#allocation78_spill] sm:$0xff]  ;;  %v8818_v26 = vld [vmem:[#allocation79_spill] sm:$0xff] }
 0x7e8   :  { %3600 = vmatpush.bf16.msra.mxu0 %v5716_v7  ;;  %3613 = vmatpush.bf16.msra.mxu1 %v5727_v11 }
 0x7e9   :  { %3626 = vmatpush.bf16.msra.mxu2 %v5729_v12  ;;  %3639 = vmatpush.bf16.msra.mxu3 %v5740_v15 }
 0x7ec   :  { %3601 = vmatpush.bf16.msra.mxu0 %v5763_v22  ;;  %3614 = vmatpush.bf16.msra.mxu1 %v5776_v27 }
 0x7ed   :  { %v5268_v37 = vpop.eup %5267  ;;  %3627 = vmatpush.bf16.msra.mxu2 %v5778_v28  ;;  %3640 = vmatpush.bf16.msra.mxu3 %v5795_v34 }
 0x7ee   :  { %v3373_v60 = vmul.f32 %v5268_v37, %v3368_v31  ;;  %v8819_v31 = vld [vmem:[#allocation80_spill] sm:$0xff]  ;;  %v8820_v37 = vld [vmem:[#allocation82_spill] sm:$0xff] }
 0x7f0   :  { %v7685_v56 = vsel %vm3391_vm8, %v3373_v60, %v7581_v17  ;;  %v3398_v14 = vsel %vm3391_vm8, %v3373_v60, 0.0  ;;  %3602 = vmatpush.bf16.msra.mxu0 %v5822_v43  ;;  %3615 = vmatpush.bf16.msra.mxu1 %v5835_v48  ;;  %v8805_v17 = vld [vmem:[#allocation62_spill] sm:$0xff] }
 0x7f1   :  { %v3399_v9 = vpack.c.bf16 %v3398_v14, %v3398_v14  ;;  %v3471_v53 = vpack.c.bf16 %v7685_v56, %v7685_v56  ;;  %3628 = vmatpush.bf16.msra.mxu2 %v5837_v49  ;;  %3641 = vmatpush.bf16.msra.mxu3 %v5854_v55  ;;  %v8821_v60 = vld [vmem:[#allocation86_spill] sm:$0xff]  ;;  %v8822_v14 = vld [vmem:[#allocation87_spill] sm:$0xff] }
 0x7f3   :  { %3401 = vst [vmem:[#allocation9 + $0x14] sm:$0xf] %v3399_v9  ;;  %3480 = vmatmul.bf16.vlgmr.msrb.gmra.mxu0 %v3471_v53  ;;  %3493 = vmatmul.bf16.vlgmr.msrb.gmra.mxu1 %v3471_v53  ;;  %v8823_v9 = vld [vmem:[#allocation88_spill] sm:$0xff] }
 0x7f4   :  { %3506 = vmatmul.bf16.vlgmr.msrb.gmra.mxu2 %v3471_v53  ;;  %3519 = vmatmul.bf16.vlgmr.msrb.gmra.mxu3 %v3471_v53  ;;  %v8824_v53 = vld [vmem:[#allocation89_spill] sm:$0xff] }
 0x7f5   :  { %3603 = vmatpush.bf16.msra.mxu0 %v5881_v4  ;;  %3616 = vmatpush.bf16.msra.mxu1 %v5894_v10 }
 0x7f6   :  { %3629 = vmatpush.bf16.msra.mxu2 %v5896_v13  ;;  %3642 = vmatpush.bf16.msra.mxu3 %v5913_v23 }
 0x7f9   :  { %3604 = vmatpush.bf16.msra.mxu0 %v5940_v44  ;;  %3617 = vmatpush.bf16.msra.mxu1 %v5953_v57 }
 0x7fa   :  { %3630 = vmatpush.bf16.msra.mxu2 %v5955_v0  ;;  %3643 = vmatpush.bf16.msra.mxu3 %v5975_v21 }
 0x7fd   :  { %3605 = vmatpush.bf16.msra.mxu0 %v6010_v25  ;;  %3618 = vmatpush.bf16.msra.mxu1 %v6023_v45 }
 0x7fe   :  { %3631 = vmatpush.bf16.msra.mxu2 %v6025_v41  ;;  %3644 = vmatpush.bf16.msra.mxu3 %v6045_v42 }
 0x801   :  { %3606 = vmatpush.bf16.msra.mxu0 %v6071_v1  ;;  %3619 = vmatpush.bf16.msra.mxu1 %v6081_v3 }
 0x802   :  { %3632 = vmatpush.bf16.msra.mxu2 %v6093_v36  ;;  %3645 = vmatpush.bf16.msra.mxu3 %v6100_v32 }
 0x805   :  { %3662 = vmatpush.bf16.msrb.mxu0 %v6102_v24  ;;  %3675 = vmatpush.bf16.msrb.mxu1 %v6107_v40 }
 0x806   :  { %3688 = vmatpush.bf16.msrb.mxu2 %v8432_v8  ;;  %3701 = vmatpush.bf16.msrb.mxu3 %v8433_v46 }
 0x809   :  { %3663 = vmatpush.bf16.msrb.mxu0 %v8805_v17  ;;  %3676 = vmatpush.bf16.msrb.mxu1 %v8806_v59 }
 0x80a   :  { %3689 = vmatpush.bf16.msrb.mxu2 %v8807_v39  ;;  %3702 = vmatpush.bf16.msrb.mxu3 %v8808_v47  ;;  %v8838_v47 = vld [vmem:[#allocation69_spill] sm:$0xff] }
 0x80d   :  { %3664 = vmatpush.bf16.msrb.mxu0 %v8809_v6  ;;  %3677 = vmatpush.bf16.msrb.mxu1 %v8810_v30 }
 0x80e   :  { %3690 = vmatpush.bf16.msrb.mxu2 %v8811_v52  ;;  %3703 = vmatpush.bf16.msrb.mxu3 %v8812_v33  ;;  %v8836_v33 = vld [vmem:[#allocation61_spill] sm:$0xff] }
 0x811   :  { %3665 = vmatpush.bf16.msrb.mxu0 %v8813_v5  ;;  %3678 = vmatpush.bf16.msrb.mxu1 %v8814_v50  ;;  %v8825_v50 = vld [vmem:[#allocation90_spill] sm:$0xff] }
 0x812   :  { %3691 = vmatpush.bf16.msrb.mxu2 %v8815_v38  ;;  %3704 = vmatpush.bf16.msrb.mxu3 %v8816_v35  ;;  %v8826_v38 = vld [vmem:[#allocation91_spill] sm:$0xff]  ;;  %v8827_v35 = vld [vmem:[#allocation92_spill] sm:$0xff] }
 0x815   :  { %3666 = vmatpush.bf16.msrb.mxu0 %v8817_v18  ;;  %3679 = vmatpush.bf16.msrb.mxu1 %v8818_v26  ;;  %v8828_v18 = vld [vmem:[#allocation94_spill] sm:$0xff] }
 0x816   :  { %3692 = vmatpush.bf16.msrb.mxu2 %v8819_v31  ;;  %3705 = vmatpush.bf16.msrb.mxu3 %v8820_v37  ;;  %v8829_v26 = vld [vmem:[#allocation98_spill] sm:$0xff]  ;;  %v8830_v31 = vld [vmem:[#allocation99_spill] sm:$0xff]  ;;  %v8831_v37 = vld [vmem:[#allocation100_spill] sm:$0xff] }
 0x819   :  { %3667 = vmatpush.bf16.msrb.mxu0 %v8821_v60  ;;  %3680 = vmatpush.bf16.msrb.mxu1 %v8822_v14  ;;  %v8832_v60 = vld [vmem:[#allocation101_spill] sm:$0xff]  ;;  %v8833_v14 = vld [vmem:[#allocation168_spill] sm:$0xff] }
 0x81a   :  { %3693 = vmatpush.bf16.msrb.mxu2 %v8823_v9  ;;  %3706 = vmatpush.bf16.msrb.mxu3 %v8824_v53  ;;  %v8834_v9 = vld [vmem:[#allocation58_spill] sm:$0xff]  ;;  %v8835_v53 = vld [vmem:[#allocation169_spill] sm:$0xff] }
 0x81b   :  { %v286_v5 = vadd.f32 %v8834_v9, %v8833_v14 }
 0x81d   :  { %3668 = vmatpush.bf16.msrb.mxu0 %v8825_v50  ;;  %3681 = vmatpush.bf16.msrb.mxu1 %v8826_v38  ;;  %v335_v50 = vadd.f32 %v8836_v33, %v8835_v53 }
 0x81e   :  { %3694 = vmatpush.bf16.msrb.mxu2 %v8827_v35  ;;  %3707 = vmatpush.bf16.msrb.mxu3 %v8828_v18 }
 0x821   :  { %3669 = vmatpush.bf16.msrb.mxu0 %v8829_v26  ;;  %3682 = vmatpush.bf16.msrb.mxu1 %v8830_v31  ;;  %v8837_v26 = vld [vmem:[#allocation14_spill] sm:$0xff] }
 0x822   :  { %3695 = vmatpush.bf16.msrb.mxu2 %v8831_v37  ;;  %3708 = vmatpush.bf16.msrb.mxu3 %v8832_v60  ;;  %v384_v31 = vadd.f32 %v8838_v47, %v8837_v26  ;;  %v8839_v37 = vld [vmem:[#allocation71_spill] sm:$0xff] }
 0x823   :  { %v433_v39 = vadd.f32 %v8839_v37, %v8551_v51 }
 0x85f   :  { %v3418_v52 = vpop.f32.mrf.mxu0  ;;  %v3431_v38 = vpop.f32.mrf.mxu1 }
 0x860   :  { %v3461_v30 = vadd.f32 %v3418_v52, %v286_v5  ;;  %v3462_v35 = vadd.f32 %v3431_v38, %v335_v50 }
 0x862   :  { %v3528_v6 = vmul.f32 0.5, %v3461_v30  ;;  %v3532_v18 = vmul.f32 0.5, %v3462_v35 }
 0x864   :  { %5269 = vtanh.f32 %v3528_v6 }
 0x865   :  { %5271 = vtanh.f32 %v3532_v18  ;;  %v8840_v18 = vld [vmem:[#allocation124_spill] sm:$0xff] }
 0x866   :  { %v3444_v60 = vpop.f32.mrf.mxu2  ;;  %v3457_v59 = vpop.f32.mrf.mxu3  ;;  %v667_v37 = vadd.f32 %v8840_v18, %v8469_v19 }
 0x867   :  { %v3463_v9 = vadd.f32 %v3444_v60, %v384_v31  ;;  %v3464_v14 = vadd.f32 %v3457_v59, %v433_v39  ;;  %v3420_v17 = vpop.f32.mrf.mxu0  ;;  %v3433_v33 = vpop.f32.mrf.mxu1  ;;  %v8841_v31 = vld [vmem:[#allocation125_spill] sm:$0xff] }
 0x868   :  { %v716_v59 = vadd.f32 %v8841_v31, %v8512_v29  ;;  %v8842_v17 = vld [vmem:[#allocation59_spill] sm:$0xff] }
 0x869   :  { %5273 = vtanh.f32 %v3463_v9  ;;  %v3537_v53 = vmul.f32 0.5, %v3464_v14 }
 0x86a   :  { %v5270_v52 = vpop.eup %5269 }
 0x86b   :  { %v5272_v5 = vpop.eup %5271  ;;  %v3530_v30 = vmul.f32 0.5, %v5270_v52  ;;  %5275 = vtanh.f32 %v3537_v53  ;;  %v3573_v53 = vpop.permute.xlu1 %3572 }
 0x86c   :  { %v3534_v50 = vmul.f32 0.5, %v5272_v5  ;;  %vm3574_vm9 = vcmp.eq.s32.totalorder %v3573_v53, 1 }
 0x86d   :  { %v3531_v6 = vadd.f32 0.5, %v3530_v30 }
 0x86e   :  { %v3535_v38 = vadd.f32 0.5, %v3534_v50  ;;  %v3446_v47 = vpop.f32.mrf.mxu2  ;;  %v3459_v35 = vpop.f32.mrf.mxu3 }
 0x86f   :  { %v5274_v26 = vpop.eup %5273 }
 0x870   :  { %v3541_v39 = vmul.f32 %v3535_v38, %v8842_v17  ;;  %v3542_v60 = vmul.f32 %v5274_v26, %v3531_v6  ;;  %v3481_v14 = vpop.f32.mrf.mxu0  ;;  %v3494_v9 = vpop.f32.mrf.mxu1  ;;  %v8844_v38 = vld [vmem:[#allocation126_spill] sm:$0xff]  ;;  %v8845_v6 = vld [vmem:[#allocation127_spill] sm:$0xff] }
 0x871   :  { %v3524_v33 = vadd.f32 %v3481_v14, %v667_v37  ;;  %v3525_v52 = vadd.f32 %v3494_v9, %v716_v59  ;;  %v5276_v5 = vpop.eup %5275  ;;  %v765_v26 = vadd.f32 %v8844_v38, %v8473_v54  ;;  %v814_v37 = vadd.f32 %v8845_v6, %v8475_v16 }
 0x872   :  { %v3543_v30 = vadd.f32 %v3542_v60, %v3541_v39  ;;  %v3539_v18 = vmul.f32 0.5, %v5276_v5 }
 0x873   :  { %v3546_v50 = vmul.f32 0.5, %v3524_v33  ;;  %v3550_v47 = vmul.f32 0.5, %v3525_v52 }
 0x874   :  { %5277 = vtanh.f32 %v3543_v30  ;;  %v7757_v35 = vsel %vm3574_vm9, %v3543_v30, %v8842_v17  ;;  %v3540_v33 = vadd.f32 0.5, %v3539_v18 }
 0x875   :  { %8843 = vst [vmem:[#allocation60_spill] sm:$0xff] %v7757_v35  ;;  %5279 = vtanh.f32 %v3546_v50 }
 0x876   :  { %5281 = vtanh.f32 %v3550_v47 }
 0x877   :  { %v3507_v31 = vpop.f32.mrf.mxu2  ;;  %v3520_v59 = vpop.f32.mrf.mxu3 }
 0x878   :  { %v3526_v39 = vadd.f32 %v3507_v31, %v765_v26  ;;  %v3527_v60 = vadd.f32 %v3520_v59, %v814_v37  ;;  %v3483_v14 = vpop.f32.mrf.mxu0  ;;  %v3496_v9 = vpop.f32.mrf.mxu1 }
 0x879   :  { %v3580_v9 = vpop.permute.xlu2 %3579 }
 0x87a   :  { %v5278_v52 = vpop.eup %5277  ;;  %5283 = vtanh.f32 %v3526_v39  ;;  %v3555_v17 = vmul.f32 0.5, %v3527_v60  ;;  %vm3581_vm10 = vcmp.eq.s32.totalorder %v3580_v9, 1  ;;  %v8857_v9 = vld [vmem:[#allocation77_spill] sm:$0xff] }
 0x87b   :  { %v5280_v30 = vpop.eup %5279  ;;  %v3545_v5 = vmul.f32 %v5278_v52, %v3540_v33 }
 0x87c   :  { %v5282_v50 = vpop.eup %5281  ;;  %v3548_v35 = vmul.f32 0.5, %v5280_v30  ;;  %5285 = vtanh.f32 %v3555_v17 }
 0x87d   :  { %v7765_v38 = vsel %vm3574_vm9, %v3545_v5, %v7661_v20  ;;  %v3584_v47 = vsel %vm3574_vm9, %v3545_v5, 0.0  ;;  %v3552_v6 = vmul.f32 0.5, %v5282_v50 }
 0x87e   :  { %v3585_v26 = vpack.c.bf16 %v3584_v47, %v3584_v47  ;;  %v3598_v37 = vpack.c.bf16 %v7765_v38, %v7765_v38  ;;  %v3549_v18 = vadd.f32 0.5, %v3548_v35 }
 0x87f   :  { %v3553_v31 = vadd.f32 0.5, %v3552_v6  ;;  %v3509_v59 = vpop.f32.mrf.mxu2  ;;  %v3522_v39 = vpop.f32.mrf.mxu3 }
 0x880   :  { %v5284_v60 = vpop.eup %5283  ;;  %3587 = vst [vmem:[#allocation8 + $0x2c] sm:$0xf] %v3585_v26  ;;  %3607 = vmatmul.bf16.vlgmr.msra.gmra.mxu0 %v3598_v37  ;;  %3620 = vmatmul.bf16.vlgmr.msra.gmra.mxu1 %v3598_v37  ;;  %v8847_v26 = vld [vmem:[#allocation63_spill] sm:$0xff]  ;;  %v8852_v39 = vld [vmem:[#allocation68_spill] sm:$0xff] }
 0x881   :  { %v3559_v14 = vmul.f32 %v3553_v31, %v7673_v61  ;;  %v3560_v20 = vmul.f32 %v5284_v60, %v3549_v18  ;;  %3633 = vmatmul.bf16.vlgmr.msra.gmra.mxu2 %v3598_v37  ;;  %3646 = vmatmul.bf16.vlgmr.msra.gmra.mxu3 %v3598_v37  ;;  %v8848_v37 = vld [vmem:[#allocation64_spill] sm:$0xff]  ;;  %v8849_v18 = vld [vmem:[#allocation65_spill] sm:$0xff]  ;;  %v8850_v31 = vld [vmem:[#allocation66_spill] sm:$0xff] }
 0x882   :  { %3789 = vmatpush.bf16.msra.mxu0 %v5673_v58  ;;  %3802 = vmatpush.bf16.msra.mxu1 %v5684_v62  ;;  %v5286_v53 = vpop.eup %5285  ;;  %v8851_v59 = vld [vmem:[#allocation67_spill] sm:$0xff]  ;;  %v8853_v60 = vld [vmem:[#allocation70_spill] sm:$0xff] }
 0x883   :  { %v3561_v33 = vadd.f32 %v3560_v20, %v3559_v14  ;;  %3815 = vmatpush.bf16.msra.mxu2 %v5686_v63  ;;  %3828 = vmatpush.bf16.msra.mxu3 %v5697_v2  ;;  %v3557_v52 = vmul.f32 0.5, %v5286_v53  ;;  %v8854_v14 = vld [vmem:[#allocation74_spill] sm:$0xff]  ;;  %v8855_v20 = vld [vmem:[#allocation75_spill] sm:$0xff]  ;;  %v8856_v53 = vld [vmem:[#allocation76_spill] sm:$0xff] }
 0x885   :  { %5287 = vtanh.f32 %v3561_v33  ;;  %v7777_v35 = vsel %vm3581_vm10, %v3561_v33, %v7673_v61  ;;  %v3558_v17 = vadd.f32 0.5, %v3557_v52  ;;  %v8858_v33 = vld [vmem:[#allocation78_spill] sm:$0xff]  ;;  %v8859_v52 = vld [vmem:[#allocation79_spill] sm:$0xff] }
 0x886   :  { %3790 = vmatpush.bf16.msra.mxu0 %v5716_v7  ;;  %3803 = vmatpush.bf16.msra.mxu1 %v5727_v11 }
 0x887   :  { %3816 = vmatpush.bf16.msra.mxu2 %v5729_v12  ;;  %3829 = vmatpush.bf16.msra.mxu3 %v5740_v15 }
 0x88a   :  { %3791 = vmatpush.bf16.msra.mxu0 %v5763_v22  ;;  %3804 = vmatpush.bf16.msra.mxu1 %v5776_v27 }
 0x88b   :  { %v5288_v30 = vpop.eup %5287  ;;  %3817 = vmatpush.bf16.msra.mxu2 %v5778_v28  ;;  %3830 = vmatpush.bf16.msra.mxu3 %v5795_v34 }
 0x88c   :  { %v3563_v61 = vmul.f32 %v5288_v30, %v3558_v17  ;;  %v8860_v17 = vld [vmem:[#allocation80_spill] sm:$0xff]  ;;  %v8861_v30 = vld [vmem:[#allocation82_spill] sm:$0xff] }
 0x88e   :  { %v7789_v5 = vsel %vm3581_vm10, %v3563_v61, %v7685_v56  ;;  %v3588_v50 = vsel %vm3581_vm10, %v3563_v61, 0.0  ;;  %3792 = vmatpush.bf16.msra.mxu0 %v5822_v43  ;;  %3805 = vmatpush.bf16.msra.mxu1 %v5835_v48  ;;  %v8846_v56 = vld [vmem:[#allocation62_spill] sm:$0xff] }
 0x88f   :  { %v3589_v47 = vpack.c.bf16 %v3588_v50, %v3588_v50  ;;  %v3661_v6 = vpack.c.bf16 %v7789_v5, %v7789_v5  ;;  %3818 = vmatpush.bf16.msra.mxu2 %v5837_v49  ;;  %3831 = vmatpush.bf16.msra.mxu3 %v5854_v55  ;;  %v8862_v61 = vld [vmem:[#allocation86_spill] sm:$0xff]  ;;  %v8863_v50 = vld [vmem:[#allocation87_spill] sm:$0xff] }
 0x891   :  { %3591 = vst [vmem:[#allocation9 + $0x10] sm:$0xf] %v3589_v47  ;;  %3670 = vmatmul.bf16.vlgmr.msrb.gmra.mxu0 %v3661_v6  ;;  %3683 = vmatmul.bf16.vlgmr.msrb.gmra.mxu1 %v3661_v6  ;;  %v8864_v47 = vld [vmem:[#allocation88_spill] sm:$0xff] }
 0x892   :  { %3696 = vmatmul.bf16.vlgmr.msrb.gmra.mxu2 %v3661_v6  ;;  %3709 = vmatmul.bf16.vlgmr.msrb.gmra.mxu3 %v3661_v6  ;;  %v8865_v6 = vld [vmem:[#allocation89_spill] sm:$0xff] }
 0x893   :  { %3793 = vmatpush.bf16.msra.mxu0 %v5881_v4  ;;  %3806 = vmatpush.bf16.msra.mxu1 %v5894_v10 }
 0x894   :  { %3819 = vmatpush.bf16.msra.mxu2 %v5896_v13  ;;  %3832 = vmatpush.bf16.msra.mxu3 %v5913_v23 }
 0x897   :  { %3794 = vmatpush.bf16.msra.mxu0 %v5940_v44  ;;  %3807 = vmatpush.bf16.msra.mxu1 %v5953_v57 }
 0x898   :  { %3820 = vmatpush.bf16.msra.mxu2 %v5955_v0  ;;  %3833 = vmatpush.bf16.msra.mxu3 %v5975_v21 }
 0x89b   :  { %3795 = vmatpush.bf16.msra.mxu0 %v6010_v25  ;;  %3808 = vmatpush.bf16.msra.mxu1 %v6023_v45 }
 0x89c   :  { %3821 = vmatpush.bf16.msra.mxu2 %v6025_v41  ;;  %3834 = vmatpush.bf16.msra.mxu3 %v6045_v42 }
 0x89f   :  { %3796 = vmatpush.bf16.msra.mxu0 %v6071_v1  ;;  %3809 = vmatpush.bf16.msra.mxu1 %v6081_v3 }
 0x8a0   :  { %3822 = vmatpush.bf16.msra.mxu2 %v6093_v36  ;;  %3835 = vmatpush.bf16.msra.mxu3 %v6100_v32 }
 0x8a3   :  { %3852 = vmatpush.bf16.msrb.mxu0 %v6102_v24  ;;  %3865 = vmatpush.bf16.msrb.mxu1 %v6107_v40 }
 0x8a4   :  { %3878 = vmatpush.bf16.msrb.mxu2 %v8432_v8  ;;  %3891 = vmatpush.bf16.msrb.mxu3 %v8433_v46 }
 0x8a7   :  { %3853 = vmatpush.bf16.msrb.mxu0 %v8846_v56  ;;  %3866 = vmatpush.bf16.msrb.mxu1 %v8847_v26 }
 0x8a8   :  { %3879 = vmatpush.bf16.msrb.mxu2 %v8848_v37  ;;  %3892 = vmatpush.bf16.msrb.mxu3 %v8849_v18  ;;  %v8879_v18 = vld [vmem:[#allocation81_spill] sm:$0xff] }
 0x8ab   :  { %3854 = vmatpush.bf16.msrb.mxu0 %v8850_v31  ;;  %3867 = vmatpush.bf16.msrb.mxu1 %v8851_v59 }
 0x8ac   :  { %3880 = vmatpush.bf16.msrb.mxu2 %v8852_v39  ;;  %3893 = vmatpush.bf16.msrb.mxu3 %v8853_v60  ;;  %v8877_v60 = vld [vmem:[#allocation73_spill] sm:$0xff] }
 0x8af   :  { %3855 = vmatpush.bf16.msrb.mxu0 %v8854_v14  ;;  %3868 = vmatpush.bf16.msrb.mxu1 %v8855_v20  ;;  %v8866_v20 = vld [vmem:[#allocation90_spill] sm:$0xff] }
 0x8b0   :  { %3881 = vmatpush.bf16.msrb.mxu2 %v8856_v53  ;;  %3894 = vmatpush.bf16.msrb.mxu3 %v8857_v9  ;;  %v8867_v53 = vld [vmem:[#allocation91_spill] sm:$0xff]  ;;  %v8868_v9 = vld [vmem:[#allocation92_spill] sm:$0xff] }
 0x8b3   :  { %3856 = vmatpush.bf16.msrb.mxu0 %v8858_v33  ;;  %3869 = vmatpush.bf16.msrb.mxu1 %v8859_v52  ;;  %v8869_v33 = vld [vmem:[#allocation94_spill] sm:$0xff] }
 0x8b4   :  { %3882 = vmatpush.bf16.msrb.mxu2 %v8860_v17  ;;  %3895 = vmatpush.bf16.msrb.mxu3 %v8861_v30  ;;  %v8870_v52 = vld [vmem:[#allocation98_spill] sm:$0xff]  ;;  %v8871_v17 = vld [vmem:[#allocation99_spill] sm:$0xff]  ;;  %v8872_v30 = vld [vmem:[#allocation100_spill] sm:$0xff] }
 0x8b7   :  { %3857 = vmatpush.bf16.msrb.mxu0 %v8862_v61  ;;  %3870 = vmatpush.bf16.msrb.mxu1 %v8863_v50  ;;  %v8873_v61 = vld [vmem:[#allocation101_spill] sm:$0xff]  ;;  %v8874_v50 = vld [vmem:[#allocation168_spill] sm:$0xff] }
 0x8b8   :  { %3883 = vmatpush.bf16.msrb.mxu2 %v8864_v47  ;;  %3896 = vmatpush.bf16.msrb.mxu3 %v8865_v6  ;;  %v8875_v47 = vld [vmem:[#allocation72_spill] sm:$0xff]  ;;  %v8876_v6 = vld [vmem:[#allocation169_spill] sm:$0xff] }
 0x8b9   :  { %v289_v14 = vadd.f32 %v8875_v47, %v8874_v50 }
 0x8bb   :  { %3858 = vmatpush.bf16.msrb.mxu0 %v8866_v20  ;;  %3871 = vmatpush.bf16.msrb.mxu1 %v8867_v53  ;;  %v338_v20 = vadd.f32 %v8877_v60, %v8876_v6 }
 0x8bc   :  { %3884 = vmatpush.bf16.msrb.mxu2 %v8868_v9  ;;  %3897 = vmatpush.bf16.msrb.mxu3 %v8869_v33 }
 0x8bf   :  { %3859 = vmatpush.bf16.msrb.mxu0 %v8870_v52  ;;  %3872 = vmatpush.bf16.msrb.mxu1 %v8871_v17  ;;  %v8878_v52 = vld [vmem:[#allocation14_spill] sm:$0xff] }
 0x8c0   :  { %3885 = vmatpush.bf16.msrb.mxu2 %v8872_v30  ;;  %3898 = vmatpush.bf16.msrb.mxu3 %v8873_v61  ;;  %v387_v17 = vadd.f32 %v8879_v18, %v8878_v52  ;;  %v8880_v30 = vld [vmem:[#allocation83_spill] sm:$0xff] }
 0x8c1   :  { %v436_v37 = vadd.f32 %v8880_v30, %v8551_v51 }
 0x8fd   :  { %v3608_v39 = vpop.f32.mrf.mxu0  ;;  %v3621_v53 = vpop.f32.mrf.mxu1 }
 0x8fe   :  { %v3651_v59 = vadd.f32 %v3608_v39, %v289_v14  ;;  %v3652_v9 = vadd.f32 %v3621_v53, %v338_v20 }
 0x900   :  { %v3718_v31 = vmul.f32 0.5, %v3651_v59  ;;  %v3722_v33 = vmul.f32 0.5, %v3652_v9 }
 0x902   :  { %5289 = vtanh.f32 %v3718_v31 }
 0x903   :  { %5291 = vtanh.f32 %v3722_v33  ;;  %v8881_v33 = vld [vmem:[#allocation120_spill] sm:$0xff] }
 0x904   :  { %v3634_v61 = vpop.f32.mrf.mxu2  ;;  %v3647_v26 = vpop.f32.mrf.mxu3  ;;  %v664_v30 = vadd.f32 %v8881_v33, %v8469_v19 }
 0x905   :  { %v3653_v47 = vadd.f32 %v3634_v61, %v387_v17  ;;  %v3654_v50 = vadd.f32 %v3647_v26, %v436_v37  ;;  %v3610_v56 = vpop.f32.mrf.mxu0  ;;  %v3623_v60 = vpop.f32.mrf.mxu1  ;;  %v8882_v17 = vld [vmem:[#allocation121_spill] sm:$0xff] }
 0x906   :  { %v713_v26 = vadd.f32 %v8882_v17, %v8512_v29  ;;  %v8883_v56 = vld [vmem:[#allocation60_spill] sm:$0xff] }
 0x907   :  { %5293 = vtanh.f32 %v3653_v47  ;;  %v3727_v6 = vmul.f32 0.5, %v3654_v50 }
 0x908   :  { %v5290_v39 = vpop.eup %5289 }
 0x909   :  { %v5292_v14 = vpop.eup %5291  ;;  %v3720_v59 = vmul.f32 0.5, %v5290_v39  ;;  %5295 = vtanh.f32 %v3727_v6  ;;  %v3763_v6 = vpop.permute.xlu0 %3762 }
 0x90a   :  { %v3724_v20 = vmul.f32 0.5, %v5292_v14  ;;  %vm3764_vm11 = vcmp.eq.s32.totalorder %v3763_v6, 1 }
 0x90b   :  { %v3721_v31 = vadd.f32 0.5, %v3720_v59 }
 0x90c   :  { %v3725_v53 = vadd.f32 0.5, %v3724_v20  ;;  %v3636_v18 = vpop.f32.mrf.mxu2  ;;  %v3649_v9 = vpop.f32.mrf.mxu3 }
 0x90d   :  { %v5294_v52 = vpop.eup %5293 }
 0x90e   :  { %v3731_v37 = vmul.f32 %v3725_v53, %v8883_v56  ;;  %v3732_v61 = vmul.f32 %v5294_v52, %v3721_v31  ;;  %v3671_v50 = vpop.f32.mrf.mxu0  ;;  %v3684_v47 = vpop.f32.mrf.mxu1  ;;  %v8885_v53 = vld [vmem:[#allocation122_spill] sm:$0xff]  ;;  %v8886_v31 = vld [vmem:[#allocation123_spill] sm:$0xff] }
 0x90f   :  { %v3714_v60 = vadd.f32 %v3671_v50, %v664_v30  ;;  %v3715_v39 = vadd.f32 %v3684_v47, %v713_v26  ;;  %v5296_v14 = vpop.eup %5295  ;;  %v762_v52 = vadd.f32 %v8885_v53, %v8473_v54  ;;  %v811_v30 = vadd.f32 %v8886_v31, %v8475_v16 }
 0x910   :  { %v3733_v59 = vadd.f32 %v3732_v61, %v3731_v37  ;;  %v3729_v33 = vmul.f32 0.5, %v5296_v14 }
 0x911   :  { %v3736_v20 = vmul.f32 0.5, %v3714_v60  ;;  %v3740_v18 = vmul.f32 0.5, %v3715_v39 }
 0x912   :  { %5297 = vtanh.f32 %v3733_v59  ;;  %v7861_v9 = vsel %vm3764_vm11, %v3733_v59, %v8883_v56  ;;  %v3730_v60 = vadd.f32 0.5, %v3729_v33 }
 0x913   :  { %8884 = vst [vmem:[#allocation22_spill] sm:$0xff] %v7861_v9  ;;  %5299 = vtanh.f32 %v3736_v20 }
 0x914   :  { %5301 = vtanh.f32 %v3740_v18 }
 0x915   :  { %v3697_v17 = vpop.f32.mrf.mxu2  ;;  %v3710_v26 = vpop.f32.mrf.mxu3 }
 0x916   :  { %v3716_v37 = vadd.f32 %v3697_v17, %v762_v52  ;;  %v3717_v61 = vadd.f32 %v3710_v26, %v811_v30  ;;  %v3673_v50 = vpop.f32.mrf.mxu0  ;;  %v3686_v47 = vpop.f32.mrf.mxu1 }
 0x917   :  { %v3770_v47 = vpop.permute.xlu1 %3769 }
 0x918   :  { %v5298_v39 = vpop.eup %5297  ;;  %5303 = vtanh.f32 %v3716_v37  ;;  %v3745_v56 = vmul.f32 0.5, %v3717_v61  ;;  %vm3771_vm12 = vcmp.eq.s32.totalorder %v3770_v47, 1  ;;  %v8898_v47 = vld [vmem:[#allocation77_spill] sm:$0xff] }
 0x919   :  { %v5300_v59 = vpop.eup %5299  ;;  %v3735_v14 = vmul.f32 %v5298_v39, %v3730_v60 }
 0x91a   :  { %v5302_v20 = vpop.eup %5301  ;;  %v3738_v9 = vmul.f32 0.5, %v5300_v59  ;;  %5305 = vtanh.f32 %v3745_v56 }
 0x91b   :  { %v7869_v53 = vsel %vm3764_vm11, %v3735_v14, %v7765_v38  ;;  %v3774_v18 = vsel %vm3764_vm11, %v3735_v14, 0.0  ;;  %v3742_v31 = vmul.f32 0.5, %v5302_v20 }
 0x91c   :  { %v3775_v52 = vpack.c.bf16 %v3774_v18, %v3774_v18  ;;  %v3788_v30 = vpack.c.bf16 %v7869_v53, %v7869_v53  ;;  %v3739_v33 = vadd.f32 0.5, %v3738_v9 }
 0x91d   :  { %v3743_v17 = vadd.f32 0.5, %v3742_v31  ;;  %v3699_v26 = vpop.f32.mrf.mxu2  ;;  %v3712_v37 = vpop.f32.mrf.mxu3 }
 0x91e   :  { %v5304_v61 = vpop.eup %5303  ;;  %3777 = vst [vmem:[#allocation8 + $0x30] sm:$0xf] %v3775_v52  ;;  %3797 = vmatmul.bf16.vlgmr.msra.gmra.mxu0 %v3788_v30  ;;  %3810 = vmatmul.bf16.vlgmr.msra.gmra.mxu1 %v3788_v30  ;;  %v8888_v52 = vld [vmem:[#allocation63_spill] sm:$0xff]  ;;  %v8893_v37 = vld [vmem:[#allocation68_spill] sm:$0xff] }
 0x91f   :  { %v3749_v50 = vmul.f32 %v3743_v17, %v7777_v35  ;;  %v3750_v38 = vmul.f32 %v5304_v61, %v3739_v33  ;;  %3823 = vmatmul.bf16.vlgmr.msra.gmra.mxu2 %v3788_v30  ;;  %3836 = vmatmul.bf16.vlgmr.msra.gmra.mxu3 %v3788_v30  ;;  %v8889_v30 = vld [vmem:[#allocation64_spill] sm:$0xff]  ;;  %v8890_v33 = vld [vmem:[#allocation65_spill] sm:$0xff]  ;;  %v8891_v17 = vld [vmem:[#allocation66_spill] sm:$0xff] }
 0x920   :  { %3979 = vmatpush.bf16.msra.mxu0 %v5673_v58  ;;  %3992 = vmatpush.bf16.msra.mxu1 %v5684_v62  ;;  %v5306_v6 = vpop.eup %5305  ;;  %v8892_v26 = vld [vmem:[#allocation67_spill] sm:$0xff]  ;;  %v8894_v61 = vld [vmem:[#allocation70_spill] sm:$0xff] }
 0x921   :  { %v3751_v60 = vadd.f32 %v3750_v38, %v3749_v50  ;;  %4005 = vmatpush.bf16.msra.mxu2 %v5686_v63  ;;  %4018 = vmatpush.bf16.msra.mxu3 %v5697_v2  ;;  %v3747_v39 = vmul.f32 0.5, %v5306_v6  ;;  %v8895_v50 = vld [vmem:[#allocation74_spill] sm:$0xff]  ;;  %v8896_v38 = vld [vmem:[#allocation75_spill] sm:$0xff]  ;;  %v8897_v6 = vld [vmem:[#allocation76_spill] sm:$0xff] }
 0x923   :  { %5307 = vtanh.f32 %v3751_v60  ;;  %v7881_v9 = vsel %vm3771_vm12, %v3751_v60, %v7777_v35  ;;  %v3748_v56 = vadd.f32 0.5, %v3747_v39  ;;  %v8899_v60 = vld [vmem:[#allocation78_spill] sm:$0xff]  ;;  %v8900_v39 = vld [vmem:[#allocation79_spill] sm:$0xff] }
 0x924   :  { %3980 = vmatpush.bf16.msra.mxu0 %v5716_v7  ;;  %3993 = vmatpush.bf16.msra.mxu1 %v5727_v11 }
 0x925   :  { %4006 = vmatpush.bf16.msra.mxu2 %v5729_v12  ;;  %4019 = vmatpush.bf16.msra.mxu3 %v5740_v15 }
 0x928   :  { %3981 = vmatpush.bf16.msra.mxu0 %v5763_v22  ;;  %3994 = vmatpush.bf16.msra.mxu1 %v5776_v27 }
 0x929   :  { %v5308_v59 = vpop.eup %5307  ;;  %4007 = vmatpush.bf16.msra.mxu2 %v5778_v28  ;;  %4020 = vmatpush.bf16.msra.mxu3 %v5795_v34 }
 0x92a   :  { %v3753_v35 = vmul.f32 %v5308_v59, %v3748_v56  ;;  %v8901_v56 = vld [vmem:[#allocation80_spill] sm:$0xff]  ;;  %v8902_v59 = vld [vmem:[#allocation82_spill] sm:$0xff] }
 0x92c   :  { %v7893_v14 = vsel %vm3771_vm12, %v3753_v35, %v7789_v5  ;;  %v3778_v20 = vsel %vm3771_vm12, %v3753_v35, 0.0  ;;  %3982 = vmatpush.bf16.msra.mxu0 %v5822_v43  ;;  %3995 = vmatpush.bf16.msra.mxu1 %v5835_v48  ;;  %v8887_v5 = vld [vmem:[#allocation62_spill] sm:$0xff] }
 0x92d   :  { %v3779_v18 = vpack.c.bf16 %v3778_v20, %v3778_v20  ;;  %v3851_v31 = vpack.c.bf16 %v7893_v14, %v7893_v14  ;;  %4008 = vmatpush.bf16.msra.mxu2 %v5837_v49  ;;  %4021 = vmatpush.bf16.msra.mxu3 %v5854_v55  ;;  %v8903_v35 = vld [vmem:[#allocation86_spill] sm:$0xff]  ;;  %v8904_v20 = vld [vmem:[#allocation87_spill] sm:$0xff] }
 0x92f   :  { %3781 = vst [vmem:[#allocation9 + $0xc] sm:$0xf] %v3779_v18  ;;  %3860 = vmatmul.bf16.vlgmr.msrb.gmra.mxu0 %v3851_v31  ;;  %3873 = vmatmul.bf16.vlgmr.msrb.gmra.mxu1 %v3851_v31  ;;  %v8905_v18 = vld [vmem:[#allocation88_spill] sm:$0xff] }
 0x930   :  { %3886 = vmatmul.bf16.vlgmr.msrb.gmra.mxu2 %v3851_v31  ;;  %3899 = vmatmul.bf16.vlgmr.msrb.gmra.mxu3 %v3851_v31  ;;  %v8906_v31 = vld [vmem:[#allocation89_spill] sm:$0xff] }
 0x931   :  { %3983 = vmatpush.bf16.msra.mxu0 %v5881_v4  ;;  %3996 = vmatpush.bf16.msra.mxu1 %v5894_v10 }
 0x932   :  { %4009 = vmatpush.bf16.msra.mxu2 %v5896_v13  ;;  %4022 = vmatpush.bf16.msra.mxu3 %v5913_v23 }
 0x935   :  { %3984 = vmatpush.bf16.msra.mxu0 %v5940_v44  ;;  %3997 = vmatpush.bf16.msra.mxu1 %v5953_v57 }
 0x936   :  { %4010 = vmatpush.bf16.msra.mxu2 %v5955_v0  ;;  %4023 = vmatpush.bf16.msra.mxu3 %v5975_v21 }
 0x939   :  { %3985 = vmatpush.bf16.msra.mxu0 %v6010_v25  ;;  %3998 = vmatpush.bf16.msra.mxu1 %v6023_v45 }
 0x93a   :  { %4011 = vmatpush.bf16.msra.mxu2 %v6025_v41  ;;  %4024 = vmatpush.bf16.msra.mxu3 %v6045_v42 }
 0x93d   :  { %3986 = vmatpush.bf16.msra.mxu0 %v6071_v1  ;;  %3999 = vmatpush.bf16.msra.mxu1 %v6081_v3 }
 0x93e   :  { %4012 = vmatpush.bf16.msra.mxu2 %v6093_v36  ;;  %4025 = vmatpush.bf16.msra.mxu3 %v6100_v32 }
 0x941   :  { %4042 = vmatpush.bf16.msrb.mxu0 %v6102_v24  ;;  %4055 = vmatpush.bf16.msrb.mxu1 %v6107_v40 }
 0x942   :  { %4068 = vmatpush.bf16.msrb.mxu2 %v8432_v8  ;;  %4081 = vmatpush.bf16.msrb.mxu3 %v8433_v46 }
 0x945   :  { %4043 = vmatpush.bf16.msrb.mxu0 %v8887_v5  ;;  %4056 = vmatpush.bf16.msrb.mxu1 %v8888_v52 }
 0x946   :  { %4069 = vmatpush.bf16.msrb.mxu2 %v8889_v30  ;;  %4082 = vmatpush.bf16.msrb.mxu3 %v8890_v33  ;;  %v8920_v33 = vld [vmem:[#allocation93_spill] sm:$0xff] }
 0x949   :  { %4044 = vmatpush.bf16.msrb.mxu0 %v8891_v17  ;;  %4057 = vmatpush.bf16.msrb.mxu1 %v8892_v26 }
 0x94a   :  { %4070 = vmatpush.bf16.msrb.mxu2 %v8893_v37  ;;  %4083 = vmatpush.bf16.msrb.mxu3 %v8894_v61  ;;  %v8918_v61 = vld [vmem:[#allocation85_spill] sm:$0xff] }
 0x94d   :  { %4045 = vmatpush.bf16.msrb.mxu0 %v8895_v50  ;;  %4058 = vmatpush.bf16.msrb.mxu1 %v8896_v38  ;;  %v8907_v38 = vld [vmem:[#allocation90_spill] sm:$0xff] }
 0x94e   :  { %4071 = vmatpush.bf16.msrb.mxu2 %v8897_v6  ;;  %4084 = vmatpush.bf16.msrb.mxu3 %v8898_v47  ;;  %v8908_v6 = vld [vmem:[#allocation91_spill] sm:$0xff]  ;;  %v8909_v47 = vld [vmem:[#allocation92_spill] sm:$0xff] }
 0x951   :  { %4046 = vmatpush.bf16.msrb.mxu0 %v8899_v60  ;;  %4059 = vmatpush.bf16.msrb.mxu1 %v8900_v39  ;;  %v8910_v60 = vld [vmem:[#allocation94_spill] sm:$0xff] }
 0x952   :  { %4072 = vmatpush.bf16.msrb.mxu2 %v8901_v56  ;;  %4085 = vmatpush.bf16.msrb.mxu3 %v8902_v59  ;;  %v8911_v39 = vld [vmem:[#allocation98_spill] sm:$0xff]  ;;  %v8912_v56 = vld [vmem:[#allocation99_spill] sm:$0xff]  ;;  %v8913_v59 = vld [vmem:[#allocation100_spill] sm:$0xff] }
 0x955   :  { %4047 = vmatpush.bf16.msrb.mxu0 %v8903_v35  ;;  %4060 = vmatpush.bf16.msrb.mxu1 %v8904_v20  ;;  %v8914_v35 = vld [vmem:[#allocation101_spill] sm:$0xff]  ;;  %v8915_v20 = vld [vmem:[#allocation168_spill] sm:$0xff] }
 0x956   :  { %4073 = vmatpush.bf16.msrb.mxu2 %v8905_v18  ;;  %4086 = vmatpush.bf16.msrb.mxu3 %v8906_v31  ;;  %v8916_v18 = vld [vmem:[#allocation84_spill] sm:$0xff]  ;;  %v8917_v31 = vld [vmem:[#allocation169_spill] sm:$0xff] }
 0x957   :  { %v291_v50 = vadd.f32 %v8916_v18, %v8915_v20 }
 0x959   :  { %4048 = vmatpush.bf16.msrb.mxu0 %v8907_v38  ;;  %4061 = vmatpush.bf16.msrb.mxu1 %v8908_v6  ;;  %v340_v38 = vadd.f32 %v8918_v61, %v8917_v31 }
 0x95a   :  { %4074 = vmatpush.bf16.msrb.mxu2 %v8909_v47  ;;  %4087 = vmatpush.bf16.msrb.mxu3 %v8910_v60 }
 0x95d   :  { %4049 = vmatpush.bf16.msrb.mxu0 %v8911_v39  ;;  %4062 = vmatpush.bf16.msrb.mxu1 %v8912_v56  ;;  %v8919_v39 = vld [vmem:[#allocation14_spill] sm:$0xff] }
 0x95e   :  { %4075 = vmatpush.bf16.msrb.mxu2 %v8913_v59  ;;  %4088 = vmatpush.bf16.msrb.mxu3 %v8914_v35  ;;  %v389_v56 = vadd.f32 %v8920_v33, %v8919_v39  ;;  %v8921_v59 = vld [vmem:[#allocation95_spill] sm:$0xff] }
 0x95f   :  { %v438_v30 = vadd.f32 %v8921_v59, %v8551_v51 }
 0x99b   :  { %v3798_v37 = vpop.f32.mrf.mxu0  ;;  %v3811_v6 = vpop.f32.mrf.mxu1 }
 0x99c   :  { %v3841_v26 = vadd.f32 %v3798_v37, %v291_v50  ;;  %v3842_v47 = vadd.f32 %v3811_v6, %v340_v38 }
 0x99e   :  { %v3908_v17 = vmul.f32 0.5, %v3841_v26  ;;  %v3912_v60 = vmul.f32 0.5, %v3842_v47 }
 0x9a0   :  { %5309 = vtanh.f32 %v3908_v17 }
 0x9a1   :  { %5311 = vtanh.f32 %v3912_v60  ;;  %v8922_v60 = vld [vmem:[#allocation116_spill] sm:$0xff] }
 0x9a2   :  { %v3824_v35 = vpop.f32.mrf.mxu2  ;;  %v3837_v52 = vpop.f32.mrf.mxu3  ;;  %v662_v59 = vadd.f32 %v8922_v60, %v8469_v19 }
 0x9a3   :  { %v3843_v18 = vadd.f32 %v3824_v35, %v389_v56  ;;  %v3844_v20 = vadd.f32 %v3837_v52, %v438_v30  ;;  %v3800_v5 = vpop.f32.mrf.mxu0  ;;  %v3813_v61 = vpop.f32.mrf.mxu1  ;;  %v8923_v56 = vld [vmem:[#allocation117_spill] sm:$0xff] }
 0x9a4   :  { %v711_v52 = vadd.f32 %v8923_v56, %v8512_v29  ;;  %v8924_v5 = vld [vmem:[#allocation22_spill] sm:$0xff] }
 0x9a5   :  { %5313 = vtanh.f32 %v3843_v18  ;;  %v3917_v31 = vmul.f32 0.5, %v3844_v20 }
 0x9a6   :  { %v5310_v37 = vpop.eup %5309 }
 0x9a7   :  { %v5312_v50 = vpop.eup %5311  ;;  %v3910_v26 = vmul.f32 0.5, %v5310_v37  ;;  %5315 = vtanh.f32 %v3917_v31  ;;  %v3953_v31 = vpop.permute.xlu2 %3952 }
 0x9a8   :  { %v3914_v38 = vmul.f32 0.5, %v5312_v50  ;;  %vm3954_vm13 = vcmp.eq.s32.totalorder %v3953_v31, 1 }
 0x9a9   :  { %v3911_v17 = vadd.f32 0.5, %v3910_v26 }
 0x9aa   :  { %v3915_v6 = vadd.f32 0.5, %v3914_v38  ;;  %v3826_v33 = vpop.f32.mrf.mxu2  ;;  %v3839_v47 = vpop.f32.mrf.mxu3 }
 0x9ab   :  { %v5314_v39 = vpop.eup %5313 }
 0x9ac   :  { %v3921_v30 = vmul.f32 %v3915_v6, %v8924_v5  ;;  %v3922_v35 = vmul.f32 %v5314_v39, %v3911_v17  ;;  %v3861_v20 = vpop.f32.mrf.mxu0  ;;  %v3874_v18 = vpop.f32.mrf.mxu1  ;;  %v8926_v6 = vld [vmem:[#allocation118_spill] sm:$0xff]  ;;  %v8927_v17 = vld [vmem:[#allocation119_spill] sm:$0xff] }
 0x9ad   :  { %v3904_v61 = vadd.f32 %v3861_v20, %v662_v59  ;;  %v3905_v37 = vadd.f32 %v3874_v18, %v711_v52  ;;  %v5316_v50 = vpop.eup %5315  ;;  %v760_v39 = vadd.f32 %v8926_v6, %v8473_v54  ;;  %v809_v59 = vadd.f32 %v8927_v17, %v8475_v16 }
 0x9ae   :  { %v3923_v26 = vadd.f32 %v3922_v35, %v3921_v30  ;;  %v3919_v60 = vmul.f32 0.5, %v5316_v50 }
 0x9af   :  { %v3926_v38 = vmul.f32 0.5, %v3904_v61  ;;  %v3930_v33 = vmul.f32 0.5, %v3905_v37 }
 0x9b0   :  { %5317 = vtanh.f32 %v3923_v26  ;;  %v7965_v47 = vsel %vm3954_vm13, %v3923_v26, %v8924_v5  ;;  %v3920_v61 = vadd.f32 0.5, %v3919_v60 }
 0x9b1   :  { %8925 = vst [vmem:[#allocation23_spill] sm:$0xff] %v7965_v47  ;;  %5319 = vtanh.f32 %v3926_v38 }
 0x9b2   :  { %5321 = vtanh.f32 %v3930_v33 }
 0x9b3   :  { %v3887_v56 = vpop.f32.mrf.mxu2  ;;  %v3900_v52 = vpop.f32.mrf.mxu3 }
 0x9b4   :  { %v3906_v30 = vadd.f32 %v3887_v56, %v760_v39  ;;  %v3907_v35 = vadd.f32 %v3900_v52, %v809_v59  ;;  %v3863_v20 = vpop.f32.mrf.mxu0  ;;  %v3876_v18 = vpop.f32.mrf.mxu1 }
 0x9b5   :  { %v3960_v18 = vpop.permute.xlu0 %3959 }
 0x9b6   :  { %v5318_v37 = vpop.eup %5317  ;;  %5323 = vtanh.f32 %v3906_v30  ;;  %v3935_v5 = vmul.f32 0.5, %v3907_v35  ;;  %vm3961_vm14 = vcmp.eq.s32.totalorder %v3960_v18, 1 }
 0x9b7   :  { %v5320_v26 = vpop.eup %5319  ;;  %v3925_v50 = vmul.f32 %v5318_v37, %v3920_v61 }
 0x9b8   :  { %v5322_v38 = vpop.eup %5321  ;;  %v3928_v47 = vmul.f32 0.5, %v5320_v26  ;;  %5325 = vtanh.f32 %v3935_v5  ;;  %v8958_v5 = vld [vmem:[#allocation169_spill] sm:$0xff] }
 0x9b9   :  { %v7973_v6 = vsel %vm3954_vm13, %v3925_v50, %v7869_v53  ;;  %v3964_v33 = vsel %vm3954_vm13, %v3925_v50, 0.0  ;;  %v3932_v17 = vmul.f32 0.5, %v5322_v38  ;;  %v8959_v26 = vld [vmem:[#allocation97_spill] sm:$0xff] }
 0x9ba   :  { %v3965_v39 = vpack.c.bf16 %v3964_v33, %v3964_v33  ;;  %v3978_v59 = vpack.c.bf16 %v7973_v6, %v7973_v6  ;;  %v3929_v60 = vadd.f32 0.5, %v3928_v47  ;;  %v343_v50 = vadd.f32 %v8959_v26, %v8958_v5 }
 0x9bb   :  { %v3933_v56 = vadd.f32 0.5, %v3932_v17  ;;  %v3889_v52 = vpop.f32.mrf.mxu2  ;;  %v3902_v30 = vpop.f32.mrf.mxu3 }
 0x9bc   :  { %v5324_v35 = vpop.eup %5323  ;;  %3967 = vst [vmem:[#allocation8 + $0x34] sm:$0xf] %v3965_v39  ;;  %3987 = vmatmul.bf16.vlgmr.msra.gmra.mxu0 %v3978_v59  ;;  %4000 = vmatmul.bf16.vlgmr.msra.gmra.mxu1 %v3978_v59  ;;  %v8961_v52 = vld [vmem:[#allocation102_spill] sm:$0xff] }
 0x9bd   :  { %v3939_v20 = vmul.f32 %v3933_v56, %v7881_v9  ;;  %v3940_v53 = vmul.f32 %v5324_v35, %v3929_v60  ;;  %4013 = vmatmul.bf16.vlgmr.msra.gmra.mxu2 %v3978_v59  ;;  %4026 = vmatmul.bf16.vlgmr.msra.gmra.mxu3 %v3978_v59  ;;  %v8960_v56 = vld [vmem:[#allocation14_spill] sm:$0xff]  ;;  %v8962_v35 = vld [vmem:[#allocation103_spill] sm:$0xff] }
 0x9be   :  { %4169 = vmatpush.bf16.msra.mxu0 %v5673_v58  ;;  %4182 = vmatpush.bf16.msra.mxu1 %v5684_v62  ;;  %v5326_v31 = vpop.eup %5325  ;;  %v392_v30 = vadd.f32 %v8961_v52, %v8960_v56 }
 0x9bf   :  { %v3941_v61 = vadd.f32 %v3940_v53, %v3939_v20  ;;  %4195 = vmatpush.bf16.msra.mxu2 %v5686_v63  ;;  %4208 = vmatpush.bf16.msra.mxu3 %v5697_v2  ;;  %v3937_v37 = vmul.f32 0.5, %v5326_v31  ;;  %v441_v20 = vadd.f32 %v8962_v35, %v8551_v51 }
 0x9c1   :  { %5327 = vtanh.f32 %v3941_v61  ;;  %v7985_v47 = vsel %vm3961_vm14, %v3941_v61, %v7881_v9  ;;  %v3938_v58 = vadd.f32 0.5, %v3937_v37  ;;  %v8957_v9 = vld [vmem:[#allocation96_spill] sm:$0xff] }
 0x9c2   :  { %4170 = vmatpush.bf16.msra.mxu0 %v5716_v7  ;;  %4183 = vmatpush.bf16.msra.mxu1 %v5727_v11 }
 0x9c3   :  { %4196 = vmatpush.bf16.msra.mxu2 %v5729_v12  ;;  %4209 = vmatpush.bf16.msra.mxu3 %v5740_v15  ;;  %v8928_v15 = vld [vmem:[#allocation62_spill] sm:$0xff] }
 0x9c6   :  { %4171 = vmatpush.bf16.msra.mxu0 %v5763_v22  ;;  %4184 = vmatpush.bf16.msra.mxu1 %v5776_v27  ;;  %v8929_v22 = vld [vmem:[#allocation63_spill] sm:$0xff]  ;;  %v8930_v27 = vld [vmem:[#allocation64_spill] sm:$0xff] }
 0x9c7   :  { %v5328_v62 = vpop.eup %5327  ;;  %4197 = vmatpush.bf16.msra.mxu2 %v5778_v28  ;;  %4210 = vmatpush.bf16.msra.mxu3 %v5795_v34  ;;  %v8931_v28 = vld [vmem:[#allocation65_spill] sm:$0xff]  ;;  %v8932_v34 = vld [vmem:[#allocation66_spill] sm:$0xff] }
 0x9c8   :  { %v3943_v63 = vmul.f32 %v5328_v62, %v3938_v58 }
 0x9ca   :  { %v7997_v2 = vsel %vm3961_vm14, %v3943_v63, %v7893_v14  ;;  %v3968_v7 = vsel %vm3961_vm14, %v3943_v63, 0.0  ;;  %4172 = vmatpush.bf16.msra.mxu0 %v5822_v43  ;;  %4185 = vmatpush.bf16.msra.mxu1 %v5835_v48  ;;  %v8933_v43 = vld [vmem:[#allocation67_spill] sm:$0xff]  ;;  %v8934_v48 = vld [vmem:[#allocation68_spill] sm:$0xff] }
 0x9cb   :  { %v3969_v11 = vpack.c.bf16 %v3968_v7, %v3968_v7  ;;  %v4041_v12 = vpack.c.bf16 %v7997_v2, %v7997_v2  ;;  %4198 = vmatpush.bf16.msra.mxu2 %v5837_v49  ;;  %4211 = vmatpush.bf16.msra.mxu3 %v5854_v55  ;;  %v8935_v49 = vld [vmem:[#allocation70_spill] sm:$0xff] }
 0x9cc   :  { %v8936_v55 = vld [vmem:[#allocation74_spill] sm:$0xff] }
 0x9cd   :  { %3971 = vst [vmem:[#allocation9 + $0x8] sm:$0xf] %v3969_v11  ;;  %4050 = vmatmul.bf16.vlgmr.msrb.gmra.mxu0 %v4041_v12  ;;  %4063 = vmatmul.bf16.vlgmr.msrb.gmra.mxu1 %v4041_v12 }
 0x9ce   :  { %4076 = vmatmul.bf16.vlgmr.msrb.gmra.mxu2 %v4041_v12  ;;  %4089 = vmatmul.bf16.vlgmr.msrb.gmra.mxu3 %v4041_v12 }
 0x9cf   :  { %4173 = vmatpush.bf16.msra.mxu0 %v5881_v4  ;;  %4186 = vmatpush.bf16.msra.mxu1 %v5894_v10  ;;  %v8937_v4 = vld [vmem:[#allocation75_spill] sm:$0xff]  ;;  %v8938_v10 = vld [vmem:[#allocation76_spill] sm:$0xff] }
 0x9d0   :  { %4199 = vmatpush.bf16.msra.mxu2 %v5896_v13  ;;  %4212 = vmatpush.bf16.msra.mxu3 %v5913_v23  ;;  %v8939_v13 = vld [vmem:[#allocation77_spill] sm:$0xff]  ;;  %v8940_v23 = vld [vmem:[#allocation78_spill] sm:$0xff] }
 0x9d3   :  { %4174 = vmatpush.bf16.msra.mxu0 %v5940_v44  ;;  %4187 = vmatpush.bf16.msra.mxu1 %v5953_v57  ;;  %v8944_v44 = vld [vmem:[#allocation86_spill] sm:$0xff]  ;;  %v8945_v57 = vld [vmem:[#allocation87_spill] sm:$0xff] }
 0x9d4   :  { %4200 = vmatpush.bf16.msra.mxu2 %v5955_v0  ;;  %4213 = vmatpush.bf16.msra.mxu3 %v5975_v21  ;;  %v8946_v0 = vld [vmem:[#allocation88_spill] sm:$0xff]  ;;  %v8949_v21 = vld [vmem:[#allocation91_spill] sm:$0xff] }
 0x9d7   :  { %4175 = vmatpush.bf16.msra.mxu0 %v6010_v25  ;;  %4188 = vmatpush.bf16.msra.mxu1 %v6023_v45  ;;  %v8950_v25 = vld [vmem:[#allocation92_spill] sm:$0xff]  ;;  %v8952_v45 = vld [vmem:[#allocation98_spill] sm:$0xff] }
 0x9d8   :  { %4201 = vmatpush.bf16.msra.mxu2 %v6025_v41  ;;  %4214 = vmatpush.bf16.msra.mxu3 %v6045_v42  ;;  %v8951_v41 = vld [vmem:[#allocation94_spill] sm:$0xff]  ;;  %v8953_v42 = vld [vmem:[#allocation99_spill] sm:$0xff] }
 0x9db   :  { %4176 = vmatpush.bf16.msra.mxu0 %v6071_v1  ;;  %4189 = vmatpush.bf16.msra.mxu1 %v6081_v3  ;;  %v8947_v1 = vld [vmem:[#allocation89_spill] sm:$0xff]  ;;  %v8948_v3 = vld [vmem:[#allocation90_spill] sm:$0xff] }
 0x9dc   :  { %4202 = vmatpush.bf16.msra.mxu2 %v6093_v36  ;;  %4215 = vmatpush.bf16.msra.mxu3 %v6100_v32  ;;  %v8942_v32 = vld [vmem:[#allocation80_spill] sm:$0xff]  ;;  %v8943_v36 = vld [vmem:[#allocation82_spill] sm:$0xff] }
 0x9df   :  { %4232 = vmatpush.bf16.msrb.mxu0 %v6102_v24  ;;  %4245 = vmatpush.bf16.msrb.mxu1 %v6107_v40  ;;  %v8941_v24 = vld [vmem:[#allocation79_spill] sm:$0xff]  ;;  %v8954_v40 = vld [vmem:[#allocation100_spill] sm:$0xff] }
 0x9e0   :  { %4258 = vmatpush.bf16.msrb.mxu2 %v8432_v8  ;;  %4271 = vmatpush.bf16.msrb.mxu3 %v8433_v46  ;;  %v8955_v8 = vld [vmem:[#allocation101_spill] sm:$0xff]  ;;  %v8956_v46 = vld [vmem:[#allocation168_spill] sm:$0xff] }
 0x9e1   :  { %v294_v14 = vadd.f32 %v8957_v9, %v8956_v46 }
 0x9e3   :  { %4233 = vmatpush.bf16.msrb.mxu0 %v8928_v15  ;;  %4246 = vmatpush.bf16.msrb.mxu1 %v8929_v22 }
 0x9e4   :  { %4259 = vmatpush.bf16.msrb.mxu2 %v8930_v27  ;;  %4272 = vmatpush.bf16.msrb.mxu3 %v8931_v28 }
 0x9e7   :  { %4234 = vmatpush.bf16.msrb.mxu0 %v8932_v34  ;;  %4247 = vmatpush.bf16.msrb.mxu1 %v8933_v43  ;;  %v8963_v43 = vld [vmem:[#allocation112_spill] sm:$0xff] }
 0x9e8   :  { %4260 = vmatpush.bf16.msrb.mxu2 %v8934_v48  ;;  %4273 = vmatpush.bf16.msrb.mxu3 %v8935_v49  ;;  %v659_v48 = vadd.f32 %v8963_v43, %v8469_v19  ;;  %v8964_v49 = vld [vmem:[#allocation113_spill] sm:$0xff] }
 0x9eb   :  { %4235 = vmatpush.bf16.msrb.mxu0 %v8936_v55  ;;  %4248 = vmatpush.bf16.msrb.mxu1 %v8937_v4  ;;  %v708_v55 = vadd.f32 %v8964_v49, %v8512_v29  ;;  %v8965_v4 = vld [vmem:[#allocation23_spill] sm:$0xff] }
 0x9ec   :  { %4261 = vmatpush.bf16.msrb.mxu2 %v8938_v10  ;;  %4274 = vmatpush.bf16.msrb.mxu3 %v8939_v13 }
 0x9ef   :  { %4236 = vmatpush.bf16.msrb.mxu0 %v8940_v23  ;;  %4249 = vmatpush.bf16.msrb.mxu1 %v8941_v24 }
 0x9f0   :  { %4262 = vmatpush.bf16.msrb.mxu2 %v8942_v32  ;;  %4275 = vmatpush.bf16.msrb.mxu3 %v8943_v36 }
 0x9f3   :  { %4237 = vmatpush.bf16.msrb.mxu0 %v8944_v44  ;;  %4250 = vmatpush.bf16.msrb.mxu1 %v8945_v57  ;;  %v4143_v57 = vpop.permute.xlu1 %4142 }
 0x9f4   :  { %4263 = vmatpush.bf16.msrb.mxu2 %v8946_v0  ;;  %4276 = vmatpush.bf16.msrb.mxu3 %v8947_v1  ;;  %vm4144_vm15 = vcmp.eq.s32.totalorder %v4143_v57, 1 }
 0x9f7   :  { %4238 = vmatpush.bf16.msrb.mxu0 %v8948_v3  ;;  %4251 = vmatpush.bf16.msrb.mxu1 %v8949_v21 }
 0x9f8   :  { %4264 = vmatpush.bf16.msrb.mxu2 %v8950_v25  ;;  %4277 = vmatpush.bf16.msrb.mxu3 %v8951_v41  ;;  %v8966_v41 = vld [vmem:[#allocation114_spill] sm:$0xff] }
 0x9fb   :  { %4239 = vmatpush.bf16.msrb.mxu0 %v8952_v45  ;;  %4252 = vmatpush.bf16.msrb.mxu1 %v8953_v42  ;;  %v757_v45 = vadd.f32 %v8966_v41, %v8473_v54  ;;  %v8967_v42 = vld [vmem:[#allocation115_spill] sm:$0xff] }
 0x9fc   :  { %4265 = vmatpush.bf16.msrb.mxu2 %v8954_v40  ;;  %4278 = vmatpush.bf16.msrb.mxu3 %v8955_v8  ;;  %v806_v40 = vadd.f32 %v8967_v42, %v8475_v16 }
 0xa39   :  { %v3988_v38 = vpop.f32.mrf.mxu0  ;;  %v4001_v33 = vpop.f32.mrf.mxu1 }
 0xa3a   :  { %v4031_v17 = vadd.f32 %v3988_v38, %v294_v14  ;;  %v4032_v39 = vadd.f32 %v4001_v33, %v343_v50 }
 0xa3c   :  { %v4098_v59 = vmul.f32 0.5, %v4031_v17  ;;  %v4102_v60 = vmul.f32 0.5, %v4032_v39 }
 0xa3e   :  { %5329 = vtanh.f32 %v4098_v59 }
 0xa3f   :  { %5331 = vtanh.f32 %v4102_v60 }
 0xa40   :  { %v4014_v53 = vpop.f32.mrf.mxu2  ;;  %v4027_v31 = vpop.f32.mrf.mxu3 }
 0xa41   :  { %v4033_v18 = vadd.f32 %v4014_v53, %v392_v30  ;;  %v4034_v61 = vadd.f32 %v4027_v31, %v441_v20  ;;  %v3990_v37 = vpop.f32.mrf.mxu0  ;;  %v4003_v58 = vpop.f32.mrf.mxu1 }
 0xa43   :  { %5333 = vtanh.f32 %v4033_v18  ;;  %v4107_v62 = vmul.f32 0.5, %v4034_v61 }
 0xa44   :  { %v5330_v63 = vpop.eup %5329 }
 0xa45   :  { %v5332_v7 = vpop.eup %5331  ;;  %v4100_v11 = vmul.f32 0.5, %v5330_v63  ;;  %5335 = vtanh.f32 %v4107_v62 }
 0xa46   :  { %v4104_v12 = vmul.f32 0.5, %v5332_v7  ;;  %v4150_v7 = vpop.permute.xlu2 %4149 }
 0xa47   :  { %v4101_v15 = vadd.f32 0.5, %v4100_v11  ;;  %vm4151_vm0 = vcmp.eq.s32.totalorder %v4150_v7, 1  ;;  %v8974_v7 = vld [vmem:[#allocation110_spill] sm:$0xff] }
 0xa48   :  { %v4105_v22 = vadd.f32 0.5, %v4104_v12  ;;  %v4016_v27 = vpop.f32.mrf.mxu2  ;;  %v4029_v28 = vpop.f32.mrf.mxu3 }
 0xa49   :  { %v5334_v34 = vpop.eup %5333 }
 0xa4a   :  { %v4111_v10 = vmul.f32 %v4105_v22, %v8965_v4  ;;  %v4112_v13 = vmul.f32 %v5334_v34, %v4101_v15  ;;  %v4051_v23 = vpop.f32.mrf.mxu0  ;;  %v4064_v24 = vpop.f32.mrf.mxu1 }
 0xa4b   :  { %v4094_v32 = vadd.f32 %v4051_v23, %v659_v48  ;;  %v4095_v36 = vadd.f32 %v4064_v24, %v708_v55  ;;  %v5336_v44 = vpop.eup %5335 }
 0xa4c   :  { %v4113_v0 = vadd.f32 %v4112_v13, %v4111_v10  ;;  %v4109_v25 = vmul.f32 0.5, %v5336_v44  ;;  %v8968_v10 = vld [vmem:[#allocation104_spill] sm:$0xff] }
 0xa4d   :  { %v4116_v1 = vmul.f32 0.5, %v4094_v32  ;;  %v4120_v3 = vmul.f32 0.5, %v4095_v36  ;;  %v296_v13 = vadd.f32 %v8968_v10, %v8956_v46 }
 0xa4e   :  { %5337 = vtanh.f32 %v4113_v0  ;;  %v8069_v21 = vsel %vm4144_vm15, %v4113_v0, %v8965_v4  ;;  %v4110_v33 = vadd.f32 0.5, %v4109_v25  ;;  %v8970_v0 = vld [vmem:[#allocation106_spill] sm:$0xff] }
 0xa4f   :  { %5339 = vtanh.f32 %v4116_v1  ;;  %v394_v1 = vadd.f32 %v8970_v0, %v8960_v56 }
 0xa50   :  { %5341 = vtanh.f32 %v4120_v3  ;;  %v8971_v3 = vld [vmem:[#allocation107_spill] sm:$0xff] }
 0xa51   :  { %v4077_v8 = vpop.f32.mrf.mxu2  ;;  %v4090_v9 = vpop.f32.mrf.mxu3  ;;  %v443_v25 = vadd.f32 %v8971_v3, %v8551_v51  ;;  %v8972_v51 = vld [vmem:[#allocation108_spill] sm:$0xff] }
 0xa52   :  { %v4096_v14 = vadd.f32 %v4077_v8, %v757_v45  ;;  %v4097_v26 = vadd.f32 %v4090_v9, %v806_v40  ;;  %v4053_v50 = vpop.f32.mrf.mxu0  ;;  %v4066_v38 = vpop.f32.mrf.mxu1 }
 0xa54   :  { %v5338_v17 = vpop.eup %5337  ;;  %5343 = vtanh.f32 %v4096_v14  ;;  %v4125_v39 = vmul.f32 0.5, %v4097_v26 }
 0xa55   :  { %v5340_v59 = vpop.eup %5339  ;;  %v4115_v60 = vmul.f32 %v5338_v17, %v4110_v33 }
 0xa56   :  { %v5342_v52 = vpop.eup %5341  ;;  %v4118_v30 = vmul.f32 0.5, %v5340_v59  ;;  %5345 = vtanh.f32 %v4125_v39  ;;  %v657_v59 = vadd.f32 %v8972_v51, %v8469_v19  ;;  %v755_v19 = vadd.f32 %v8974_v7, %v8473_v54 }
 0xa57   :  { %v4145_v35 = vsel %vm4144_vm15, %v4115_v60, %v7973_v6  ;;  %v4154_v20 = vsel %vm4144_vm15, %v4115_v60, 0.0  ;;  %v4122_v53 = vmul.f32 0.5, %v5342_v52  ;;  %v8973_v60 = vld [vmem:[#allocation109_spill] sm:$0xff] }
 0xa58   :  { %v4155_v31 = vpack.c.bf16 %v4154_v20, %v4154_v20  ;;  %v4168_v18 = vpack.c.bf16 %v4145_v35, %v4145_v35  ;;  %v4119_v61 = vadd.f32 0.5, %v4118_v30  ;;  %v706_v52 = vadd.f32 %v8973_v60, %v8512_v29 }
 0xa59   :  { %v4123_v37 = vadd.f32 0.5, %v4122_v53  ;;  %v4079_v58 = vpop.f32.mrf.mxu2  ;;  %v4092_v62 = vpop.f32.mrf.mxu3 }
 0xa5a   :  { %v5344_v63 = vpop.eup %5343  ;;  %4157 = vst [vmem:[#allocation8 + $0x38] sm:$0xf] %v4155_v31  ;;  %4177 = vmatmul.bf16.vlgmr.msra.gmra.mxu0 %v4168_v18  ;;  %4190 = vmatmul.bf16.vlgmr.msra.gmra.mxu1 %v4168_v18 }
 0xa5b   :  { %v4129_v11 = vmul.f32 %v4123_v37, %v7985_v47  ;;  %v4130_v12 = vmul.f32 %v5344_v63, %v4119_v61  ;;  %4203 = vmatmul.bf16.vlgmr.msra.gmra.mxu2 %v4168_v18  ;;  %4216 = vmatmul.bf16.vlgmr.msra.gmra.mxu3 %v4168_v18 }
 0xa5c   :  { %v5346_v6 = vpop.eup %5345 }
 0xa5d   :  { %v4131_v15 = vadd.f32 %v4130_v12, %v4129_v11  ;;  %v4127_v27 = vmul.f32 0.5, %v5346_v6  ;;  %v8975_v11 = vld [vmem:[#allocation111_spill] sm:$0xff] }
 0xa5e   :  { %v804_v29 = vadd.f32 %v8975_v11, %v8475_v16 }
 0xa5f   :  { %5347 = vtanh.f32 %v4131_v15  ;;  %v8080_v22 = vsel %vm4151_vm0, %v4131_v15, %v7985_v47  ;;  %v4128_v28 = vadd.f32 0.5, %v4127_v27  ;;  %v8969_v47 = vld [vmem:[#allocation105_spill] sm:$0xff] }
 0xa60   :  { %v345_v23 = vadd.f32 %v8969_v47, %v8958_v5 }
 0xa65   :  { %v5348_v34 = vpop.eup %5347 }
 0xa66   :  { %v4133_v43 = vmul.f32 %v5348_v34, %v4128_v28  ;;  %v4332_v34 = vpop.permute.xlu0 %4331 }
 0xa67   :  { %vm4333_vm1 = vcmp.eq.s32.totalorder %v4332_v34, 1 }
 0xa68   :  { %v4152_v48 = vsel %vm4151_vm0, %v4133_v43, %v7997_v2  ;;  %v4158_v49 = vsel %vm4151_vm0, %v4133_v43, 0.0 }
 0xa69   :  { %v4159_v55 = vpack.c.bf16 %v4158_v49, %v4158_v49  ;;  %v4231_v4 = vpack.c.bf16 %v4152_v48, %v4152_v48 }
 0xa6b   :  { %4161 = vst [vmem:[#allocation9 + $0x4] sm:$0xf] %v4159_v55  ;;  %4240 = vmatmul.bf16.vlgmr.msrb.gmra.mxu0 %v4231_v4  ;;  %4253 = vmatmul.bf16.vlgmr.msrb.gmra.mxu1 %v4231_v4 }
 0xa6c   :  { %4266 = vmatmul.bf16.vlgmr.msrb.gmra.mxu2 %v4231_v4  ;;  %4279 = vmatmul.bf16.vlgmr.msrb.gmra.mxu3 %v4231_v4 }
 0xad7   :  { %v4178_v24 = vpop.f32.mrf.mxu0  ;;  %v4191_v32 = vpop.f32.mrf.mxu1 }
 0xad8   :  { %v4221_v36 = vadd.f32 %v4178_v24, %v296_v13  ;;  %v4222_v44 = vadd.f32 %v4191_v32, %v345_v23 }
 0xada   :  { %v4288_v57 = vmul.f32 0.5, %v4221_v36  ;;  %v4292_v2 = vmul.f32 0.5, %v4222_v44 }
 0xadc   :  { %5349 = vtanh.f32 %v4288_v57 }
 0xadd   :  { %5351 = vtanh.f32 %v4292_v2 }
 0xade   :  { %v4204_v41 = vpop.f32.mrf.mxu2  ;;  %v4217_v45 = vpop.f32.mrf.mxu3 }
 0xadf   :  { %v4223_v46 = vadd.f32 %v4204_v41, %v394_v1  ;;  %v4224_v42 = vadd.f32 %v4217_v45, %v443_v25  ;;  %v4180_v40 = vpop.f32.mrf.mxu0  ;;  %v4193_v5 = vpop.f32.mrf.mxu1 }
 0xae0   :  { %v4339_v25 = vpop.permute.xlu1 %4338 }
 0xae1   :  { %5353 = vtanh.f32 %v4223_v46  ;;  %v4297_v8 = vmul.f32 0.5, %v4224_v42  ;;  %vm4340_vm2 = vcmp.eq.s32.totalorder %v4339_v25, 1 }
 0xae2   :  { %v5350_v9 = vpop.eup %5349 }
 0xae3   :  { %v5352_v14 = vpop.eup %5351  ;;  %v4290_v26 = vmul.f32 0.5, %v5350_v9  ;;  %5355 = vtanh.f32 %v4297_v8 }
 0xae4   :  { %v4294_v50 = vmul.f32 0.5, %v5352_v14 }
 0xae5   :  { %v4291_v38 = vadd.f32 0.5, %v4290_v26 }
 0xae6   :  { %v4295_v33 = vadd.f32 0.5, %v4294_v50  ;;  %v4206_v56 = vpop.f32.mrf.mxu2  ;;  %v4219_v17 = vpop.f32.mrf.mxu3 }
 0xae7   :  { %v5354_v39 = vpop.eup %5353 }
 0xae8   :  { %v4301_v30 = vmul.f32 %v4295_v33, %v8069_v21  ;;  %v4302_v35 = vmul.f32 %v5354_v39, %v4291_v38  ;;  %v4241_v20 = vpop.f32.mrf.mxu0  ;;  %v4254_v53 = vpop.f32.mrf.mxu1 }
 0xae9   :  { %v4284_v31 = vadd.f32 %v4241_v20, %v657_v59  ;;  %v4285_v18 = vadd.f32 %v4254_v53, %v706_v52  ;;  %v5356_v61 = vpop.eup %5355 }
 0xaea   :  { %v4303_v37 = vadd.f32 %v4302_v35, %v4301_v30  ;;  %v4299_v63 = vmul.f32 0.5, %v5356_v61 }
 0xaeb   :  { %v4306_v58 = vmul.f32 0.5, %v4284_v31  ;;  %v4310_v62 = vmul.f32 0.5, %v4285_v18 }
 0xaec   :  { %5357 = vtanh.f32 %v4303_v37  ;;  %v4300_v43 = vadd.f32 0.5, %v4299_v63 }
 0xaed   :  { %5359 = vtanh.f32 %v4306_v58 }
 0xaee   :  { %5361 = vtanh.f32 %v4310_v62 }
 0xaef   :  { %v4267_v21 = vpop.f32.mrf.mxu2  ;;  %v4280_v12 = vpop.f32.mrf.mxu3 }
 0xaf0   :  { %v4286_v6 = vadd.f32 %v4267_v21, %v755_v19  ;;  %v4287_v15 = vadd.f32 %v4280_v12, %v804_v29  ;;  %v4243_v27 = vpop.f32.mrf.mxu0  ;;  %v4256_v28 = vpop.f32.mrf.mxu1 }
 0xaf2   :  { %v5358_v48 = vpop.eup %5357  ;;  %5363 = vtanh.f32 %v4286_v6  ;;  %v4315_v49 = vmul.f32 0.5, %v4287_v15 }
 0xaf3   :  { %v5360_v54 = vpop.eup %5359  ;;  %v4305_v16 = vmul.f32 %v5358_v48, %v4300_v43 }
 0xaf4   :  { %v5362_v55 = vpop.eup %5361  ;;  %v4308_v4 = vmul.f32 0.5, %v5360_v54  ;;  %5365 = vtanh.f32 %v4315_v49 }
 0xaf5   :  { %v4343_v10 = vsel %vm4333_vm1, %v4305_v16, 0.0  ;;  %v4312_v13 = vmul.f32 0.5, %v5362_v55 }
 0xaf6   :  { %v4344_v47 = vpack.c.bf16 %v4343_v10, %v4343_v10  ;;  %v4309_v23 = vadd.f32 0.5, %v4308_v4 }
 0xaf7   :  { %v4313_v24 = vadd.f32 0.5, %v4312_v13  ;;  %v4269_v32 = vpop.f32.mrf.mxu2  ;;  %v4282_v36 = vpop.f32.mrf.mxu3 }
 0xaf8   :  { %v5364_v44 = vpop.eup %5363  ;;  %4346 = vst [vmem:[#allocation8 + $0x3c] sm:$0xf] %v4344_v47 }
 0xaf9   :  { %v4319_v57 = vmul.f32 %v4313_v24, %v8080_v22  ;;  %v4320_v2 = vmul.f32 %v5364_v44, %v4309_v23  ;;  %4366 = dma.vmem_to_hbm [thread:$0]  %s4359_s1, 1024, %s4361_s19, [#allocation7], %s5453_s10, %s5453_s10, %s5454_s20  }
 0xafa   :  { %v5366_v0 = vpop.eup %5365 }
 0xafb   :  { %v4321_v1 = vadd.f32 %v4320_v2, %v4319_v57  ;;  %v4317_v3 = vmul.f32 0.5, %v5366_v0 }
 0xafd   :  { %5367 = vtanh.f32 %v4321_v1  ;;  %v4318_v41 = vadd.f32 0.5, %v4317_v3 }
 0xb03   :  { %v5368_v45 = vpop.eup %5367 }
 0xb04   :  { %v4323_v46 = vmul.f32 %v5368_v45, %v4318_v41 }
 0xb06   :  { %v4347_v22 = vsel %vm4340_vm2, %v4323_v46, 0.0 }
 0xb07   :  { %v4348_v42 = vpack.c.bf16 %v4347_v22, %v4347_v22 }
 0xb09   :  { %4349 = vst [vmem:[#allocation9] sm:$0xf] %v4348_v42 }
 0xb0a   :  { %4383 = dma.vmem_to_hbm [thread:$0]  %s4376_s21, 1024, %s4378_s24, [#allocation10], %s5453_s10, %s5453_s10, %s5454_s20  }
 0xb0b   :  { %5443 = dma.done.wait [#allocation7], 1024  }
 0xb0c   :  { %5444 = vsyncadd [#allocation7], 4294966272 }
 0xb0d   :  { %5445 = dma.done.wait [#allocation10], 1024  }
 0xb0e   :  { %5446 = vsyncadd [#allocation10], 4294966272 }
 0xb0f   :  { %4392 = vsyncpa [#allocation6], 1 }
 0xb10   :  { %4393 = vsyncpa [#allocation7], 1 }
 0xb11   :  { %4394 = vsyncpa [#allocation10], 1 }

</bundles_post_ra>
